<compile_context>
chip_gen: v7x
topology: tpu7x:2x2x1
jax: 0.10.0
libtpu: 0.0.40
codegen_flags: <defaults>
</compile_context>

<pallas_src>
import functools

import jax
import jax.numpy as jnp
from jax.experimental import pallas as pl
from jax.experimental.pallas import tpu as pltpu

Z_SIZE = 32               # config['z_size']
USE_BIAS = True           # config['model']['G']['use_bias']
HIDDEN = (64, 128, 256, 512, 2048)
OUT_FEATURES = 2048 * 3   # 6144
TN = 512                  # head tile along the 6144-wide output dim (12 steps)


# ----------------------------------------------------------------------------
# Fused kernel: trunk recomputed per step (trivial) + one head stripe per step.
# No scratch carry -> the single grid axis is megacore-"parallel".
# ----------------------------------------------------------------------------
def generator_kernel(z_ref,
                     w1, b1, w2, b2, w3, b3, w4, b4, w5, b5,
                     w6_ref, b6_ref,
                     o_ref):
    # --- trunk: z(B,32) -> h5(B,2048), bf16 matmuls with f32 accumulation ---
    x = z_ref[...].astype(jnp.bfloat16)
    for w, b in ((w1, b1), (w2, b2), (w3, b3), (w4, b4), (w5, b5)):
        y = jnp.dot(x, w[...], preferred_element_type=jnp.float32) + b[...]
        x = jnp.maximum(y, 0.0).astype(jnp.bfloat16)

    # --- head: h5 @ W6[:, stripe] + b6[stripe] -------------------------------
    o_ref[...] = (
        jnp.dot(x, w6_ref[...], preferred_element_type=jnp.float32)
        + b6_ref[...]
    ).astype(o_ref.dtype)


def generator_forward(z, params):
    """z: (B, z_size, 1, 1) or (B, z_size). Returns (B, 3, 2048) float32."""
    (w1, b1), (w2, b2), (w3, b3), (w4, b4), (w5, b5), (w6, b6) = params
    B = z.shape[0]
    z2 = z.reshape(B, Z_SIZE).astype(jnp.float32)  # torch .squeeze() on (B,z,1,1)

    resident = lambda j: (0, 0)  # constant block index -> stays resident in VMEM
    trunk_args = [z2, w1, b1, w2, b2, w3, b3, w4, b4, w5, b5]

    out = pl.pallas_call(
        generator_kernel,
        out_shape=jax.ShapeDtypeStruct((B, OUT_FEATURES), jnp.float32),
        grid_spec=pltpu.PrefetchScalarGridSpec(
            num_scalar_prefetch=0,
            grid=(OUT_FEATURES // TN,),
            in_specs=(
                [pl.BlockSpec(a.shape, resident) for a in trunk_args]
                + [
                    pl.BlockSpec((HIDDEN[-1], TN), lambda j: (0, j)),  # W6 stripe
                    pl.BlockSpec((1, TN), lambda j: (0, j)),           # b6 stripe
                ]
            ),
            out_specs=pl.BlockSpec((B, TN), lambda j: (0, j)),
        ),
        compiler_params=pltpu.CompilerParams(
            # Trunk is recomputed per step -> no cross-step state -> the head
            # axis can split across both TensorCores on v7x.
            dimension_semantics=("parallel",),
            vmem_limit_bytes=32 << 20,
        ),
    )(*trunk_args, w6, b6)

    # output.view(-1, 3, 2048)
    return out.reshape(-1, 3, 2048)


def init_params(key):
    """Init mimicking nn.Linear defaults. Returns (f32 master, bf16 streaming)."""
    dims = (Z_SIZE,) + HIDDEN + (OUT_FEATURES,)
    params_f32, params_bf16 = [], []
    for i in range(len(dims) - 1):
        fan_in, fan_out = dims[i], dims[i + 1]
        key, kw, kb = jax.random.split(key, 3)
        bound = 1.0 / jnp.sqrt(jnp.float32(fan_in))
        w = jax.random.uniform(kw, (fan_in, fan_out), jnp.float32, -bound, bound)
        if USE_BIAS:
            b = jax.random.uniform(kb, (1, fan_out), jnp.float32, -bound, bound)
        else:
            b = jnp.zeros((1, fan_out), jnp.float32)
        params_f32.append((w, b))
        params_bf16.append((w.astype(jnp.bfloat16), b))  # weights streamed bf16
    return params_f32, params_bf16


def reference_forward(z, params, cast_bf16):
    """Pure-JAX reference. cast_bf16=True mirrors the kernel's precision."""
    x = z.reshape(z.shape[0], Z_SIZE).astype(jnp.float32)
    for i, (w, b) in enumerate(params):
        lhs = x.astype(jnp.bfloat16) if cast_bf16 else x
        x = jnp.dot(lhs, w, preferred_element_type=jnp.float32) + b
        if i < len(params) - 1:
            x = jnp.maximum(x, 0.0)
    return x.reshape(-1, 3, 2048)


if __name__ == "__main__":
    key = jax.random.PRNGKey(0)
    kp, kz = jax.random.split(key)
    params_f32, params_bf16 = init_params(kp)

    B = 2
    z = jax.random.normal(kz, (B, Z_SIZE, 1, 1), jnp.float32)

    out = jax.jit(functools.partial(generator_forward, params=params_bf16))(z)
    out = jax.block_until_ready(out)

    assert out.shape == (B, 3, 2048), out.shape

    # Strict check against a same-precision (bf16-weight) JAX reference.
    ref_bf16 = reference_forward(z, params_bf16, cast_bf16=True)
    err = jnp.max(jnp.abs(out - ref_bf16))
    assert err < 1e-3, f"max abs err vs bf16 reference: {err}"

    # Loose parity check against the fp32 "PyTorch-equivalent" reference,
    # validating that the bf16 weight streaming stays close to the original.
    ref_f32 = reference_forward(z, params_f32, cast_bf16=False)
    rel = jnp.max(jnp.abs(out - ref_f32)) / (jnp.max(jnp.abs(ref_f32)) + 1e-12)
    assert rel < 5e-2, f"relative err vs f32 reference: {rel}"

    print("KERNEL_OK")
</pallas_src>

<mosaic_0001>
module attributes {stable_mosaic.version = 11 : i64} {
  func.func @generator_kernel(%arg0: i32, %arg1: memref<2x32xf32, #tpu.memory_space<vmem>>, %arg2: memref<32x64xbf16, #tpu.memory_space<vmem>>, %arg3: memref<1x64xf32, #tpu.memory_space<vmem>>, %arg4: memref<64x128xbf16, #tpu.memory_space<vmem>>, %arg5: memref<1x128xf32, #tpu.memory_space<vmem>>, %arg6: memref<128x256xbf16, #tpu.memory_space<vmem>>, %arg7: memref<1x256xf32, #tpu.memory_space<vmem>>, %arg8: memref<256x512xbf16, #tpu.memory_space<vmem>>, %arg9: memref<1x512xf32, #tpu.memory_space<vmem>>, %arg10: memref<512x2048xbf16, #tpu.memory_space<vmem>>, %arg11: memref<1x2048xf32, #tpu.memory_space<vmem>>, %arg12: memref<2048x512xbf16, #tpu.memory_space<vmem>>, %arg13: memref<1x512xf32, #tpu.memory_space<vmem>>, %arg14: memref<2x512xf32, #tpu.memory_space<vmem>>) attributes {dimension_semantics = [#tpu.dimension_semantics<parallel>], iteration_bounds = array<i64: 12>, scalar_prefetch = 0 : i64, scratch_operands = 0 : i64, tpu.core_type = #tpu.core_type<tc>, window_params = [{pipeline_mode = #tpu.pipeline_mode<synchronous>, transform_indices = @transform_0, window_bounds = array<i64: 2, 32>}, {pipeline_mode = #tpu.pipeline_mode<synchronous>, transform_indices = @transform_1, window_bounds = array<i64: 32, 64>}, {pipeline_mode = #tpu.pipeline_mode<synchronous>, transform_indices = @transform_2, window_bounds = array<i64: 1, 64>}, {pipeline_mode = #tpu.pipeline_mode<synchronous>, transform_indices = @transform_3, window_bounds = array<i64: 64, 128>}, {pipeline_mode = #tpu.pipeline_mode<synchronous>, transform_indices = @transform_4, window_bounds = array<i64: 1, 128>}, {pipeline_mode = #tpu.pipeline_mode<synchronous>, transform_indices = @transform_5, window_bounds = array<i64: 128, 256>}, {pipeline_mode = #tpu.pipeline_mode<synchronous>, transform_indices = @transform_6, window_bounds = array<i64: 1, 256>}, {pipeline_mode = #tpu.pipeline_mode<synchronous>, transform_indices = @transform_7, window_bounds = array<i64: 256, 512>}, {pipeline_mode = #tpu.pipeline_mode<synchronous>, transform_indices = @transform_8, window_bounds = array<i64: 1, 512>}, {pipeline_mode = #tpu.pipeline_mode<synchronous>, transform_indices = @transform_9, window_bounds = array<i64: 512, 2048>}, {pipeline_mode = #tpu.pipeline_mode<synchronous>, transform_indices = @transform_10, window_bounds = array<i64: 1, 2048>}, {transform_indices = @transform_11, window_bounds = array<i64: 2048, 512>}, {transform_indices = @transform_12, window_bounds = array<i64: 1, 512>}, {transform_indices = @transform_13, window_bounds = array<i64: 2, 512>}]} {
    %c0 = arith.constant 0 : index
    %c0_0 = arith.constant 0 : index
    %0 = vector.load %arg1[%c0, %c0_0] : memref<2x32xf32, #tpu.memory_space<vmem>>, vector<2x32xf32>
    %1 = arith.truncf %0 : vector<2x32xf32> to vector<2x32xbf16>
    %c0_1 = arith.constant 0 : index
    %c0_2 = arith.constant 0 : index
    %2 = vector.load %arg2[%c0_1, %c0_2] : memref<32x64xbf16, #tpu.memory_space<vmem>>, vector<32x64xbf16>
    %cst = arith.constant dense<0.000000e+00> : vector<2x64xf32>
    %3 = tpu.matmul %1, %2, %cst {dimension_numbers = #tpu.dot_dimension_numbers<[1], [0], [0], [1], [0, 0, 1, 1], [], []>} : vector<2x32xbf16>, vector<32x64xbf16>, vector<2x64xf32> -> vector<2x64xf32>
    %c0_3 = arith.constant 0 : index
    %c0_4 = arith.constant 0 : index
    %4 = vector.load %arg3[%c0_3, %c0_4] : memref<1x64xf32, #tpu.memory_space<vmem>>, vector<1x64xf32>
    %5 = vector.broadcast %4 : vector<1x64xf32> to vector<2x64xf32>
    %6 = arith.addf %3, %5 : vector<2x64xf32>
    %cst_5 = arith.constant 0.000000e+00 : f32
    %7 = vector.broadcast %cst_5 : f32 to vector<2x64xf32>
    %8 = arith.maximumf %6, %7 : vector<2x64xf32>
    %9 = arith.truncf %8 : vector<2x64xf32> to vector<2x64xbf16>
    %c0_6 = arith.constant 0 : index
    %c0_7 = arith.constant 0 : index
    %10 = vector.load %arg4[%c0_6, %c0_7] : memref<64x128xbf16, #tpu.memory_space<vmem>>, vector<64x128xbf16>
    %cst_8 = arith.constant dense<0.000000e+00> : vector<2x128xf32>
    %11 = tpu.matmul %9, %10, %cst_8 {dimension_numbers = #tpu.dot_dimension_numbers<[1], [0], [0], [1], [0, 0, 1, 1], [], []>} : vector<2x64xbf16>, vector<64x128xbf16>, vector<2x128xf32> -> vector<2x128xf32>
    %c0_9 = arith.constant 0 : index
    %c0_10 = arith.constant 0 : index
    %12 = vector.load %arg5[%c0_9, %c0_10] : memref<1x128xf32, #tpu.memory_space<vmem>>, vector<1x128xf32>
    %13 = vector.broadcast %12 : vector<1x128xf32> to vector<2x128xf32>
    %14 = arith.addf %11, %13 : vector<2x128xf32>
    %cst_11 = arith.constant 0.000000e+00 : f32
    %15 = vector.broadcast %cst_11 : f32 to vector<2x128xf32>
    %16 = arith.maximumf %14, %15 : vector<2x128xf32>
    %17 = arith.truncf %16 : vector<2x128xf32> to vector<2x128xbf16>
    %c0_12 = arith.constant 0 : index
    %c0_13 = arith.constant 0 : index
    %18 = vector.load %arg6[%c0_12, %c0_13] : memref<128x256xbf16, #tpu.memory_space<vmem>>, vector<128x256xbf16>
    %cst_14 = arith.constant dense<0.000000e+00> : vector<2x256xf32>
    %19 = tpu.matmul %17, %18, %cst_14 {dimension_numbers = #tpu.dot_dimension_numbers<[1], [0], [0], [1], [0, 0, 1, 1], [], []>} : vector<2x128xbf16>, vector<128x256xbf16>, vector<2x256xf32> -> vector<2x256xf32>
    %c0_15 = arith.constant 0 : index
    %c0_16 = arith.constant 0 : index
    %20 = vector.load %arg7[%c0_15, %c0_16] : memref<1x256xf32, #tpu.memory_space<vmem>>, vector<1x256xf32>
    %21 = vector.broadcast %20 : vector<1x256xf32> to vector<2x256xf32>
    %22 = arith.addf %19, %21 : vector<2x256xf32>
    %cst_17 = arith.constant 0.000000e+00 : f32
    %23 = vector.broadcast %cst_17 : f32 to vector<2x256xf32>
    %24 = arith.maximumf %22, %23 : vector<2x256xf32>
    %25 = arith.truncf %24 : vector<2x256xf32> to vector<2x256xbf16>
    %c0_18 = arith.constant 0 : index
    %c0_19 = arith.constant 0 : index
    %26 = vector.load %arg8[%c0_18, %c0_19] : memref<256x512xbf16, #tpu.memory_space<vmem>>, vector<256x512xbf16>
    %cst_20 = arith.constant dense<0.000000e+00> : vector<2x512xf32>
    %27 = tpu.matmul %25, %26, %cst_20 {dimension_numbers = #tpu.dot_dimension_numbers<[1], [0], [0], [1], [0, 0, 1, 1], [], []>} : vector<2x256xbf16>, vector<256x512xbf16>, vector<2x512xf32> -> vector<2x512xf32>
    %c0_21 = arith.constant 0 : index
    %c0_22 = arith.constant 0 : index
    %28 = vector.load %arg9[%c0_21, %c0_22] : memref<1x512xf32, #tpu.memory_space<vmem>>, vector<1x512xf32>
    %29 = vector.broadcast %28 : vector<1x512xf32> to vector<2x512xf32>
    %30 = arith.addf %27, %29 : vector<2x512xf32>
    %cst_23 = arith.constant 0.000000e+00 : f32
    %31 = vector.broadcast %cst_23 : f32 to vector<2x512xf32>
    %32 = arith.maximumf %30, %31 : vector<2x512xf32>
    %33 = arith.truncf %32 : vector<2x512xf32> to vector<2x512xbf16>
    %c0_24 = arith.constant 0 : index
    %c0_25 = arith.constant 0 : index
    %34 = vector.load %arg10[%c0_24, %c0_25] : memref<512x2048xbf16, #tpu.memory_space<vmem>>, vector<512x2048xbf16>
    %cst_26 = arith.constant dense<0.000000e+00> : vector<2x2048xf32>
    %35 = tpu.matmul %33, %34, %cst_26 {dimension_numbers = #tpu.dot_dimension_numbers<[1], [0], [0], [1], [0, 0, 1, 1], [], []>} : vector<2x512xbf16>, vector<512x2048xbf16>, vector<2x2048xf32> -> vector<2x2048xf32>
    %c0_27 = arith.constant 0 : index
    %c0_28 = arith.constant 0 : index
    %36 = vector.load %arg11[%c0_27, %c0_28] : memref<1x2048xf32, #tpu.memory_space<vmem>>, vector<1x2048xf32>
    %37 = vector.broadcast %36 : vector<1x2048xf32> to vector<2x2048xf32>
    %38 = arith.addf %35, %37 : vector<2x2048xf32>
    %cst_29 = arith.constant 0.000000e+00 : f32
    %39 = vector.broadcast %cst_29 : f32 to vector<2x2048xf32>
    %40 = arith.maximumf %38, %39 : vector<2x2048xf32>
    %41 = arith.truncf %40 : vector<2x2048xf32> to vector<2x2048xbf16>
    %c0_30 = arith.constant 0 : index
    %c0_31 = arith.constant 0 : index
    %42 = vector.load %arg12[%c0_30, %c0_31] : memref<2048x512xbf16, #tpu.memory_space<vmem>>, vector<2048x512xbf16>
    %cst_32 = arith.constant dense<0.000000e+00> : vector<2x512xf32>
    %43 = tpu.matmul %41, %42, %cst_32 {dimension_numbers = #tpu.dot_dimension_numbers<[1], [0], [0], [1], [0, 0, 1, 1], [], []>} : vector<2x2048xbf16>, vector<2048x512xbf16>, vector<2x512xf32> -> vector<2x512xf32>
    %c0_33 = arith.constant 0 : index
    %c0_34 = arith.constant 0 : index
    %44 = vector.load %arg13[%c0_33, %c0_34] : memref<1x512xf32, #tpu.memory_space<vmem>>, vector<1x512xf32>
    %45 = vector.broadcast %44 : vector<1x512xf32> to vector<2x512xf32>
    %46 = arith.addf %43, %45 : vector<2x512xf32>
    %c0_35 = arith.constant 0 : index
    %c0_36 = arith.constant 0 : index
    %47 = vector.load %arg14[%c0_35, %c0_36] : memref<2x512xf32, #tpu.memory_space<vmem>>, vector<2x512xf32>
    tpu.vector_store %arg14[%c0_35, %c0_36], %46 {strides = array<i32>} : memref<2x512xf32, #tpu.memory_space<vmem>>, vector<2x512xf32>,
    return
  }
  func.func @transform_0(%arg0: i32) -> (i32, i32) {
    %c0_i32 = arith.constant 0 : i32
    %c0_i32_0 = arith.constant 0 : i32
    %c0_i32_1 = arith.constant 0 : i32
    return %c0_i32, %c0_i32_0 : i32, i32
  }
  func.func @transform_1(%arg0: i32) -> (i32, i32) {
    %c0_i32 = arith.constant 0 : i32
    %c0_i32_0 = arith.constant 0 : i32
    %c0_i32_1 = arith.constant 0 : i32
    return %c0_i32, %c0_i32_0 : i32, i32
  }
  func.func @transform_2(%arg0: i32) -> (i32, i32) {
    %c0_i32 = arith.constant 0 : i32
    %c0_i32_0 = arith.constant 0 : i32
    %c0_i32_1 = arith.constant 0 : i32
    return %c0_i32, %c0_i32_0 : i32, i32
  }
  func.func @transform_3(%arg0: i32) -> (i32, i32) {
    %c0_i32 = arith.constant 0 : i32
    %c0_i32_0 = arith.constant 0 : i32
    %c0_i32_1 = arith.constant 0 : i32
    return %c0_i32, %c0_i32_0 : i32, i32
  }
  func.func @transform_4(%arg0: i32) -> (i32, i32) {
    %c0_i32 = arith.constant 0 : i32
    %c0_i32_0 = arith.constant 0 : i32
    %c0_i32_1 = arith.constant 0 : i32
    return %c0_i32, %c0_i32_0 : i32, i32
  }
  func.func @transform_5(%arg0: i32) -> (i32, i32) {
    %c0_i32 = arith.constant 0 : i32
    %c0_i32_0 = arith.constant 0 : i32
    %c0_i32_1 = arith.constant 0 : i32
    return %c0_i32, %c0_i32_0 : i32, i32
  }
  func.func @transform_6(%arg0: i32) -> (i32, i32) {
    %c0_i32 = arith.constant 0 : i32
    %c0_i32_0 = arith.constant 0 : i32
    %c0_i32_1 = arith.constant 0 : i32
    return %c0_i32, %c0_i32_0 : i32, i32
  }
  func.func @transform_7(%arg0: i32) -> (i32, i32) {
    %c0_i32 = arith.constant 0 : i32
    %c0_i32_0 = arith.constant 0 : i32
    %c0_i32_1 = arith.constant 0 : i32
    return %c0_i32, %c0_i32_0 : i32, i32
  }
  func.func @transform_8(%arg0: i32) -> (i32, i32) {
    %c0_i32 = arith.constant 0 : i32
    %c0_i32_0 = arith.constant 0 : i32
    %c0_i32_1 = arith.constant 0 : i32
    return %c0_i32, %c0_i32_0 : i32, i32
  }
  func.func @transform_9(%arg0: i32) -> (i32, i32) {
    %c0_i32 = arith.constant 0 : i32
    %c0_i32_0 = arith.constant 0 : i32
    %c0_i32_1 = arith.constant 0 : i32
    return %c0_i32, %c0_i32_0 : i32, i32
  }
  func.func @transform_10(%arg0: i32) -> (i32, i32) {
    %c0_i32 = arith.constant 0 : i32
    %c0_i32_0 = arith.constant 0 : i32
    %c0_i32_1 = arith.constant 0 : i32
    return %c0_i32, %c0_i32_0 : i32, i32
  }
  func.func @transform_11(%arg0: i32) -> (i32, i32) {
    %c0_i32 = arith.constant 0 : i32
    %c0_i32_0 = arith.constant 0 : i32
    return %c0_i32, %arg0 : i32, i32
  }
  func.func @transform_12(%arg0: i32) -> (i32, i32) {
    %c0_i32 = arith.constant 0 : i32
    %c0_i32_0 = arith.constant 0 : i32
    return %c0_i32, %arg0 : i32, i32
  }
  func.func @transform_13(%arg0: i32) -> (i32, i32) {
    %c0_i32 = arith.constant 0 : i32
    %c0_i32_0 = arith.constant 0 : i32
    return %c0_i32, %arg0 : i32, i32
  }
}

</mosaic_0001>

<bundles_post_ra>
// kernel: generator_forward.1
= control target key start
LH: loop header
LB: loop body
LE: loop exit
PB: predicated region body
PF: predicated region fallthrough
CT: control target
= control target key end

     0   :  { %s16004_s0 = inlined_call_operand.vmem [shape: f32[2,32], index: 0, kind: input, shape index: {}]   ;;  %s16005_s1 = inlined_call_operand.vmem [shape: bf16[32,64], index: 1, kind: input, shape index: {}]   ;;  %s16006_s2 = inlined_call_operand.vmem [shape: f32[1,64], index: 2, kind: input, shape index: {}]   ;;  %s16007_s3 = inlined_call_operand.vmem [shape: bf16[64,128], index: 3, kind: input, shape index: {}]   ;;  %s16008_s4 = inlined_call_operand.vmem [shape: f32[1,128], index: 4, kind: input, shape index: {}]   ;;  %s16009_s5 = inlined_call_operand.vmem [shape: bf16[128,256], index: 5, kind: input, shape index: {}]   ;;  %s16010_s6 = inlined_call_operand.vmem [shape: f32[1,256], index: 6, kind: input, shape index: {}]   ;;  %s16011_s7 = inlined_call_operand.vmem [shape: bf16[256,512], index: 7, kind: input, shape index: {}]   ;;  %s16012_s8 = inlined_call_operand.vmem [shape: f32[1,512], index: 8, kind: input, shape index: {}]   ;;  %s16013_s9 = inlined_call_operand.vmem [shape: bf16[512,2048], index: 9, kind: input, shape index: {}]   ;;  %s16014_s10 = inlined_call_operand.vmem [shape: f32[1,2048], index: 10, kind: input, shape index: {}]   ;;  %s16015_s11 = inlined_call_operand.vmem [shape: bf16[2048,6144], index: 11, kind: input, shape index: {}]   ;;  %s16016_s12 = inlined_call_operand.vmem [shape: f32[1,6144], index: 12, kind: input, shape index: {}]   ;;  %s16017_s13 = inlined_call_operand.hbm [shape: f32[2,6144], index: 13, kind: output, shape index: {}]  }
   0x1   :  { %16018 = sst [smem:[#allocation6_spill]] %s16004_s0 }
   0x2   :  { %16019 = sst [smem:[#allocation7_spill]] %s16005_s1 }
   0x3   :  { %16020 = sst [smem:[#allocation8_spill]] %s16006_s2 }
   0x4   :  { %16021 = sst [smem:[#allocation9_spill]] %s16007_s3 }
   0x5   :  { %18 = vsyncpa [#allocation4], 0 }
   0x6   :  { %20 = vsyncpa [#allocation4 + $0x1], 0  ;;  %s12359_s25 = smov 0   ;;  %s12361_s26 = smov 0  }
   0x7   :  { %s12363_s27 = smov 0   ;;  %s12365_s28 = smov 0  }
   0x8 LB: > { %s12380_s29 = sadd.s32 4294967295, %s12282_s28   ;;  %s10014_s30 = sadd.s32 4294967294, %s12282_s28   ;;  %s12282_s28 = sphi %s12365_s28, %s16031_s28   ;;  %s12278_s27 = sphi %s12363_s27, %s16030_s27   ;;  %s12274_s26 = sphi %s12361_s26, %s16029_s26   ;;  %s12270_s25 = sphi %s12359_s25, %s16028_s25  }
   0x9   : > { %s12384_s14 = sadd.s32 1, %s12282_s28   ;;  %s264_s15 = sadd.s32 1, %s12278_s27 }
   0xa   : > { %s261_s16 = ssub.s32 %s12282_s28, %s12384_s14  ;;  %p271_p0 = scmp.ne.s32.totalorder %s12278_s27, %s12274_s26 }
   0xb   : > { %p262_p1 = scmp.eq.s32.totalorder %s261_s16, 0  ;;  %p272_p2 = scmp.eq.s32.totalorder %s12282_s28, 0 }
   0xc   : > { %p327_p3 = scmp.eq.s32.totalorder %s12380_s29, 11  ;;  %p332_p4 = scmp.ne.s32.totalorder %s12274_s26, %s12270_s25 }
   0xd   : > { %s12396_s17 = scalar_select %p262_p1, %s12278_s27, %s264_s15  }
   0xe   : > { %p273_p5 = por %p272_p2, %p271_p0  ;;  %p12398_p6 = por %p327_p3, %p271_p0 }
   0xf   : > { %p333_p7 = scmp.eq.s32.totalorder %s10014_s30, 11  ;;  %p10016_p9 = scmp.ge.s32.totalorder %s12282_s28, 12 }
  0x11   : > { %p12402_p8 = por %p333_p7, %p332_p4  ;;  %382 = sbr.rel (%p10016_p9) target bundleno = 284 (0x11c), region = 60 }
  0x18   : > { %385 = sbr.rel (!%p273_p5) target bundleno = 284 (0x11c), region = 64  ;;  %s387_s20 = sand.u32 (%p273_p5), 1, %s12278_s27  }
  0x19   : > { %s11143_s21 = sshll.u32 (%p273_p5), %s12282_s28, 4  ;;  %s10017_s22 = sshll.u32 (%p273_p5), %s387_s20, 12 }
  0x1a   : > { %s12412_s15 = scalar_lea.vmem (%p273_p5), %s16015_s11, %s11143_s21  ;;  %s12417_s30 = scalar_lea.vmem (%p273_p5), [#allocation2], %s10017_s22 }
  0x1b   : > { %v405_v0 = vld [vmem:[%s12412_s15] sm:$0xff] (%p273_p5)  ;;  %v407_v1 = vld [vmem:[%s12412_s15 + $0x8] sm:$0xff] (%p273_p5) }
  0x1c   : > { %v409_v2 = vld [vmem:[%s12412_s15 + $0xc0] sm:$0xff] (%p273_p5)  ;;  %406 = vst [vmem:[%s12417_s30] sm:$0xff] (%p273_p5), %v405_v0  ;;  %408 = vst [vmem:[%s12417_s30 + $0x8] sm:$0xff] (%p273_p5), %v407_v1  ;;  %v411_v3 = vld [vmem:[%s12412_s15 + $0xc8] sm:$0xff] (%p273_p5) }
  0x1d   : > { %410 = vst [vmem:[%s12417_s30 + $0x10] sm:$0xff] (%p273_p5), %v409_v2  ;;  %v413_v4 = vld [vmem:[%s12412_s15 + $0x180] sm:$0xff] (%p273_p5)  ;;  %v415_v5 = vld [vmem:[%s12412_s15 + $0x188] sm:$0xff] (%p273_p5)  ;;  %412 = vst [vmem:[%s12417_s30 + $0x18] sm:$0xff] (%p273_p5), %v411_v3 }
  0x1e   : > { %414 = vst [vmem:[%s12417_s30 + $0x20] sm:$0xff] (%p273_p5), %v413_v4  ;;  %416 = vst [vmem:[%s12417_s30 + $0x28] sm:$0xff] (%p273_p5), %v415_v5  ;;  %v417_v6 = vld [vmem:[%s12412_s15 + $0x240] sm:$0xff] (%p273_p5)  ;;  %v419_v7 = vld [vmem:[%s12412_s15 + $0x248] sm:$0xff] (%p273_p5) }
  0x1f   : > { %v421_v8 = vld [vmem:[%s12412_s15 + $0x300] sm:$0xff]  ;;  %418 = vst [vmem:[%s12417_s30 + $0x30] sm:$0xff] %v417_v6  ;;  %420 = vst [vmem:[%s12417_s30 + $0x38] sm:$0xff] %v419_v7  ;;  %v423_v9 = vld [vmem:[%s12412_s15 + $0x308] sm:$0xff] }
  0x20   : > { %422 = vst [vmem:[%s12417_s30 + $0x40] sm:$0xff] %v421_v8  ;;  %v425_v10 = vld [vmem:[%s12412_s15 + $0x3c0] sm:$0xff]  ;;  %v427_v11 = vld [vmem:[%s12412_s15 + $0x3c8] sm:$0xff]  ;;  %424 = vst [vmem:[%s12417_s30 + $0x48] sm:$0xff] %v423_v9 }
  0x21   : > { %426 = vst [vmem:[%s12417_s30 + $0x50] sm:$0xff] %v425_v10  ;;  %428 = vst [vmem:[%s12417_s30 + $0x58] sm:$0xff] %v427_v11  ;;  %v429_v12 = vld [vmem:[%s12412_s15 + $0x480] sm:$0xff]  ;;  %v431_v13 = vld [vmem:[%s12412_s15 + $0x488] sm:$0xff] }
  0x22   : > { %v433_v14 = vld [vmem:[%s12412_s15 + $0x540] sm:$0xff]  ;;  %430 = vst [vmem:[%s12417_s30 + $0x60] sm:$0xff] %v429_v12  ;;  %432 = vst [vmem:[%s12417_s30 + $0x68] sm:$0xff] %v431_v13  ;;  %v435_v15 = vld [vmem:[%s12412_s15 + $0x548] sm:$0xff] }
  0x23   : > { %434 = vst [vmem:[%s12417_s30 + $0x70] sm:$0xff] %v433_v14  ;;  %v437_v16 = vld [vmem:[%s12412_s15 + $0x600] sm:$0xff]  ;;  %v439_v17 = vld [vmem:[%s12412_s15 + $0x608] sm:$0xff]  ;;  %436 = vst [vmem:[%s12417_s30 + $0x78] sm:$0xff] %v435_v15 }
  0x24   : > { %438 = vst [vmem:[%s12417_s30 + $0x80] sm:$0xff] %v437_v16  ;;  %440 = vst [vmem:[%s12417_s30 + $0x88] sm:$0xff] %v439_v17  ;;  %v441_v18 = vld [vmem:[%s12412_s15 + $0x6c0] sm:$0xff]  ;;  %v443_v19 = vld [vmem:[%s12412_s15 + $0x6c8] sm:$0xff] }
  0x25   : > { %v445_v20 = vld [vmem:[%s12412_s15 + $0x780] sm:$0xff]  ;;  %442 = vst [vmem:[%s12417_s30 + $0x90] sm:$0xff] %v441_v18  ;;  %444 = vst [vmem:[%s12417_s30 + $0x98] sm:$0xff] %v443_v19  ;;  %v447_v21 = vld [vmem:[%s12412_s15 + $0x788] sm:$0xff] }
  0x26   : > { %446 = vst [vmem:[%s12417_s30 + $0xa0] sm:$0xff] %v445_v20  ;;  %v449_v22 = vld [vmem:[%s12412_s15 + $0x840] sm:$0xff]  ;;  %v451_v23 = vld [vmem:[%s12412_s15 + $0x848] sm:$0xff]  ;;  %448 = vst [vmem:[%s12417_s30 + $0xa8] sm:$0xff] %v447_v21 }
  0x27   : > { %450 = vst [vmem:[%s12417_s30 + $0xb0] sm:$0xff] %v449_v22  ;;  %452 = vst [vmem:[%s12417_s30 + $0xb8] sm:$0xff] %v451_v23  ;;  %v453_v24 = vld [vmem:[%s12412_s15 + $0x900] sm:$0xff]  ;;  %v455_v25 = vld [vmem:[%s12412_s15 + $0x908] sm:$0xff] }
  0x28   : > { %v457_v26 = vld [vmem:[%s12412_s15 + $0x9c0] sm:$0xff]  ;;  %454 = vst [vmem:[%s12417_s30 + $0xc0] sm:$0xff] %v453_v24  ;;  %456 = vst [vmem:[%s12417_s30 + $0xc8] sm:$0xff] %v455_v25  ;;  %v459_v27 = vld [vmem:[%s12412_s15 + $0x9c8] sm:$0xff] }
  0x29   : > { %458 = vst [vmem:[%s12417_s30 + $0xd0] sm:$0xff] %v457_v26  ;;  %v461_v28 = vld [vmem:[%s12412_s15 + $0xa80] sm:$0xff]  ;;  %v463_v29 = vld [vmem:[%s12412_s15 + $0xa88] sm:$0xff]  ;;  %460 = vst [vmem:[%s12417_s30 + $0xd8] sm:$0xff] %v459_v27 }
  0x2a   : > { %462 = vst [vmem:[%s12417_s30 + $0xe0] sm:$0xff] %v461_v28  ;;  %464 = vst [vmem:[%s12417_s30 + $0xe8] sm:$0xff] %v463_v29  ;;  %v465_v30 = vld [vmem:[%s12412_s15 + $0xb40] sm:$0xff]  ;;  %v467_v31 = vld [vmem:[%s12412_s15 + $0xb48] sm:$0xff] }
  0x2b   : > { %v469_v32 = vld [vmem:[%s12412_s15 + $0xc00] sm:$0xff]  ;;  %466 = vst [vmem:[%s12417_s30 + $0xf0] sm:$0xff] %v465_v30  ;;  %468 = vst [vmem:[%s12417_s30 + $0xf8] sm:$0xff] %v467_v31  ;;  %v471_v33 = vld [vmem:[%s12412_s15 + $0xc08] sm:$0xff] }
  0x2c   : > { %470 = vst [vmem:[%s12417_s30 + $0x100] sm:$0xff] %v469_v32  ;;  %v473_v34 = vld [vmem:[%s12412_s15 + $0xcc0] sm:$0xff]  ;;  %v475_v35 = vld [vmem:[%s12412_s15 + $0xcc8] sm:$0xff]  ;;  %472 = vst [vmem:[%s12417_s30 + $0x108] sm:$0xff] %v471_v33 }
  0x2d   : > { %474 = vst [vmem:[%s12417_s30 + $0x110] sm:$0xff] %v473_v34  ;;  %476 = vst [vmem:[%s12417_s30 + $0x118] sm:$0xff] %v475_v35  ;;  %v477_v36 = vld [vmem:[%s12412_s15 + $0xd80] sm:$0xff]  ;;  %v479_v37 = vld [vmem:[%s12412_s15 + $0xd88] sm:$0xff] }
  0x2e   : > { %v481_v38 = vld [vmem:[%s12412_s15 + $0xe40] sm:$0xff]  ;;  %478 = vst [vmem:[%s12417_s30 + $0x120] sm:$0xff] %v477_v36  ;;  %480 = vst [vmem:[%s12417_s30 + $0x128] sm:$0xff] %v479_v37  ;;  %v483_v39 = vld [vmem:[%s12412_s15 + $0xe48] sm:$0xff] }
  0x2f   : > { %482 = vst [vmem:[%s12417_s30 + $0x130] sm:$0xff] %v481_v38  ;;  %v485_v40 = vld [vmem:[%s12412_s15 + $0xf00] sm:$0xff]  ;;  %v487_v41 = vld [vmem:[%s12412_s15 + $0xf08] sm:$0xff]  ;;  %484 = vst [vmem:[%s12417_s30 + $0x138] sm:$0xff] %v483_v39 }
  0x30   : > { %486 = vst [vmem:[%s12417_s30 + $0x140] sm:$0xff] %v485_v40  ;;  %488 = vst [vmem:[%s12417_s30 + $0x148] sm:$0xff] %v487_v41  ;;  %v489_v42 = vld [vmem:[%s12412_s15 + $0xfc0] sm:$0xff]  ;;  %v491_v43 = vld [vmem:[%s12412_s15 + $0xfc8] sm:$0xff] }
  0x31   : > { %v493_v44 = vld [vmem:[%s12412_s15 + $0x1080] sm:$0xff]  ;;  %490 = vst [vmem:[%s12417_s30 + $0x150] sm:$0xff] %v489_v42  ;;  %492 = vst [vmem:[%s12417_s30 + $0x158] sm:$0xff] %v491_v43  ;;  %v495_v45 = vld [vmem:[%s12412_s15 + $0x1088] sm:$0xff] }
  0x32   : > { %494 = vst [vmem:[%s12417_s30 + $0x160] sm:$0xff] %v493_v44  ;;  %v497_v46 = vld [vmem:[%s12412_s15 + $0x1140] sm:$0xff]  ;;  %v499_v47 = vld [vmem:[%s12412_s15 + $0x1148] sm:$0xff]  ;;  %496 = vst [vmem:[%s12417_s30 + $0x168] sm:$0xff] %v495_v45 }
  0x33   : > { %498 = vst [vmem:[%s12417_s30 + $0x170] sm:$0xff] %v497_v46  ;;  %500 = vst [vmem:[%s12417_s30 + $0x178] sm:$0xff] %v499_v47  ;;  %v501_v48 = vld [vmem:[%s12412_s15 + $0x1200] sm:$0xff]  ;;  %v503_v49 = vld [vmem:[%s12412_s15 + $0x1208] sm:$0xff] }
  0x34   : > { %v505_v50 = vld [vmem:[%s12412_s15 + $0x12c0] sm:$0xff]  ;;  %502 = vst [vmem:[%s12417_s30 + $0x180] sm:$0xff] %v501_v48  ;;  %504 = vst [vmem:[%s12417_s30 + $0x188] sm:$0xff] %v503_v49  ;;  %v507_v51 = vld [vmem:[%s12412_s15 + $0x12c8] sm:$0xff] }
  0x35   : > { %506 = vst [vmem:[%s12417_s30 + $0x190] sm:$0xff] %v505_v50  ;;  %v509_v52 = vld [vmem:[%s12412_s15 + $0x1380] sm:$0xff]  ;;  %v511_v53 = vld [vmem:[%s12412_s15 + $0x1388] sm:$0xff]  ;;  %508 = vst [vmem:[%s12417_s30 + $0x198] sm:$0xff] %v507_v51 }
  0x36   : > { %510 = vst [vmem:[%s12417_s30 + $0x1a0] sm:$0xff] %v509_v52  ;;  %512 = vst [vmem:[%s12417_s30 + $0x1a8] sm:$0xff] %v511_v53  ;;  %v513_v54 = vld [vmem:[%s12412_s15 + $0x1440] sm:$0xff]  ;;  %v515_v55 = vld [vmem:[%s12412_s15 + $0x1448] sm:$0xff] }
  0x37   : > { %v517_v56 = vld [vmem:[%s12412_s15 + $0x1500] sm:$0xff]  ;;  %514 = vst [vmem:[%s12417_s30 + $0x1b0] sm:$0xff] %v513_v54  ;;  %516 = vst [vmem:[%s12417_s30 + $0x1b8] sm:$0xff] %v515_v55  ;;  %v519_v57 = vld [vmem:[%s12412_s15 + $0x1508] sm:$0xff] }
  0x38   : > { %518 = vst [vmem:[%s12417_s30 + $0x1c0] sm:$0xff] %v517_v56  ;;  %v521_v58 = vld [vmem:[%s12412_s15 + $0x15c0] sm:$0xff]  ;;  %v523_v59 = vld [vmem:[%s12412_s15 + $0x15c8] sm:$0xff]  ;;  %520 = vst [vmem:[%s12417_s30 + $0x1c8] sm:$0xff] %v519_v57 }
  0x39   : > { %522 = vst [vmem:[%s12417_s30 + $0x1d0] sm:$0xff] %v521_v58  ;;  %524 = vst [vmem:[%s12417_s30 + $0x1d8] sm:$0xff] %v523_v59  ;;  %v525_v60 = vld [vmem:[%s12412_s15 + $0x1680] sm:$0xff]  ;;  %v527_v61 = vld [vmem:[%s12412_s15 + $0x1688] sm:$0xff] }
  0x3a   : > { %v529_v62 = vld [vmem:[%s12412_s15 + $0x1740] sm:$0xff]  ;;  %526 = vst [vmem:[%s12417_s30 + $0x1e0] sm:$0xff] %v525_v60  ;;  %528 = vst [vmem:[%s12417_s30 + $0x1e8] sm:$0xff] %v527_v61  ;;  %v531_v63 = vld [vmem:[%s12412_s15 + $0x1748] sm:$0xff] }
  0x3b   : > { %530 = vst [vmem:[%s12417_s30 + $0x1f0] sm:$0xff] %v529_v62  ;;  %v533_v0 = vld [vmem:[%s12412_s15 + $0x1800] sm:$0xff]  ;;  %v535_v1 = vld [vmem:[%s12412_s15 + $0x1808] sm:$0xff]  ;;  %532 = vst [vmem:[%s12417_s30 + $0x1f8] sm:$0xff] %v531_v63 }
  0x3c   : > { %534 = vst [vmem:[%s12417_s30 + $0x200] sm:$0xff] %v533_v0  ;;  %536 = vst [vmem:[%s12417_s30 + $0x208] sm:$0xff] %v535_v1  ;;  %v537_v2 = vld [vmem:[%s12412_s15 + $0x18c0] sm:$0xff]  ;;  %v539_v3 = vld [vmem:[%s12412_s15 + $0x18c8] sm:$0xff] }
  0x3d   : > { %v541_v4 = vld [vmem:[%s12412_s15 + $0x1980] sm:$0xff]  ;;  %538 = vst [vmem:[%s12417_s30 + $0x210] sm:$0xff] %v537_v2  ;;  %540 = vst [vmem:[%s12417_s30 + $0x218] sm:$0xff] %v539_v3  ;;  %v543_v5 = vld [vmem:[%s12412_s15 + $0x1988] sm:$0xff] }
  0x3e   : > { %542 = vst [vmem:[%s12417_s30 + $0x220] sm:$0xff] %v541_v4  ;;  %v545_v6 = vld [vmem:[%s12412_s15 + $0x1a40] sm:$0xff]  ;;  %v547_v7 = vld [vmem:[%s12412_s15 + $0x1a48] sm:$0xff]  ;;  %544 = vst [vmem:[%s12417_s30 + $0x228] sm:$0xff] %v543_v5 }
  0x3f   : > { %546 = vst [vmem:[%s12417_s30 + $0x230] sm:$0xff] %v545_v6  ;;  %548 = vst [vmem:[%s12417_s30 + $0x238] sm:$0xff] %v547_v7  ;;  %v549_v8 = vld [vmem:[%s12412_s15 + $0x1b00] sm:$0xff]  ;;  %v551_v9 = vld [vmem:[%s12412_s15 + $0x1b08] sm:$0xff] }
  0x40   : > { %v553_v10 = vld [vmem:[%s12412_s15 + $0x1bc0] sm:$0xff]  ;;  %550 = vst [vmem:[%s12417_s30 + $0x240] sm:$0xff] %v549_v8  ;;  %552 = vst [vmem:[%s12417_s30 + $0x248] sm:$0xff] %v551_v9  ;;  %v555_v11 = vld [vmem:[%s12412_s15 + $0x1bc8] sm:$0xff] }
  0x41   : > { %554 = vst [vmem:[%s12417_s30 + $0x250] sm:$0xff] %v553_v10  ;;  %v557_v12 = vld [vmem:[%s12412_s15 + $0x1c80] sm:$0xff]  ;;  %v559_v13 = vld [vmem:[%s12412_s15 + $0x1c88] sm:$0xff]  ;;  %556 = vst [vmem:[%s12417_s30 + $0x258] sm:$0xff] %v555_v11 }
  0x42   : > { %558 = vst [vmem:[%s12417_s30 + $0x260] sm:$0xff] %v557_v12  ;;  %560 = vst [vmem:[%s12417_s30 + $0x268] sm:$0xff] %v559_v13  ;;  %v561_v14 = vld [vmem:[%s12412_s15 + $0x1d40] sm:$0xff]  ;;  %v563_v15 = vld [vmem:[%s12412_s15 + $0x1d48] sm:$0xff] }
  0x43   : > { %v565_v16 = vld [vmem:[%s12412_s15 + $0x1e00] sm:$0xff]  ;;  %562 = vst [vmem:[%s12417_s30 + $0x270] sm:$0xff] %v561_v14  ;;  %564 = vst [vmem:[%s12417_s30 + $0x278] sm:$0xff] %v563_v15  ;;  %v567_v17 = vld [vmem:[%s12412_s15 + $0x1e08] sm:$0xff] }
  0x44   : > { %566 = vst [vmem:[%s12417_s30 + $0x280] sm:$0xff] %v565_v16  ;;  %v569_v18 = vld [vmem:[%s12412_s15 + $0x1ec0] sm:$0xff]  ;;  %v571_v19 = vld [vmem:[%s12412_s15 + $0x1ec8] sm:$0xff]  ;;  %568 = vst [vmem:[%s12417_s30 + $0x288] sm:$0xff] %v567_v17 }
  0x45   : > { %570 = vst [vmem:[%s12417_s30 + $0x290] sm:$0xff] %v569_v18  ;;  %572 = vst [vmem:[%s12417_s30 + $0x298] sm:$0xff] %v571_v19  ;;  %v573_v20 = vld [vmem:[%s12412_s15 + $0x1f80] sm:$0xff]  ;;  %v575_v21 = vld [vmem:[%s12412_s15 + $0x1f88] sm:$0xff] }
  0x46   : > { %v577_v22 = vld [vmem:[%s12412_s15 + $0x2040] sm:$0xff]  ;;  %574 = vst [vmem:[%s12417_s30 + $0x2a0] sm:$0xff] %v573_v20  ;;  %576 = vst [vmem:[%s12417_s30 + $0x2a8] sm:$0xff] %v575_v21  ;;  %v579_v23 = vld [vmem:[%s12412_s15 + $0x2048] sm:$0xff] }
  0x47   : > { %578 = vst [vmem:[%s12417_s30 + $0x2b0] sm:$0xff] %v577_v22  ;;  %v581_v24 = vld [vmem:[%s12412_s15 + $0x2100] sm:$0xff]  ;;  %v583_v25 = vld [vmem:[%s12412_s15 + $0x2108] sm:$0xff]  ;;  %580 = vst [vmem:[%s12417_s30 + $0x2b8] sm:$0xff] %v579_v23 }
  0x48   : > { %582 = vst [vmem:[%s12417_s30 + $0x2c0] sm:$0xff] %v581_v24  ;;  %584 = vst [vmem:[%s12417_s30 + $0x2c8] sm:$0xff] %v583_v25  ;;  %v585_v26 = vld [vmem:[%s12412_s15 + $0x21c0] sm:$0xff]  ;;  %v587_v27 = vld [vmem:[%s12412_s15 + $0x21c8] sm:$0xff] }
  0x49   : > { %v589_v28 = vld [vmem:[%s12412_s15 + $0x2280] sm:$0xff]  ;;  %586 = vst [vmem:[%s12417_s30 + $0x2d0] sm:$0xff] %v585_v26  ;;  %588 = vst [vmem:[%s12417_s30 + $0x2d8] sm:$0xff] %v587_v27  ;;  %v591_v29 = vld [vmem:[%s12412_s15 + $0x2288] sm:$0xff] }
  0x4a   : > { %590 = vst [vmem:[%s12417_s30 + $0x2e0] sm:$0xff] %v589_v28  ;;  %v593_v30 = vld [vmem:[%s12412_s15 + $0x2340] sm:$0xff]  ;;  %v595_v31 = vld [vmem:[%s12412_s15 + $0x2348] sm:$0xff]  ;;  %592 = vst [vmem:[%s12417_s30 + $0x2e8] sm:$0xff] %v591_v29 }
  0x4b   : > { %594 = vst [vmem:[%s12417_s30 + $0x2f0] sm:$0xff] %v593_v30  ;;  %596 = vst [vmem:[%s12417_s30 + $0x2f8] sm:$0xff] %v595_v31  ;;  %v597_v32 = vld [vmem:[%s12412_s15 + $0x2400] sm:$0xff]  ;;  %v599_v33 = vld [vmem:[%s12412_s15 + $0x2408] sm:$0xff] }
  0x4c   : > { %v601_v34 = vld [vmem:[%s12412_s15 + $0x24c0] sm:$0xff]  ;;  %598 = vst [vmem:[%s12417_s30 + $0x300] sm:$0xff] %v597_v32  ;;  %600 = vst [vmem:[%s12417_s30 + $0x308] sm:$0xff] %v599_v33  ;;  %v603_v35 = vld [vmem:[%s12412_s15 + $0x24c8] sm:$0xff] }
  0x4d   : > { %602 = vst [vmem:[%s12417_s30 + $0x310] sm:$0xff] %v601_v34  ;;  %v605_v36 = vld [vmem:[%s12412_s15 + $0x2580] sm:$0xff]  ;;  %v607_v37 = vld [vmem:[%s12412_s15 + $0x2588] sm:$0xff]  ;;  %604 = vst [vmem:[%s12417_s30 + $0x318] sm:$0xff] %v603_v35 }
  0x4e   : > { %606 = vst [vmem:[%s12417_s30 + $0x320] sm:$0xff] %v605_v36  ;;  %608 = vst [vmem:[%s12417_s30 + $0x328] sm:$0xff] %v607_v37  ;;  %v609_v38 = vld [vmem:[%s12412_s15 + $0x2640] sm:$0xff]  ;;  %v611_v39 = vld [vmem:[%s12412_s15 + $0x2648] sm:$0xff] }
  0x4f   : > { %v613_v40 = vld [vmem:[%s12412_s15 + $0x2700] sm:$0xff]  ;;  %610 = vst [vmem:[%s12417_s30 + $0x330] sm:$0xff] %v609_v38  ;;  %612 = vst [vmem:[%s12417_s30 + $0x338] sm:$0xff] %v611_v39  ;;  %v615_v41 = vld [vmem:[%s12412_s15 + $0x2708] sm:$0xff] }
  0x50   : > { %614 = vst [vmem:[%s12417_s30 + $0x340] sm:$0xff] %v613_v40  ;;  %v617_v42 = vld [vmem:[%s12412_s15 + $0x27c0] sm:$0xff]  ;;  %v619_v43 = vld [vmem:[%s12412_s15 + $0x27c8] sm:$0xff]  ;;  %616 = vst [vmem:[%s12417_s30 + $0x348] sm:$0xff] %v615_v41 }
  0x51   : > { %618 = vst [vmem:[%s12417_s30 + $0x350] sm:$0xff] %v617_v42  ;;  %620 = vst [vmem:[%s12417_s30 + $0x358] sm:$0xff] %v619_v43  ;;  %v621_v44 = vld [vmem:[%s12412_s15 + $0x2880] sm:$0xff]  ;;  %v623_v45 = vld [vmem:[%s12412_s15 + $0x2888] sm:$0xff] }
  0x52   : > { %v625_v46 = vld [vmem:[%s12412_s15 + $0x2940] sm:$0xff]  ;;  %622 = vst [vmem:[%s12417_s30 + $0x360] sm:$0xff] %v621_v44  ;;  %624 = vst [vmem:[%s12417_s30 + $0x368] sm:$0xff] %v623_v45  ;;  %v627_v47 = vld [vmem:[%s12412_s15 + $0x2948] sm:$0xff] }
  0x53   : > { %626 = vst [vmem:[%s12417_s30 + $0x370] sm:$0xff] %v625_v46  ;;  %v629_v48 = vld [vmem:[%s12412_s15 + $0x2a00] sm:$0xff]  ;;  %v631_v49 = vld [vmem:[%s12412_s15 + $0x2a08] sm:$0xff]  ;;  %628 = vst [vmem:[%s12417_s30 + $0x378] sm:$0xff] %v627_v47 }
  0x54   : > { %630 = vst [vmem:[%s12417_s30 + $0x380] sm:$0xff] %v629_v48  ;;  %632 = vst [vmem:[%s12417_s30 + $0x388] sm:$0xff] %v631_v49  ;;  %v633_v50 = vld [vmem:[%s12412_s15 + $0x2ac0] sm:$0xff]  ;;  %v635_v51 = vld [vmem:[%s12412_s15 + $0x2ac8] sm:$0xff] }
  0x55   : > { %v637_v52 = vld [vmem:[%s12412_s15 + $0x2b80] sm:$0xff]  ;;  %634 = vst [vmem:[%s12417_s30 + $0x390] sm:$0xff] %v633_v50  ;;  %636 = vst [vmem:[%s12417_s30 + $0x398] sm:$0xff] %v635_v51  ;;  %v639_v53 = vld [vmem:[%s12412_s15 + $0x2b88] sm:$0xff] }
  0x56   : > { %638 = vst [vmem:[%s12417_s30 + $0x3a0] sm:$0xff] %v637_v52  ;;  %v641_v54 = vld [vmem:[%s12412_s15 + $0x2c40] sm:$0xff]  ;;  %v643_v55 = vld [vmem:[%s12412_s15 + $0x2c48] sm:$0xff]  ;;  %640 = vst [vmem:[%s12417_s30 + $0x3a8] sm:$0xff] %v639_v53 }
  0x57   : > { %642 = vst [vmem:[%s12417_s30 + $0x3b0] sm:$0xff] %v641_v54  ;;  %644 = vst [vmem:[%s12417_s30 + $0x3b8] sm:$0xff] %v643_v55  ;;  %v645_v56 = vld [vmem:[%s12412_s15 + $0x2d00] sm:$0xff]  ;;  %v647_v57 = vld [vmem:[%s12412_s15 + $0x2d08] sm:$0xff] }
  0x58   : > { %v649_v58 = vld [vmem:[%s12412_s15 + $0x2dc0] sm:$0xff]  ;;  %646 = vst [vmem:[%s12417_s30 + $0x3c0] sm:$0xff] %v645_v56  ;;  %648 = vst [vmem:[%s12417_s30 + $0x3c8] sm:$0xff] %v647_v57  ;;  %v651_v59 = vld [vmem:[%s12412_s15 + $0x2dc8] sm:$0xff] }
  0x59   : > { %650 = vst [vmem:[%s12417_s30 + $0x3d0] sm:$0xff] %v649_v58  ;;  %v653_v60 = vld [vmem:[%s12412_s15 + $0x2e80] sm:$0xff]  ;;  %v655_v61 = vld [vmem:[%s12412_s15 + $0x2e88] sm:$0xff]  ;;  %652 = vst [vmem:[%s12417_s30 + $0x3d8] sm:$0xff] %v651_v59 }
  0x5a   : > { %654 = vst [vmem:[%s12417_s30 + $0x3e0] sm:$0xff] %v653_v60  ;;  %656 = vst [vmem:[%s12417_s30 + $0x3e8] sm:$0xff] %v655_v61  ;;  %v657_v62 = vld [vmem:[%s12412_s15 + $0x2f40] sm:$0xff]  ;;  %v659_v63 = vld [vmem:[%s12412_s15 + $0x2f48] sm:$0xff] }
  0x5b   : > { %v661_v0 = vld [vmem:[%s12412_s15 + $0x3000] sm:$0xff]  ;;  %658 = vst [vmem:[%s12417_s30 + $0x3f0] sm:$0xff] %v657_v62  ;;  %660 = vst [vmem:[%s12417_s30 + $0x3f8] sm:$0xff] %v659_v63  ;;  %v663_v1 = vld [vmem:[%s12412_s15 + $0x3008] sm:$0xff] }
  0x5c   : > { %662 = vst [vmem:[%s12417_s30 + $0x400] sm:$0xff] %v661_v0  ;;  %v665_v2 = vld [vmem:[%s12412_s15 + $0x30c0] sm:$0xff]  ;;  %v667_v3 = vld [vmem:[%s12412_s15 + $0x30c8] sm:$0xff]  ;;  %664 = vst [vmem:[%s12417_s30 + $0x408] sm:$0xff] %v663_v1 }
  0x5d   : > { %666 = vst [vmem:[%s12417_s30 + $0x410] sm:$0xff] %v665_v2  ;;  %668 = vst [vmem:[%s12417_s30 + $0x418] sm:$0xff] %v667_v3  ;;  %v669_v4 = vld [vmem:[%s12412_s15 + $0x3180] sm:$0xff]  ;;  %v671_v5 = vld [vmem:[%s12412_s15 + $0x3188] sm:$0xff] }
  0x5e   : > { %v673_v6 = vld [vmem:[%s12412_s15 + $0x3240] sm:$0xff]  ;;  %670 = vst [vmem:[%s12417_s30 + $0x420] sm:$0xff] %v669_v4  ;;  %672 = vst [vmem:[%s12417_s30 + $0x428] sm:$0xff] %v671_v5  ;;  %v675_v7 = vld [vmem:[%s12412_s15 + $0x3248] sm:$0xff] }
  0x5f   : > { %674 = vst [vmem:[%s12417_s30 + $0x430] sm:$0xff] %v673_v6  ;;  %v677_v8 = vld [vmem:[%s12412_s15 + $0x3300] sm:$0xff]  ;;  %v679_v9 = vld [vmem:[%s12412_s15 + $0x3308] sm:$0xff]  ;;  %676 = vst [vmem:[%s12417_s30 + $0x438] sm:$0xff] %v675_v7 }
  0x60   : > { %678 = vst [vmem:[%s12417_s30 + $0x440] sm:$0xff] %v677_v8  ;;  %680 = vst [vmem:[%s12417_s30 + $0x448] sm:$0xff] %v679_v9  ;;  %v681_v10 = vld [vmem:[%s12412_s15 + $0x33c0] sm:$0xff]  ;;  %v683_v11 = vld [vmem:[%s12412_s15 + $0x33c8] sm:$0xff] }
  0x61   : > { %v685_v12 = vld [vmem:[%s12412_s15 + $0x3480] sm:$0xff]  ;;  %682 = vst [vmem:[%s12417_s30 + $0x450] sm:$0xff] %v681_v10  ;;  %684 = vst [vmem:[%s12417_s30 + $0x458] sm:$0xff] %v683_v11  ;;  %v687_v13 = vld [vmem:[%s12412_s15 + $0x3488] sm:$0xff] }
  0x62   : > { %686 = vst [vmem:[%s12417_s30 + $0x460] sm:$0xff] %v685_v12  ;;  %v689_v14 = vld [vmem:[%s12412_s15 + $0x3540] sm:$0xff]  ;;  %v691_v15 = vld [vmem:[%s12412_s15 + $0x3548] sm:$0xff]  ;;  %688 = vst [vmem:[%s12417_s30 + $0x468] sm:$0xff] %v687_v13 }
  0x63   : > { %690 = vst [vmem:[%s12417_s30 + $0x470] sm:$0xff] %v689_v14  ;;  %692 = vst [vmem:[%s12417_s30 + $0x478] sm:$0xff] %v691_v15  ;;  %v693_v16 = vld [vmem:[%s12412_s15 + $0x3600] sm:$0xff]  ;;  %v695_v17 = vld [vmem:[%s12412_s15 + $0x3608] sm:$0xff] }
  0x64   : > { %v697_v18 = vld [vmem:[%s12412_s15 + $0x36c0] sm:$0xff]  ;;  %694 = vst [vmem:[%s12417_s30 + $0x480] sm:$0xff] %v693_v16  ;;  %696 = vst [vmem:[%s12417_s30 + $0x488] sm:$0xff] %v695_v17  ;;  %v699_v19 = vld [vmem:[%s12412_s15 + $0x36c8] sm:$0xff] }
  0x65   : > { %698 = vst [vmem:[%s12417_s30 + $0x490] sm:$0xff] %v697_v18  ;;  %v701_v20 = vld [vmem:[%s12412_s15 + $0x3780] sm:$0xff]  ;;  %v703_v21 = vld [vmem:[%s12412_s15 + $0x3788] sm:$0xff]  ;;  %700 = vst [vmem:[%s12417_s30 + $0x498] sm:$0xff] %v699_v19 }
  0x66   : > { %702 = vst [vmem:[%s12417_s30 + $0x4a0] sm:$0xff] %v701_v20  ;;  %704 = vst [vmem:[%s12417_s30 + $0x4a8] sm:$0xff] %v703_v21  ;;  %v705_v22 = vld [vmem:[%s12412_s15 + $0x3840] sm:$0xff]  ;;  %v707_v23 = vld [vmem:[%s12412_s15 + $0x3848] sm:$0xff] }
  0x67   : > { %v709_v24 = vld [vmem:[%s12412_s15 + $0x3900] sm:$0xff]  ;;  %706 = vst [vmem:[%s12417_s30 + $0x4b0] sm:$0xff] %v705_v22  ;;  %708 = vst [vmem:[%s12417_s30 + $0x4b8] sm:$0xff] %v707_v23  ;;  %v711_v25 = vld [vmem:[%s12412_s15 + $0x3908] sm:$0xff] }
  0x68   : > { %710 = vst [vmem:[%s12417_s30 + $0x4c0] sm:$0xff] %v709_v24  ;;  %v713_v26 = vld [vmem:[%s12412_s15 + $0x39c0] sm:$0xff]  ;;  %v715_v27 = vld [vmem:[%s12412_s15 + $0x39c8] sm:$0xff]  ;;  %712 = vst [vmem:[%s12417_s30 + $0x4c8] sm:$0xff] %v711_v25 }
  0x69   : > { %714 = vst [vmem:[%s12417_s30 + $0x4d0] sm:$0xff] %v713_v26  ;;  %716 = vst [vmem:[%s12417_s30 + $0x4d8] sm:$0xff] %v715_v27  ;;  %v717_v28 = vld [vmem:[%s12412_s15 + $0x3a80] sm:$0xff]  ;;  %v719_v29 = vld [vmem:[%s12412_s15 + $0x3a88] sm:$0xff] }
  0x6a   : > { %v721_v30 = vld [vmem:[%s12412_s15 + $0x3b40] sm:$0xff]  ;;  %718 = vst [vmem:[%s12417_s30 + $0x4e0] sm:$0xff] %v717_v28  ;;  %720 = vst [vmem:[%s12417_s30 + $0x4e8] sm:$0xff] %v719_v29  ;;  %v723_v31 = vld [vmem:[%s12412_s15 + $0x3b48] sm:$0xff] }
  0x6b   : > { %722 = vst [vmem:[%s12417_s30 + $0x4f0] sm:$0xff] %v721_v30  ;;  %v725_v32 = vld [vmem:[%s12412_s15 + $0x3c00] sm:$0xff]  ;;  %v727_v33 = vld [vmem:[%s12412_s15 + $0x3c08] sm:$0xff]  ;;  %724 = vst [vmem:[%s12417_s30 + $0x4f8] sm:$0xff] %v723_v31 }
  0x6c   : > { %726 = vst [vmem:[%s12417_s30 + $0x500] sm:$0xff] %v725_v32  ;;  %728 = vst [vmem:[%s12417_s30 + $0x508] sm:$0xff] %v727_v33  ;;  %v729_v34 = vld [vmem:[%s12412_s15 + $0x3cc0] sm:$0xff]  ;;  %v731_v35 = vld [vmem:[%s12412_s15 + $0x3cc8] sm:$0xff] }
  0x6d   : > { %v733_v36 = vld [vmem:[%s12412_s15 + $0x3d80] sm:$0xff]  ;;  %730 = vst [vmem:[%s12417_s30 + $0x510] sm:$0xff] %v729_v34  ;;  %732 = vst [vmem:[%s12417_s30 + $0x518] sm:$0xff] %v731_v35  ;;  %v735_v37 = vld [vmem:[%s12412_s15 + $0x3d88] sm:$0xff] }
  0x6e   : > { %734 = vst [vmem:[%s12417_s30 + $0x520] sm:$0xff] %v733_v36  ;;  %v737_v38 = vld [vmem:[%s12412_s15 + $0x3e40] sm:$0xff]  ;;  %v739_v39 = vld [vmem:[%s12412_s15 + $0x3e48] sm:$0xff]  ;;  %736 = vst [vmem:[%s12417_s30 + $0x528] sm:$0xff] %v735_v37 }
  0x6f   : > { %738 = vst [vmem:[%s12417_s30 + $0x530] sm:$0xff] %v737_v38  ;;  %740 = vst [vmem:[%s12417_s30 + $0x538] sm:$0xff] %v739_v39  ;;  %v741_v40 = vld [vmem:[%s12412_s15 + $0x3f00] sm:$0xff]  ;;  %v743_v41 = vld [vmem:[%s12412_s15 + $0x3f08] sm:$0xff] }
  0x70   : > { %v745_v42 = vld [vmem:[%s12412_s15 + $0x3fc0] sm:$0xff]  ;;  %742 = vst [vmem:[%s12417_s30 + $0x540] sm:$0xff] %v741_v40  ;;  %744 = vst [vmem:[%s12417_s30 + $0x548] sm:$0xff] %v743_v41  ;;  %v747_v43 = vld [vmem:[%s12412_s15 + $0x3fc8] sm:$0xff] }
  0x71   : > { %746 = vst [vmem:[%s12417_s30 + $0x550] sm:$0xff] %v745_v42  ;;  %v749_v44 = vld [vmem:[%s12412_s15 + $0x4080] sm:$0xff]  ;;  %v751_v45 = vld [vmem:[%s12412_s15 + $0x4088] sm:$0xff]  ;;  %748 = vst [vmem:[%s12417_s30 + $0x558] sm:$0xff] %v747_v43 }
  0x72   : > { %750 = vst [vmem:[%s12417_s30 + $0x560] sm:$0xff] %v749_v44  ;;  %752 = vst [vmem:[%s12417_s30 + $0x568] sm:$0xff] %v751_v45  ;;  %v753_v46 = vld [vmem:[%s12412_s15 + $0x4140] sm:$0xff]  ;;  %v755_v47 = vld [vmem:[%s12412_s15 + $0x4148] sm:$0xff] }
  0x73   : > { %v757_v48 = vld [vmem:[%s12412_s15 + $0x4200] sm:$0xff]  ;;  %754 = vst [vmem:[%s12417_s30 + $0x570] sm:$0xff] %v753_v46  ;;  %756 = vst [vmem:[%s12417_s30 + $0x578] sm:$0xff] %v755_v47  ;;  %v759_v49 = vld [vmem:[%s12412_s15 + $0x4208] sm:$0xff] }
  0x74   : > { %758 = vst [vmem:[%s12417_s30 + $0x580] sm:$0xff] %v757_v48  ;;  %v761_v50 = vld [vmem:[%s12412_s15 + $0x42c0] sm:$0xff]  ;;  %v763_v51 = vld [vmem:[%s12412_s15 + $0x42c8] sm:$0xff]  ;;  %760 = vst [vmem:[%s12417_s30 + $0x588] sm:$0xff] %v759_v49 }
  0x75   : > { %762 = vst [vmem:[%s12417_s30 + $0x590] sm:$0xff] %v761_v50  ;;  %764 = vst [vmem:[%s12417_s30 + $0x598] sm:$0xff] %v763_v51  ;;  %v765_v52 = vld [vmem:[%s12412_s15 + $0x4380] sm:$0xff]  ;;  %v767_v53 = vld [vmem:[%s12412_s15 + $0x4388] sm:$0xff] }
  0x76   : > { %v769_v54 = vld [vmem:[%s12412_s15 + $0x4440] sm:$0xff]  ;;  %766 = vst [vmem:[%s12417_s30 + $0x5a0] sm:$0xff] %v765_v52  ;;  %768 = vst [vmem:[%s12417_s30 + $0x5a8] sm:$0xff] %v767_v53  ;;  %v771_v55 = vld [vmem:[%s12412_s15 + $0x4448] sm:$0xff] }
  0x77   : > { %770 = vst [vmem:[%s12417_s30 + $0x5b0] sm:$0xff] %v769_v54  ;;  %v773_v56 = vld [vmem:[%s12412_s15 + $0x4500] sm:$0xff]  ;;  %v775_v57 = vld [vmem:[%s12412_s15 + $0x4508] sm:$0xff]  ;;  %772 = vst [vmem:[%s12417_s30 + $0x5b8] sm:$0xff] %v771_v55 }
  0x78   : > { %774 = vst [vmem:[%s12417_s30 + $0x5c0] sm:$0xff] %v773_v56  ;;  %776 = vst [vmem:[%s12417_s30 + $0x5c8] sm:$0xff] %v775_v57  ;;  %v777_v58 = vld [vmem:[%s12412_s15 + $0x45c0] sm:$0xff]  ;;  %v779_v59 = vld [vmem:[%s12412_s15 + $0x45c8] sm:$0xff] }
  0x79   : > { %v781_v60 = vld [vmem:[%s12412_s15 + $0x4680] sm:$0xff]  ;;  %778 = vst [vmem:[%s12417_s30 + $0x5d0] sm:$0xff] %v777_v58  ;;  %780 = vst [vmem:[%s12417_s30 + $0x5d8] sm:$0xff] %v779_v59  ;;  %v783_v61 = vld [vmem:[%s12412_s15 + $0x4688] sm:$0xff] }
  0x7a   : > { %782 = vst [vmem:[%s12417_s30 + $0x5e0] sm:$0xff] %v781_v60  ;;  %v785_v62 = vld [vmem:[%s12412_s15 + $0x4740] sm:$0xff]  ;;  %v787_v63 = vld [vmem:[%s12412_s15 + $0x4748] sm:$0xff]  ;;  %784 = vst [vmem:[%s12417_s30 + $0x5e8] sm:$0xff] %v783_v61 }
  0x7b   : > { %786 = vst [vmem:[%s12417_s30 + $0x5f0] sm:$0xff] %v785_v62  ;;  %788 = vst [vmem:[%s12417_s30 + $0x5f8] sm:$0xff] %v787_v63  ;;  %v789_v0 = vld [vmem:[%s12412_s15 + $0x4800] sm:$0xff]  ;;  %v791_v1 = vld [vmem:[%s12412_s15 + $0x4808] sm:$0xff] }
  0x7c   : > { %v793_v2 = vld [vmem:[%s12412_s15 + $0x48c0] sm:$0xff]  ;;  %790 = vst [vmem:[%s12417_s30 + $0x600] sm:$0xff] %v789_v0  ;;  %792 = vst [vmem:[%s12417_s30 + $0x608] sm:$0xff] %v791_v1  ;;  %v795_v3 = vld [vmem:[%s12412_s15 + $0x48c8] sm:$0xff] }
  0x7d   : > { %794 = vst [vmem:[%s12417_s30 + $0x610] sm:$0xff] %v793_v2  ;;  %v797_v4 = vld [vmem:[%s12412_s15 + $0x4980] sm:$0xff]  ;;  %v799_v5 = vld [vmem:[%s12412_s15 + $0x4988] sm:$0xff]  ;;  %796 = vst [vmem:[%s12417_s30 + $0x618] sm:$0xff] %v795_v3 }
  0x7e   : > { %798 = vst [vmem:[%s12417_s30 + $0x620] sm:$0xff] %v797_v4  ;;  %800 = vst [vmem:[%s12417_s30 + $0x628] sm:$0xff] %v799_v5  ;;  %v801_v6 = vld [vmem:[%s12412_s15 + $0x4a40] sm:$0xff]  ;;  %v803_v7 = vld [vmem:[%s12412_s15 + $0x4a48] sm:$0xff] }
  0x7f   : > { %v805_v8 = vld [vmem:[%s12412_s15 + $0x4b00] sm:$0xff]  ;;  %802 = vst [vmem:[%s12417_s30 + $0x630] sm:$0xff] %v801_v6  ;;  %804 = vst [vmem:[%s12417_s30 + $0x638] sm:$0xff] %v803_v7  ;;  %v807_v9 = vld [vmem:[%s12412_s15 + $0x4b08] sm:$0xff] }
  0x80   : > { %806 = vst [vmem:[%s12417_s30 + $0x640] sm:$0xff] %v805_v8  ;;  %v809_v10 = vld [vmem:[%s12412_s15 + $0x4bc0] sm:$0xff]  ;;  %v811_v11 = vld [vmem:[%s12412_s15 + $0x4bc8] sm:$0xff]  ;;  %808 = vst [vmem:[%s12417_s30 + $0x648] sm:$0xff] %v807_v9 }
  0x81   : > { %810 = vst [vmem:[%s12417_s30 + $0x650] sm:$0xff] %v809_v10  ;;  %812 = vst [vmem:[%s12417_s30 + $0x658] sm:$0xff] %v811_v11  ;;  %v813_v12 = vld [vmem:[%s12412_s15 + $0x4c80] sm:$0xff]  ;;  %v815_v13 = vld [vmem:[%s12412_s15 + $0x4c88] sm:$0xff] }
  0x82   : > { %v817_v14 = vld [vmem:[%s12412_s15 + $0x4d40] sm:$0xff]  ;;  %814 = vst [vmem:[%s12417_s30 + $0x660] sm:$0xff] %v813_v12  ;;  %816 = vst [vmem:[%s12417_s30 + $0x668] sm:$0xff] %v815_v13  ;;  %v819_v15 = vld [vmem:[%s12412_s15 + $0x4d48] sm:$0xff] }
  0x83   : > { %818 = vst [vmem:[%s12417_s30 + $0x670] sm:$0xff] %v817_v14  ;;  %v821_v16 = vld [vmem:[%s12412_s15 + $0x4e00] sm:$0xff]  ;;  %v823_v17 = vld [vmem:[%s12412_s15 + $0x4e08] sm:$0xff]  ;;  %820 = vst [vmem:[%s12417_s30 + $0x678] sm:$0xff] %v819_v15 }
  0x84   : > { %822 = vst [vmem:[%s12417_s30 + $0x680] sm:$0xff] %v821_v16  ;;  %824 = vst [vmem:[%s12417_s30 + $0x688] sm:$0xff] %v823_v17  ;;  %v825_v18 = vld [vmem:[%s12412_s15 + $0x4ec0] sm:$0xff]  ;;  %v827_v19 = vld [vmem:[%s12412_s15 + $0x4ec8] sm:$0xff] }
  0x85   : > { %v829_v20 = vld [vmem:[%s12412_s15 + $0x4f80] sm:$0xff]  ;;  %826 = vst [vmem:[%s12417_s30 + $0x690] sm:$0xff] %v825_v18  ;;  %828 = vst [vmem:[%s12417_s30 + $0x698] sm:$0xff] %v827_v19  ;;  %v831_v21 = vld [vmem:[%s12412_s15 + $0x4f88] sm:$0xff] }
  0x86   : > { %830 = vst [vmem:[%s12417_s30 + $0x6a0] sm:$0xff] %v829_v20  ;;  %v833_v22 = vld [vmem:[%s12412_s15 + $0x5040] sm:$0xff]  ;;  %v835_v23 = vld [vmem:[%s12412_s15 + $0x5048] sm:$0xff]  ;;  %832 = vst [vmem:[%s12417_s30 + $0x6a8] sm:$0xff] %v831_v21 }
  0x87   : > { %834 = vst [vmem:[%s12417_s30 + $0x6b0] sm:$0xff] %v833_v22  ;;  %836 = vst [vmem:[%s12417_s30 + $0x6b8] sm:$0xff] %v835_v23  ;;  %v837_v24 = vld [vmem:[%s12412_s15 + $0x5100] sm:$0xff]  ;;  %v839_v25 = vld [vmem:[%s12412_s15 + $0x5108] sm:$0xff] }
  0x88   : > { %v841_v26 = vld [vmem:[%s12412_s15 + $0x51c0] sm:$0xff]  ;;  %838 = vst [vmem:[%s12417_s30 + $0x6c0] sm:$0xff] %v837_v24  ;;  %840 = vst [vmem:[%s12417_s30 + $0x6c8] sm:$0xff] %v839_v25  ;;  %v843_v27 = vld [vmem:[%s12412_s15 + $0x51c8] sm:$0xff] }
  0x89   : > { %842 = vst [vmem:[%s12417_s30 + $0x6d0] sm:$0xff] %v841_v26  ;;  %v845_v28 = vld [vmem:[%s12412_s15 + $0x5280] sm:$0xff]  ;;  %v847_v29 = vld [vmem:[%s12412_s15 + $0x5288] sm:$0xff]  ;;  %844 = vst [vmem:[%s12417_s30 + $0x6d8] sm:$0xff] %v843_v27 }
  0x8a   : > { %846 = vst [vmem:[%s12417_s30 + $0x6e0] sm:$0xff] %v845_v28  ;;  %848 = vst [vmem:[%s12417_s30 + $0x6e8] sm:$0xff] %v847_v29  ;;  %v849_v30 = vld [vmem:[%s12412_s15 + $0x5340] sm:$0xff]  ;;  %v851_v31 = vld [vmem:[%s12412_s15 + $0x5348] sm:$0xff] }
  0x8b   : > { %v853_v32 = vld [vmem:[%s12412_s15 + $0x5400] sm:$0xff]  ;;  %850 = vst [vmem:[%s12417_s30 + $0x6f0] sm:$0xff] %v849_v30  ;;  %852 = vst [vmem:[%s12417_s30 + $0x6f8] sm:$0xff] %v851_v31  ;;  %v855_v33 = vld [vmem:[%s12412_s15 + $0x5408] sm:$0xff] }
  0x8c   : > { %854 = vst [vmem:[%s12417_s30 + $0x700] sm:$0xff] %v853_v32  ;;  %v857_v34 = vld [vmem:[%s12412_s15 + $0x54c0] sm:$0xff]  ;;  %v859_v35 = vld [vmem:[%s12412_s15 + $0x54c8] sm:$0xff]  ;;  %856 = vst [vmem:[%s12417_s30 + $0x708] sm:$0xff] %v855_v33 }
  0x8d   : > { %858 = vst [vmem:[%s12417_s30 + $0x710] sm:$0xff] %v857_v34  ;;  %860 = vst [vmem:[%s12417_s30 + $0x718] sm:$0xff] %v859_v35  ;;  %v861_v36 = vld [vmem:[%s12412_s15 + $0x5580] sm:$0xff]  ;;  %v863_v37 = vld [vmem:[%s12412_s15 + $0x5588] sm:$0xff] }
  0x8e   : > { %v865_v38 = vld [vmem:[%s12412_s15 + $0x5640] sm:$0xff]  ;;  %862 = vst [vmem:[%s12417_s30 + $0x720] sm:$0xff] %v861_v36  ;;  %864 = vst [vmem:[%s12417_s30 + $0x728] sm:$0xff] %v863_v37  ;;  %v867_v39 = vld [vmem:[%s12412_s15 + $0x5648] sm:$0xff] }
  0x8f   : > { %866 = vst [vmem:[%s12417_s30 + $0x730] sm:$0xff] %v865_v38  ;;  %v869_v40 = vld [vmem:[%s12412_s15 + $0x5700] sm:$0xff]  ;;  %v871_v41 = vld [vmem:[%s12412_s15 + $0x5708] sm:$0xff]  ;;  %868 = vst [vmem:[%s12417_s30 + $0x738] sm:$0xff] %v867_v39 }
  0x90   : > { %870 = vst [vmem:[%s12417_s30 + $0x740] sm:$0xff] %v869_v40  ;;  %872 = vst [vmem:[%s12417_s30 + $0x748] sm:$0xff] %v871_v41  ;;  %v873_v42 = vld [vmem:[%s12412_s15 + $0x57c0] sm:$0xff]  ;;  %v875_v43 = vld [vmem:[%s12412_s15 + $0x57c8] sm:$0xff] }
  0x91   : > { %v877_v44 = vld [vmem:[%s12412_s15 + $0x5880] sm:$0xff]  ;;  %874 = vst [vmem:[%s12417_s30 + $0x750] sm:$0xff] %v873_v42  ;;  %876 = vst [vmem:[%s12417_s30 + $0x758] sm:$0xff] %v875_v43  ;;  %v879_v45 = vld [vmem:[%s12412_s15 + $0x5888] sm:$0xff] }
  0x92   : > { %878 = vst [vmem:[%s12417_s30 + $0x760] sm:$0xff] %v877_v44  ;;  %v881_v46 = vld [vmem:[%s12412_s15 + $0x5940] sm:$0xff]  ;;  %v883_v47 = vld [vmem:[%s12412_s15 + $0x5948] sm:$0xff]  ;;  %880 = vst [vmem:[%s12417_s30 + $0x768] sm:$0xff] %v879_v45 }
  0x93   : > { %882 = vst [vmem:[%s12417_s30 + $0x770] sm:$0xff] %v881_v46  ;;  %884 = vst [vmem:[%s12417_s30 + $0x778] sm:$0xff] %v883_v47  ;;  %v885_v48 = vld [vmem:[%s12412_s15 + $0x5a00] sm:$0xff]  ;;  %v887_v49 = vld [vmem:[%s12412_s15 + $0x5a08] sm:$0xff] }
  0x94   : > { %v889_v50 = vld [vmem:[%s12412_s15 + $0x5ac0] sm:$0xff]  ;;  %886 = vst [vmem:[%s12417_s30 + $0x780] sm:$0xff] %v885_v48  ;;  %888 = vst [vmem:[%s12417_s30 + $0x788] sm:$0xff] %v887_v49  ;;  %v891_v51 = vld [vmem:[%s12412_s15 + $0x5ac8] sm:$0xff] }
  0x95   : > { %890 = vst [vmem:[%s12417_s30 + $0x790] sm:$0xff] %v889_v50  ;;  %v893_v52 = vld [vmem:[%s12412_s15 + $0x5b80] sm:$0xff]  ;;  %v895_v53 = vld [vmem:[%s12412_s15 + $0x5b88] sm:$0xff]  ;;  %892 = vst [vmem:[%s12417_s30 + $0x798] sm:$0xff] %v891_v51 }
  0x96   : > { %894 = vst [vmem:[%s12417_s30 + $0x7a0] sm:$0xff] %v893_v52  ;;  %896 = vst [vmem:[%s12417_s30 + $0x7a8] sm:$0xff] %v895_v53  ;;  %v897_v54 = vld [vmem:[%s12412_s15 + $0x5c40] sm:$0xff]  ;;  %v899_v55 = vld [vmem:[%s12412_s15 + $0x5c48] sm:$0xff] }
  0x97   : > { %v901_v56 = vld [vmem:[%s12412_s15 + $0x5d00] sm:$0xff]  ;;  %898 = vst [vmem:[%s12417_s30 + $0x7b0] sm:$0xff] %v897_v54  ;;  %900 = vst [vmem:[%s12417_s30 + $0x7b8] sm:$0xff] %v899_v55  ;;  %v903_v57 = vld [vmem:[%s12412_s15 + $0x5d08] sm:$0xff] }
  0x98   : > { %902 = vst [vmem:[%s12417_s30 + $0x7c0] sm:$0xff] %v901_v56  ;;  %v905_v58 = vld [vmem:[%s12412_s15 + $0x5dc0] sm:$0xff]  ;;  %v907_v59 = vld [vmem:[%s12412_s15 + $0x5dc8] sm:$0xff]  ;;  %904 = vst [vmem:[%s12417_s30 + $0x7c8] sm:$0xff] %v903_v57 }
  0x99   : > { %906 = vst [vmem:[%s12417_s30 + $0x7d0] sm:$0xff] %v905_v58  ;;  %908 = vst [vmem:[%s12417_s30 + $0x7d8] sm:$0xff] %v907_v59  ;;  %v909_v60 = vld [vmem:[%s12412_s15 + $0x5e80] sm:$0xff]  ;;  %v911_v61 = vld [vmem:[%s12412_s15 + $0x5e88] sm:$0xff] }
  0x9a   : > { %v913_v62 = vld [vmem:[%s12412_s15 + $0x5f40] sm:$0xff]  ;;  %910 = vst [vmem:[%s12417_s30 + $0x7e0] sm:$0xff] %v909_v60  ;;  %912 = vst [vmem:[%s12417_s30 + $0x7e8] sm:$0xff] %v911_v61  ;;  %v915_v63 = vld [vmem:[%s12412_s15 + $0x5f48] sm:$0xff] }
  0x9b   : > { %914 = vst [vmem:[%s12417_s30 + $0x7f0] sm:$0xff] %v913_v62  ;;  %v917_v0 = vld [vmem:[%s12412_s15 + $0x6000] sm:$0xff]  ;;  %v919_v1 = vld [vmem:[%s12412_s15 + $0x6008] sm:$0xff]  ;;  %916 = vst [vmem:[%s12417_s30 + $0x7f8] sm:$0xff] %v915_v63 }
  0x9c   : > { %918 = vst [vmem:[%s12417_s30 + $0x800] sm:$0xff] %v917_v0  ;;  %920 = vst [vmem:[%s12417_s30 + $0x808] sm:$0xff] %v919_v1  ;;  %v921_v2 = vld [vmem:[%s12412_s15 + $0x60c0] sm:$0xff]  ;;  %v923_v3 = vld [vmem:[%s12412_s15 + $0x60c8] sm:$0xff] }
  0x9d   : > { %v925_v4 = vld [vmem:[%s12412_s15 + $0x6180] sm:$0xff]  ;;  %922 = vst [vmem:[%s12417_s30 + $0x810] sm:$0xff] %v921_v2  ;;  %924 = vst [vmem:[%s12417_s30 + $0x818] sm:$0xff] %v923_v3  ;;  %v927_v5 = vld [vmem:[%s12412_s15 + $0x6188] sm:$0xff] }
  0x9e   : > { %926 = vst [vmem:[%s12417_s30 + $0x820] sm:$0xff] %v925_v4  ;;  %v929_v6 = vld [vmem:[%s12412_s15 + $0x6240] sm:$0xff]  ;;  %v931_v7 = vld [vmem:[%s12412_s15 + $0x6248] sm:$0xff]  ;;  %928 = vst [vmem:[%s12417_s30 + $0x828] sm:$0xff] %v927_v5 }
  0x9f   : > { %930 = vst [vmem:[%s12417_s30 + $0x830] sm:$0xff] %v929_v6  ;;  %932 = vst [vmem:[%s12417_s30 + $0x838] sm:$0xff] %v931_v7  ;;  %v933_v8 = vld [vmem:[%s12412_s15 + $0x6300] sm:$0xff]  ;;  %v935_v9 = vld [vmem:[%s12412_s15 + $0x6308] sm:$0xff] }
  0xa0   : > { %v937_v10 = vld [vmem:[%s12412_s15 + $0x63c0] sm:$0xff]  ;;  %934 = vst [vmem:[%s12417_s30 + $0x840] sm:$0xff] %v933_v8  ;;  %936 = vst [vmem:[%s12417_s30 + $0x848] sm:$0xff] %v935_v9  ;;  %v939_v11 = vld [vmem:[%s12412_s15 + $0x63c8] sm:$0xff] }
  0xa1   : > { %938 = vst [vmem:[%s12417_s30 + $0x850] sm:$0xff] %v937_v10  ;;  %v941_v12 = vld [vmem:[%s12412_s15 + $0x6480] sm:$0xff]  ;;  %v943_v13 = vld [vmem:[%s12412_s15 + $0x6488] sm:$0xff]  ;;  %940 = vst [vmem:[%s12417_s30 + $0x858] sm:$0xff] %v939_v11 }
  0xa2   : > { %942 = vst [vmem:[%s12417_s30 + $0x860] sm:$0xff] %v941_v12  ;;  %944 = vst [vmem:[%s12417_s30 + $0x868] sm:$0xff] %v943_v13  ;;  %v945_v14 = vld [vmem:[%s12412_s15 + $0x6540] sm:$0xff]  ;;  %v947_v15 = vld [vmem:[%s12412_s15 + $0x6548] sm:$0xff] }
  0xa3   : > { %v949_v16 = vld [vmem:[%s12412_s15 + $0x6600] sm:$0xff]  ;;  %946 = vst [vmem:[%s12417_s30 + $0x870] sm:$0xff] %v945_v14  ;;  %948 = vst [vmem:[%s12417_s30 + $0x878] sm:$0xff] %v947_v15  ;;  %v951_v17 = vld [vmem:[%s12412_s15 + $0x6608] sm:$0xff] }
  0xa4   : > { %950 = vst [vmem:[%s12417_s30 + $0x880] sm:$0xff] %v949_v16  ;;  %v953_v18 = vld [vmem:[%s12412_s15 + $0x66c0] sm:$0xff]  ;;  %v955_v19 = vld [vmem:[%s12412_s15 + $0x66c8] sm:$0xff]  ;;  %952 = vst [vmem:[%s12417_s30 + $0x888] sm:$0xff] %v951_v17 }
  0xa5   : > { %954 = vst [vmem:[%s12417_s30 + $0x890] sm:$0xff] %v953_v18  ;;  %956 = vst [vmem:[%s12417_s30 + $0x898] sm:$0xff] %v955_v19  ;;  %v957_v20 = vld [vmem:[%s12412_s15 + $0x6780] sm:$0xff]  ;;  %v959_v21 = vld [vmem:[%s12412_s15 + $0x6788] sm:$0xff] }
  0xa6   : > { %v961_v22 = vld [vmem:[%s12412_s15 + $0x6840] sm:$0xff]  ;;  %958 = vst [vmem:[%s12417_s30 + $0x8a0] sm:$0xff] %v957_v20  ;;  %960 = vst [vmem:[%s12417_s30 + $0x8a8] sm:$0xff] %v959_v21  ;;  %v963_v23 = vld [vmem:[%s12412_s15 + $0x6848] sm:$0xff] }
  0xa7   : > { %962 = vst [vmem:[%s12417_s30 + $0x8b0] sm:$0xff] %v961_v22  ;;  %v965_v24 = vld [vmem:[%s12412_s15 + $0x6900] sm:$0xff]  ;;  %v967_v25 = vld [vmem:[%s12412_s15 + $0x6908] sm:$0xff]  ;;  %964 = vst [vmem:[%s12417_s30 + $0x8b8] sm:$0xff] %v963_v23 }
  0xa8   : > { %966 = vst [vmem:[%s12417_s30 + $0x8c0] sm:$0xff] %v965_v24  ;;  %968 = vst [vmem:[%s12417_s30 + $0x8c8] sm:$0xff] %v967_v25  ;;  %v969_v26 = vld [vmem:[%s12412_s15 + $0x69c0] sm:$0xff]  ;;  %v971_v27 = vld [vmem:[%s12412_s15 + $0x69c8] sm:$0xff] }
  0xa9   : > { %v973_v28 = vld [vmem:[%s12412_s15 + $0x6a80] sm:$0xff]  ;;  %970 = vst [vmem:[%s12417_s30 + $0x8d0] sm:$0xff] %v969_v26  ;;  %972 = vst [vmem:[%s12417_s30 + $0x8d8] sm:$0xff] %v971_v27  ;;  %v975_v29 = vld [vmem:[%s12412_s15 + $0x6a88] sm:$0xff] }
  0xaa   : > { %974 = vst [vmem:[%s12417_s30 + $0x8e0] sm:$0xff] %v973_v28  ;;  %v977_v30 = vld [vmem:[%s12412_s15 + $0x6b40] sm:$0xff]  ;;  %v979_v31 = vld [vmem:[%s12412_s15 + $0x6b48] sm:$0xff]  ;;  %976 = vst [vmem:[%s12417_s30 + $0x8e8] sm:$0xff] %v975_v29 }
  0xab   : > { %978 = vst [vmem:[%s12417_s30 + $0x8f0] sm:$0xff] %v977_v30  ;;  %980 = vst [vmem:[%s12417_s30 + $0x8f8] sm:$0xff] %v979_v31  ;;  %v981_v32 = vld [vmem:[%s12412_s15 + $0x6c00] sm:$0xff]  ;;  %v983_v33 = vld [vmem:[%s12412_s15 + $0x6c08] sm:$0xff] }
  0xac   : > { %v985_v34 = vld [vmem:[%s12412_s15 + $0x6cc0] sm:$0xff]  ;;  %982 = vst [vmem:[%s12417_s30 + $0x900] sm:$0xff] %v981_v32  ;;  %984 = vst [vmem:[%s12417_s30 + $0x908] sm:$0xff] %v983_v33  ;;  %v987_v35 = vld [vmem:[%s12412_s15 + $0x6cc8] sm:$0xff] }
  0xad   : > { %986 = vst [vmem:[%s12417_s30 + $0x910] sm:$0xff] %v985_v34  ;;  %v989_v36 = vld [vmem:[%s12412_s15 + $0x6d80] sm:$0xff]  ;;  %v991_v37 = vld [vmem:[%s12412_s15 + $0x6d88] sm:$0xff]  ;;  %988 = vst [vmem:[%s12417_s30 + $0x918] sm:$0xff] %v987_v35 }
  0xae   : > { %990 = vst [vmem:[%s12417_s30 + $0x920] sm:$0xff] %v989_v36  ;;  %992 = vst [vmem:[%s12417_s30 + $0x928] sm:$0xff] %v991_v37  ;;  %v993_v38 = vld [vmem:[%s12412_s15 + $0x6e40] sm:$0xff]  ;;  %v995_v39 = vld [vmem:[%s12412_s15 + $0x6e48] sm:$0xff] }
  0xaf   : > { %v997_v40 = vld [vmem:[%s12412_s15 + $0x6f00] sm:$0xff]  ;;  %994 = vst [vmem:[%s12417_s30 + $0x930] sm:$0xff] %v993_v38  ;;  %996 = vst [vmem:[%s12417_s30 + $0x938] sm:$0xff] %v995_v39  ;;  %v999_v41 = vld [vmem:[%s12412_s15 + $0x6f08] sm:$0xff] }
  0xb0   : > { %998 = vst [vmem:[%s12417_s30 + $0x940] sm:$0xff] %v997_v40  ;;  %v1001_v42 = vld [vmem:[%s12412_s15 + $0x6fc0] sm:$0xff]  ;;  %v1003_v43 = vld [vmem:[%s12412_s15 + $0x6fc8] sm:$0xff]  ;;  %1000 = vst [vmem:[%s12417_s30 + $0x948] sm:$0xff] %v999_v41 }
  0xb1   : > { %1002 = vst [vmem:[%s12417_s30 + $0x950] sm:$0xff] %v1001_v42  ;;  %1004 = vst [vmem:[%s12417_s30 + $0x958] sm:$0xff] %v1003_v43  ;;  %v1005_v44 = vld [vmem:[%s12412_s15 + $0x7080] sm:$0xff]  ;;  %v1007_v45 = vld [vmem:[%s12412_s15 + $0x7088] sm:$0xff] }
  0xb2   : > { %v1009_v46 = vld [vmem:[%s12412_s15 + $0x7140] sm:$0xff]  ;;  %1006 = vst [vmem:[%s12417_s30 + $0x960] sm:$0xff] %v1005_v44  ;;  %1008 = vst [vmem:[%s12417_s30 + $0x968] sm:$0xff] %v1007_v45  ;;  %v1011_v47 = vld [vmem:[%s12412_s15 + $0x7148] sm:$0xff] }
  0xb3   : > { %1010 = vst [vmem:[%s12417_s30 + $0x970] sm:$0xff] %v1009_v46  ;;  %v1013_v48 = vld [vmem:[%s12412_s15 + $0x7200] sm:$0xff]  ;;  %v1015_v49 = vld [vmem:[%s12412_s15 + $0x7208] sm:$0xff]  ;;  %1012 = vst [vmem:[%s12417_s30 + $0x978] sm:$0xff] %v1011_v47 }
  0xb4   : > { %1014 = vst [vmem:[%s12417_s30 + $0x980] sm:$0xff] %v1013_v48  ;;  %1016 = vst [vmem:[%s12417_s30 + $0x988] sm:$0xff] %v1015_v49  ;;  %v1017_v50 = vld [vmem:[%s12412_s15 + $0x72c0] sm:$0xff]  ;;  %v1019_v51 = vld [vmem:[%s12412_s15 + $0x72c8] sm:$0xff] }
  0xb5   : > { %v1021_v52 = vld [vmem:[%s12412_s15 + $0x7380] sm:$0xff]  ;;  %1018 = vst [vmem:[%s12417_s30 + $0x990] sm:$0xff] %v1017_v50  ;;  %1020 = vst [vmem:[%s12417_s30 + $0x998] sm:$0xff] %v1019_v51  ;;  %v1023_v53 = vld [vmem:[%s12412_s15 + $0x7388] sm:$0xff] }
  0xb6   : > { %1022 = vst [vmem:[%s12417_s30 + $0x9a0] sm:$0xff] %v1021_v52  ;;  %v1025_v54 = vld [vmem:[%s12412_s15 + $0x7440] sm:$0xff]  ;;  %v1027_v55 = vld [vmem:[%s12412_s15 + $0x7448] sm:$0xff]  ;;  %1024 = vst [vmem:[%s12417_s30 + $0x9a8] sm:$0xff] %v1023_v53 }
  0xb7   : > { %1026 = vst [vmem:[%s12417_s30 + $0x9b0] sm:$0xff] %v1025_v54  ;;  %1028 = vst [vmem:[%s12417_s30 + $0x9b8] sm:$0xff] %v1027_v55  ;;  %v1029_v56 = vld [vmem:[%s12412_s15 + $0x7500] sm:$0xff]  ;;  %v1031_v57 = vld [vmem:[%s12412_s15 + $0x7508] sm:$0xff] }
  0xb8   : > { %v1033_v58 = vld [vmem:[%s12412_s15 + $0x75c0] sm:$0xff]  ;;  %1030 = vst [vmem:[%s12417_s30 + $0x9c0] sm:$0xff] %v1029_v56  ;;  %1032 = vst [vmem:[%s12417_s30 + $0x9c8] sm:$0xff] %v1031_v57  ;;  %v1035_v59 = vld [vmem:[%s12412_s15 + $0x75c8] sm:$0xff] }
  0xb9   : > { %1034 = vst [vmem:[%s12417_s30 + $0x9d0] sm:$0xff] %v1033_v58  ;;  %v1037_v60 = vld [vmem:[%s12412_s15 + $0x7680] sm:$0xff]  ;;  %v1039_v61 = vld [vmem:[%s12412_s15 + $0x7688] sm:$0xff]  ;;  %1036 = vst [vmem:[%s12417_s30 + $0x9d8] sm:$0xff] %v1035_v59 }
  0xba   : > { %1038 = vst [vmem:[%s12417_s30 + $0x9e0] sm:$0xff] %v1037_v60  ;;  %1040 = vst [vmem:[%s12417_s30 + $0x9e8] sm:$0xff] %v1039_v61  ;;  %v1041_v62 = vld [vmem:[%s12412_s15 + $0x7740] sm:$0xff]  ;;  %v1043_v63 = vld [vmem:[%s12412_s15 + $0x7748] sm:$0xff] }
  0xbb   : > { %v1045_v0 = vld [vmem:[%s12412_s15 + $0x7800] sm:$0xff]  ;;  %1042 = vst [vmem:[%s12417_s30 + $0x9f0] sm:$0xff] %v1041_v62  ;;  %1044 = vst [vmem:[%s12417_s30 + $0x9f8] sm:$0xff] %v1043_v63  ;;  %v1047_v1 = vld [vmem:[%s12412_s15 + $0x7808] sm:$0xff] }
  0xbc   : > { %1046 = vst [vmem:[%s12417_s30 + $0xa00] sm:$0xff] %v1045_v0  ;;  %v1049_v2 = vld [vmem:[%s12412_s15 + $0x78c0] sm:$0xff]  ;;  %v1051_v3 = vld [vmem:[%s12412_s15 + $0x78c8] sm:$0xff]  ;;  %1048 = vst [vmem:[%s12417_s30 + $0xa08] sm:$0xff] %v1047_v1 }
  0xbd   : > { %1050 = vst [vmem:[%s12417_s30 + $0xa10] sm:$0xff] %v1049_v2  ;;  %1052 = vst [vmem:[%s12417_s30 + $0xa18] sm:$0xff] %v1051_v3  ;;  %v1053_v4 = vld [vmem:[%s12412_s15 + $0x7980] sm:$0xff]  ;;  %v1055_v5 = vld [vmem:[%s12412_s15 + $0x7988] sm:$0xff] }
  0xbe   : > { %v1057_v6 = vld [vmem:[%s12412_s15 + $0x7a40] sm:$0xff]  ;;  %1054 = vst [vmem:[%s12417_s30 + $0xa20] sm:$0xff] %v1053_v4  ;;  %1056 = vst [vmem:[%s12417_s30 + $0xa28] sm:$0xff] %v1055_v5  ;;  %v1059_v7 = vld [vmem:[%s12412_s15 + $0x7a48] sm:$0xff] }
  0xbf   : > { %1058 = vst [vmem:[%s12417_s30 + $0xa30] sm:$0xff] %v1057_v6  ;;  %v1061_v8 = vld [vmem:[%s12412_s15 + $0x7b00] sm:$0xff]  ;;  %v1063_v9 = vld [vmem:[%s12412_s15 + $0x7b08] sm:$0xff]  ;;  %1060 = vst [vmem:[%s12417_s30 + $0xa38] sm:$0xff] %v1059_v7 }
  0xc0   : > { %1062 = vst [vmem:[%s12417_s30 + $0xa40] sm:$0xff] %v1061_v8  ;;  %1064 = vst [vmem:[%s12417_s30 + $0xa48] sm:$0xff] %v1063_v9  ;;  %v1065_v10 = vld [vmem:[%s12412_s15 + $0x7bc0] sm:$0xff]  ;;  %v1067_v11 = vld [vmem:[%s12412_s15 + $0x7bc8] sm:$0xff] }
  0xc1   : > { %v1069_v12 = vld [vmem:[%s12412_s15 + $0x7c80] sm:$0xff]  ;;  %1066 = vst [vmem:[%s12417_s30 + $0xa50] sm:$0xff] %v1065_v10  ;;  %1068 = vst [vmem:[%s12417_s30 + $0xa58] sm:$0xff] %v1067_v11  ;;  %v1071_v13 = vld [vmem:[%s12412_s15 + $0x7c88] sm:$0xff] }
  0xc2   : > { %1070 = vst [vmem:[%s12417_s30 + $0xa60] sm:$0xff] %v1069_v12  ;;  %v1073_v14 = vld [vmem:[%s12412_s15 + $0x7d40] sm:$0xff]  ;;  %v1075_v15 = vld [vmem:[%s12412_s15 + $0x7d48] sm:$0xff]  ;;  %1072 = vst [vmem:[%s12417_s30 + $0xa68] sm:$0xff] %v1071_v13 }
  0xc3   : > { %1074 = vst [vmem:[%s12417_s30 + $0xa70] sm:$0xff] %v1073_v14  ;;  %1076 = vst [vmem:[%s12417_s30 + $0xa78] sm:$0xff] %v1075_v15  ;;  %v1077_v16 = vld [vmem:[%s12412_s15 + $0x7e00] sm:$0xff]  ;;  %v1079_v17 = vld [vmem:[%s12412_s15 + $0x7e08] sm:$0xff] }
  0xc4   : > { %v1081_v18 = vld [vmem:[%s12412_s15 + $0x7ec0] sm:$0xff]  ;;  %1078 = vst [vmem:[%s12417_s30 + $0xa80] sm:$0xff] %v1077_v16  ;;  %1080 = vst [vmem:[%s12417_s30 + $0xa88] sm:$0xff] %v1079_v17  ;;  %v1083_v19 = vld [vmem:[%s12412_s15 + $0x7ec8] sm:$0xff] }
  0xc5   : > { %1082 = vst [vmem:[%s12417_s30 + $0xa90] sm:$0xff] %v1081_v18  ;;  %v1085_v20 = vld [vmem:[%s12412_s15 + $0x7f80] sm:$0xff]  ;;  %v1087_v21 = vld [vmem:[%s12412_s15 + $0x7f88] sm:$0xff]  ;;  %1084 = vst [vmem:[%s12417_s30 + $0xa98] sm:$0xff] %v1083_v19 }
  0xc6   : > { %1086 = vst [vmem:[%s12417_s30 + $0xaa0] sm:$0xff] %v1085_v20  ;;  %1088 = vst [vmem:[%s12417_s30 + $0xaa8] sm:$0xff] %v1087_v21  ;;  %v1089_v22 = vld [vmem:[%s12412_s15 + $0x8040] sm:$0xff]  ;;  %v1091_v23 = vld [vmem:[%s12412_s15 + $0x8048] sm:$0xff] }
  0xc7   : > { %v1093_v24 = vld [vmem:[%s12412_s15 + $0x8100] sm:$0xff]  ;;  %1090 = vst [vmem:[%s12417_s30 + $0xab0] sm:$0xff] %v1089_v22  ;;  %1092 = vst [vmem:[%s12417_s30 + $0xab8] sm:$0xff] %v1091_v23  ;;  %v1095_v25 = vld [vmem:[%s12412_s15 + $0x8108] sm:$0xff] }
  0xc8   : > { %1094 = vst [vmem:[%s12417_s30 + $0xac0] sm:$0xff] %v1093_v24  ;;  %v1097_v26 = vld [vmem:[%s12412_s15 + $0x81c0] sm:$0xff]  ;;  %v1099_v27 = vld [vmem:[%s12412_s15 + $0x81c8] sm:$0xff]  ;;  %1096 = vst [vmem:[%s12417_s30 + $0xac8] sm:$0xff] %v1095_v25 }
  0xc9   : > { %1098 = vst [vmem:[%s12417_s30 + $0xad0] sm:$0xff] %v1097_v26  ;;  %1100 = vst [vmem:[%s12417_s30 + $0xad8] sm:$0xff] %v1099_v27  ;;  %v1101_v28 = vld [vmem:[%s12412_s15 + $0x8280] sm:$0xff]  ;;  %v1103_v29 = vld [vmem:[%s12412_s15 + $0x8288] sm:$0xff] }
  0xca   : > { %v1105_v30 = vld [vmem:[%s12412_s15 + $0x8340] sm:$0xff]  ;;  %1102 = vst [vmem:[%s12417_s30 + $0xae0] sm:$0xff] %v1101_v28  ;;  %1104 = vst [vmem:[%s12417_s30 + $0xae8] sm:$0xff] %v1103_v29  ;;  %v1107_v31 = vld [vmem:[%s12412_s15 + $0x8348] sm:$0xff] }
  0xcb   : > { %1106 = vst [vmem:[%s12417_s30 + $0xaf0] sm:$0xff] %v1105_v30  ;;  %v1109_v32 = vld [vmem:[%s12412_s15 + $0x8400] sm:$0xff]  ;;  %v1111_v33 = vld [vmem:[%s12412_s15 + $0x8408] sm:$0xff]  ;;  %1108 = vst [vmem:[%s12417_s30 + $0xaf8] sm:$0xff] %v1107_v31 }
  0xcc   : > { %1110 = vst [vmem:[%s12417_s30 + $0xb00] sm:$0xff] %v1109_v32  ;;  %1112 = vst [vmem:[%s12417_s30 + $0xb08] sm:$0xff] %v1111_v33  ;;  %v1113_v34 = vld [vmem:[%s12412_s15 + $0x84c0] sm:$0xff]  ;;  %v1115_v35 = vld [vmem:[%s12412_s15 + $0x84c8] sm:$0xff] }
  0xcd   : > { %v1117_v36 = vld [vmem:[%s12412_s15 + $0x8580] sm:$0xff]  ;;  %1114 = vst [vmem:[%s12417_s30 + $0xb10] sm:$0xff] %v1113_v34  ;;  %1116 = vst [vmem:[%s12417_s30 + $0xb18] sm:$0xff] %v1115_v35  ;;  %v1119_v37 = vld [vmem:[%s12412_s15 + $0x8588] sm:$0xff] }
  0xce   : > { %1118 = vst [vmem:[%s12417_s30 + $0xb20] sm:$0xff] %v1117_v36  ;;  %v1121_v38 = vld [vmem:[%s12412_s15 + $0x8640] sm:$0xff]  ;;  %v1123_v39 = vld [vmem:[%s12412_s15 + $0x8648] sm:$0xff]  ;;  %1120 = vst [vmem:[%s12417_s30 + $0xb28] sm:$0xff] %v1119_v37 }
  0xcf   : > { %1122 = vst [vmem:[%s12417_s30 + $0xb30] sm:$0xff] %v1121_v38  ;;  %1124 = vst [vmem:[%s12417_s30 + $0xb38] sm:$0xff] %v1123_v39  ;;  %v1125_v40 = vld [vmem:[%s12412_s15 + $0x8700] sm:$0xff]  ;;  %v1127_v41 = vld [vmem:[%s12412_s15 + $0x8708] sm:$0xff] }
  0xd0   : > { %v1129_v42 = vld [vmem:[%s12412_s15 + $0x87c0] sm:$0xff]  ;;  %1126 = vst [vmem:[%s12417_s30 + $0xb40] sm:$0xff] %v1125_v40  ;;  %1128 = vst [vmem:[%s12417_s30 + $0xb48] sm:$0xff] %v1127_v41  ;;  %v1131_v43 = vld [vmem:[%s12412_s15 + $0x87c8] sm:$0xff] }
  0xd1   : > { %1130 = vst [vmem:[%s12417_s30 + $0xb50] sm:$0xff] %v1129_v42  ;;  %v1133_v44 = vld [vmem:[%s12412_s15 + $0x8880] sm:$0xff]  ;;  %v1135_v45 = vld [vmem:[%s12412_s15 + $0x8888] sm:$0xff]  ;;  %1132 = vst [vmem:[%s12417_s30 + $0xb58] sm:$0xff] %v1131_v43 }
  0xd2   : > { %1134 = vst [vmem:[%s12417_s30 + $0xb60] sm:$0xff] %v1133_v44  ;;  %1136 = vst [vmem:[%s12417_s30 + $0xb68] sm:$0xff] %v1135_v45  ;;  %v1137_v46 = vld [vmem:[%s12412_s15 + $0x8940] sm:$0xff]  ;;  %v1139_v47 = vld [vmem:[%s12412_s15 + $0x8948] sm:$0xff] }
  0xd3   : > { %v1141_v48 = vld [vmem:[%s12412_s15 + $0x8a00] sm:$0xff]  ;;  %1138 = vst [vmem:[%s12417_s30 + $0xb70] sm:$0xff] %v1137_v46  ;;  %1140 = vst [vmem:[%s12417_s30 + $0xb78] sm:$0xff] %v1139_v47  ;;  %v1143_v49 = vld [vmem:[%s12412_s15 + $0x8a08] sm:$0xff] }
  0xd4   : > { %1142 = vst [vmem:[%s12417_s30 + $0xb80] sm:$0xff] %v1141_v48  ;;  %v1145_v50 = vld [vmem:[%s12412_s15 + $0x8ac0] sm:$0xff]  ;;  %v1147_v51 = vld [vmem:[%s12412_s15 + $0x8ac8] sm:$0xff]  ;;  %1144 = vst [vmem:[%s12417_s30 + $0xb88] sm:$0xff] %v1143_v49 }
  0xd5   : > { %1146 = vst [vmem:[%s12417_s30 + $0xb90] sm:$0xff] %v1145_v50  ;;  %1148 = vst [vmem:[%s12417_s30 + $0xb98] sm:$0xff] %v1147_v51  ;;  %v1149_v52 = vld [vmem:[%s12412_s15 + $0x8b80] sm:$0xff]  ;;  %v1151_v53 = vld [vmem:[%s12412_s15 + $0x8b88] sm:$0xff] }
  0xd6   : > { %v1153_v54 = vld [vmem:[%s12412_s15 + $0x8c40] sm:$0xff]  ;;  %1150 = vst [vmem:[%s12417_s30 + $0xba0] sm:$0xff] %v1149_v52  ;;  %1152 = vst [vmem:[%s12417_s30 + $0xba8] sm:$0xff] %v1151_v53  ;;  %v1155_v55 = vld [vmem:[%s12412_s15 + $0x8c48] sm:$0xff] }
  0xd7   : > { %1154 = vst [vmem:[%s12417_s30 + $0xbb0] sm:$0xff] %v1153_v54  ;;  %v1157_v56 = vld [vmem:[%s12412_s15 + $0x8d00] sm:$0xff]  ;;  %v1159_v57 = vld [vmem:[%s12412_s15 + $0x8d08] sm:$0xff]  ;;  %1156 = vst [vmem:[%s12417_s30 + $0xbb8] sm:$0xff] %v1155_v55 }
  0xd8   : > { %1158 = vst [vmem:[%s12417_s30 + $0xbc0] sm:$0xff] %v1157_v56  ;;  %1160 = vst [vmem:[%s12417_s30 + $0xbc8] sm:$0xff] %v1159_v57  ;;  %v1161_v58 = vld [vmem:[%s12412_s15 + $0x8dc0] sm:$0xff]  ;;  %v1163_v59 = vld [vmem:[%s12412_s15 + $0x8dc8] sm:$0xff] }
  0xd9   : > { %v1165_v60 = vld [vmem:[%s12412_s15 + $0x8e80] sm:$0xff]  ;;  %1162 = vst [vmem:[%s12417_s30 + $0xbd0] sm:$0xff] %v1161_v58  ;;  %1164 = vst [vmem:[%s12417_s30 + $0xbd8] sm:$0xff] %v1163_v59  ;;  %v1167_v61 = vld [vmem:[%s12412_s15 + $0x8e88] sm:$0xff] }
  0xda   : > { %1166 = vst [vmem:[%s12417_s30 + $0xbe0] sm:$0xff] %v1165_v60  ;;  %v1169_v62 = vld [vmem:[%s12412_s15 + $0x8f40] sm:$0xff]  ;;  %v1171_v63 = vld [vmem:[%s12412_s15 + $0x8f48] sm:$0xff]  ;;  %1168 = vst [vmem:[%s12417_s30 + $0xbe8] sm:$0xff] %v1167_v61 }
  0xdb   : > { %1170 = vst [vmem:[%s12417_s30 + $0xbf0] sm:$0xff] %v1169_v62  ;;  %1172 = vst [vmem:[%s12417_s30 + $0xbf8] sm:$0xff] %v1171_v63  ;;  %v1173_v0 = vld [vmem:[%s12412_s15 + $0x9000] sm:$0xff]  ;;  %v1175_v1 = vld [vmem:[%s12412_s15 + $0x9008] sm:$0xff] }
  0xdc   : > { %v1177_v2 = vld [vmem:[%s12412_s15 + $0x90c0] sm:$0xff]  ;;  %1174 = vst [vmem:[%s12417_s30 + $0xc00] sm:$0xff] %v1173_v0  ;;  %1176 = vst [vmem:[%s12417_s30 + $0xc08] sm:$0xff] %v1175_v1  ;;  %v1179_v3 = vld [vmem:[%s12412_s15 + $0x90c8] sm:$0xff] }
  0xdd   : > { %1178 = vst [vmem:[%s12417_s30 + $0xc10] sm:$0xff] %v1177_v2  ;;  %v1181_v4 = vld [vmem:[%s12412_s15 + $0x9180] sm:$0xff]  ;;  %v1183_v5 = vld [vmem:[%s12412_s15 + $0x9188] sm:$0xff]  ;;  %1180 = vst [vmem:[%s12417_s30 + $0xc18] sm:$0xff] %v1179_v3 }
  0xde   : > { %1182 = vst [vmem:[%s12417_s30 + $0xc20] sm:$0xff] %v1181_v4  ;;  %1184 = vst [vmem:[%s12417_s30 + $0xc28] sm:$0xff] %v1183_v5  ;;  %v1185_v6 = vld [vmem:[%s12412_s15 + $0x9240] sm:$0xff]  ;;  %v1187_v7 = vld [vmem:[%s12412_s15 + $0x9248] sm:$0xff] }
  0xdf   : > { %v1189_v8 = vld [vmem:[%s12412_s15 + $0x9300] sm:$0xff]  ;;  %1186 = vst [vmem:[%s12417_s30 + $0xc30] sm:$0xff] %v1185_v6  ;;  %1188 = vst [vmem:[%s12417_s30 + $0xc38] sm:$0xff] %v1187_v7  ;;  %v1191_v9 = vld [vmem:[%s12412_s15 + $0x9308] sm:$0xff] }
  0xe0   : > { %1190 = vst [vmem:[%s12417_s30 + $0xc40] sm:$0xff] %v1189_v8  ;;  %v1193_v10 = vld [vmem:[%s12412_s15 + $0x93c0] sm:$0xff]  ;;  %v1195_v11 = vld [vmem:[%s12412_s15 + $0x93c8] sm:$0xff]  ;;  %1192 = vst [vmem:[%s12417_s30 + $0xc48] sm:$0xff] %v1191_v9 }
  0xe1   : > { %1194 = vst [vmem:[%s12417_s30 + $0xc50] sm:$0xff] %v1193_v10  ;;  %1196 = vst [vmem:[%s12417_s30 + $0xc58] sm:$0xff] %v1195_v11  ;;  %v1197_v12 = vld [vmem:[%s12412_s15 + $0x9480] sm:$0xff]  ;;  %v1199_v13 = vld [vmem:[%s12412_s15 + $0x9488] sm:$0xff] }
  0xe2   : > { %v1201_v14 = vld [vmem:[%s12412_s15 + $0x9540] sm:$0xff]  ;;  %1198 = vst [vmem:[%s12417_s30 + $0xc60] sm:$0xff] %v1197_v12  ;;  %1200 = vst [vmem:[%s12417_s30 + $0xc68] sm:$0xff] %v1199_v13  ;;  %v1203_v15 = vld [vmem:[%s12412_s15 + $0x9548] sm:$0xff] }
  0xe3   : > { %1202 = vst [vmem:[%s12417_s30 + $0xc70] sm:$0xff] %v1201_v14  ;;  %v1205_v16 = vld [vmem:[%s12412_s15 + $0x9600] sm:$0xff]  ;;  %v1207_v17 = vld [vmem:[%s12412_s15 + $0x9608] sm:$0xff]  ;;  %1204 = vst [vmem:[%s12417_s30 + $0xc78] sm:$0xff] %v1203_v15 }
  0xe4   : > { %1206 = vst [vmem:[%s12417_s30 + $0xc80] sm:$0xff] %v1205_v16  ;;  %1208 = vst [vmem:[%s12417_s30 + $0xc88] sm:$0xff] %v1207_v17  ;;  %v1209_v18 = vld [vmem:[%s12412_s15 + $0x96c0] sm:$0xff]  ;;  %v1211_v19 = vld [vmem:[%s12412_s15 + $0x96c8] sm:$0xff] }
  0xe5   : > { %v1213_v20 = vld [vmem:[%s12412_s15 + $0x9780] sm:$0xff]  ;;  %1210 = vst [vmem:[%s12417_s30 + $0xc90] sm:$0xff] %v1209_v18  ;;  %1212 = vst [vmem:[%s12417_s30 + $0xc98] sm:$0xff] %v1211_v19  ;;  %v1215_v21 = vld [vmem:[%s12412_s15 + $0x9788] sm:$0xff] }
  0xe6   : > { %1214 = vst [vmem:[%s12417_s30 + $0xca0] sm:$0xff] %v1213_v20  ;;  %v1217_v22 = vld [vmem:[%s12412_s15 + $0x9840] sm:$0xff]  ;;  %v1219_v23 = vld [vmem:[%s12412_s15 + $0x9848] sm:$0xff]  ;;  %1216 = vst [vmem:[%s12417_s30 + $0xca8] sm:$0xff] %v1215_v21 }
  0xe7   : > { %1218 = vst [vmem:[%s12417_s30 + $0xcb0] sm:$0xff] %v1217_v22  ;;  %1220 = vst [vmem:[%s12417_s30 + $0xcb8] sm:$0xff] %v1219_v23  ;;  %v1221_v24 = vld [vmem:[%s12412_s15 + $0x9900] sm:$0xff]  ;;  %v1223_v25 = vld [vmem:[%s12412_s15 + $0x9908] sm:$0xff] }
  0xe8   : > { %v1225_v26 = vld [vmem:[%s12412_s15 + $0x99c0] sm:$0xff]  ;;  %1222 = vst [vmem:[%s12417_s30 + $0xcc0] sm:$0xff] %v1221_v24  ;;  %1224 = vst [vmem:[%s12417_s30 + $0xcc8] sm:$0xff] %v1223_v25  ;;  %v1227_v27 = vld [vmem:[%s12412_s15 + $0x99c8] sm:$0xff] }
  0xe9   : > { %1226 = vst [vmem:[%s12417_s30 + $0xcd0] sm:$0xff] %v1225_v26  ;;  %v1229_v28 = vld [vmem:[%s12412_s15 + $0x9a80] sm:$0xff]  ;;  %v1231_v29 = vld [vmem:[%s12412_s15 + $0x9a88] sm:$0xff]  ;;  %1228 = vst [vmem:[%s12417_s30 + $0xcd8] sm:$0xff] %v1227_v27 }
  0xea   : > { %1230 = vst [vmem:[%s12417_s30 + $0xce0] sm:$0xff] %v1229_v28  ;;  %1232 = vst [vmem:[%s12417_s30 + $0xce8] sm:$0xff] %v1231_v29  ;;  %v1233_v30 = vld [vmem:[%s12412_s15 + $0x9b40] sm:$0xff]  ;;  %v1235_v31 = vld [vmem:[%s12412_s15 + $0x9b48] sm:$0xff] }
  0xeb   : > { %v1237_v32 = vld [vmem:[%s12412_s15 + $0x9c00] sm:$0xff]  ;;  %1234 = vst [vmem:[%s12417_s30 + $0xcf0] sm:$0xff] %v1233_v30  ;;  %1236 = vst [vmem:[%s12417_s30 + $0xcf8] sm:$0xff] %v1235_v31  ;;  %v1239_v33 = vld [vmem:[%s12412_s15 + $0x9c08] sm:$0xff] }
  0xec   : > { %1238 = vst [vmem:[%s12417_s30 + $0xd00] sm:$0xff] %v1237_v32  ;;  %v1241_v34 = vld [vmem:[%s12412_s15 + $0x9cc0] sm:$0xff]  ;;  %v1243_v35 = vld [vmem:[%s12412_s15 + $0x9cc8] sm:$0xff]  ;;  %1240 = vst [vmem:[%s12417_s30 + $0xd08] sm:$0xff] %v1239_v33 }
  0xed   : > { %1242 = vst [vmem:[%s12417_s30 + $0xd10] sm:$0xff] %v1241_v34  ;;  %1244 = vst [vmem:[%s12417_s30 + $0xd18] sm:$0xff] %v1243_v35  ;;  %v1245_v36 = vld [vmem:[%s12412_s15 + $0x9d80] sm:$0xff]  ;;  %v1247_v37 = vld [vmem:[%s12412_s15 + $0x9d88] sm:$0xff] }
  0xee   : > { %v1249_v38 = vld [vmem:[%s12412_s15 + $0x9e40] sm:$0xff]  ;;  %1246 = vst [vmem:[%s12417_s30 + $0xd20] sm:$0xff] %v1245_v36  ;;  %1248 = vst [vmem:[%s12417_s30 + $0xd28] sm:$0xff] %v1247_v37  ;;  %v1251_v39 = vld [vmem:[%s12412_s15 + $0x9e48] sm:$0xff] }
  0xef   : > { %1250 = vst [vmem:[%s12417_s30 + $0xd30] sm:$0xff] %v1249_v38  ;;  %v1253_v40 = vld [vmem:[%s12412_s15 + $0x9f00] sm:$0xff]  ;;  %v1255_v41 = vld [vmem:[%s12412_s15 + $0x9f08] sm:$0xff]  ;;  %1252 = vst [vmem:[%s12417_s30 + $0xd38] sm:$0xff] %v1251_v39 }
  0xf0   : > { %1254 = vst [vmem:[%s12417_s30 + $0xd40] sm:$0xff] %v1253_v40  ;;  %1256 = vst [vmem:[%s12417_s30 + $0xd48] sm:$0xff] %v1255_v41  ;;  %v1257_v42 = vld [vmem:[%s12412_s15 + $0x9fc0] sm:$0xff]  ;;  %v1259_v43 = vld [vmem:[%s12412_s15 + $0x9fc8] sm:$0xff] }
  0xf1   : > { %v1261_v44 = vld [vmem:[%s12412_s15 + $0xa080] sm:$0xff]  ;;  %1258 = vst [vmem:[%s12417_s30 + $0xd50] sm:$0xff] %v1257_v42  ;;  %1260 = vst [vmem:[%s12417_s30 + $0xd58] sm:$0xff] %v1259_v43  ;;  %v1263_v45 = vld [vmem:[%s12412_s15 + $0xa088] sm:$0xff] }
  0xf2   : > { %1262 = vst [vmem:[%s12417_s30 + $0xd60] sm:$0xff] %v1261_v44  ;;  %v1265_v46 = vld [vmem:[%s12412_s15 + $0xa140] sm:$0xff]  ;;  %v1267_v47 = vld [vmem:[%s12412_s15 + $0xa148] sm:$0xff]  ;;  %1264 = vst [vmem:[%s12417_s30 + $0xd68] sm:$0xff] %v1263_v45 }
  0xf3   : > { %1266 = vst [vmem:[%s12417_s30 + $0xd70] sm:$0xff] %v1265_v46  ;;  %1268 = vst [vmem:[%s12417_s30 + $0xd78] sm:$0xff] %v1267_v47  ;;  %v1269_v48 = vld [vmem:[%s12412_s15 + $0xa200] sm:$0xff]  ;;  %v1271_v49 = vld [vmem:[%s12412_s15 + $0xa208] sm:$0xff] }
  0xf4   : > { %v1273_v50 = vld [vmem:[%s12412_s15 + $0xa2c0] sm:$0xff]  ;;  %1270 = vst [vmem:[%s12417_s30 + $0xd80] sm:$0xff] %v1269_v48  ;;  %1272 = vst [vmem:[%s12417_s30 + $0xd88] sm:$0xff] %v1271_v49  ;;  %v1275_v51 = vld [vmem:[%s12412_s15 + $0xa2c8] sm:$0xff] }
  0xf5   : > { %1274 = vst [vmem:[%s12417_s30 + $0xd90] sm:$0xff] %v1273_v50  ;;  %v1277_v52 = vld [vmem:[%s12412_s15 + $0xa380] sm:$0xff]  ;;  %v1279_v53 = vld [vmem:[%s12412_s15 + $0xa388] sm:$0xff]  ;;  %1276 = vst [vmem:[%s12417_s30 + $0xd98] sm:$0xff] %v1275_v51 }
  0xf6   : > { %1278 = vst [vmem:[%s12417_s30 + $0xda0] sm:$0xff] %v1277_v52  ;;  %1280 = vst [vmem:[%s12417_s30 + $0xda8] sm:$0xff] %v1279_v53  ;;  %v1281_v54 = vld [vmem:[%s12412_s15 + $0xa440] sm:$0xff]  ;;  %v1283_v55 = vld [vmem:[%s12412_s15 + $0xa448] sm:$0xff] }
  0xf7   : > { %v1285_v56 = vld [vmem:[%s12412_s15 + $0xa500] sm:$0xff]  ;;  %1282 = vst [vmem:[%s12417_s30 + $0xdb0] sm:$0xff] %v1281_v54  ;;  %1284 = vst [vmem:[%s12417_s30 + $0xdb8] sm:$0xff] %v1283_v55  ;;  %v1287_v57 = vld [vmem:[%s12412_s15 + $0xa508] sm:$0xff] }
  0xf8   : > { %1286 = vst [vmem:[%s12417_s30 + $0xdc0] sm:$0xff] %v1285_v56  ;;  %v1289_v58 = vld [vmem:[%s12412_s15 + $0xa5c0] sm:$0xff]  ;;  %v1291_v59 = vld [vmem:[%s12412_s15 + $0xa5c8] sm:$0xff]  ;;  %1288 = vst [vmem:[%s12417_s30 + $0xdc8] sm:$0xff] %v1287_v57 }
  0xf9   : > { %1290 = vst [vmem:[%s12417_s30 + $0xdd0] sm:$0xff] %v1289_v58  ;;  %1292 = vst [vmem:[%s12417_s30 + $0xdd8] sm:$0xff] %v1291_v59  ;;  %v1293_v60 = vld [vmem:[%s12412_s15 + $0xa680] sm:$0xff]  ;;  %v1295_v61 = vld [vmem:[%s12412_s15 + $0xa688] sm:$0xff] }
  0xfa   : > { %v1297_v62 = vld [vmem:[%s12412_s15 + $0xa740] sm:$0xff]  ;;  %1294 = vst [vmem:[%s12417_s30 + $0xde0] sm:$0xff] %v1293_v60  ;;  %1296 = vst [vmem:[%s12417_s30 + $0xde8] sm:$0xff] %v1295_v61  ;;  %v1299_v63 = vld [vmem:[%s12412_s15 + $0xa748] sm:$0xff] }
  0xfb   : > { %1298 = vst [vmem:[%s12417_s30 + $0xdf0] sm:$0xff] %v1297_v62  ;;  %v1301_v0 = vld [vmem:[%s12412_s15 + $0xa800] sm:$0xff]  ;;  %v1303_v1 = vld [vmem:[%s12412_s15 + $0xa808] sm:$0xff]  ;;  %1300 = vst [vmem:[%s12417_s30 + $0xdf8] sm:$0xff] %v1299_v63 }
  0xfc   : > { %1302 = vst [vmem:[%s12417_s30 + $0xe00] sm:$0xff] %v1301_v0  ;;  %1304 = vst [vmem:[%s12417_s30 + $0xe08] sm:$0xff] %v1303_v1  ;;  %v1305_v2 = vld [vmem:[%s12412_s15 + $0xa8c0] sm:$0xff]  ;;  %v1307_v3 = vld [vmem:[%s12412_s15 + $0xa8c8] sm:$0xff] }
  0xfd   : > { %v1309_v4 = vld [vmem:[%s12412_s15 + $0xa980] sm:$0xff]  ;;  %1306 = vst [vmem:[%s12417_s30 + $0xe10] sm:$0xff] %v1305_v2  ;;  %1308 = vst [vmem:[%s12417_s30 + $0xe18] sm:$0xff] %v1307_v3  ;;  %v1311_v5 = vld [vmem:[%s12412_s15 + $0xa988] sm:$0xff] }
  0xfe   : > { %1310 = vst [vmem:[%s12417_s30 + $0xe20] sm:$0xff] %v1309_v4  ;;  %v1313_v6 = vld [vmem:[%s12412_s15 + $0xaa40] sm:$0xff]  ;;  %v1315_v7 = vld [vmem:[%s12412_s15 + $0xaa48] sm:$0xff]  ;;  %1312 = vst [vmem:[%s12417_s30 + $0xe28] sm:$0xff] %v1311_v5 }
  0xff   : > { %1314 = vst [vmem:[%s12417_s30 + $0xe30] sm:$0xff] %v1313_v6  ;;  %1316 = vst [vmem:[%s12417_s30 + $0xe38] sm:$0xff] %v1315_v7  ;;  %v1317_v8 = vld [vmem:[%s12412_s15 + $0xab00] sm:$0xff]  ;;  %v1319_v9 = vld [vmem:[%s12412_s15 + $0xab08] sm:$0xff] }
 0x100   : > { %v1321_v10 = vld [vmem:[%s12412_s15 + $0xabc0] sm:$0xff]  ;;  %1318 = vst [vmem:[%s12417_s30 + $0xe40] sm:$0xff] %v1317_v8  ;;  %1320 = vst [vmem:[%s12417_s30 + $0xe48] sm:$0xff] %v1319_v9  ;;  %v1323_v11 = vld [vmem:[%s12412_s15 + $0xabc8] sm:$0xff] }
 0x101   : > { %1322 = vst [vmem:[%s12417_s30 + $0xe50] sm:$0xff] %v1321_v10  ;;  %v1325_v12 = vld [vmem:[%s12412_s15 + $0xac80] sm:$0xff]  ;;  %v1327_v13 = vld [vmem:[%s12412_s15 + $0xac88] sm:$0xff]  ;;  %1324 = vst [vmem:[%s12417_s30 + $0xe58] sm:$0xff] %v1323_v11 }
 0x102   : > { %1326 = vst [vmem:[%s12417_s30 + $0xe60] sm:$0xff] %v1325_v12  ;;  %1328 = vst [vmem:[%s12417_s30 + $0xe68] sm:$0xff] %v1327_v13  ;;  %v1329_v14 = vld [vmem:[%s12412_s15 + $0xad40] sm:$0xff]  ;;  %v1331_v15 = vld [vmem:[%s12412_s15 + $0xad48] sm:$0xff] }
 0x103   : > { %v1333_v16 = vld [vmem:[%s12412_s15 + $0xae00] sm:$0xff]  ;;  %1330 = vst [vmem:[%s12417_s30 + $0xe70] sm:$0xff] %v1329_v14  ;;  %1332 = vst [vmem:[%s12417_s30 + $0xe78] sm:$0xff] %v1331_v15  ;;  %v1335_v17 = vld [vmem:[%s12412_s15 + $0xae08] sm:$0xff] }
 0x104   : > { %1334 = vst [vmem:[%s12417_s30 + $0xe80] sm:$0xff] %v1333_v16  ;;  %v1337_v18 = vld [vmem:[%s12412_s15 + $0xaec0] sm:$0xff]  ;;  %v1339_v19 = vld [vmem:[%s12412_s15 + $0xaec8] sm:$0xff]  ;;  %1336 = vst [vmem:[%s12417_s30 + $0xe88] sm:$0xff] %v1335_v17 }
 0x105   : > { %1338 = vst [vmem:[%s12417_s30 + $0xe90] sm:$0xff] %v1337_v18  ;;  %1340 = vst [vmem:[%s12417_s30 + $0xe98] sm:$0xff] %v1339_v19  ;;  %v1341_v20 = vld [vmem:[%s12412_s15 + $0xaf80] sm:$0xff]  ;;  %v1343_v21 = vld [vmem:[%s12412_s15 + $0xaf88] sm:$0xff] }
 0x106   : > { %v1345_v22 = vld [vmem:[%s12412_s15 + $0xb040] sm:$0xff]  ;;  %1342 = vst [vmem:[%s12417_s30 + $0xea0] sm:$0xff] %v1341_v20  ;;  %1344 = vst [vmem:[%s12417_s30 + $0xea8] sm:$0xff] %v1343_v21  ;;  %v1347_v23 = vld [vmem:[%s12412_s15 + $0xb048] sm:$0xff] }
 0x107   : > { %1346 = vst [vmem:[%s12417_s30 + $0xeb0] sm:$0xff] %v1345_v22  ;;  %v1349_v24 = vld [vmem:[%s12412_s15 + $0xb100] sm:$0xff]  ;;  %v1351_v25 = vld [vmem:[%s12412_s15 + $0xb108] sm:$0xff]  ;;  %1348 = vst [vmem:[%s12417_s30 + $0xeb8] sm:$0xff] %v1347_v23 }
 0x108   : > { %1350 = vst [vmem:[%s12417_s30 + $0xec0] sm:$0xff] %v1349_v24  ;;  %1352 = vst [vmem:[%s12417_s30 + $0xec8] sm:$0xff] %v1351_v25  ;;  %v1353_v26 = vld [vmem:[%s12412_s15 + $0xb1c0] sm:$0xff]  ;;  %v1355_v27 = vld [vmem:[%s12412_s15 + $0xb1c8] sm:$0xff] }
 0x109   : > { %v1357_v28 = vld [vmem:[%s12412_s15 + $0xb280] sm:$0xff]  ;;  %1354 = vst [vmem:[%s12417_s30 + $0xed0] sm:$0xff] %v1353_v26  ;;  %1356 = vst [vmem:[%s12417_s30 + $0xed8] sm:$0xff] %v1355_v27  ;;  %v1359_v29 = vld [vmem:[%s12412_s15 + $0xb288] sm:$0xff] }
 0x10a   : > { %1358 = vst [vmem:[%s12417_s30 + $0xee0] sm:$0xff] %v1357_v28  ;;  %v1361_v30 = vld [vmem:[%s12412_s15 + $0xb340] sm:$0xff]  ;;  %v1363_v31 = vld [vmem:[%s12412_s15 + $0xb348] sm:$0xff]  ;;  %1360 = vst [vmem:[%s12417_s30 + $0xee8] sm:$0xff] %v1359_v29 }
 0x10b   : > { %1362 = vst [vmem:[%s12417_s30 + $0xef0] sm:$0xff] %v1361_v30  ;;  %1364 = vst [vmem:[%s12417_s30 + $0xef8] sm:$0xff] %v1363_v31  ;;  %v1365_v32 = vld [vmem:[%s12412_s15 + $0xb400] sm:$0xff]  ;;  %v1367_v33 = vld [vmem:[%s12412_s15 + $0xb408] sm:$0xff] }
 0x10c   : > { %v1369_v34 = vld [vmem:[%s12412_s15 + $0xb4c0] sm:$0xff]  ;;  %1366 = vst [vmem:[%s12417_s30 + $0xf00] sm:$0xff] %v1365_v32  ;;  %1368 = vst [vmem:[%s12417_s30 + $0xf08] sm:$0xff] %v1367_v33  ;;  %v1371_v35 = vld [vmem:[%s12412_s15 + $0xb4c8] sm:$0xff] }
 0x10d   : > { %1370 = vst [vmem:[%s12417_s30 + $0xf10] sm:$0xff] %v1369_v34  ;;  %v1373_v36 = vld [vmem:[%s12412_s15 + $0xb580] sm:$0xff]  ;;  %v1375_v37 = vld [vmem:[%s12412_s15 + $0xb588] sm:$0xff]  ;;  %1372 = vst [vmem:[%s12417_s30 + $0xf18] sm:$0xff] %v1371_v35 }
 0x10e   : > { %1374 = vst [vmem:[%s12417_s30 + $0xf20] sm:$0xff] %v1373_v36  ;;  %1376 = vst [vmem:[%s12417_s30 + $0xf28] sm:$0xff] %v1375_v37  ;;  %v1377_v38 = vld [vmem:[%s12412_s15 + $0xb640] sm:$0xff]  ;;  %v1379_v39 = vld [vmem:[%s12412_s15 + $0xb648] sm:$0xff] }
 0x10f   : > { %v1381_v40 = vld [vmem:[%s12412_s15 + $0xb700] sm:$0xff]  ;;  %1378 = vst [vmem:[%s12417_s30 + $0xf30] sm:$0xff] %v1377_v38  ;;  %1380 = vst [vmem:[%s12417_s30 + $0xf38] sm:$0xff] %v1379_v39  ;;  %v1383_v41 = vld [vmem:[%s12412_s15 + $0xb708] sm:$0xff] }
 0x110   : > { %1382 = vst [vmem:[%s12417_s30 + $0xf40] sm:$0xff] %v1381_v40  ;;  %v1385_v42 = vld [vmem:[%s12412_s15 + $0xb7c0] sm:$0xff]  ;;  %v1387_v43 = vld [vmem:[%s12412_s15 + $0xb7c8] sm:$0xff]  ;;  %1384 = vst [vmem:[%s12417_s30 + $0xf48] sm:$0xff] %v1383_v41 }
 0x111   : > { %1386 = vst [vmem:[%s12417_s30 + $0xf50] sm:$0xff] %v1385_v42  ;;  %1388 = vst [vmem:[%s12417_s30 + $0xf58] sm:$0xff] %v1387_v43  ;;  %v1389_v44 = vld [vmem:[%s12412_s15 + $0xb880] sm:$0xff]  ;;  %v1391_v45 = vld [vmem:[%s12412_s15 + $0xb888] sm:$0xff] }
 0x112   : > { %v1393_v46 = vld [vmem:[%s12412_s15 + $0xb940] sm:$0xff]  ;;  %1390 = vst [vmem:[%s12417_s30 + $0xf60] sm:$0xff] %v1389_v44  ;;  %1392 = vst [vmem:[%s12417_s30 + $0xf68] sm:$0xff] %v1391_v45  ;;  %v1395_v47 = vld [vmem:[%s12412_s15 + $0xb948] sm:$0xff] }
 0x113   : > { %1394 = vst [vmem:[%s12417_s30 + $0xf70] sm:$0xff] %v1393_v46  ;;  %v1397_v48 = vld [vmem:[%s12412_s15 + $0xba00] sm:$0xff]  ;;  %v1399_v49 = vld [vmem:[%s12412_s15 + $0xba08] sm:$0xff]  ;;  %1396 = vst [vmem:[%s12417_s30 + $0xf78] sm:$0xff] %v1395_v47 }
 0x114   : > { %1398 = vst [vmem:[%s12417_s30 + $0xf80] sm:$0xff] %v1397_v48  ;;  %1400 = vst [vmem:[%s12417_s30 + $0xf88] sm:$0xff] %v1399_v49  ;;  %v1401_v50 = vld [vmem:[%s12412_s15 + $0xbac0] sm:$0xff]  ;;  %v1403_v51 = vld [vmem:[%s12412_s15 + $0xbac8] sm:$0xff] }
 0x115   : > { %v1405_v52 = vld [vmem:[%s12412_s15 + $0xbb80] sm:$0xff]  ;;  %1402 = vst [vmem:[%s12417_s30 + $0xf90] sm:$0xff] %v1401_v50  ;;  %1404 = vst [vmem:[%s12417_s30 + $0xf98] sm:$0xff] %v1403_v51  ;;  %v1407_v53 = vld [vmem:[%s12412_s15 + $0xbb88] sm:$0xff] }
 0x116   : > { %1406 = vst [vmem:[%s12417_s30 + $0xfa0] sm:$0xff] %v1405_v52  ;;  %v1409_v54 = vld [vmem:[%s12412_s15 + $0xbc40] sm:$0xff]  ;;  %v1411_v55 = vld [vmem:[%s12412_s15 + $0xbc48] sm:$0xff]  ;;  %1408 = vst [vmem:[%s12417_s30 + $0xfa8] sm:$0xff] %v1407_v53 }
 0x117   : > { %1410 = vst [vmem:[%s12417_s30 + $0xfb0] sm:$0xff] %v1409_v54  ;;  %1412 = vst [vmem:[%s12417_s30 + $0xfb8] sm:$0xff] %v1411_v55  ;;  %v1413_v56 = vld [vmem:[%s12412_s15 + $0xbd00] sm:$0xff]  ;;  %v1415_v57 = vld [vmem:[%s12412_s15 + $0xbd08] sm:$0xff] }
 0x118   : > { %v1417_v58 = vld [vmem:[%s12412_s15 + $0xbdc0] sm:$0xff]  ;;  %1414 = vst [vmem:[%s12417_s30 + $0xfc0] sm:$0xff] %v1413_v56  ;;  %1416 = vst [vmem:[%s12417_s30 + $0xfc8] sm:$0xff] %v1415_v57  ;;  %v1419_v59 = vld [vmem:[%s12412_s15 + $0xbdc8] sm:$0xff] }
 0x119   : > { %1418 = vst [vmem:[%s12417_s30 + $0xfd0] sm:$0xff] %v1417_v58  ;;  %v1421_v60 = vld [vmem:[%s12412_s15 + $0xbe80] sm:$0xff]  ;;  %v1423_v61 = vld [vmem:[%s12412_s15 + $0xbe88] sm:$0xff]  ;;  %1420 = vst [vmem:[%s12417_s30 + $0xfd8] sm:$0xff] %v1419_v59 }
 0x11a   : > { %1422 = vst [vmem:[%s12417_s30 + $0xfe0] sm:$0xff] %v1421_v60  ;;  %1424 = vst [vmem:[%s12417_s30 + $0xfe8] sm:$0xff] %v1423_v61  ;;  %v1425_v62 = vld [vmem:[%s12412_s15 + $0xbf40] sm:$0xff]  ;;  %v1427_v63 = vld [vmem:[%s12412_s15 + $0xbf48] sm:$0xff] }
 0x11b   : > { %1426 = vst [vmem:[%s12417_s30 + $0xff0] sm:$0xff] %v1425_v62  ;;  %1428 = vst [vmem:[%s12417_s30 + $0xff8] sm:$0xff] %v1427_v63 }
 0x11c PF: > { %p10020_p10 = scmp.ge.s32.totalorder %s12282_s28, 1  ;;  %p1441_p11 = scmp.lt.s32.totalorder %s12282_s28, 13 }
 0x11e   : > { %p1442_p12 = pnand %p10020_p10, %p1441_p11 }
 0x11f   : > { %s16024_s1 = sld [smem:[#allocation7_spill]] (!%p1442_p12)  ;;  %v12284_v1 = vmov (!%p1442_p12), 0.0   ;;  %vm12285_vm0 = vmmov (!%p1442_p12), 0   ;;  %s16025_s0 = sld [smem:[#allocation6_spill]] (!%p1442_p12)  ;;  %vm1528_vm1 = vcmask (!%p1442_p12), 261120   ;;  %vm1613_vm2 = vcmask (!%p1442_p12), 523264  }
 0x120   : > { %1445 = sbr.rel (%p1442_p12) target bundleno = 2373 (0x945), region = 91  ;;  %11153 = vmatprep.subr.bf16.mxu1 (!%p1442_p12), %v12284_v1  ;;  %11157 = vmatprep.mubr.msk.bf16.mxu1 (!%p1442_p12), %vm12285_vm0, %v12284_v1  ;;  %s16026_s3 = sld [smem:[#allocation9_spill]] (!%p1442_p12)  ;;  %v11330_v9 = vld [vmem:[%s16009_s5 + $0x4] ss:$8 sps:$4 sm:$0xff] (!%p1442_p12)   ;;  %v11332_v10 = vld [vmem:[%s16009_s5] ss:$8 sps:$4 sm:$0xff] (!%p1442_p12)  }
 0x121   : > { %v11333_v11 = vld [vmem:[%s16009_s5 + $0x14] ss:$8 sps:$4 sm:$0xff] (!%p1442_p12)   ;;  %1767 = vmatprep.subr.bf16.mxu0 (!%p1442_p12), %v11330_v9  ;;  %v11335_v12 = vld [vmem:[%s16009_s5 + $0x10] ss:$8 sps:$4 sm:$0xff] (!%p1442_p12)   ;;  %v11336_v13 = vld [vmem:[%s16009_s5 + $0x24] ss:$8 sps:$4 sm:$0xff] (!%p1442_p12)  }
 0x122   : > { %1768 = vmatpush1.bf16.msra.mxu0 (!%p1442_p12), %v11332_v10  ;;  %v11338_v14 = vld [vmem:[%s16009_s5 + $0x20] ss:$8 sps:$4 sm:$0xff] (!%p1442_p12)   ;;  %v11339_v15 = vld [vmem:[%s16009_s5 + $0x34] ss:$8 sps:$4 sm:$0xff] (!%p1442_p12)   ;;  %v11341_v16 = vld [vmem:[%s16009_s5 + $0x30] ss:$8 sps:$4 sm:$0xff] (!%p1442_p12)  }
 0x123   : > { %1769 = vmatprep.subr.bf16.mxu0 (!%p1442_p12), %v11333_v11  ;;  %v11342_v17 = vld [vmem:[%s16009_s5 + $0x44] ss:$8 sps:$4 sm:$0xff] (!%p1442_p12)   ;;  %v11344_v18 = vld [vmem:[%s16009_s5 + $0x40] ss:$8 sps:$4 sm:$0xff] (!%p1442_p12)   ;;  %v11345_v19 = vld [vmem:[%s16009_s5 + $0x54] ss:$8 sps:$4 sm:$0xff] (!%p1442_p12)  }
 0x124   : > { %v11347_v20 = vld [vmem:[%s16009_s5 + $0x50] ss:$8 sps:$4 sm:$0xff] (!%p1442_p12)   ;;  %v11348_v21 = vld [vmem:[%s16009_s5 + $0x64] ss:$8 sps:$4 sm:$0xff] (!%p1442_p12)   ;;  %s16027_s2 = sld [smem:[#allocation8_spill]] (!%p1442_p12)  ;;  %v12286_v33 = vmov (!%p1442_p12), 0  }
 0x125   : > { %v11324_v0 = vld [vmem:[%s16024_s1] sm:$0xff] (!%p1442_p12)   ;;  %v11325_v2 = vld [vmem:[%s16024_s1 + $0x8] sm:$0xff] (!%p1442_p12)   ;;  %v11351_v31 = vld [vmem:[%s16009_s5 + $0x74] ss:$8 sps:$4 sm:$0xff] (!%p1442_p12)   ;;  %1799 = vmatprep.mubr.bf16.mxu0 (!%p1442_p12), %v12286_v33  ;;  %s14959_s16 = sand.u32 (!%p1442_p12), 1, %s12274_s26   ;;  %s10023_s21 = sshll.u32 (!%p1442_p12), %s12380_s29, 2 }
 0x126   : > { %11154 = vmatpush3.bf16.msra.mxu1 (!%p1442_p12), %v11324_v0  ;;  %v1503_v3 = vld [vmem:[%s16025_s0] sm:$0x3] (!%p1442_p12)  ;;  %v11327_v6 = vld [vmem:[%s16026_s3 + $0x8] sm:$0xff] (!%p1442_p12)   ;;  %v11328_v7 = vld [vmem:[%s16026_s3 + $0x10] sm:$0xff] (!%p1442_p12)   ;;  %1770 = vmatpush1.bf16.msra.mxu0 (!%p1442_p12), %v11335_v12  ;;  %s10021_s0 = sshll.u32 (!%p1442_p12), %s14959_s16, 12  ;;  %p1497_p13 = scmp.lt.s32.totalorder (!%p1442_p12), %s10023_s21, 47 }
 0x127   : > { %11155 = vmatprep.subr.bf16.mxu1 %v12284_v1  ;;  %v11326_v4 = vld [vmem:[%s16026_s3] sm:$0xff]   ;;  %v1504_v5 = vpack.c.bf16 %v1503_v3, %v1503_v3  ;;  %v11329_v8 = vld [vmem:[%s16026_s3 + $0x18] sm:$0xff]   ;;  %1771 = vmatprep.subr.bf16.mxu0 %v11336_v13  ;;  %s11144_s24 = sshll.u32 %s12380_s29, 7  ;;  %s12288_s29 = smov [#allocation3]  }
 0x128   : > { %v11350_v30 = vld [vmem:[%s16009_s5 + $0x60] ss:$8 sps:$4 sm:$0xff]   ;;  %v11353_v32 = vld [vmem:[%s16009_s5 + $0x70] ss:$8 sps:$4 sm:$0xff]   ;;  %v11356_v35 = vld [vmem:[%s16011_s7 + $0x4] ss:$16 sps:$4 sm:$0xff]   ;;  %s15961_s20 = scalar_lea.hbm %s16017_s13, %s11144_s24 }
 0x129   : > { %v11354_v34 = vld [vmem:[%s16011_s7] ss:$16 sps:$4 sm:$0xff]   ;;  %v11359_v36 = vld [vmem:[%s16011_s7 + $0xc] ss:$16 sps:$4 sm:$0xff]   ;;  %v11362_v37 = vld [vmem:[%s16011_s7 + $0x24] ss:$16 sps:$4 sm:$0xff]  }
 0x12a   : > { %11156 = vmatpush3.bf16.msra.mxu1 %v11325_v2  ;;  %1772 = vmatpush1.bf16.msra.mxu0 %v11338_v14  ;;  %v10024_v22 = vld [vmem:[%s16027_s2] ss:$0 sm:$0xff]  ;;  %v11368_v39 = vld [vmem:[%s16011_s7 + $0x44] ss:$16 sps:$4 sm:$0xff]   ;;  %v11363_v9 = vld [vmem:[%s16011_s7 + $0x28] ss:$16 sps:$4 sm:$0xff]  }
 0x12b   : > { %11161 = vmatprep.subr.bf16.mxu1 %v12284_v1  ;;  %1773 = vmatprep.subr.bf16.mxu0 %v11339_v15  ;;  %v11360_v38 = vld [vmem:[%s16011_s7 + $0x20] ss:$16 sps:$4 sm:$0xff]   ;;  %v11374_v41 = vld [vmem:[%s16011_s7 + $0x64] ss:$16 sps:$4 sm:$0xff]   ;;  %v11371_v10 = vld [vmem:[%s16011_s7 + $0x4c] ss:$16 sps:$4 sm:$0xff]  }
 0x12c   : > { %v11366_v40 = vld [vmem:[%s16011_s7 + $0x40] ss:$16 sps:$4 sm:$0xff]   ;;  %v11380_v43 = vld [vmem:[%s16011_s7 + $0x84] ss:$16 sps:$4 sm:$0xff]   ;;  %v11369_v11 = vld [vmem:[%s16011_s7 + $0x48] ss:$16 sps:$4 sm:$0xff]  }
 0x12d   : > { %11158 = vmatmul.mubr.msk.bf16.vlgmr.msra.gmra.mrb[0].mxu1 %vm1528_vm1, %v1504_v5  ;;  %v11372_v42 = vld [vmem:[%s16011_s7 + $0x60] ss:$16 sps:$4 sm:$0xff]   ;;  %v11386_v45 = vld [vmem:[%s16011_s7 + $0xa4] ss:$16 sps:$4 sm:$0xff]   ;;  %v11377_v12 = vld [vmem:[%s16011_s7 + $0x6c] ss:$16 sps:$4 sm:$0xff]  }
 0x12e   : > { %11162 = vmatpush3.bf16.msra.mxu1 %v11326_v4  ;;  %11169 = vmatprep.mubr.msk.bf16.mxu1 %vm12285_vm0, %v12284_v1  ;;  %v11378_v44 = vld [vmem:[%s16011_s7 + $0x80] ss:$16 sps:$4 sm:$0xff]   ;;  %v11392_v47 = vld [vmem:[%s16011_s7 + $0xc4] ss:$16 sps:$4 sm:$0xff]   ;;  %v11375_v13 = vld [vmem:[%s16011_s7 + $0x68] ss:$16 sps:$4 sm:$0xff]  }
 0x12f   : > { %11163 = vmatprep.subr.bf16.mxu1 %v12284_v1  ;;  %1774 = vmatpush1.bf16.msra.mxu0 %v11341_v16  ;;  %v11384_v46 = vld [vmem:[%s16011_s7 + $0xa0] ss:$16 sps:$4 sm:$0xff]   ;;  %v11398_v49 = vld [vmem:[%s16011_s7 + $0xe4] ss:$16 sps:$4 sm:$0xff]   ;;  %v11383_v14 = vld [vmem:[%s16011_s7 + $0x8c] ss:$16 sps:$4 sm:$0xff]  }
 0x130   : > { %1775 = vmatprep.subr.bf16.mxu0 %v11342_v17  ;;  %v11390_v48 = vld [vmem:[%s16011_s7 + $0xc0] ss:$16 sps:$4 sm:$0xff]   ;;  %v11404_v51 = vld [vmem:[%s16011_s7 + $0x104] ss:$16 sps:$4 sm:$0xff]   ;;  %v11381_v15 = vld [vmem:[%s16011_s7 + $0x88] ss:$16 sps:$4 sm:$0xff]  }
 0x131   : > { %v11396_v50 = vld [vmem:[%s16011_s7 + $0xe0] ss:$16 sps:$4 sm:$0xff]   ;;  %v11410_v53 = vld [vmem:[%s16011_s7 + $0x124] ss:$16 sps:$4 sm:$0xff]   ;;  %v11389_v16 = vld [vmem:[%s16011_s7 + $0xac] ss:$16 sps:$4 sm:$0xff]  }
 0x132   : > { %11164 = vmatpush3.bf16.msra.mxu1 %v11327_v6  ;;  %v11402_v52 = vld [vmem:[%s16011_s7 + $0x100] ss:$16 sps:$4 sm:$0xff]   ;;  %v11416_v55 = vld [vmem:[%s16011_s7 + $0x144] ss:$16 sps:$4 sm:$0xff]   ;;  %v11357_v6 = vld [vmem:[%s16011_s7 + $0x8] ss:$16 sps:$4 sm:$0xff]  }
 0x133   : > { %11165 = vmatprep.subr.bf16.mxu1 %v12284_v1  ;;  %1776 = vmatpush1.bf16.msra.mxu0 %v11344_v18  ;;  %v11408_v54 = vld [vmem:[%s16011_s7 + $0x120] ss:$16 sps:$4 sm:$0xff]   ;;  %v11422_v57 = vld [vmem:[%s16011_s7 + $0x164] ss:$16 sps:$4 sm:$0xff]   ;;  %v11387_v17 = vld [vmem:[%s16011_s7 + $0xa8] ss:$16 sps:$4 sm:$0xff]  }
 0x134   : > { %1777 = vmatprep.subr.bf16.mxu0 %v11345_v19  ;;  %v11414_v56 = vld [vmem:[%s16011_s7 + $0x140] ss:$16 sps:$4 sm:$0xff]   ;;  %v11428_v59 = vld [vmem:[%s16011_s7 + $0x184] ss:$16 sps:$4 sm:$0xff]   ;;  %v11395_v18 = vld [vmem:[%s16011_s7 + $0xcc] ss:$16 sps:$4 sm:$0xff]  }
 0x135   : > { %v11420_v58 = vld [vmem:[%s16011_s7 + $0x160] ss:$16 sps:$4 sm:$0xff]   ;;  %v11434_v61 = vld [vmem:[%s16011_s7 + $0x1a4] ss:$16 sps:$4 sm:$0xff]   ;;  %v11393_v19 = vld [vmem:[%s16011_s7 + $0xc8] ss:$16 sps:$4 sm:$0xff]  }
 0x136   : > { %11166 = vmatpush3.bf16.msra.mxu1 %v11328_v7  ;;  %v11426_v60 = vld [vmem:[%s16011_s7 + $0x180] ss:$16 sps:$4 sm:$0xff]   ;;  %v11435_v33 = vld [vmem:[%s16011_s7 + $0x1a8] ss:$16 sps:$4 sm:$0xff]   ;;  %s14975_s2 = scalar_lea.vmem [#allocation2], %s10021_s0  ;;  %s16033_s21 = smov (!%p1497_p13, %s10023_s21), 47 }
 0x137   : > { %11167 = vmatprep.subr.bf16.mxu1 %v12284_v1  ;;  %1778 = vmatpush1.bf16.msra.mxu0 %v11347_v20  ;;  %v11432_v62 = vld [vmem:[%s16011_s7 + $0x1a0] ss:$16 sps:$4 sm:$0xff]   ;;  %v11401_v20 = vld [vmem:[%s16011_s7 + $0xec] ss:$16 sps:$4 sm:$0xff]   ;;  %s1499_s23 = scalar_lea.vmem %s16016_s12, %s16033_s21  ;;  %s9926_s21 = scalar_lea.sflag [#allocation4], %s14959_s16 }
 0x138   : > { %1779 = vmatprep.subr.bf16.mxu0 %v11348_v21  ;;  %v10028_v63 = vld [vmem:[%s16008_s4] ss:$0 sm:$0xff]  ;;  %v11399_v21 = vld [vmem:[%s16011_s7 + $0xe8] ss:$16 sps:$4 sm:$0xff]   ;;  %s12224_s22 = sshll.u32 %s12288_s29, 4  ;;  %s12225_s22 = int_to_ptr.vmem [resolvable:$false] %s12224_s22 }
 0x13a   : > { %11168 = vmatpush3.bf16.msra.mxu1 %v11329_v8  ;;  %v11365_v8 = vld [vmem:[%s16011_s7 + $0x2c] ss:$16 sps:$4 sm:$0xff]  }
 0x13b   : > { %1780 = vmatpush1.bf16.msra.mxu0 %v11350_v30  ;;  %2218 = vmatprep.subr.bf16.mxu1 %v11356_v35  ;;  %v11431_v30 = vld [vmem:[%s16011_s7 + $0x18c] ss:$16 sps:$4 sm:$0xff]  }
 0x13c   : > { %1781 = vmatprep.subr.bf16.mxu0 %v11351_v31  ;;  %v11429_v31 = vld [vmem:[%s16011_s7 + $0x188] ss:$16 sps:$4 sm:$0xff]   ;;  %v11443_v35 = vld [vmem:[%s16011_s7 + $0x1cc] ss:$16 sps:$4 sm:$0xff]  }
 0x13f   : > { %1782 = vmatpush1.bf16.msra.mxu0 %v11353_v32  ;;  %v11437_v32 = vld [vmem:[%s16011_s7 + $0x1ac] ss:$16 sps:$4 sm:$0xff]  }
 0x140   : > { %2259 = vmatprep.subr.bf16.mxu0 %v11359_v36  ;;  %v11438_v36 = vld [vmem:[%s16011_s7 + $0x1c0] ss:$16 sps:$4 sm:$0xff]  }
 0x200   : > { %v1566_v23 = vpop.f32.mrb[0].mxu1 }
 0x201   : > { %v1567_v24 = vadd.f32 %v10024_v22, %v1566_v23  ;;  %v11159_v25 = vpop.f32.mrb[1].mxu1  ;;  %v11407_v22 = vld [vmem:[%s16011_s7 + $0x10c] ss:$16 sps:$4 sm:$0xff]   ;;  %v11405_v23 = vld [vmem:[%s16011_s7 + $0x108] ss:$16 sps:$4 sm:$0xff]  }
 0x202   : > { %v1569_v26 = vpop.f32.mrb[2].mxu1  ;;  %v11411_v25 = vld [vmem:[%s16011_s7 + $0x128] ss:$16 sps:$4 sm:$0xff]  }
 0x203   : > { %v1572_v27 = vmax.f32 %v1567_v24, 0.0  ;;  %v11160_v28 = vpop.f32.mrb[3].mxu1  ;;  %v11413_v24 = vld [vmem:[%s16011_s7 + $0x12c] ss:$16 sps:$4 sm:$0xff]  }
 0x204   : > { %v11419_v26 = vld [vmem:[%s16011_s7 + $0x14c] ss:$16 sps:$4 sm:$0xff]  }
 0x205   : > { %v1573_v29 = vpack.c.bf16 %v1572_v27, %v1572_v27  ;;  %v11417_v27 = vld [vmem:[%s16011_s7 + $0x148] ss:$16 sps:$4 sm:$0xff]   ;;  %v11425_v28 = vld [vmem:[%s16011_s7 + $0x16c] ss:$16 sps:$4 sm:$0xff]  }
 0x207   : > { %11170 = vmatmul.mubr.msk.bf16.vlgmr.msra.gmra.mrb[4].mxu1 %vm1613_vm2, %v1573_v29  ;;  %v11423_v29 = vld [vmem:[%s16011_s7 + $0x168] ss:$16 sps:$4 sm:$0xff]  }
 0x208   : > { %2219 = vmatpush1.bf16.msra.mxu1 %v11354_v34  ;;  %v11440_v34 = vld [vmem:[%s16011_s7 + $0x1c4] ss:$16 sps:$4 sm:$0xff]  }
 0x209   : > { %2220 = vmatprep.subr.bf16.mxu1 %v11362_v37  ;;  %v11441_v37 = vld [vmem:[%s16011_s7 + $0x1c8] ss:$16 sps:$4 sm:$0xff]  }
 0x20c   : > { %2221 = vmatpush1.bf16.msra.mxu1 %v11360_v38  ;;  %v11446_v38 = vld [vmem:[%s16011_s7 + $0x1e4] ss:$16 sps:$4 sm:$0xff]  }
 0x20d   : > { %2222 = vmatprep.subr.bf16.mxu1 %v11368_v39  ;;  %v11449_v39 = vld [vmem:[%s16011_s7 + $0x1ec] ss:$16 sps:$4 sm:$0xff]  }
 0x210   : > { %2223 = vmatpush1.bf16.msra.mxu1 %v11366_v40  ;;  %v11444_v40 = vld [vmem:[%s16011_s7 + $0x1e0] ss:$16 sps:$4 sm:$0xff]  }
 0x211   : > { %2224 = vmatprep.subr.bf16.mxu1 %v11374_v41  ;;  %v11447_v41 = vld [vmem:[%s16011_s7 + $0x1e8] ss:$16 sps:$4 sm:$0xff]  }
 0x214   : > { %2225 = vmatpush1.bf16.msra.mxu1 %v11372_v42  ;;  %v2308_v42 = vld [vmem:[%s16013_s9] sm:$0xff] }
 0x215   : > { %2226 = vmatprep.subr.bf16.mxu1 %v11380_v43  ;;  %v2316_v43 = vld [vmem:[%s16013_s9 + $0x40] sm:$0xff] }
 0x218   : > { %2227 = vmatpush1.bf16.msra.mxu1 %v11378_v44  ;;  %v2309_v44 = vld [vmem:[%s16013_s9 + $0x8] sm:$0xff] }
 0x219   : > { %2228 = vmatprep.subr.bf16.mxu1 %v11386_v45  ;;  %v10114_v45 = vcombine.low %v2308_v42, %v2316_v43 }
 0x21c   : > { %2229 = vmatpush1.bf16.msra.mxu1 %v11384_v46  ;;  %v10115_v46 = vcombine.high %v2308_v42, %v2316_v43  ;;  %v2412_v42 = vld [vmem:[%s16013_s9 + $0x340] sm:$0xff]  ;;  %v2405_v43 = vld [vmem:[%s16013_s9 + $0x308] sm:$0xff] }
 0x21d   : > { %2230 = vmatprep.subr.bf16.mxu1 %v11392_v47  ;;  %v2317_v47 = vld [vmem:[%s16013_s9 + $0x48] sm:$0xff] }
 0x220   : > { %2231 = vmatpush1.bf16.msra.mxu1 %v11390_v48  ;;  %v10116_v48 = vcombine.low %v2309_v44, %v2317_v47 }
 0x221   : > { %2232 = vmatprep.subr.bf16.mxu1 %v11398_v49  ;;  %v10117_v49 = vcombine.high %v2309_v44, %v2317_v47  ;;  %v2413_v44 = vld [vmem:[%s16013_s9 + $0x348] sm:$0xff] }
 0x224   : > { %2233 = vmatpush1.bf16.msra.mxu1 %v11396_v50  ;;  %v1677_v50 = vlaneseq }
 0x225   : > { %2234 = vmatprep.subr.bf16.mxu1 %v11404_v51 }
 0x226   : > { %v13721_v51 = vshrl.u32 %v1677_v50, 7  ;;  %v2428_v50 = vld [vmem:[%s16013_s9 + $0x3c0] sm:$0xff] }
 0x228   : > { %2235 = vmatpush1.bf16.msra.mxu1 %v11402_v52  ;;  %v13724_v52 = vsub.s32 0, %v13721_v51 }
 0x229   : > { %2236 = vmatprep.subr.bf16.mxu1 %v11410_v53  ;;  %v1675_v53 = vld [vmem:[%s16010_s6] sm:$0x3] }
 0x22c   : > { %2237 = vmatpush1.bf16.msra.mxu1 %v11408_v54  ;;  %v13730_v54 = vsub.s32 1, %v13721_v51 }
 0x22d   : > { %2238 = vmatprep.subr.bf16.mxu1 %v11416_v55  ;;  %v1680_v55 = vrot.slane %v1675_v53, %v13724_v52 }
 0x230   : > { %2239 = vmatpush1.bf16.msra.mxu1 %v11414_v56  ;;  %v1684_v56 = vrot.slane %v1675_v53, %v13730_v54  ;;  %v2421_v53 = vld [vmem:[%s16013_s9 + $0x388] sm:$0xff] }
 0x231   : > { %2240 = vmatprep.subr.bf16.mxu1 %v11422_v57 }
 0x234   : > { %2241 = vmatpush1.bf16.msra.mxu1 %v11420_v58 }
 0x235   : > { %2242 = vmatprep.subr.bf16.mxu1 %v11428_v59 }
 0x238   : > { %2243 = vmatpush1.bf16.msra.mxu1 %v11426_v60 }
 0x239   : > { %2244 = vmatprep.subr.bf16.mxu1 %v11434_v61 }
 0x23c   : > { %2245 = vmatpush1.bf16.msra.mxu1 %v11432_v62 }
 0x23d   : > { %2246 = vmatprep.subr.bf16.mxu1 %v11440_v34  ;;  %v2396_v34 = vld [vmem:[%s16013_s9 + $0x2c0] sm:$0xff] }
 0x240   : > { %2247 = vmatpush1.bf16.msra.mxu1 %v11438_v36  ;;  %v2397_v36 = vld [vmem:[%s16013_s9 + $0x2c8] sm:$0xff] }
 0x241   : > { %2248 = vmatprep.subr.bf16.mxu1 %v11446_v38 }
 0x244   : > { %2249 = vmatpush1.bf16.msra.mxu1 %v11444_v40 }
 0x245   : > { %5464 = vmatprep.subr.bf16.mxu1 %v10115_v46 }
 0x2da   : > { %v1651_v0 = vpop.f32.mrb[4].mxu1 }
 0x2db   : > { %v1652_v1 = vadd.f32 %v10028_v63, %v1651_v0  ;;  %v11171_v2 = vpop.f32.mrb[5].mxu1  ;;  %v2324_v0 = vld [vmem:[%s16013_s9 + $0x80] sm:$0xff] }
 0x2dc   : > { %v1654_v3 = vpop.f32.mrb[6].mxu1  ;;  %v2332_v2 = vld [vmem:[%s16013_s9 + $0xc0] sm:$0xff] }
 0x2dd   : > { %v1657_v4 = vmax.f32 %v1652_v1, 0.0  ;;  %v11172_v5 = vpop.f32.mrb[7].mxu1  ;;  %v2325_v3 = vld [vmem:[%s16013_s9 + $0x88] sm:$0xff] }
 0x2df   : > { %v1658_v7 = vpack.c.bf16 %v1657_v4, %v1657_v4  ;;  %v2333_v4 = vld [vmem:[%s16013_s9 + $0xc8] sm:$0xff] }
 0x2e1   : > { %1800 = vmatmul.mubr.bf16.vlgmr.msra.gmra.mrb[0].mxu0 %v1658_v7  ;;  %v10131_v7 = vcombine.high %v2324_v0, %v2332_v2 }
 0x2e2   : > { %2260 = vmatpush1.bf16.msra.mxu0 %v11357_v6 }
 0x2e3   : > { %2261 = vmatprep.subr.bf16.mxu0 %v11365_v8  ;;  %v10133_v8 = vcombine.high %v2325_v3, %v2333_v4 }
 0x2e6   : > { %2262 = vmatpush1.bf16.msra.mxu0 %v11363_v9  ;;  %v2340_v9 = vld [vmem:[%s16013_s9 + $0x100] sm:$0xff] }
 0x2e7   : > { %2263 = vmatprep.subr.bf16.mxu0 %v11371_v10  ;;  %v2348_v10 = vld [vmem:[%s16013_s9 + $0x140] sm:$0xff] }
 0x2ea   : > { %2264 = vmatpush1.bf16.msra.mxu0 %v11369_v11  ;;  %v2341_v11 = vld [vmem:[%s16013_s9 + $0x108] sm:$0xff] }
 0x2eb   : > { %2265 = vmatprep.subr.bf16.mxu0 %v11377_v12  ;;  %v2349_v12 = vld [vmem:[%s16013_s9 + $0x148] sm:$0xff] }
 0x2ee   : > { %2266 = vmatpush1.bf16.msra.mxu0 %v11375_v13  ;;  %v10130_v13 = vcombine.low %v2324_v0, %v2332_v2 }
 0x2ef   : > { %2267 = vmatprep.subr.bf16.mxu0 %v11383_v14  ;;  %v10132_v14 = vcombine.low %v2325_v3, %v2333_v4  ;;  %v2452_v4 = vld [vmem:[%s16013_s9 + $0x480] sm:$0xff] }
 0x2f2   : > { %2268 = vmatpush1.bf16.msra.mxu0 %v11381_v15  ;;  %v10147_v15 = vcombine.high %v2340_v9, %v2348_v10 }
 0x2f3   : > { %2269 = vmatprep.subr.bf16.mxu0 %v11389_v16  ;;  %v10149_v16 = vcombine.high %v2341_v11, %v2349_v12 }
 0x2f6   : > { %2270 = vmatpush1.bf16.msra.mxu0 %v11387_v17  ;;  %v2356_v17 = vld [vmem:[%s16013_s9 + $0x180] sm:$0xff] }
 0x2f7   : > { %2271 = vmatprep.subr.bf16.mxu0 %v11395_v18  ;;  %v2364_v18 = vld [vmem:[%s16013_s9 + $0x1c0] sm:$0xff] }
 0x2fa   : > { %2272 = vmatpush1.bf16.msra.mxu0 %v11393_v19  ;;  %v2357_v19 = vld [vmem:[%s16013_s9 + $0x188] sm:$0xff] }
 0x2fb   : > { %2273 = vmatprep.subr.bf16.mxu0 %v11401_v20  ;;  %v2365_v20 = vld [vmem:[%s16013_s9 + $0x1c8] sm:$0xff] }
 0x2fe   : > { %2274 = vmatpush1.bf16.msra.mxu0 %v11399_v21  ;;  %v10146_v21 = vcombine.low %v2340_v9, %v2348_v10 }
 0x2ff   : > { %2275 = vmatprep.subr.bf16.mxu0 %v11407_v22  ;;  %v10148_v22 = vcombine.low %v2341_v11, %v2349_v12  ;;  %v2468_v12 = vld [vmem:[%s16013_s9 + $0x500] sm:$0xff] }
 0x302   : > { %2276 = vmatpush1.bf16.msra.mxu0 %v11405_v23  ;;  %v10163_v23 = vcombine.high %v2356_v17, %v2364_v18 }
 0x303   : > { %2277 = vmatprep.subr.bf16.mxu0 %v11413_v24  ;;  %v10165_v24 = vcombine.high %v2357_v19, %v2365_v20 }
 0x306   : > { %2278 = vmatpush1.bf16.msra.mxu0 %v11411_v25  ;;  %v2372_v25 = vld [vmem:[%s16013_s9 + $0x200] sm:$0xff] }
 0x307   : > { %2279 = vmatprep.subr.bf16.mxu0 %v11419_v26  ;;  %v2380_v26 = vld [vmem:[%s16013_s9 + $0x240] sm:$0xff] }
 0x30a   : > { %2280 = vmatpush1.bf16.msra.mxu0 %v11417_v27  ;;  %v2373_v27 = vld [vmem:[%s16013_s9 + $0x208] sm:$0xff] }
 0x30b   : > { %2281 = vmatprep.subr.bf16.mxu0 %v11425_v28  ;;  %v2381_v28 = vld [vmem:[%s16013_s9 + $0x248] sm:$0xff] }
 0x30c   : > { %v10180_v38 = vcombine.low %v2373_v27, %v2381_v28 }
 0x30e   : > { %2282 = vmatpush1.bf16.msra.mxu0 %v11423_v29  ;;  %v10162_v29 = vcombine.low %v2356_v17, %v2364_v18 }
 0x30f   : > { %2283 = vmatprep.subr.bf16.mxu0 %v11431_v30  ;;  %v10164_v30 = vcombine.low %v2357_v19, %v2365_v20  ;;  %v2484_v20 = vld [vmem:[%s16013_s9 + $0x580] sm:$0xff] }
 0x312   : > { %2284 = vmatpush1.bf16.msra.mxu0 %v11429_v31  ;;  %v10179_v31 = vcombine.high %v2372_v25, %v2380_v26 }
 0x313   : > { %2285 = vmatprep.subr.bf16.mxu0 %v11437_v32  ;;  %v10181_v32 = vcombine.high %v2373_v27, %v2381_v28  ;;  %v2500_v28 = vld [vmem:[%s16013_s9 + $0x600] sm:$0xff] }
 0x316   : > { %2286 = vmatpush1.bf16.msra.mxu0 %v11435_v33  ;;  %v2388_v33 = vld [vmem:[%s16013_s9 + $0x280] sm:$0xff] }
 0x317   : > { %2287 = vmatprep.subr.bf16.mxu0 %v11443_v35  ;;  %v2389_v35 = vld [vmem:[%s16013_s9 + $0x288] sm:$0xff] }
 0x318   : > { %v10197_v40 = vcombine.high %v2389_v35, %v2397_v36  ;;  %v10196_v46 = vcombine.low %v2389_v35, %v2397_v36  ;;  %v2516_v36 = vld [vmem:[%s16013_s9 + $0x680] sm:$0xff] }
 0x31a   : > { %2288 = vmatpush1.bf16.msra.mxu0 %v11441_v37  ;;  %v10178_v37 = vcombine.low %v2372_v25, %v2380_v26 }
 0x31b   : > { %2289 = vmatprep.subr.bf16.mxu0 %v11449_v39  ;;  %v10195_v39 = vcombine.high %v2388_v33, %v2396_v34 }
 0x31e   : > { %2290 = vmatpush1.bf16.msra.mxu0 %v11447_v41  ;;  %v2404_v41 = vld [vmem:[%s16013_s9 + $0x300] sm:$0xff] }
 0x31f   : > { %5546 = vmatprep.subr.bf16.mxu0 %v10117_v49  ;;  %v10211_v47 = vcombine.high %v2404_v41, %v2412_v42  ;;  %v2420_v49 = vld [vmem:[%s16013_s9 + $0x380] sm:$0xff] }
 0x320   : > { %v10226_v0 = vcombine.low %v2420_v49, %v2428_v50 }
 0x3b4   : > { %v1801_v57 = vpop.f32.mrb[0].mxu0 }
 0x3b5   : > { %v1802_v58 = vadd.f32 %v1801_v57, %v1680_v55  ;;  %v1803_v59 = vpop.f32.mrb[1].mxu0  ;;  %v2429_v55 = vld [vmem:[%s16013_s9 + $0x3c8] sm:$0xff]  ;;  %v10212_v57 = vcombine.low %v2405_v43, %v2413_v44 }
 0x3b6   : > { %v1804_v60 = vadd.f32 %v1803_v59, %v1684_v56  ;;  %v1805_v61 = vpop.f32.mrb[2].mxu0  ;;  %v10210_v56 = vcombine.low %v2404_v41, %v2412_v42  ;;  %v10229_v59 = vcombine.high %v2421_v53, %v2429_v55 }
 0x3b7   : > { %v1808_v62 = vmax.f32 %v1802_v58, 0.0  ;;  %v1806_v63 = vpop.f32.mrb[3].mxu0  ;;  %v10227_v58 = vcombine.high %v2420_v49, %v2428_v50  ;;  %v2444_v61 = vld [vmem:[%s16013_s9 + $0x440] sm:$0xff]  ;;  %v2541_v50 = vld [vmem:[%s16013_s9 + $0x748] sm:$0xff] }
 0x3b8   : > { %v1809_v1 = vmax.f32 %v1804_v60, 0.0  ;;  %v2436_v60 = vld [vmem:[%s16013_s9 + $0x400] sm:$0xff]  ;;  %v2445_v63 = vld [vmem:[%s16013_s9 + $0x448] sm:$0xff] }
 0x3b9   : > { %v1810_v6 = vpack.c.bf16 %v1808_v62, %v1808_v62  ;;  %v2437_v62 = vld [vmem:[%s16013_s9 + $0x408] sm:$0xff]  ;;  %v10243_v2 = vcombine.high %v2436_v60, %v2444_v61 }
 0x3ba   : > { %v1811_v5 = vpack.c.bf16 %v1809_v1, %v1809_v1  ;;  %v10228_v1 = vcombine.low %v2421_v53, %v2429_v55  ;;  %v10245_v3 = vcombine.high %v2437_v62, %v2445_v63  ;;  %v10244_v9 = vcombine.low %v2437_v62, %v2445_v63 }
 0x3bc   : > { %2250 = vmatprep.mubr.bf16.mxu1 %v1811_v5  ;;  %2291 = vmatprep.mubr.bf16.mxu0 %v1811_v5  ;;  %v2460_v5 = vld [vmem:[%s16013_s9 + $0x4c0] sm:$0xff] }
 0x3bd   : > { %2251 = vmatmul.mubr.bf16.vlgmr.msra.gmra.mrb[8].mxu1 %v1810_v6  ;;  %2292 = vmatmul.mubr.bf16.vlgmr.msra.gmra.mrb[4].mxu0 %v1810_v6  ;;  %v2453_v6 = vld [vmem:[%s16013_s9 + $0x488] sm:$0xff]  ;;  %v10259_v10 = vcombine.high %v2452_v4, %v2460_v5 }
 0x3be   : > { %5465 = vmatpush1.bf16.msra.mxu1 %v10114_v45  ;;  %5547 = vmatpush1.bf16.msra.mxu0 %v10116_v48  ;;  %v10194_v45 = vcombine.low %v2388_v33, %v2396_v34  ;;  %v10213_v48 = vcombine.high %v2405_v43, %v2413_v44 }
 0x3bf   : > { %5466 = vmatprep.subr.bf16.mxu1 %v10131_v7  ;;  %5548 = vmatprep.subr.bf16.mxu0 %v10133_v8  ;;  %v2461_v7 = vld [vmem:[%s16013_s9 + $0x4c8] sm:$0xff]  ;;  %v10242_v8 = vcombine.low %v2436_v60, %v2444_v61 }
 0x3c0   : > { %v10261_v11 = vcombine.high %v2453_v6, %v2461_v7  ;;  %v10260_v17 = vcombine.low %v2453_v6, %v2461_v7  ;;  %v2557_v61 = vld [vmem:[%s16013_s9 + $0x7c8] sm:$0xff] }
 0x3c2   : > { %5467 = vmatpush1.bf16.msra.mxu1 %v10130_v13  ;;  %5549 = vmatpush1.bf16.msra.mxu0 %v10132_v14  ;;  %v2476_v13 = vld [vmem:[%s16013_s9 + $0x540] sm:$0xff]  ;;  %v2469_v14 = vld [vmem:[%s16013_s9 + $0x508] sm:$0xff] }
 0x3c3   : > { %5468 = vmatprep.subr.bf16.mxu1 %v10147_v15  ;;  %5550 = vmatprep.subr.bf16.mxu0 %v10149_v16  ;;  %v2477_v15 = vld [vmem:[%s16013_s9 + $0x548] sm:$0xff]  ;;  %v10258_v16 = vcombine.low %v2452_v4, %v2460_v5  ;;  %v10275_v18 = vcombine.high %v2468_v12, %v2476_v13 }
 0x3c4   : > { %v10277_v19 = vcombine.high %v2469_v14, %v2477_v15  ;;  %v10276_v25 = vcombine.low %v2469_v14, %v2477_v15  ;;  %v2573_v5 = vld [vmem:[%s16013_s9 + $0x848] sm:$0xff] }
 0x3c6   : > { %5469 = vmatpush1.bf16.msra.mxu1 %v10146_v21  ;;  %5551 = vmatpush1.bf16.msra.mxu0 %v10148_v22  ;;  %v2492_v21 = vld [vmem:[%s16013_s9 + $0x5c0] sm:$0xff]  ;;  %v2485_v22 = vld [vmem:[%s16013_s9 + $0x588] sm:$0xff] }
 0x3c7   : > { %5470 = vmatprep.subr.bf16.mxu1 %v10163_v23  ;;  %5552 = vmatprep.subr.bf16.mxu0 %v10165_v24  ;;  %v2493_v23 = vld [vmem:[%s16013_s9 + $0x5c8] sm:$0xff]  ;;  %v10274_v24 = vcombine.low %v2468_v12, %v2476_v13  ;;  %v10291_v26 = vcombine.high %v2484_v20, %v2492_v21 }
 0x3c8   : > { %v10293_v27 = vcombine.high %v2485_v22, %v2493_v23  ;;  %v10292_v33 = vcombine.low %v2485_v22, %v2493_v23 }
 0x3ca   : > { %5471 = vmatpush1.bf16.msra.mxu1 %v10162_v29  ;;  %5553 = vmatpush1.bf16.msra.mxu0 %v10164_v30  ;;  %v2508_v29 = vld [vmem:[%s16013_s9 + $0x640] sm:$0xff]  ;;  %v2501_v30 = vld [vmem:[%s16013_s9 + $0x608] sm:$0xff] }
 0x3cb   : > { %5472 = vmatprep.subr.bf16.mxu1 %v10179_v31  ;;  %5554 = vmatprep.subr.bf16.mxu0 %v10181_v32  ;;  %v2509_v31 = vld [vmem:[%s16013_s9 + $0x648] sm:$0xff]  ;;  %v10290_v32 = vcombine.low %v2484_v20, %v2492_v21  ;;  %v10307_v34 = vcombine.high %v2500_v28, %v2508_v29 }
 0x3cc   : > { %v10309_v35 = vcombine.high %v2501_v30, %v2509_v31  ;;  %v10308_v41 = vcombine.low %v2501_v30, %v2509_v31  ;;  %v2581_v30 = vld [vmem:[%s16013_s9 + $0x888] sm:$0xff] }
 0x3cd   : > { %v2589_v31 = vld [vmem:[%s16013_s9 + $0x8c8] sm:$0xff] }
 0x3ce   : > { %5473 = vmatpush1.bf16.msra.mxu1 %v10178_v37  ;;  %5555 = vmatpush1.bf16.msra.mxu0 %v10180_v38  ;;  %v2524_v37 = vld [vmem:[%s16013_s9 + $0x6c0] sm:$0xff]  ;;  %v2517_v38 = vld [vmem:[%s16013_s9 + $0x688] sm:$0xff] }
 0x3cf   : > { %5474 = vmatprep.subr.bf16.mxu1 %v10195_v39  ;;  %5556 = vmatprep.subr.bf16.mxu0 %v10197_v40  ;;  %v2525_v39 = vld [vmem:[%s16013_s9 + $0x6c8] sm:$0xff]  ;;  %v10306_v40 = vcombine.low %v2500_v28, %v2508_v29  ;;  %v10323_v42 = vcombine.high %v2516_v36, %v2524_v37  ;;  %v10322_v44 = vcombine.low %v2516_v36, %v2524_v37  ;;  %v2588_v29 = vld [vmem:[%s16013_s9 + $0x8c0] sm:$0xff] }
 0x3d0   : > { %v10325_v43 = vcombine.high %v2517_v38, %v2525_v39  ;;  %v10389_v36 = vcombine.high %v2581_v30, %v2589_v31  ;;  %v2604_v37 = vld [vmem:[%s16013_s9 + $0x940] sm:$0xff] }
 0x3d2   : > { %5475 = vmatpush1.bf16.msra.mxu1 %v10194_v45  ;;  %5557 = vmatpush1.bf16.msra.mxu0 %v10196_v46  ;;  %v10324_v45 = vcombine.low %v2517_v38, %v2525_v39  ;;  %v2532_v46 = vld [vmem:[%s16013_s9 + $0x700] sm:$0xff]  ;;  %v2597_v38 = vld [vmem:[%s16013_s9 + $0x908] sm:$0xff] }
 0x3d3   : > { %5476 = vmatprep.subr.bf16.mxu1 %v10211_v47  ;;  %5558 = vmatprep.subr.bf16.mxu0 %v10213_v48  ;;  %v2540_v47 = vld [vmem:[%s16013_s9 + $0x740] sm:$0xff]  ;;  %v2533_v48 = vld [vmem:[%s16013_s9 + $0x708] sm:$0xff] }
 0x3d4   : > { %v10339_v49 = vcombine.high %v2532_v46, %v2540_v47  ;;  %v10338_v53 = vcombine.low %v2532_v46, %v2540_v47  ;;  %v10340_v55 = vcombine.low %v2533_v48, %v2541_v50  ;;  %v2605_v39 = vld [vmem:[%s16013_s9 + $0x948] sm:$0xff]  ;;  %v2620_v46 = vld [vmem:[%s16013_s9 + $0x9c0] sm:$0xff] }
 0x3d5   : > { %v2613_v47 = vld [vmem:[%s16013_s9 + $0x988] sm:$0xff] }
 0x3d6   : > { %5477 = vmatpush1.bf16.msra.mxu1 %v10210_v56  ;;  %5559 = vmatpush1.bf16.msra.mxu0 %v10212_v57  ;;  %v10341_v56 = vcombine.high %v2533_v48, %v2541_v50  ;;  %v2548_v57 = vld [vmem:[%s16013_s9 + $0x780] sm:$0xff]  ;;  %v2621_v48 = vld [vmem:[%s16013_s9 + $0x9c8] sm:$0xff]  ;;  %v10404_v50 = vcombine.low %v2597_v38, %v2605_v39 }
 0x3d7   : > { %5478 = vmatprep.subr.bf16.mxu1 %v10227_v58  ;;  %5560 = vmatprep.subr.bf16.mxu0 %v10229_v59  ;;  %v2556_v58 = vld [vmem:[%s16013_s9 + $0x7c0] sm:$0xff]  ;;  %v2549_v59 = vld [vmem:[%s16013_s9 + $0x788] sm:$0xff] }
 0x3d8   : > { %v10355_v60 = vcombine.high %v2548_v57, %v2556_v58  ;;  %v10354_v62 = vcombine.low %v2548_v57, %v2556_v58  ;;  %v10356_v63 = vcombine.low %v2549_v59, %v2557_v61  ;;  %v2636_v57 = vld [vmem:[%s16013_s9 + $0xa40] sm:$0xff]  ;;  %v2629_v58 = vld [vmem:[%s16013_s9 + $0xa08] sm:$0xff] }
 0x3da   : > { %5479 = vmatpush1.bf16.msra.mxu1 %v10226_v0  ;;  %5561 = vmatpush1.bf16.msra.mxu0 %v10228_v1  ;;  %v10357_v0 = vcombine.high %v2549_v59, %v2557_v61  ;;  %v2564_v1 = vld [vmem:[%s16013_s9 + $0x800] sm:$0xff]  ;;  %v2637_v59 = vld [vmem:[%s16013_s9 + $0xa48] sm:$0xff]  ;;  %v10420_v61 = vcombine.low %v2613_v47, %v2621_v48 }
 0x3db   : > { %5480 = vmatprep.subr.bf16.mxu1 %v10243_v2  ;;  %5562 = vmatprep.subr.bf16.mxu0 %v10245_v3  ;;  %v2572_v2 = vld [vmem:[%s16013_s9 + $0x840] sm:$0xff]  ;;  %v2565_v3 = vld [vmem:[%s16013_s9 + $0x808] sm:$0xff] }
 0x3dc   : > { %v10371_v4 = vcombine.high %v2564_v1, %v2572_v2  ;;  %v10370_v6 = vcombine.low %v2564_v1, %v2572_v2  ;;  %v10372_v7 = vcombine.low %v2565_v3, %v2573_v5  ;;  %v2652_v1 = vld [vmem:[%s16013_s9 + $0xac0] sm:$0xff]  ;;  %v2645_v2 = vld [vmem:[%s16013_s9 + $0xa88] sm:$0xff] }
 0x3de   : > { %5481 = vmatpush1.bf16.msra.mxu1 %v10242_v8  ;;  %5563 = vmatpush1.bf16.msra.mxu0 %v10244_v9  ;;  %v10373_v8 = vcombine.high %v2565_v3, %v2573_v5  ;;  %v13929_v9 = vld [vmem:[%s16012_s8] sm:$0xf]  ;;  %v2653_v3 = vld [vmem:[%s16013_s9 + $0xac8] sm:$0xff]  ;;  %v10436_v5 = vcombine.low %v2629_v58, %v2637_v59 }
 0x3df   : > { %5482 = vmatprep.subr.bf16.mxu1 %v10259_v10  ;;  %5564 = vmatprep.subr.bf16.mxu0 %v10261_v11  ;;  %v13932_v10 = vsub.s32 3, %v13721_v51  ;;  %v1881_v11 = vrot.slane %v13929_v9, %v13724_v52  ;;  %v1885_v12 = vrot.slane %v13929_v9, %v13730_v54 }
 0x3e1   : > { %v1893_v13 = vrot.slane %v13929_v9, %v13932_v10 }
 0x3e2   : > { %5483 = vmatpush1.bf16.msra.mxu1 %v10258_v16  ;;  %5565 = vmatpush1.bf16.msra.mxu0 %v10260_v17 }
 0x3e3   : > { %5484 = vmatprep.subr.bf16.mxu1 %v10275_v18  ;;  %5566 = vmatprep.subr.bf16.mxu0 %v10277_v19 }
 0x3e6   : > { %5485 = vmatpush1.bf16.msra.mxu1 %v10274_v24  ;;  %5567 = vmatpush1.bf16.msra.mxu0 %v10276_v25 }
 0x3e7   : > { %5486 = vmatprep.subr.bf16.mxu1 %v10291_v26  ;;  %5568 = vmatprep.subr.bf16.mxu0 %v10293_v27  ;;  %v2580_v27 = vld [vmem:[%s16013_s9 + $0x880] sm:$0xff] }
 0x3ea   : > { %5487 = vmatpush1.bf16.msra.mxu1 %v10290_v32  ;;  %5569 = vmatpush1.bf16.msra.mxu0 %v10292_v33 }
 0x3eb   : > { %5488 = vmatprep.subr.bf16.mxu1 %v10307_v34  ;;  %5570 = vmatprep.subr.bf16.mxu0 %v10309_v35  ;;  %v2596_v34 = vld [vmem:[%s16013_s9 + $0x900] sm:$0xff]  ;;  %v10387_v35 = vcombine.high %v2580_v27, %v2588_v29 }
 0x3ee   : > { %5489 = vmatpush1.bf16.msra.mxu1 %v10306_v40  ;;  %5571 = vmatpush1.bf16.msra.mxu0 %v10308_v41  ;;  %v10386_v41 = vcombine.low %v2580_v27, %v2588_v29  ;;  %v2692_v27 = vld [vmem:[%s16013_s9 + $0xc00] sm:$0xff]  ;;  %v2693_v29 = vld [vmem:[%s16013_s9 + $0xc08] sm:$0xff] }
 0x3ef   : > { %5490 = vmatprep.subr.bf16.mxu1 %v10323_v42  ;;  %5572 = vmatprep.subr.bf16.mxu0 %v10325_v43  ;;  %v10388_v42 = vcombine.low %v2581_v30, %v2589_v31  ;;  %v10403_v43 = vcombine.high %v2596_v34, %v2604_v37  ;;  %v2701_v30 = vld [vmem:[%s16013_s9 + $0xc48] sm:$0xff] }
 0x3f2   : > { %5491 = vmatpush1.bf16.msra.mxu1 %v10322_v44  ;;  %5573 = vmatpush1.bf16.msra.mxu0 %v10324_v45  ;;  %v10405_v44 = vcombine.high %v2597_v38, %v2605_v39  ;;  %v2612_v45 = vld [vmem:[%s16013_s9 + $0x980] sm:$0xff]  ;;  %v2709_v39 = vld [vmem:[%s16013_s9 + $0xc88] sm:$0xff] }
 0x3f3   : > { %5492 = vmatprep.subr.bf16.mxu1 %v10339_v49  ;;  %5574 = vmatprep.subr.bf16.mxu0 %v10341_v56  ;;  %v10402_v49 = vcombine.low %v2596_v34, %v2604_v37  ;;  %v2628_v56 = vld [vmem:[%s16013_s9 + $0xa00] sm:$0xff] }
 0x3f4   : > { %v2708_v37 = vld [vmem:[%s16013_s9 + $0xc80] sm:$0xff] }
 0x3f5   : > { %v2716_v38 = vld [vmem:[%s16013_s9 + $0xcc0] sm:$0xff] }
 0x3f6   : > { %5493 = vmatpush1.bf16.msra.mxu1 %v10338_v53  ;;  %5575 = vmatpush1.bf16.msra.mxu0 %v10340_v55  ;;  %v10419_v53 = vcombine.high %v2612_v45, %v2620_v46  ;;  %v10421_v55 = vcombine.high %v2613_v47, %v2621_v48  ;;  %v2732_v47 = vld [vmem:[%s16013_s9 + $0xd40] sm:$0xff]  ;;  %v2725_v48 = vld [vmem:[%s16013_s9 + $0xd08] sm:$0xff] }
 0x3f7   : > { %5494 = vmatprep.subr.bf16.mxu1 %v10355_v60  ;;  %5576 = vmatprep.subr.bf16.mxu0 %v10357_v0  ;;  %v10418_v60 = vcombine.low %v2612_v45, %v2620_v46  ;;  %v2644_v0 = vld [vmem:[%s16013_s9 + $0xa80] sm:$0xff] }
 0x3f8   : > { %v2724_v46 = vld [vmem:[%s16013_s9 + $0xd00] sm:$0xff] }
 0x3fa   : > { %5495 = vmatpush1.bf16.msra.mxu1 %v10354_v62  ;;  %5577 = vmatpush1.bf16.msra.mxu0 %v10356_v63  ;;  %v10435_v62 = vcombine.high %v2628_v56, %v2636_v57  ;;  %v10437_v63 = vcombine.high %v2629_v58, %v2637_v59  ;;  %v2748_v58 = vld [vmem:[%s16013_s9 + $0xdc0] sm:$0xff]  ;;  %v2741_v59 = vld [vmem:[%s16013_s9 + $0xd88] sm:$0xff] }
 0x3fb   : > { %5505 = vmatprep.subr.bf16.mxu1 %v10371_v4  ;;  %5587 = vmatprep.subr.bf16.mxu0 %v10373_v8  ;;  %v10434_v4 = vcombine.low %v2628_v56, %v2636_v57  ;;  %v2660_v8 = vld [vmem:[%s16013_s9 + $0xb00] sm:$0xff] }
 0x3fc   : > { %v2740_v57 = vld [vmem:[%s16013_s9 + $0xd80] sm:$0xff] }
 0x490   : > { %v2252_v14 = vpop.f32.mrb[8].mxu1  ;;  %v13940_v15 = vpop.f32.mrb[4].mxu0 }
 0x491   : > { %v2253_v16 = vadd.f32 %v2252_v14, %v1881_v11  ;;  %v2254_v17 = vpop.f32.mrb[9].mxu1  ;;  %v2295_v18 = vpop.f32.mrb[5].mxu0  ;;  %v2668_v11 = vld [vmem:[%s16013_s9 + $0xb40] sm:$0xff]  ;;  %v10450_v14 = vcombine.low %v2644_v0, %v2652_v1 }
 0x492   : > { %v2255_v19 = vadd.f32 %v2254_v17, %v1885_v12  ;;  %v2296_v20 = vadd.f32 %v2295_v18, %v1893_v13  ;;  %v2256_v21 = vpop.f32.mrb[10].mxu1  ;;  %v2297_v22 = vpop.f32.mrb[6].mxu0  ;;  %v2661_v12 = vld [vmem:[%s16013_s9 + $0xb08] sm:$0xff]  ;;  %v10467_v17 = vcombine.high %v2660_v8, %v2668_v11 }
 0x493   : > { %v2300_v23 = vmax.f32 %v2253_v16, 0.0  ;;  %v2257_v24 = vpop.f32.mrb[11].mxu1  ;;  %v2298_v25 = vpop.f32.mrb[7].mxu0  ;;  %v2669_v13 = vld [vmem:[%s16013_s9 + $0xb48] sm:$0xff]  ;;  %v10452_v16 = vcombine.low %v2645_v2, %v2653_v3 }
 0x494   : > { %v2301_v26 = vmax.f32 %v2255_v19, 0.0  ;;  %v2303_v28 = vmax.f32 %v2296_v20, 0.0  ;;  %v10469_v18 = vcombine.high %v2661_v12, %v2669_v13  ;;  %v2676_v19 = vld [vmem:[%s16013_s9 + $0xb80] sm:$0xff]  ;;  %v2677_v21 = vld [vmem:[%s16013_s9 + $0xb88] sm:$0xff]  ;;  %v10468_v24 = vcombine.low %v2661_v12, %v2669_v13 }
 0x495   : > { %v13956_v33 = vpack.c.bf16 %v2300_v23, %v2300_v23  ;;  %v2684_v20 = vld [vmem:[%s16013_s9 + $0xbc0] sm:$0xff]  ;;  %v2685_v22 = vld [vmem:[%s16013_s9 + $0xbc8] sm:$0xff]  ;;  %v10466_v23 = vcombine.low %v2660_v8, %v2668_v11 }
 0x496   : > { %v13954_v32 = vpack.c.bf16 %v2301_v26, %v2301_v26  ;;  %v13972_v40 = vpack.c.bf16 %v2303_v28, %v2303_v28  ;;  %v10483_v25 = vcombine.high %v2676_v19, %v2684_v20  ;;  %v10485_v26 = vcombine.high %v2677_v21, %v2685_v22  ;;  %v2700_v28 = vld [vmem:[%s16013_s9 + $0xc40] sm:$0xff]  ;;  %v2773_v13 = vld [vmem:[%s16013_s9 + $0xe88] sm:$0xff] }
 0x497   : > { %v10482_v31 = vcombine.low %v2676_v19, %v2684_v20  ;;  %v10484_v34 = vcombine.low %v2677_v21, %v2685_v22  ;;  %v2772_v11 = vld [vmem:[%s16013_s9 + $0xe80] sm:$0xff] }
 0x498   : > { %5496 = vmatprep.mubr.bf16.mxu1 %v13954_v32  ;;  %5578 = vmatprep.mubr.bf16.mxu0 %v13954_v32  ;;  %v2780_v12 = vld [vmem:[%s16013_s9 + $0xec0] sm:$0xff] }
 0x499   : > { %5497 = vmatmul.mubr.bf16.vlgmr.msra.gmra.mrb[12].mxu1 %v13956_v33  ;;  %5579 = vmatmul.mubr.bf16.vlgmr.msra.gmra.mrb[8].mxu0 %v13956_v33  ;;  %v10579_v19 = vcombine.high %v2772_v11, %v2780_v12  ;;  %v2788_v21 = vld [vmem:[%s16013_s9 + $0xf00] sm:$0xff] }
 0x49a   : > { %5506 = vmatpush1.bf16.msra.mxu1 %v10370_v6  ;;  %5588 = vmatpush1.bf16.msra.mxu0 %v10372_v7  ;;  %v10451_v6 = vcombine.high %v2644_v0, %v2652_v1  ;;  %v10453_v7 = vcombine.high %v2645_v2, %v2653_v3  ;;  %v2756_v1 = vld [vmem:[%s16013_s9 + $0xe00] sm:$0xff]  ;;  %v2757_v3 = vld [vmem:[%s16013_s9 + $0xe08] sm:$0xff] }
 0x49b   : > { %5537 = vmatprep.mubr.bf16.mxu1 %v13972_v40  ;;  %5619 = vmatprep.mubr.bf16.mxu0 %v13972_v40  ;;  %v2764_v2 = vld [vmem:[%s16013_s9 + $0xe40] sm:$0xff] }
 0x49c   : > { %5507 = vmatprep.subr.bf16.mxu1 %v10387_v35  ;;  %5589 = vmatprep.subr.bf16.mxu0 %v10389_v36  ;;  %v10499_v35 = vcombine.high %v2692_v27, %v2700_v28  ;;  %v10501_v36 = vcombine.high %v2693_v29, %v2701_v30  ;;  %v2796_v22 = vld [vmem:[%s16013_s9 + $0xf40] sm:$0xff] }
 0x49e   : > { %5508 = vmatpush1.bf16.msra.mxu1 %v10386_v41  ;;  %5590 = vmatpush1.bf16.msra.mxu0 %v10388_v42  ;;  %v2717_v41 = vld [vmem:[%s16013_s9 + $0xcc8] sm:$0xff]  ;;  %v10498_v42 = vcombine.low %v2692_v27, %v2700_v28  ;;  %v10595_v28 = vcombine.high %v2788_v21, %v2796_v22 }
 0x49f   : > { %5509 = vmatprep.subr.bf16.mxu1 %v10403_v43  ;;  %5591 = vmatprep.subr.bf16.mxu0 %v10405_v44  ;;  %v10500_v43 = vcombine.low %v2693_v29, %v2701_v30  ;;  %v10515_v44 = vcombine.high %v2708_v37, %v2716_v38  ;;  %v10517_v45 = vcombine.high %v2709_v39, %v2717_v41  ;;  %v2804_v30 = vld [vmem:[%s16013_s9 + $0xf80] sm:$0xff] }
 0x4a2   : > { %5510 = vmatpush1.bf16.msra.mxu1 %v10402_v49  ;;  %5592 = vmatpush1.bf16.msra.mxu0 %v10404_v50  ;;  %v2733_v49 = vld [vmem:[%s16013_s9 + $0xd48] sm:$0xff]  ;;  %v10514_v50 = vcombine.low %v2708_v37, %v2716_v38 }
 0x4a3   : > { %5511 = vmatprep.subr.bf16.mxu1 %v10419_v53  ;;  %5593 = vmatprep.subr.bf16.mxu0 %v10421_v55  ;;  %v10516_v53 = vcombine.low %v2709_v39, %v2717_v41  ;;  %v10531_v55 = vcombine.high %v2724_v46, %v2732_v47  ;;  %v10533_v56 = vcombine.high %v2725_v48, %v2733_v49  ;;  %v2310_v41 = vld [vmem:[%s16013_s9 + $0x10] sm:$0xff] }
 0x4a6   : > { %5512 = vmatpush1.bf16.msra.mxu1 %v10418_v60  ;;  %5594 = vmatpush1.bf16.msra.mxu0 %v10420_v61  ;;  %v2749_v60 = vld [vmem:[%s16013_s9 + $0xdc8] sm:$0xff]  ;;  %v10530_v61 = vcombine.low %v2724_v46, %v2732_v47 }
 0x4a7   : > { %5513 = vmatprep.subr.bf16.mxu1 %v10435_v62  ;;  %5595 = vmatprep.subr.bf16.mxu0 %v10437_v63  ;;  %v10532_v62 = vcombine.low %v2725_v48, %v2733_v49  ;;  %v10547_v63 = vcombine.high %v2740_v57, %v2748_v58  ;;  %v10549_v0 = vcombine.high %v2741_v59, %v2749_v60  ;;  %v2326_v49 = vld [vmem:[%s16013_s9 + $0x90] sm:$0xff] }
 0x4aa   : > { %5514 = vmatpush1.bf16.msra.mxu1 %v10434_v4  ;;  %5596 = vmatpush1.bf16.msra.mxu0 %v10436_v5  ;;  %v2765_v4 = vld [vmem:[%s16013_s9 + $0xe48] sm:$0xff]  ;;  %v10546_v5 = vcombine.low %v2740_v57, %v2748_v58 }
 0x4ab   : > { %5515 = vmatprep.subr.bf16.mxu1 %v10451_v6  ;;  %5597 = vmatprep.subr.bf16.mxu0 %v10453_v7  ;;  %v10548_v6 = vcombine.low %v2741_v59, %v2749_v60  ;;  %v10563_v7 = vcombine.high %v2756_v1, %v2764_v2  ;;  %v10565_v8 = vcombine.high %v2757_v3, %v2765_v4 }
 0x4ae   : > { %5516 = vmatpush1.bf16.msra.mxu1 %v10450_v14  ;;  %5598 = vmatpush1.bf16.msra.mxu0 %v10452_v16  ;;  %v2781_v14 = vld [vmem:[%s16013_s9 + $0xec8] sm:$0xff]  ;;  %v10562_v16 = vcombine.low %v2756_v1, %v2764_v2 }
 0x4af   : > { %5517 = vmatprep.subr.bf16.mxu1 %v10467_v17  ;;  %5599 = vmatprep.subr.bf16.mxu0 %v10469_v18  ;;  %v10564_v17 = vcombine.low %v2757_v3, %v2765_v4  ;;  %v14111_v18 = vsub.s32 2, %v13721_v51  ;;  %v10581_v20 = vcombine.high %v2773_v13, %v2781_v14 }
 0x4b1   : > { %v1889_v27 = vrot.slane %v13929_v9, %v14111_v18  ;;  %v2813_v9 = vld [vmem:[%s16013_s9 + $0xfc8] sm:$0xff] }
 0x4b2   : > { %5518 = vmatpush1.bf16.msra.mxu1 %v10466_v23  ;;  %5600 = vmatpush1.bf16.msra.mxu0 %v10468_v24  ;;  %v2789_v23 = vld [vmem:[%s16013_s9 + $0xf08] sm:$0xff] }
 0x4b3   : > { %5519 = vmatprep.subr.bf16.mxu1 %v10483_v25  ;;  %5601 = vmatprep.subr.bf16.mxu0 %v10485_v26  ;;  %v2797_v24 = vld [vmem:[%s16013_s9 + $0xf48] sm:$0xff]  ;;  %v10578_v25 = vcombine.low %v2772_v11, %v2780_v12  ;;  %v10580_v26 = vcombine.low %v2773_v13, %v2781_v14  ;;  %v2294_v37 = vadd.f32 %v13940_v15, %v1889_v27  ;;  %v2319_v15 = vld [vmem:[%s16013_s9 + $0x58] sm:$0xff] }
 0x4b4   : > { %v10597_v29 = vcombine.high %v2789_v23, %v2797_v24  ;;  %v2391_v27 = vld [vmem:[%s16013_s9 + $0x298] sm:$0xff] }
 0x4b5   : > { %v2302_v46 = vmax.f32 %v2294_v37, 0.0  ;;  %v2415_v37 = vld [vmem:[%s16013_s9 + $0x358] sm:$0xff] }
 0x4b6   : > { %5520 = vmatpush1.bf16.msra.mxu1 %v10482_v31  ;;  %5602 = vmatpush1.bf16.msra.mxu0 %v10484_v34  ;;  %v2812_v31 = vld [vmem:[%s16013_s9 + $0xfc0] sm:$0xff]  ;;  %v2805_v34 = vld [vmem:[%s16013_s9 + $0xf88] sm:$0xff] }
 0x4b7   : > { %5521 = vmatprep.subr.bf16.mxu1 %v10499_v35  ;;  %5603 = vmatprep.subr.bf16.mxu0 %v10501_v36  ;;  %v10594_v35 = vcombine.low %v2788_v21, %v2796_v22  ;;  %v10596_v36 = vcombine.low %v2789_v23, %v2797_v24  ;;  %v10611_v38 = vcombine.high %v2804_v30, %v2812_v31 }
 0x4b8   : > { %v10613_v39 = vcombine.high %v2805_v34, %v2813_v9  ;;  %v14164_v57 = vpack.c.bf16 %v2302_v46, %v2302_v46 }
 0x4ba   : > { %5522 = vmatpush1.bf16.msra.mxu1 %v10498_v42  ;;  %5604 = vmatpush1.bf16.msra.mxu0 %v10500_v43  ;;  %v2318_v42 = vld [vmem:[%s16013_s9 + $0x50] sm:$0xff]  ;;  %v2311_v43 = vld [vmem:[%s16013_s9 + $0x18] sm:$0xff] }
 0x4bb   : > { %5523 = vmatprep.subr.bf16.mxu1 %v10515_v44  ;;  %5605 = vmatprep.subr.bf16.mxu0 %v10517_v45  ;;  %v10610_v44 = vcombine.low %v2804_v30, %v2812_v31  ;;  %v10612_v45 = vcombine.low %v2805_v34, %v2813_v9  ;;  %v10119_v47 = vcombine.high %v2310_v41, %v2318_v42  ;;  %v2406_v9 = vld [vmem:[%s16013_s9 + $0x310] sm:$0xff] }
 0x4bc   : > { %v10121_v48 = vcombine.high %v2311_v43, %v2319_v15  ;;  %v10120_v58 = vcombine.low %v2311_v43, %v2319_v15  ;;  %v2422_v43 = vld [vmem:[%s16013_s9 + $0x390] sm:$0xff] }
 0x4bd   : > { %v2430_v15 = vld [vmem:[%s16013_s9 + $0x3d0] sm:$0xff] }
 0x4be   : > { %5524 = vmatpush1.bf16.msra.mxu1 %v10514_v50  ;;  %5606 = vmatpush1.bf16.msra.mxu0 %v10516_v53  ;;  %v2334_v50 = vld [vmem:[%s16013_s9 + $0xd0] sm:$0xff]  ;;  %v2327_v53 = vld [vmem:[%s16013_s9 + $0x98] sm:$0xff] }
 0x4bf   : > { %5525 = vmatprep.subr.bf16.mxu1 %v10531_v55  ;;  %5607 = vmatprep.subr.bf16.mxu0 %v10533_v56  ;;  %v2335_v55 = vld [vmem:[%s16013_s9 + $0xd8] sm:$0xff]  ;;  %v10118_v56 = vcombine.low %v2310_v41, %v2318_v42  ;;  %v10135_v59 = vcombine.high %v2326_v49, %v2334_v50  ;;  %v10134_v1 = vcombine.low %v2326_v49, %v2334_v50  ;;  %v2438_v50 = vld [vmem:[%s16013_s9 + $0x410] sm:$0xff] }
 0x4c0   : > { %v10137_v60 = vcombine.high %v2327_v53, %v2335_v55  ;;  %v10136_v2 = vcombine.low %v2327_v53, %v2335_v55  ;;  %v2446_v53 = vld [vmem:[%s16013_s9 + $0x450] sm:$0xff]  ;;  %v2439_v55 = vld [vmem:[%s16013_s9 + $0x418] sm:$0xff] }
 0x4c2   : > { %5526 = vmatpush1.bf16.msra.mxu1 %v10530_v61  ;;  %5608 = vmatpush1.bf16.msra.mxu0 %v10532_v62  ;;  %v2342_v61 = vld [vmem:[%s16013_s9 + $0x110] sm:$0xff] }
 0x4c3   : > { %5527 = vmatprep.subr.bf16.mxu1 %v10547_v63  ;;  %5609 = vmatprep.subr.bf16.mxu0 %v10549_v0  ;;  %v2350_v62 = vld [vmem:[%s16013_s9 + $0x150] sm:$0xff]  ;;  %v2343_v63 = vld [vmem:[%s16013_s9 + $0x118] sm:$0xff] }
 0x4c4   : > { %v2351_v0 = vld [vmem:[%s16013_s9 + $0x158] sm:$0xff]  ;;  %v10151_v3 = vcombine.high %v2342_v61, %v2350_v62  ;;  %v10150_v11 = vcombine.low %v2342_v61, %v2350_v62  ;;  %v2454_v62 = vld [vmem:[%s16013_s9 + $0x490] sm:$0xff] }
 0x4c5   : > { %v10153_v4 = vcombine.high %v2343_v63, %v2351_v0  ;;  %v10152_v12 = vcombine.low %v2343_v63, %v2351_v0  ;;  %v2462_v63 = vld [vmem:[%s16013_s9 + $0x4d0] sm:$0xff]  ;;  %v2455_v0 = vld [vmem:[%s16013_s9 + $0x498] sm:$0xff] }
 0x4c6   : > { %5528 = vmatpush1.bf16.msra.mxu1 %v10546_v5  ;;  %5610 = vmatpush1.bf16.msra.mxu0 %v10548_v6  ;;  %v2358_v5 = vld [vmem:[%s16013_s9 + $0x190] sm:$0xff] }
 0x4c7   : > { %5529 = vmatprep.subr.bf16.mxu1 %v10563_v7  ;;  %5611 = vmatprep.subr.bf16.mxu0 %v10565_v8  ;;  %v2366_v6 = vld [vmem:[%s16013_s9 + $0x1d0] sm:$0xff]  ;;  %v2359_v7 = vld [vmem:[%s16013_s9 + $0x198] sm:$0xff] }
 0x4c8   : > { %v2367_v8 = vld [vmem:[%s16013_s9 + $0x1d8] sm:$0xff]  ;;  %v10167_v13 = vcombine.high %v2358_v5, %v2366_v6  ;;  %v10166_v21 = vcombine.low %v2358_v5, %v2366_v6  ;;  %v2470_v6 = vld [vmem:[%s16013_s9 + $0x510] sm:$0xff] }
 0x4c9   : > { %v10169_v14 = vcombine.high %v2359_v7, %v2367_v8  ;;  %v10168_v22 = vcombine.low %v2359_v7, %v2367_v8  ;;  %v2478_v7 = vld [vmem:[%s16013_s9 + $0x550] sm:$0xff]  ;;  %v2471_v8 = vld [vmem:[%s16013_s9 + $0x518] sm:$0xff] }
 0x4ca   : > { %5530 = vmatpush1.bf16.msra.mxu1 %v10562_v16  ;;  %5612 = vmatpush1.bf16.msra.mxu0 %v10564_v17  ;;  %v2374_v16 = vld [vmem:[%s16013_s9 + $0x210] sm:$0xff] }
 0x4cb   : > { %5531 = vmatprep.subr.bf16.mxu1 %v10579_v19  ;;  %5613 = vmatprep.subr.bf16.mxu0 %v10581_v20  ;;  %v2382_v17 = vld [vmem:[%s16013_s9 + $0x250] sm:$0xff]  ;;  %v2375_v19 = vld [vmem:[%s16013_s9 + $0x218] sm:$0xff] }
 0x4cc   : > { %v2383_v20 = vld [vmem:[%s16013_s9 + $0x258] sm:$0xff]  ;;  %v10183_v23 = vcombine.high %v2374_v16, %v2382_v17 }
 0x4cd   : > { %v10185_v24 = vcombine.high %v2375_v19, %v2383_v20  ;;  %v10184_v30 = vcombine.low %v2375_v19, %v2383_v20  ;;  %v2494_v19 = vld [vmem:[%s16013_s9 + $0x5d0] sm:$0xff]  ;;  %v2487_v20 = vld [vmem:[%s16013_s9 + $0x598] sm:$0xff] }
 0x4ce   : > { %5532 = vmatpush1.bf16.msra.mxu1 %v10578_v25  ;;  %5614 = vmatpush1.bf16.msra.mxu0 %v10580_v26  ;;  %v2390_v25 = vld [vmem:[%s16013_s9 + $0x290] sm:$0xff] }
 0x4cf   : > { %5533 = vmatprep.subr.bf16.mxu1 %v10595_v28  ;;  %5615 = vmatprep.subr.bf16.mxu0 %v10597_v29  ;;  %v2398_v26 = vld [vmem:[%s16013_s9 + $0x2d0] sm:$0xff]  ;;  %v2399_v28 = vld [vmem:[%s16013_s9 + $0x2d8] sm:$0xff]  ;;  %v10182_v29 = vcombine.low %v2374_v16, %v2382_v17 }
 0x4d0   : > { %v10199_v31 = vcombine.high %v2390_v25, %v2398_v26  ;;  %v10201_v34 = vcombine.high %v2391_v27, %v2399_v28  ;;  %v2486_v17 = vld [vmem:[%s16013_s9 + $0x590] sm:$0xff] }
 0x4d2   : > { %5534 = vmatpush1.bf16.msra.mxu1 %v10594_v35  ;;  %5616 = vmatpush1.bf16.msra.mxu0 %v10596_v36  ;;  %v2414_v35 = vld [vmem:[%s16013_s9 + $0x350] sm:$0xff]  ;;  %v2407_v36 = vld [vmem:[%s16013_s9 + $0x318] sm:$0xff] }
 0x4d3   : > { %5535 = vmatprep.subr.bf16.mxu1 %v10611_v38  ;;  %5617 = vmatprep.subr.bf16.mxu0 %v10613_v39  ;;  %v10198_v38 = vcombine.low %v2390_v25, %v2398_v26  ;;  %v10200_v39 = vcombine.low %v2391_v27, %v2399_v28  ;;  %v10215_v41 = vcombine.high %v2406_v9, %v2414_v35  ;;  %v2502_v26 = vld [vmem:[%s16013_s9 + $0x610] sm:$0xff]  ;;  %v2503_v28 = vld [vmem:[%s16013_s9 + $0x618] sm:$0xff] }
 0x4d4   : > { %v10217_v42 = vcombine.high %v2407_v36, %v2415_v37  ;;  %v10214_v46 = vcombine.low %v2406_v9, %v2414_v35  ;;  %v2510_v27 = vld [vmem:[%s16013_s9 + $0x650] sm:$0xff] }
 0x4d5   : > { %v2518_v35 = vld [vmem:[%s16013_s9 + $0x690] sm:$0xff] }
 0x4d6   : > { %5536 = vmatpush1.bf16.msra.mxu1 %v10610_v44  ;;  %5618 = vmatpush1.bf16.msra.mxu0 %v10612_v45  ;;  %v2423_v44 = vld [vmem:[%s16013_s9 + $0x398] sm:$0xff] }
 0x4d7   : > { %5628 = vmatprep.subr.bf16.mxu1 %v10119_v47  ;;  %5710 = vmatprep.subr.bf16.mxu0 %v10121_v48  ;;  %v2431_v45 = vld [vmem:[%s16013_s9 + $0x3d8] sm:$0xff]  ;;  %v10216_v47 = vcombine.low %v2407_v36, %v2415_v37  ;;  %v10231_v48 = vcombine.high %v2422_v43, %v2430_v15  ;;  %v2526_v36 = vld [vmem:[%s16013_s9 + $0x6d0] sm:$0xff] }
 0x4d8   : > { %v10233_v49 = vcombine.high %v2423_v44, %v2431_v45  ;;  %v2519_v37 = vld [vmem:[%s16013_s9 + $0x698] sm:$0xff] }
 0x4d9   : > { %5538 = vmatmul.mubr.bf16.vlgmr.msra.gmra.mrb[12].mxu1 %v14164_v57  ;;  %5620 = vmatmul.mubr.bf16.vlgmr.msra.gmra.mrb[8].mxu0 %v14164_v57 }
 0x4da   : > { %5629 = vmatpush1.bf16.msra.mxu1 %v10118_v56  ;;  %5660 = vmatprep.mubr.bf16.mxu1 %v13954_v32  ;;  %v2447_v56 = vld [vmem:[%s16013_s9 + $0x458] sm:$0xff] }
 0x4db   : > { %5711 = vmatpush1.bf16.msra.mxu0 %v10120_v58  ;;  %5742 = vmatprep.mubr.bf16.mxu0 %v13954_v32  ;;  %v10230_v58 = vcombine.low %v2422_v43, %v2430_v15  ;;  %v10249_v61 = vcombine.high %v2439_v55, %v2447_v56  ;;  %v2534_v15 = vld [vmem:[%s16013_s9 + $0x710] sm:$0xff] }
 0x4dc   : > { %5630 = vmatprep.subr.bf16.mxu1 %v10135_v59  ;;  %5712 = vmatprep.subr.bf16.mxu0 %v10137_v60  ;;  %v10232_v59 = vcombine.low %v2423_v44, %v2431_v45  ;;  %v10247_v60 = vcombine.high %v2438_v50, %v2446_v53  ;;  %v2542_v44 = vld [vmem:[%s16013_s9 + $0x750] sm:$0xff]  ;;  %v2535_v45 = vld [vmem:[%s16013_s9 + $0x718] sm:$0xff] }
 0x4de   : > { %5631 = vmatpush1.bf16.msra.mxu1 %v10134_v1  ;;  %v2463_v1 = vld [vmem:[%s16013_s9 + $0x4d8] sm:$0xff] }
 0x4df   : > { %5713 = vmatpush1.bf16.msra.mxu0 %v10136_v2  ;;  %5632 = vmatprep.subr.bf16.mxu1 %v10151_v3  ;;  %v10246_v2 = vcombine.low %v2438_v50, %v2446_v53  ;;  %v10248_v3 = vcombine.low %v2439_v55, %v2447_v56  ;;  %v10265_v5 = vcombine.high %v2455_v0, %v2463_v1  ;;  %v2550_v53 = vld [vmem:[%s16013_s9 + $0x790] sm:$0xff]  ;;  %v2551_v56 = vld [vmem:[%s16013_s9 + $0x798] sm:$0xff] }
 0x4e0   : > { %5714 = vmatprep.subr.bf16.mxu0 %v10153_v4  ;;  %v10263_v4 = vcombine.high %v2454_v62, %v2462_v63  ;;  %v2558_v55 = vld [vmem:[%s16013_s9 + $0x7d0] sm:$0xff] }
 0x4e2   : > { %5633 = vmatpush1.bf16.msra.mxu1 %v10150_v11  ;;  %v2479_v11 = vld [vmem:[%s16013_s9 + $0x558] sm:$0xff] }
 0x4e3   : > { %5715 = vmatpush1.bf16.msra.mxu0 %v10152_v12  ;;  %5634 = vmatprep.subr.bf16.mxu1 %v10167_v13  ;;  %v10262_v12 = vcombine.low %v2454_v62, %v2462_v63  ;;  %v10264_v13 = vcombine.low %v2455_v0, %v2463_v1  ;;  %v10281_v16 = vcombine.high %v2471_v8, %v2479_v11  ;;  %v2566_v63 = vld [vmem:[%s16013_s9 + $0x810] sm:$0xff]  ;;  %v2567_v1 = vld [vmem:[%s16013_s9 + $0x818] sm:$0xff] }
 0x4e4   : > { %5716 = vmatprep.subr.bf16.mxu0 %v10169_v14  ;;  %v10279_v14 = vcombine.high %v2470_v6, %v2478_v7  ;;  %v2574_v0 = vld [vmem:[%s16013_s9 + $0x850] sm:$0xff] }
 0x4e6   : > { %5635 = vmatpush1.bf16.msra.mxu1 %v10166_v21  ;;  %v2495_v21 = vld [vmem:[%s16013_s9 + $0x5d8] sm:$0xff] }
 0x4e7   : > { %5717 = vmatpush1.bf16.msra.mxu0 %v10168_v22  ;;  %5636 = vmatprep.subr.bf16.mxu1 %v10183_v23  ;;  %v10278_v22 = vcombine.low %v2470_v6, %v2478_v7  ;;  %v10280_v23 = vcombine.low %v2471_v8, %v2479_v11  ;;  %v10297_v25 = vcombine.high %v2487_v20, %v2495_v21  ;;  %v2582_v7 = vld [vmem:[%s16013_s9 + $0x890] sm:$0xff] }
 0x4e8   : > { %5718 = vmatprep.subr.bf16.mxu0 %v10185_v24  ;;  %v10295_v24 = vcombine.high %v2486_v17, %v2494_v19  ;;  %v2590_v8 = vld [vmem:[%s16013_s9 + $0x8d0] sm:$0xff]  ;;  %v10374_v11 = vcombine.low %v2566_v63, %v2574_v0 }
 0x4ea   : > { %5637 = vmatpush1.bf16.msra.mxu1 %v10182_v29  ;;  %v2511_v29 = vld [vmem:[%s16013_s9 + $0x658] sm:$0xff] }
 0x4eb   : > { %5719 = vmatpush1.bf16.msra.mxu0 %v10184_v30  ;;  %5638 = vmatprep.subr.bf16.mxu1 %v10199_v31  ;;  %v10294_v30 = vcombine.low %v2486_v17, %v2494_v19  ;;  %v10296_v31 = vcombine.low %v2487_v20, %v2495_v21  ;;  %v10313_v9 = vcombine.high %v2503_v28, %v2511_v29  ;;  %v2598_v17 = vld [vmem:[%s16013_s9 + $0x910] sm:$0xff]  ;;  %v2599_v21 = vld [vmem:[%s16013_s9 + $0x918] sm:$0xff] }
 0x4ec   : > { %5720 = vmatprep.subr.bf16.mxu0 %v10201_v34  ;;  %v10311_v34 = vcombine.high %v2502_v26, %v2510_v27  ;;  %v2606_v19 = vld [vmem:[%s16013_s9 + $0x950] sm:$0xff] }
 0x4ee   : > { %5639 = vmatpush1.bf16.msra.mxu1 %v10198_v38  ;;  %v2527_v38 = vld [vmem:[%s16013_s9 + $0x6d8] sm:$0xff] }
 0x4ef   : > { %5721 = vmatpush1.bf16.msra.mxu0 %v10200_v39  ;;  %5640 = vmatprep.subr.bf16.mxu1 %v10215_v41  ;;  %v10310_v39 = vcombine.low %v2502_v26, %v2510_v27  ;;  %v10312_v41 = vcombine.low %v2503_v28, %v2511_v29  ;;  %v10329_v43 = vcombine.high %v2519_v37, %v2527_v38  ;;  %v2614_v27 = vld [vmem:[%s16013_s9 + $0x990] sm:$0xff]  ;;  %v2615_v29 = vld [vmem:[%s16013_s9 + $0x998] sm:$0xff] }
 0x4f0   : > { %5722 = vmatprep.subr.bf16.mxu0 %v10217_v42  ;;  %v10327_v42 = vcombine.high %v2518_v35, %v2526_v36  ;;  %v2622_v28 = vld [vmem:[%s16013_s9 + $0x9d0] sm:$0xff] }
 0x4f2   : > { %5641 = vmatpush1.bf16.msra.mxu1 %v10214_v46  ;;  %v2543_v46 = vld [vmem:[%s16013_s9 + $0x758] sm:$0xff] }
 0x4f3   : > { %5723 = vmatpush1.bf16.msra.mxu0 %v10216_v47  ;;  %5642 = vmatprep.subr.bf16.mxu1 %v10231_v48  ;;  %v10326_v47 = vcombine.low %v2518_v35, %v2526_v36  ;;  %v10328_v48 = vcombine.low %v2519_v37, %v2527_v38  ;;  %v10345_v50 = vcombine.high %v2535_v45, %v2543_v46  ;;  %v2630_v36 = vld [vmem:[%s16013_s9 + $0xa10] sm:$0xff]  ;;  %v2631_v38 = vld [vmem:[%s16013_s9 + $0xa18] sm:$0xff] }
 0x4f4   : > { %5724 = vmatprep.subr.bf16.mxu0 %v10233_v49  ;;  %v10343_v49 = vcombine.high %v2534_v15, %v2542_v44  ;;  %v2638_v37 = vld [vmem:[%s16013_s9 + $0xa50] sm:$0xff] }
 0x4f6   : > { %5643 = vmatpush1.bf16.msra.mxu1 %v10230_v58  ;;  %v2559_v58 = vld [vmem:[%s16013_s9 + $0x7d8] sm:$0xff] }
 0x4f7   : > { %5725 = vmatpush1.bf16.msra.mxu0 %v10232_v59  ;;  %5644 = vmatprep.subr.bf16.mxu1 %v10247_v60  ;;  %v10342_v59 = vcombine.low %v2534_v15, %v2542_v44  ;;  %v10344_v60 = vcombine.low %v2535_v45, %v2543_v46  ;;  %v10361_v62 = vcombine.high %v2551_v56, %v2559_v58  ;;  %v2646_v44 = vld [vmem:[%s16013_s9 + $0xa90] sm:$0xff]  ;;  %v2647_v46 = vld [vmem:[%s16013_s9 + $0xa98] sm:$0xff] }
 0x4f8   : > { %5726 = vmatprep.subr.bf16.mxu0 %v10249_v61  ;;  %v10359_v61 = vcombine.high %v2550_v53, %v2558_v55  ;;  %v2654_v45 = vld [vmem:[%s16013_s9 + $0xad0] sm:$0xff] }
 0x4fa   : > { %5645 = vmatpush1.bf16.msra.mxu1 %v10246_v2  ;;  %v2575_v2 = vld [vmem:[%s16013_s9 + $0x858] sm:$0xff] }
 0x4fb   : > { %5727 = vmatpush1.bf16.msra.mxu0 %v10248_v3  ;;  %5646 = vmatprep.subr.bf16.mxu1 %v10263_v4  ;;  %v10358_v3 = vcombine.low %v2550_v53, %v2558_v55  ;;  %v10360_v4 = vcombine.low %v2551_v56, %v2559_v58  ;;  %v10377_v6 = vcombine.high %v2567_v1, %v2575_v2  ;;  %v2662_v55 = vld [vmem:[%s16013_s9 + $0xb10] sm:$0xff]  ;;  %v2663_v58 = vld [vmem:[%s16013_s9 + $0xb18] sm:$0xff] }
 0x4fc   : > { %5728 = vmatprep.subr.bf16.mxu0 %v10265_v5  ;;  %v10375_v5 = vcombine.high %v2566_v63, %v2574_v0  ;;  %v2670_v56 = vld [vmem:[%s16013_s9 + $0xb50] sm:$0xff] }
 0x4fd   : > { %v2678_v0 = vld [vmem:[%s16013_s9 + $0xb90] sm:$0xff] }
 0x4fe   : > { %5647 = vmatpush1.bf16.msra.mxu1 %v10262_v12  ;;  %v2583_v12 = vld [vmem:[%s16013_s9 + $0x898] sm:$0xff] }
 0x4ff   : > { %5729 = vmatpush1.bf16.msra.mxu0 %v10264_v13  ;;  %5648 = vmatprep.subr.bf16.mxu1 %v10279_v14  ;;  %v2591_v13 = vld [vmem:[%s16013_s9 + $0x8d8] sm:$0xff]  ;;  %v10376_v14 = vcombine.low %v2567_v1, %v2575_v2  ;;  %v2686_v1 = vld [vmem:[%s16013_s9 + $0xbd0] sm:$0xff] }
 0x500   : > { %5730 = vmatprep.subr.bf16.mxu0 %v10281_v16  ;;  %v10391_v16 = vcombine.high %v2582_v7, %v2590_v8  ;;  %v10393_v20 = vcombine.high %v2583_v12, %v2591_v13  ;;  %v2679_v2 = vld [vmem:[%s16013_s9 + $0xb98] sm:$0xff] }
 0x502   : > { %5649 = vmatpush1.bf16.msra.mxu1 %v10278_v22  ;;  %v2607_v22 = vld [vmem:[%s16013_s9 + $0x958] sm:$0xff] }
 0x503   : > { %5731 = vmatpush1.bf16.msra.mxu0 %v10280_v23  ;;  %5650 = vmatprep.subr.bf16.mxu1 %v10295_v24  ;;  %v10390_v23 = vcombine.low %v2582_v7, %v2590_v8  ;;  %v10392_v24 = vcombine.low %v2583_v12, %v2591_v13  ;;  %v10409_v26 = vcombine.high %v2599_v21, %v2607_v22  ;;  %v2694_v8 = vld [vmem:[%s16013_s9 + $0xc10] sm:$0xff]  ;;  %v2695_v12 = vld [vmem:[%s16013_s9 + $0xc18] sm:$0xff] }
 0x504   : > { %5732 = vmatprep.subr.bf16.mxu0 %v10297_v25  ;;  %v10407_v25 = vcombine.high %v2598_v17, %v2606_v19  ;;  %v2703_v13 = vld [vmem:[%s16013_s9 + $0xc58] sm:$0xff] }
 0x506   : > { %5651 = vmatpush1.bf16.msra.mxu1 %v10294_v30  ;;  %v2623_v30 = vld [vmem:[%s16013_s9 + $0x9d8] sm:$0xff] }
 0x507   : > { %5733 = vmatpush1.bf16.msra.mxu0 %v10296_v31  ;;  %5652 = vmatprep.subr.bf16.mxu1 %v10311_v34  ;;  %v10406_v31 = vcombine.low %v2598_v17, %v2606_v19  ;;  %v10408_v34 = vcombine.low %v2599_v21, %v2607_v22  ;;  %v10425_v35 = vcombine.high %v2615_v29, %v2623_v30  ;;  %v2718_v21 = vld [vmem:[%s16013_s9 + $0xcd0] sm:$0xff]  ;;  %v2711_v22 = vld [vmem:[%s16013_s9 + $0xc98] sm:$0xff] }
 0x508   : > { %5734 = vmatprep.subr.bf16.mxu0 %v10313_v9  ;;  %v10423_v9 = vcombine.high %v2614_v27, %v2622_v28  ;;  %v10505_v19 = vcombine.high %v2695_v12, %v2703_v13 }
 0x50a   : > { %5653 = vmatpush1.bf16.msra.mxu1 %v10310_v39  ;;  %v2639_v39 = vld [vmem:[%s16013_s9 + $0xa58] sm:$0xff] }
 0x50b   : > { %5735 = vmatpush1.bf16.msra.mxu0 %v10312_v41  ;;  %5654 = vmatprep.subr.bf16.mxu1 %v10327_v42  ;;  %v10422_v41 = vcombine.low %v2614_v27, %v2622_v28  ;;  %v10424_v42 = vcombine.low %v2615_v29, %v2623_v30  ;;  %v10441_v15 = vcombine.high %v2631_v38, %v2639_v39  ;;  %v2726_v28 = vld [vmem:[%s16013_s9 + $0xd10] sm:$0xff]  ;;  %v2727_v30 = vld [vmem:[%s16013_s9 + $0xd18] sm:$0xff] }
 0x50c   : > { %5736 = vmatprep.subr.bf16.mxu0 %v10329_v43  ;;  %v10439_v43 = vcombine.high %v2630_v36, %v2638_v37  ;;  %v2734_v29 = vld [vmem:[%s16013_s9 + $0xd50] sm:$0xff] }
 0x50e   : > { %5655 = vmatpush1.bf16.msra.mxu1 %v10326_v47  ;;  %v2655_v47 = vld [vmem:[%s16013_s9 + $0xad8] sm:$0xff] }
 0x50f   : > { %5737 = vmatpush1.bf16.msra.mxu0 %v10328_v48  ;;  %5656 = vmatprep.subr.bf16.mxu1 %v10343_v49  ;;  %v10438_v48 = vcombine.low %v2630_v36, %v2638_v37  ;;  %v10440_v49 = vcombine.low %v2631_v38, %v2639_v39  ;;  %v10457_v53 = vcombine.high %v2647_v46, %v2655_v47  ;;  %v2742_v37 = vld [vmem:[%s16013_s9 + $0xd90] sm:$0xff]  ;;  %v2743_v39 = vld [vmem:[%s16013_s9 + $0xd98] sm:$0xff] }
 0x510   : > { %5738 = vmatprep.subr.bf16.mxu0 %v10345_v50  ;;  %v10455_v50 = vcombine.high %v2646_v44, %v2654_v45  ;;  %v2750_v38 = vld [vmem:[%s16013_s9 + $0xdd0] sm:$0xff] }
 0x512   : > { %5657 = vmatpush1.bf16.msra.mxu1 %v10342_v59  ;;  %v2671_v59 = vld [vmem:[%s16013_s9 + $0xb58] sm:$0xff] }
 0x513   : > { %5739 = vmatpush1.bf16.msra.mxu0 %v10344_v60  ;;  %5658 = vmatprep.subr.bf16.mxu1 %v10359_v61  ;;  %v10454_v60 = vcombine.low %v2646_v44, %v2654_v45  ;;  %v10456_v61 = vcombine.low %v2647_v46, %v2655_v47  ;;  %v10473_v63 = vcombine.high %v2663_v58, %v2671_v59  ;;  %v2758_v45 = vld [vmem:[%s16013_s9 + $0xe10] sm:$0xff]  ;;  %v2759_v47 = vld [vmem:[%s16013_s9 + $0xe18] sm:$0xff] }
 0x514   : > { %5740 = vmatprep.subr.bf16.mxu0 %v10361_v62  ;;  %v10471_v62 = vcombine.high %v2662_v55, %v2670_v56  ;;  %v2766_v46 = vld [vmem:[%s16013_s9 + $0xe50] sm:$0xff] }
 0x516   : > { %5659 = vmatpush1.bf16.msra.mxu1 %v10358_v3  ;;  %v2687_v3 = vld [vmem:[%s16013_s9 + $0xbd8] sm:$0xff] }
 0x517   : > { %5741 = vmatpush1.bf16.msra.mxu0 %v10360_v4  ;;  %5669 = vmatprep.subr.bf16.mxu1 %v10375_v5  ;;  %v10470_v4 = vcombine.low %v2662_v55, %v2670_v56  ;;  %v10472_v5 = vcombine.low %v2663_v58, %v2671_v59  ;;  %v10489_v7 = vcombine.high %v2679_v2, %v2687_v3  ;;  %v2774_v56 = vld [vmem:[%s16013_s9 + $0xe90] sm:$0xff]  ;;  %v2775_v59 = vld [vmem:[%s16013_s9 + $0xe98] sm:$0xff] }
 0x518   : > { %5751 = vmatprep.subr.bf16.mxu0 %v10377_v6  ;;  %v10487_v6 = vcombine.high %v2678_v0, %v2686_v1  ;;  %v2782_v58 = vld [vmem:[%s16013_s9 + $0xed0] sm:$0xff] }
 0x519   : > { %5661 = vmatmul.mubr.bf16.vlgmr.msra.gmra.mrb[16].mxu1 %v13956_v33 }
 0x51a   : > { %5743 = vmatmul.mubr.bf16.vlgmr.msra.gmra.mrb[12].mxu0 %v13956_v33  ;;  %5670 = vmatpush1.bf16.msra.mxu1 %v10374_v11  ;;  %v2702_v11 = vld [vmem:[%s16013_s9 + $0xc50] sm:$0xff] }
 0x51b   : > { %5701 = vmatprep.mubr.bf16.mxu1 %v13972_v40  ;;  %5752 = vmatpush1.bf16.msra.mxu0 %v10376_v14  ;;  %v10486_v14 = vcombine.low %v2678_v0, %v2686_v1  ;;  %v10503_v17 = vcombine.high %v2694_v8, %v2702_v11  ;;  %v2790_v1 = vld [vmem:[%s16013_s9 + $0xf10] sm:$0xff] }
 0x51c   : > { %5783 = vmatprep.mubr.bf16.mxu0 %v13972_v40  ;;  %5671 = vmatprep.subr.bf16.mxu1 %v10391_v16  ;;  %v10488_v16 = vcombine.low %v2679_v2, %v2687_v3  ;;  %v2798_v2 = vld [vmem:[%s16013_s9 + $0xf50] sm:$0xff]  ;;  %v2791_v3 = vld [vmem:[%s16013_s9 + $0xf18] sm:$0xff] }
 0x51d   : > { %5753 = vmatprep.subr.bf16.mxu0 %v10393_v20  ;;  %v2710_v20 = vld [vmem:[%s16013_s9 + $0xc90] sm:$0xff] }
 0x51e   : > { %5672 = vmatpush1.bf16.msra.mxu1 %v10390_v23  ;;  %v2719_v23 = vld [vmem:[%s16013_s9 + $0xcd8] sm:$0xff] }
 0x51f   : > { %5754 = vmatpush1.bf16.msra.mxu0 %v10392_v24  ;;  %5673 = vmatprep.subr.bf16.mxu1 %v10407_v25  ;;  %v10502_v24 = vcombine.low %v2694_v8, %v2702_v11  ;;  %v10504_v25 = vcombine.low %v2695_v12, %v2703_v13  ;;  %v10521_v27 = vcombine.high %v2711_v22, %v2719_v23  ;;  %v2806_v11 = vld [vmem:[%s16013_s9 + $0xf90] sm:$0xff]  ;;  %v2807_v13 = vld [vmem:[%s16013_s9 + $0xf98] sm:$0xff] }
 0x520   : > { %5755 = vmatprep.subr.bf16.mxu0 %v10409_v26  ;;  %v10519_v26 = vcombine.high %v2710_v20, %v2718_v21  ;;  %v2814_v12 = vld [vmem:[%s16013_s9 + $0xfd0] sm:$0xff] }
 0x522   : > { %5674 = vmatpush1.bf16.msra.mxu1 %v10406_v31  ;;  %v2735_v31 = vld [vmem:[%s16013_s9 + $0xd58] sm:$0xff] }
 0x523   : > { %5756 = vmatpush1.bf16.msra.mxu0 %v10408_v34  ;;  %5675 = vmatprep.subr.bf16.mxu1 %v10423_v9  ;;  %v10518_v34 = vcombine.low %v2710_v20, %v2718_v21  ;;  %v10520_v9 = vcombine.low %v2711_v22, %v2719_v23  ;;  %v10537_v36 = vcombine.high %v2727_v30, %v2735_v31  ;;  %v2312_v21 = vld [vmem:[%s16013_s9 + $0x20] sm:$0xff]  ;;  %v2313_v23 = vld [vmem:[%s16013_s9 + $0x28] sm:$0xff] }
 0x524   : > { %5757 = vmatprep.subr.bf16.mxu0 %v10425_v35  ;;  %v10535_v35 = vcombine.high %v2726_v28, %v2734_v29  ;;  %v2320_v22 = vld [vmem:[%s16013_s9 + $0x60] sm:$0xff] }
 0x526   : > { %5676 = vmatpush1.bf16.msra.mxu1 %v10422_v41  ;;  %v2751_v41 = vld [vmem:[%s16013_s9 + $0xdd8] sm:$0xff] }
 0x527   : > { %5758 = vmatpush1.bf16.msra.mxu0 %v10424_v42  ;;  %5677 = vmatprep.subr.bf16.mxu1 %v10439_v43  ;;  %v10534_v42 = vcombine.low %v2726_v28, %v2734_v29  ;;  %v10536_v43 = vcombine.low %v2727_v30, %v2735_v31  ;;  %v10553_v44 = vcombine.high %v2743_v39, %v2751_v41  ;;  %v2328_v29 = vld [vmem:[%s16013_s9 + $0xa0] sm:$0xff] }
 0x528   : > { %5759 = vmatprep.subr.bf16.mxu0 %v10441_v15  ;;  %v10551_v15 = vcombine.high %v2742_v37, %v2750_v38  ;;  %v2336_v30 = vld [vmem:[%s16013_s9 + $0xe0] sm:$0xff]  ;;  %v10122_v31 = vcombine.low %v2312_v21, %v2320_v22 }
 0x52a   : > { %5678 = vmatpush1.bf16.msra.mxu1 %v10438_v48  ;;  %v2767_v48 = vld [vmem:[%s16013_s9 + $0xe58] sm:$0xff] }
 0x52b   : > { %5760 = vmatpush1.bf16.msra.mxu0 %v10440_v49  ;;  %5679 = vmatprep.subr.bf16.mxu1 %v10455_v50  ;;  %v10550_v49 = vcombine.low %v2742_v37, %v2750_v38  ;;  %v10552_v50 = vcombine.low %v2743_v39, %v2751_v41  ;;  %v10569_v55 = vcombine.high %v2759_v47, %v2767_v48  ;;  %v2344_v37 = vld [vmem:[%s16013_s9 + $0x120] sm:$0xff]  ;;  %v2345_v41 = vld [vmem:[%s16013_s9 + $0x128] sm:$0xff] }
 0x52c   : > { %5761 = vmatprep.subr.bf16.mxu0 %v10457_v53  ;;  %v10567_v53 = vcombine.high %v2758_v45, %v2766_v46  ;;  %v2352_v38 = vld [vmem:[%s16013_s9 + $0x160] sm:$0xff] }
 0x52e   : > { %5680 = vmatpush1.bf16.msra.mxu1 %v10454_v60  ;;  %v2783_v60 = vld [vmem:[%s16013_s9 + $0xed8] sm:$0xff] }
 0x52f   : > { %5762 = vmatpush1.bf16.msra.mxu0 %v10456_v61  ;;  %5681 = vmatprep.subr.bf16.mxu1 %v10471_v62  ;;  %v10566_v61 = vcombine.low %v2758_v45, %v2766_v46  ;;  %v10568_v62 = vcombine.low %v2759_v47, %v2767_v48  ;;  %v10585_v0 = vcombine.high %v2775_v59, %v2783_v60  ;;  %v2360_v46 = vld [vmem:[%s16013_s9 + $0x1a0] sm:$0xff]  ;;  %v2361_v48 = vld [vmem:[%s16013_s9 + $0x1a8] sm:$0xff] }
 0x530   : > { %5763 = vmatprep.subr.bf16.mxu0 %v10473_v63  ;;  %v10583_v63 = vcombine.high %v2774_v56, %v2782_v58  ;;  %v2368_v47 = vld [vmem:[%s16013_s9 + $0x1e0] sm:$0xff] }
 0x532   : > { %5682 = vmatpush1.bf16.msra.mxu1 %v10470_v4  ;;  %v2799_v4 = vld [vmem:[%s16013_s9 + $0xf58] sm:$0xff] }
 0x533   : > { %5764 = vmatpush1.bf16.msra.mxu0 %v10472_v5  ;;  %5683 = vmatprep.subr.bf16.mxu1 %v10487_v6  ;;  %v10582_v5 = vcombine.low %v2774_v56, %v2782_v58  ;;  %v10584_v6 = vcombine.low %v2775_v59, %v2783_v60  ;;  %v10601_v8 = vcombine.high %v2791_v3, %v2799_v4  ;;  %v2376_v58 = vld [vmem:[%s16013_s9 + $0x220] sm:$0xff]  ;;  %v2377_v60 = vld [vmem:[%s16013_s9 + $0x228] sm:$0xff] }
 0x534   : > { %5765 = vmatprep.subr.bf16.mxu0 %v10489_v7  ;;  %v10599_v7 = vcombine.high %v2790_v1, %v2798_v2  ;;  %v2384_v59 = vld [vmem:[%s16013_s9 + $0x260] sm:$0xff] }
 0x536   : > { %5684 = vmatpush1.bf16.msra.mxu1 %v10486_v14  ;;  %v2815_v14 = vld [vmem:[%s16013_s9 + $0xfd8] sm:$0xff] }
 0x537   : > { %5766 = vmatpush1.bf16.msra.mxu0 %v10488_v16  ;;  %5685 = vmatprep.subr.bf16.mxu1 %v10503_v17  ;;  %v10598_v16 = vcombine.low %v2790_v1, %v2798_v2  ;;  %v10600_v17 = vcombine.low %v2791_v3, %v2799_v4  ;;  %v10617_v20 = vcombine.high %v2807_v13, %v2815_v14  ;;  %v2392_v2 = vld [vmem:[%s16013_s9 + $0x2a0] sm:$0xff]  ;;  %v2393_v4 = vld [vmem:[%s16013_s9 + $0x2a8] sm:$0xff] }
 0x538   : > { %5767 = vmatprep.subr.bf16.mxu0 %v10505_v19  ;;  %v10615_v19 = vcombine.high %v2806_v11, %v2814_v12  ;;  %v2400_v3 = vld [vmem:[%s16013_s9 + $0x2e0] sm:$0xff] }
 0x53a   : > { %5686 = vmatpush1.bf16.msra.mxu1 %v10502_v24  ;;  %v2321_v24 = vld [vmem:[%s16013_s9 + $0x68] sm:$0xff] }
 0x53b   : > { %5768 = vmatpush1.bf16.msra.mxu0 %v10504_v25  ;;  %5687 = vmatprep.subr.bf16.mxu1 %v10519_v26  ;;  %v10614_v25 = vcombine.low %v2806_v11, %v2814_v12  ;;  %v10616_v26 = vcombine.low %v2807_v13, %v2815_v14  ;;  %v10125_v28 = vcombine.high %v2313_v23, %v2321_v24  ;;  %v2408_v12 = vld [vmem:[%s16013_s9 + $0x320] sm:$0xff]  ;;  %v2409_v14 = vld [vmem:[%s16013_s9 + $0x328] sm:$0xff] }
 0x53c   : > { %5769 = vmatprep.subr.bf16.mxu0 %v10521_v27  ;;  %v10123_v27 = vcombine.high %v2312_v21, %v2320_v22  ;;  %v2416_v13 = vld [vmem:[%s16013_s9 + $0x360] sm:$0xff] }
 0x53d   : > { %v2424_v22 = vld [vmem:[%s16013_s9 + $0x3a0] sm:$0xff] }
 0x53e   : > { %5688 = vmatpush1.bf16.msra.mxu1 %v10518_v34  ;;  %v2329_v34 = vld [vmem:[%s16013_s9 + $0xa8] sm:$0xff] }
 0x53f   : > { %5770 = vmatpush1.bf16.msra.mxu0 %v10520_v9  ;;  %5689 = vmatprep.subr.bf16.mxu1 %v10535_v35  ;;  %v2337_v9 = vld [vmem:[%s16013_s9 + $0xe8] sm:$0xff]  ;;  %v10124_v35 = vcombine.low %v2313_v23, %v2321_v24  ;;  %v2432_v23 = vld [vmem:[%s16013_s9 + $0x3e0] sm:$0xff] }
 0x540   : > { %5771 = vmatprep.subr.bf16.mxu0 %v10537_v36  ;;  %v10139_v36 = vcombine.high %v2328_v29, %v2336_v30  ;;  %v10141_v39 = vcombine.high %v2329_v34, %v2337_v9  ;;  %v2425_v24 = vld [vmem:[%s16013_s9 + $0x3a8] sm:$0xff] }
 0x542   : > { %5690 = vmatpush1.bf16.msra.mxu1 %v10534_v42  ;;  %v2353_v42 = vld [vmem:[%s16013_s9 + $0x168] sm:$0xff] }
 0x543   : > { %5772 = vmatpush1.bf16.msra.mxu0 %v10536_v43  ;;  %5691 = vmatprep.subr.bf16.mxu1 %v10551_v15  ;;  %v10138_v43 = vcombine.low %v2328_v29, %v2336_v30  ;;  %v10140_v15 = vcombine.low %v2329_v34, %v2337_v9  ;;  %v10157_v45 = vcombine.high %v2345_v41, %v2353_v42  ;;  %v2440_v30 = vld [vmem:[%s16013_s9 + $0x420] sm:$0xff]  ;;  %v2441_v34 = vld [vmem:[%s16013_s9 + $0x428] sm:$0xff] }
 0x544   : > { %5773 = vmatprep.subr.bf16.mxu0 %v10553_v44  ;;  %v10155_v44 = vcombine.high %v2344_v37, %v2352_v38  ;;  %v2449_v9 = vld [vmem:[%s16013_s9 + $0x468] sm:$0xff] }
 0x546   : > { %5692 = vmatpush1.bf16.msra.mxu1 %v10550_v49  ;;  %v2369_v49 = vld [vmem:[%s16013_s9 + $0x1e8] sm:$0xff] }
 0x547   : > { %5774 = vmatpush1.bf16.msra.mxu0 %v10552_v50  ;;  %5693 = vmatprep.subr.bf16.mxu1 %v10567_v53  ;;  %v10154_v50 = vcombine.low %v2344_v37, %v2352_v38  ;;  %v10156_v53 = vcombine.low %v2345_v41, %v2353_v42  ;;  %v10173_v56 = vcombine.high %v2361_v48, %v2369_v49  ;;  %v2464_v41 = vld [vmem:[%s16013_s9 + $0x4e0] sm:$0xff]  ;;  %v2457_v42 = vld [vmem:[%s16013_s9 + $0x4a8] sm:$0xff] }
 0x548   : > { %5775 = vmatprep.subr.bf16.mxu0 %v10569_v55  ;;  %v10171_v55 = vcombine.high %v2360_v46, %v2368_v47  ;;  %v10253_v38 = vcombine.high %v2441_v34, %v2449_v9 }
 0x54a   : > { %5694 = vmatpush1.bf16.msra.mxu1 %v10566_v61  ;;  %v2385_v61 = vld [vmem:[%s16013_s9 + $0x268] sm:$0xff] }
 0x54b   : > { %5776 = vmatpush1.bf16.msra.mxu0 %v10568_v62  ;;  %5695 = vmatprep.subr.bf16.mxu1 %v10583_v63  ;;  %v10170_v62 = vcombine.low %v2360_v46, %v2368_v47  ;;  %v10172_v63 = vcombine.low %v2361_v48, %v2369_v49  ;;  %v10189_v1 = vcombine.high %v2377_v60, %v2385_v61  ;;  %v2472_v47 = vld [vmem:[%s16013_s9 + $0x520] sm:$0xff]  ;;  %v2473_v49 = vld [vmem:[%s16013_s9 + $0x528] sm:$0xff] }
 0x54c   : > { %5777 = vmatprep.subr.bf16.mxu0 %v10585_v0  ;;  %v10187_v0 = vcombine.high %v2376_v58, %v2384_v59  ;;  %v2480_v48 = vld [vmem:[%s16013_s9 + $0x560] sm:$0xff] }
 0x54e   : > { %5696 = vmatpush1.bf16.msra.mxu1 %v10582_v5  ;;  %v2401_v5 = vld [vmem:[%s16013_s9 + $0x2e8] sm:$0xff] }
 0x54f   : > { %5778 = vmatpush1.bf16.msra.mxu0 %v10584_v6  ;;  %5697 = vmatprep.subr.bf16.mxu1 %v10599_v7  ;;  %v10186_v6 = vcombine.low %v2376_v58, %v2384_v59  ;;  %v10188_v7 = vcombine.low %v2377_v60, %v2385_v61  ;;  %v10205_v11 = vcombine.high %v2393_v4, %v2401_v5  ;;  %v2488_v59 = vld [vmem:[%s16013_s9 + $0x5a0] sm:$0xff]  ;;  %v2489_v61 = vld [vmem:[%s16013_s9 + $0x5a8] sm:$0xff] }
 0x550   : > { %5779 = vmatprep.subr.bf16.mxu0 %v10601_v8  ;;  %v10203_v8 = vcombine.high %v2392_v2, %v2400_v3  ;;  %v2496_v60 = vld [vmem:[%s16013_s9 + $0x5e0] sm:$0xff] }
 0x552   : > { %5698 = vmatpush1.bf16.msra.mxu1 %v10598_v16  ;;  %v2417_v16 = vld [vmem:[%s16013_s9 + $0x368] sm:$0xff] }
 0x553   : > { %5780 = vmatpush1.bf16.msra.mxu0 %v10600_v17  ;;  %5699 = vmatprep.subr.bf16.mxu1 %v10615_v19  ;;  %v10202_v17 = vcombine.low %v2392_v2, %v2400_v3  ;;  %v10204_v19 = vcombine.low %v2393_v4, %v2401_v5  ;;  %v10221_v21 = vcombine.high %v2409_v14, %v2417_v16  ;;  %v2504_v3 = vld [vmem:[%s16013_s9 + $0x620] sm:$0xff]  ;;  %v2505_v5 = vld [vmem:[%s16013_s9 + $0x628] sm:$0xff] }
 0x554   : > { %5781 = vmatprep.subr.bf16.mxu0 %v10617_v20  ;;  %v10219_v20 = vcombine.high %v2408_v12, %v2416_v13  ;;  %v2512_v4 = vld [vmem:[%s16013_s9 + $0x660] sm:$0xff] }
 0x556   : > { %5700 = vmatpush1.bf16.msra.mxu1 %v10614_v25  ;;  %v2433_v25 = vld [vmem:[%s16013_s9 + $0x3e8] sm:$0xff] }
 0x557   : > { %5782 = vmatpush1.bf16.msra.mxu0 %v10616_v26  ;;  %5792 = vmatprep.subr.bf16.mxu1 %v10123_v27  ;;  %v10218_v26 = vcombine.low %v2408_v12, %v2416_v13  ;;  %v10220_v27 = vcombine.low %v2409_v14, %v2417_v16  ;;  %v10237_v29 = vcombine.high %v2425_v24, %v2433_v25  ;;  %v2520_v13 = vld [vmem:[%s16013_s9 + $0x6a0] sm:$0xff]  ;;  %v2521_v16 = vld [vmem:[%s16013_s9 + $0x6a8] sm:$0xff] }
 0x558   : > { %5874 = vmatprep.subr.bf16.mxu0 %v10125_v28  ;;  %v10235_v28 = vcombine.high %v2424_v22, %v2432_v23  ;;  %v2528_v14 = vld [vmem:[%s16013_s9 + $0x6e0] sm:$0xff] }
 0x559   : > { %5702 = vmatmul.mubr.bf16.vlgmr.msra.gmra.mrb[16].mxu1 %v14164_v57 }
 0x55a   : > { %5784 = vmatmul.mubr.bf16.vlgmr.msra.gmra.mrb[12].mxu0 %v14164_v57  ;;  %5793 = vmatpush1.bf16.msra.mxu1 %v10122_v31  ;;  %v2448_v31 = vld [vmem:[%s16013_s9 + $0x460] sm:$0xff] }
 0x55b   : > { %5824 = vmatprep.mubr.bf16.mxu1 %v13954_v32  ;;  %5875 = vmatpush1.bf16.msra.mxu0 %v10124_v35  ;;  %v10234_v35 = vcombine.low %v2424_v22, %v2432_v23  ;;  %v10251_v37 = vcombine.high %v2440_v30, %v2448_v31  ;;  %v2536_v23 = vld [vmem:[%s16013_s9 + $0x720] sm:$0xff] }
 0x55c   : > { %5906 = vmatprep.mubr.bf16.mxu0 %v13954_v32  ;;  %5794 = vmatprep.subr.bf16.mxu1 %v10139_v36  ;;  %v10236_v36 = vcombine.low %v2425_v24, %v2433_v25  ;;  %v2544_v24 = vld [vmem:[%s16013_s9 + $0x760] sm:$0xff]  ;;  %v2537_v25 = vld [vmem:[%s16013_s9 + $0x728] sm:$0xff] }
 0x55d   : > { %5876 = vmatprep.subr.bf16.mxu0 %v10141_v39  ;;  %v2456_v39 = vld [vmem:[%s16013_s9 + $0x4a0] sm:$0xff] }
 0x55e   : > { %5795 = vmatpush1.bf16.msra.mxu1 %v10138_v43  ;;  %v2465_v43 = vld [vmem:[%s16013_s9 + $0x4e8] sm:$0xff] }
 0x55f   : > { %5877 = vmatpush1.bf16.msra.mxu0 %v10140_v15  ;;  %5796 = vmatprep.subr.bf16.mxu1 %v10155_v44  ;;  %v10250_v15 = vcombine.low %v2440_v30, %v2448_v31  ;;  %v10252_v44 = vcombine.low %v2441_v34, %v2449_v9  ;;  %v10269_v46 = vcombine.high %v2457_v42, %v2465_v43  ;;  %v2552_v31 = vld [vmem:[%s16013_s9 + $0x7a0] sm:$0xff]  ;;  %v2553_v9 = vld [vmem:[%s16013_s9 + $0x7a8] sm:$0xff] }
 0x560   : > { %5878 = vmatprep.subr.bf16.mxu0 %v10157_v45  ;;  %v10267_v45 = vcombine.high %v2456_v39, %v2464_v41  ;;  %v2560_v34 = vld [vmem:[%s16013_s9 + $0x7e0] sm:$0xff] }
 0x562   : > { %5797 = vmatpush1.bf16.msra.mxu1 %v10154_v50  ;;  %v2481_v50 = vld [vmem:[%s16013_s9 + $0x568] sm:$0xff] }
 0x563   : > { %5879 = vmatpush1.bf16.msra.mxu0 %v10156_v53  ;;  %5798 = vmatprep.subr.bf16.mxu1 %v10171_v55  ;;  %v10266_v53 = vcombine.low %v2456_v39, %v2464_v41  ;;  %v10268_v55 = vcombine.low %v2457_v42, %v2465_v43  ;;  %v10285_v58 = vcombine.high %v2473_v49, %v2481_v50  ;;  %v2568_v41 = vld [vmem:[%s16013_s9 + $0x820] sm:$0xff]  ;;  %v2569_v43 = vld [vmem:[%s16013_s9 + $0x828] sm:$0xff] }
 0x564   : > { %5880 = vmatprep.subr.bf16.mxu0 %v10173_v56  ;;  %v10283_v56 = vcombine.high %v2472_v47, %v2480_v48  ;;  %v2576_v42 = vld [vmem:[%s16013_s9 + $0x860] sm:$0xff] }
 0x566   : > { %5799 = vmatpush1.bf16.msra.mxu1 %v10170_v62  ;;  %v2497_v62 = vld [vmem:[%s16013_s9 + $0x5e8] sm:$0xff] }
 0x567   : > { %5881 = vmatpush1.bf16.msra.mxu0 %v10172_v63  ;;  %5800 = vmatprep.subr.bf16.mxu1 %v10187_v0  ;;  %v10282_v63 = vcombine.low %v2472_v47, %v2480_v48  ;;  %v10284_v0 = vcombine.low %v2473_v49, %v2481_v50  ;;  %v10301_v2 = vcombine.high %v2489_v61, %v2497_v62  ;;  %v2584_v48 = vld [vmem:[%s16013_s9 + $0x8a0] sm:$0xff] }
 0x568   : > { %5882 = vmatprep.subr.bf16.mxu0 %v10189_v1  ;;  %v10299_v1 = vcombine.high %v2488_v59, %v2496_v60  ;;  %v2592_v49 = vld [vmem:[%s16013_s9 + $0x8e0] sm:$0xff]  ;;  %v10378_v50 = vcombine.low %v2568_v41, %v2576_v42 }
 0x56a   : > { %5801 = vmatpush1.bf16.msra.mxu1 %v10186_v6  ;;  %v2513_v6 = vld [vmem:[%s16013_s9 + $0x668] sm:$0xff] }
 0x56b   : > { %5883 = vmatpush1.bf16.msra.mxu0 %v10188_v7  ;;  %5802 = vmatprep.subr.bf16.mxu1 %v10203_v8  ;;  %v10298_v7 = vcombine.low %v2488_v59, %v2496_v60  ;;  %v10300_v8 = vcombine.low %v2489_v61, %v2497_v62  ;;  %v10317_v12 = vcombine.high %v2505_v5, %v2513_v6  ;;  %v2600_v59 = vld [vmem:[%s16013_s9 + $0x920] sm:$0xff]  ;;  %v2601_v62 = vld [vmem:[%s16013_s9 + $0x928] sm:$0xff] }
 0x56c   : > { %5884 = vmatprep.subr.bf16.mxu0 %v10205_v11  ;;  %v10315_v11 = vcombine.high %v2504_v3, %v2512_v4  ;;  %v2608_v60 = vld [vmem:[%s16013_s9 + $0x960] sm:$0xff] }
 0x56e   : > { %5803 = vmatpush1.bf16.msra.mxu1 %v10202_v17  ;;  %v2529_v17 = vld [vmem:[%s16013_s9 + $0x6e8] sm:$0xff] }
 0x56f   : > { %5885 = vmatpush1.bf16.msra.mxu0 %v10204_v19  ;;  %5804 = vmatprep.subr.bf16.mxu1 %v10219_v20  ;;  %v10314_v19 = vcombine.low %v2504_v3, %v2512_v4  ;;  %v10316_v20 = vcombine.low %v2505_v5, %v2513_v6  ;;  %v10333_v22 = vcombine.high %v2521_v16, %v2529_v17  ;;  %v2616_v4 = vld [vmem:[%s16013_s9 + $0x9a0] sm:$0xff]  ;;  %v2617_v6 = vld [vmem:[%s16013_s9 + $0x9a8] sm:$0xff] }
 0x570   : > { %5886 = vmatprep.subr.bf16.mxu0 %v10221_v21  ;;  %v10331_v21 = vcombine.high %v2520_v13, %v2528_v14  ;;  %v2624_v5 = vld [vmem:[%s16013_s9 + $0x9e0] sm:$0xff] }
 0x572   : > { %5805 = vmatpush1.bf16.msra.mxu1 %v10218_v26  ;;  %v2545_v26 = vld [vmem:[%s16013_s9 + $0x768] sm:$0xff] }
 0x573   : > { %5887 = vmatpush1.bf16.msra.mxu0 %v10220_v27  ;;  %5806 = vmatprep.subr.bf16.mxu1 %v10235_v28  ;;  %v10330_v27 = vcombine.low %v2520_v13, %v2528_v14  ;;  %v10332_v28 = vcombine.low %v2521_v16, %v2529_v17  ;;  %v10349_v30 = vcombine.high %v2537_v25, %v2545_v26  ;;  %v2632_v14 = vld [vmem:[%s16013_s9 + $0xa20] sm:$0xff]  ;;  %v2633_v17 = vld [vmem:[%s16013_s9 + $0xa28] sm:$0xff] }
 0x574   : > { %5888 = vmatprep.subr.bf16.mxu0 %v10237_v29  ;;  %v10347_v29 = vcombine.high %v2536_v23, %v2544_v24  ;;  %v2640_v16 = vld [vmem:[%s16013_s9 + $0xa60] sm:$0xff] }
 0x576   : > { %5807 = vmatpush1.bf16.msra.mxu1 %v10234_v35  ;;  %v2561_v35 = vld [vmem:[%s16013_s9 + $0x7e8] sm:$0xff] }
 0x577   : > { %5889 = vmatpush1.bf16.msra.mxu0 %v10236_v36  ;;  %5808 = vmatprep.subr.bf16.mxu1 %v10251_v37  ;;  %v10346_v36 = vcombine.low %v2536_v23, %v2544_v24  ;;  %v10348_v37 = vcombine.low %v2537_v25, %v2545_v26  ;;  %v10365_v39 = vcombine.high %v2553_v9, %v2561_v35  ;;  %v2648_v24 = vld [vmem:[%s16013_s9 + $0xaa0] sm:$0xff]  ;;  %v2649_v26 = vld [vmem:[%s16013_s9 + $0xaa8] sm:$0xff] }
 0x578   : > { %5890 = vmatprep.subr.bf16.mxu0 %v10253_v38  ;;  %v10363_v38 = vcombine.high %v2552_v31, %v2560_v34  ;;  %v2656_v25 = vld [vmem:[%s16013_s9 + $0xae0] sm:$0xff] }
 0x57a   : > { %5809 = vmatpush1.bf16.msra.mxu1 %v10250_v15  ;;  %v2577_v15 = vld [vmem:[%s16013_s9 + $0x868] sm:$0xff] }
 0x57b   : > { %5891 = vmatpush1.bf16.msra.mxu0 %v10252_v44  ;;  %5810 = vmatprep.subr.bf16.mxu1 %v10267_v45  ;;  %v10362_v44 = vcombine.low %v2552_v31, %v2560_v34  ;;  %v10364_v45 = vcombine.low %v2553_v9, %v2561_v35  ;;  %v10381_v47 = vcombine.high %v2569_v43, %v2577_v15  ;;  %v2664_v34 = vld [vmem:[%s16013_s9 + $0xb20] sm:$0xff]  ;;  %v2665_v35 = vld [vmem:[%s16013_s9 + $0xb28] sm:$0xff] }
 0x57c   : > { %5892 = vmatprep.subr.bf16.mxu0 %v10269_v46  ;;  %v10379_v46 = vcombine.high %v2568_v41, %v2576_v42  ;;  %v2672_v9 = vld [vmem:[%s16013_s9 + $0xb60] sm:$0xff] }
 0x57e   : > { %5811 = vmatpush1.bf16.msra.mxu1 %v10266_v53  ;;  %v2585_v53 = vld [vmem:[%s16013_s9 + $0x8a8] sm:$0xff] }
 0x57f   : > { %5893 = vmatpush1.bf16.msra.mxu0 %v10268_v55  ;;  %5812 = vmatprep.subr.bf16.mxu1 %v10283_v56  ;;  %v2593_v55 = vld [vmem:[%s16013_s9 + $0x8e8] sm:$0xff]  ;;  %v10380_v56 = vcombine.low %v2569_v43, %v2577_v15  ;;  %v2680_v15 = vld [vmem:[%s16013_s9 + $0xba0] sm:$0xff] }
 0x580   : > { %5894 = vmatprep.subr.bf16.mxu0 %v10285_v58  ;;  %v10395_v58 = vcombine.high %v2584_v48, %v2592_v49  ;;  %v10397_v61 = vcombine.high %v2585_v53, %v2593_v55 }
 0x582   : > { %5813 = vmatpush1.bf16.msra.mxu1 %v10282_v63  ;;  %v2609_v63 = vld [vmem:[%s16013_s9 + $0x968] sm:$0xff] }
 0x583   : > { %5895 = vmatpush1.bf16.msra.mxu0 %v10284_v0  ;;  %5814 = vmatprep.subr.bf16.mxu1 %v10299_v1  ;;  %v10394_v0 = vcombine.low %v2584_v48, %v2592_v49  ;;  %v10396_v1 = vcombine.low %v2585_v53, %v2593_v55  ;;  %v10413_v3 = vcombine.high %v2601_v62, %v2609_v63  ;;  %v2689_v48 = vld [vmem:[%s16013_s9 + $0xbe8] sm:$0xff] }
 0x584   : > { %5896 = vmatprep.subr.bf16.mxu0 %v10301_v2  ;;  %v10411_v2 = vcombine.high %v2600_v59, %v2608_v60  ;;  %v10474_v53 = vcombine.low %v2664_v34, %v2672_v9 }
 0x586   : > { %5815 = vmatpush1.bf16.msra.mxu1 %v10298_v7  ;;  %v2625_v7 = vld [vmem:[%s16013_s9 + $0x9e8] sm:$0xff] }
 0x587   : > { %5897 = vmatpush1.bf16.msra.mxu0 %v10300_v8  ;;  %5816 = vmatprep.subr.bf16.mxu1 %v10315_v11  ;;  %v10410_v8 = vcombine.low %v2600_v59, %v2608_v60  ;;  %v10412_v11 = vcombine.low %v2601_v62, %v2609_v63  ;;  %v10429_v13 = vcombine.high %v2617_v6, %v2625_v7  ;;  %v2704_v62 = vld [vmem:[%s16013_s9 + $0xc60] sm:$0xff]  ;;  %v2697_v63 = vld [vmem:[%s16013_s9 + $0xc28] sm:$0xff] }
 0x588   : > { %5898 = vmatprep.subr.bf16.mxu0 %v10317_v12  ;;  %v10427_v12 = vcombine.high %v2616_v4, %v2624_v5 }
 0x58a   : > { %5817 = vmatpush1.bf16.msra.mxu1 %v10314_v19  ;;  %v2641_v19 = vld [vmem:[%s16013_s9 + $0xa68] sm:$0xff] }
 0x58b   : > { %5899 = vmatpush1.bf16.msra.mxu0 %v10316_v20  ;;  %5818 = vmatprep.subr.bf16.mxu1 %v10331_v21  ;;  %v10426_v20 = vcombine.low %v2616_v4, %v2624_v5  ;;  %v10428_v21 = vcombine.low %v2617_v6, %v2625_v7  ;;  %v10445_v23 = vcombine.high %v2633_v17, %v2641_v19  ;;  %v2712_v5 = vld [vmem:[%s16013_s9 + $0xca0] sm:$0xff]  ;;  %v2713_v7 = vld [vmem:[%s16013_s9 + $0xca8] sm:$0xff] }
 0x58c   : > { %5900 = vmatprep.subr.bf16.mxu0 %v10333_v22  ;;  %v10443_v22 = vcombine.high %v2632_v14, %v2640_v16  ;;  %v2720_v6 = vld [vmem:[%s16013_s9 + $0xce0] sm:$0xff] }
 0x58e   : > { %5819 = vmatpush1.bf16.msra.mxu1 %v10330_v27  ;;  %v2657_v27 = vld [vmem:[%s16013_s9 + $0xae8] sm:$0xff] }
 0x58f   : > { %5901 = vmatpush1.bf16.msra.mxu0 %v10332_v28  ;;  %5820 = vmatprep.subr.bf16.mxu1 %v10347_v29  ;;  %v10442_v28 = vcombine.low %v2632_v14, %v2640_v16  ;;  %v10444_v29 = vcombine.low %v2633_v17, %v2641_v19  ;;  %v10461_v31 = vcombine.high %v2649_v26, %v2657_v27  ;;  %v2728_v16 = vld [vmem:[%s16013_s9 + $0xd20] sm:$0xff]  ;;  %v2729_v19 = vld [vmem:[%s16013_s9 + $0xd28] sm:$0xff] }
 0x590   : > { %5902 = vmatprep.subr.bf16.mxu0 %v10349_v30  ;;  %v10459_v30 = vcombine.high %v2648_v24, %v2656_v25  ;;  %v2736_v17 = vld [vmem:[%s16013_s9 + $0xd60] sm:$0xff] }
 0x592   : > { %5821 = vmatpush1.bf16.msra.mxu1 %v10346_v36  ;;  %v2673_v36 = vld [vmem:[%s16013_s9 + $0xb68] sm:$0xff] }
 0x593   : > { %5903 = vmatpush1.bf16.msra.mxu0 %v10348_v37  ;;  %5822 = vmatprep.subr.bf16.mxu1 %v10363_v38  ;;  %v10458_v37 = vcombine.low %v2648_v24, %v2656_v25  ;;  %v10460_v38 = vcombine.low %v2649_v26, %v2657_v27  ;;  %v10477_v43 = vcombine.high %v2665_v35, %v2673_v36  ;;  %v2744_v25 = vld [vmem:[%s16013_s9 + $0xda0] sm:$0xff]  ;;  %v2745_v27 = vld [vmem:[%s16013_s9 + $0xda8] sm:$0xff] }
 0x594   : > { %5904 = vmatprep.subr.bf16.mxu0 %v10365_v39  ;;  %v10475_v39 = vcombine.high %v2664_v34, %v2672_v9  ;;  %v2752_v26 = vld [vmem:[%s16013_s9 + $0xde0] sm:$0xff] }
 0x595   : > { %v2760_v9 = vld [vmem:[%s16013_s9 + $0xe20] sm:$0xff] }
 0x596   : > { %5823 = vmatpush1.bf16.msra.mxu1 %v10362_v44  ;;  %v2688_v44 = vld [vmem:[%s16013_s9 + $0xbe0] sm:$0xff] }
 0x597   : > { %5905 = vmatpush1.bf16.msra.mxu0 %v10364_v45  ;;  %5833 = vmatprep.subr.bf16.mxu1 %v10379_v46  ;;  %v10491_v59 = vcombine.high %v2680_v15, %v2688_v44 }
 0x598   : > { %5915 = vmatprep.subr.bf16.mxu0 %v10381_v47  ;;  %v2681_v47 = vld [vmem:[%s16013_s9 + $0xba8] sm:$0xff] }
 0x599   : > { %5825 = vmatmul.mubr.bf16.vlgmr.msra.gmra.mrb[20].mxu1 %v13956_v33  ;;  %v10493_v60 = vcombine.high %v2681_v47, %v2689_v48 }
 0x59a   : > { %5907 = vmatmul.mubr.bf16.vlgmr.msra.gmra.mrb[16].mxu0 %v13956_v33  ;;  %5834 = vmatpush1.bf16.msra.mxu1 %v10378_v50 }
 0x59b   : > { %5865 = vmatprep.mubr.bf16.mxu1 %v13972_v40  ;;  %5916 = vmatpush1.bf16.msra.mxu0 %v10380_v56 }
 0x59c   : > { %5947 = vmatprep.mubr.bf16.mxu0 %v13972_v40  ;;  %5835 = vmatprep.subr.bf16.mxu1 %v10395_v58  ;;  %v10476_v58 = vcombine.low %v2665_v35, %v2673_v36  ;;  %v2768_v35 = vld [vmem:[%s16013_s9 + $0xe60] sm:$0xff]  ;;  %v2761_v36 = vld [vmem:[%s16013_s9 + $0xe28] sm:$0xff] }
 0x59d   : > { %5917 = vmatprep.subr.bf16.mxu0 %v10397_v61  ;;  %v2696_v61 = vld [vmem:[%s16013_s9 + $0xc20] sm:$0xff] }
 0x59e   : > { %5836 = vmatpush1.bf16.msra.mxu1 %v10394_v0  ;;  %v2705_v0 = vld [vmem:[%s16013_s9 + $0xc68] sm:$0xff] }
 0x59f   : > { %5918 = vmatpush1.bf16.msra.mxu0 %v10396_v1  ;;  %5837 = vmatprep.subr.bf16.mxu1 %v10411_v2  ;;  %v10490_v1 = vcombine.low %v2680_v15, %v2688_v44  ;;  %v10492_v2 = vcombine.low %v2681_v47, %v2689_v48  ;;  %v10509_v4 = vcombine.high %v2697_v63, %v2705_v0  ;;  %v2776_v44 = vld [vmem:[%s16013_s9 + $0xea0] sm:$0xff]  ;;  %v2777_v48 = vld [vmem:[%s16013_s9 + $0xea8] sm:$0xff] }
 0x5a0   : > { %5919 = vmatprep.subr.bf16.mxu0 %v10413_v3  ;;  %v10507_v3 = vcombine.high %v2696_v61, %v2704_v62  ;;  %v2784_v47 = vld [vmem:[%s16013_s9 + $0xee0] sm:$0xff] }
 0x5a2   : > { %5838 = vmatpush1.bf16.msra.mxu1 %v10410_v8  ;;  %v2721_v8 = vld [vmem:[%s16013_s9 + $0xce8] sm:$0xff] }
 0x5a3   : > { %5920 = vmatpush1.bf16.msra.mxu0 %v10412_v11  ;;  %5839 = vmatprep.subr.bf16.mxu1 %v10427_v12  ;;  %v10506_v11 = vcombine.low %v2696_v61, %v2704_v62  ;;  %v10508_v12 = vcombine.low %v2697_v63, %v2705_v0  ;;  %v10525_v14 = vcombine.high %v2713_v7, %v2721_v8  ;;  %v2801_v61 = vld [vmem:[%s16013_s9 + $0xf68] sm:$0xff] }
 0x5a4   : > { %5921 = vmatprep.subr.bf16.mxu0 %v10429_v13  ;;  %v10523_v13 = vcombine.high %v2712_v5, %v2720_v6  ;;  %v10586_v62 = vcombine.low %v2776_v44, %v2784_v47 }
 0x5a6   : > { %5840 = vmatpush1.bf16.msra.mxu1 %v10426_v20  ;;  %v2737_v20 = vld [vmem:[%s16013_s9 + $0xd68] sm:$0xff] }
 0x5a7   : > { %5922 = vmatpush1.bf16.msra.mxu0 %v10428_v21  ;;  %5841 = vmatprep.subr.bf16.mxu1 %v10443_v22  ;;  %v10522_v21 = vcombine.low %v2712_v5, %v2720_v6  ;;  %v10524_v22 = vcombine.low %v2713_v7, %v2721_v8  ;;  %v10541_v24 = vcombine.high %v2729_v19, %v2737_v20  ;;  %v2817_v5 = vld [vmem:[%s16013_s9 + $0xfe8] sm:$0xff] }
 0x5a8   : > { %5923 = vmatprep.subr.bf16.mxu0 %v10445_v23  ;;  %v10539_v23 = vcombine.high %v2728_v16, %v2736_v17 }
 0x5aa   : > { %5842 = vmatpush1.bf16.msra.mxu1 %v10442_v28  ;;  %v2753_v28 = vld [vmem:[%s16013_s9 + $0xde8] sm:$0xff] }
 0x5ab   : > { %5924 = vmatpush1.bf16.msra.mxu0 %v10444_v29  ;;  %5843 = vmatprep.subr.bf16.mxu1 %v10459_v30  ;;  %v10538_v29 = vcombine.low %v2728_v16, %v2736_v17  ;;  %v10540_v30 = vcombine.low %v2729_v19, %v2737_v20  ;;  %v10557_v34 = vcombine.high %v2745_v27, %v2753_v28  ;;  %v2323_v16 = vld [vmem:[%s16013_s9 + $0x78] sm:$0xff] }
 0x5ac   : > { %v14818_v41 = vpop.f32.mrb[12].mxu1  ;;  %v14820_v42 = vpop.f32.mrb[8].mxu0  ;;  %5925 = vmatprep.subr.bf16.mxu0 %v10461_v31  ;;  %v10555_v31 = vcombine.high %v2744_v25, %v2752_v26 }
 0x5ad   : > { %v14828_v45 = vpop.f32.mrb[13].mxu1  ;;  %v14830_v46 = vpop.f32.mrb[9].mxu0 }
 0x5ae   : > { %v5543_v49 = vpop.f32.mrb[14].mxu1  ;;  %v5625_v50 = vpop.f32.mrb[10].mxu0  ;;  %5844 = vmatpush1.bf16.msra.mxu1 %v10458_v37  ;;  %v2769_v37 = vld [vmem:[%s16013_s9 + $0xe68] sm:$0xff] }
 0x5af   : > { %5926 = vmatpush1.bf16.msra.mxu0 %v10460_v38  ;;  %v5544_v55 = vpop.f32.mrb[15].mxu1  ;;  %v5626_v56 = vpop.f32.mrb[11].mxu0  ;;  %5845 = vmatprep.subr.bf16.mxu1 %v10475_v39  ;;  %v10554_v38 = vcombine.low %v2744_v25, %v2752_v26  ;;  %v10556_v39 = vcombine.low %v2745_v27, %v2753_v28  ;;  %v10573_v15 = vcombine.high %v2761_v36, %v2769_v37  ;;  %v2785_v49 = vld [vmem:[%s16013_s9 + $0xee8] sm:$0xff]  ;;  %v2331_v25 = vld [vmem:[%s16013_s9 + $0xb8] sm:$0xff] }
 0x5b0   : > { %5927 = vmatprep.subr.bf16.mxu0 %v10477_v43  ;;  %v10571_v43 = vcombine.high %v2760_v9, %v2768_v35  ;;  %v10570_v50 = vcombine.low %v2760_v9, %v2768_v35  ;;  %v10587_v55 = vcombine.high %v2776_v44, %v2784_v47  ;;  %v10589_v56 = vcombine.high %v2777_v48, %v2785_v49  ;;  %v2339_v26 = vld [vmem:[%s16013_s9 + $0xf8] sm:$0xff] }
 0x5b1   : > { %v10588_v63 = vcombine.low %v2777_v48, %v2785_v49  ;;  %v2355_v9 = vld [vmem:[%s16013_s9 + $0x178] sm:$0xff]  ;;  %v2378_v49 = vld [vmem:[%s16013_s9 + $0x230] sm:$0xff] }
 0x5b2   : > { %5846 = vmatpush1.bf16.msra.mxu1 %v10474_v53  ;;  %v10572_v53 = vcombine.low %v2761_v36, %v2769_v37  ;;  %v10144_v36 = vcombine.low %v2331_v25, %v2339_v26  ;;  %v2371_v44 = vld [vmem:[%s16013_s9 + $0x1f8] sm:$0xff] }
 0x5b3   : > { %5928 = vmatpush1.bf16.msra.mxu0 %v10476_v58  ;;  %5847 = vmatprep.subr.bf16.mxu1 %v10491_v59  ;;  %v2792_v58 = vld [vmem:[%s16013_s9 + $0xf20] sm:$0xff] }
 0x5b4   : > { %5929 = vmatprep.subr.bf16.mxu0 %v10493_v60  ;;  %v2800_v59 = vld [vmem:[%s16013_s9 + $0xf60] sm:$0xff]  ;;  %v2793_v60 = vld [vmem:[%s16013_s9 + $0xf28] sm:$0xff] }
 0x5b5   : > { %v10603_v0 = vcombine.high %v2792_v58, %v2800_v59  ;;  %v10602_v6 = vcombine.low %v2792_v58, %v2800_v59  ;;  %v10604_v7 = vcombine.low %v2793_v60, %v2801_v61 }
 0x5b6   : > { %5848 = vmatpush1.bf16.msra.mxu1 %v10490_v1  ;;  %v10605_v1 = vcombine.high %v2793_v60, %v2801_v61  ;;  %v2394_v61 = vld [vmem:[%s16013_s9 + $0x2b0] sm:$0xff] }
 0x5b7   : > { %5930 = vmatpush1.bf16.msra.mxu0 %v10492_v2  ;;  %5849 = vmatprep.subr.bf16.mxu1 %v10507_v3  ;;  %v2808_v2 = vld [vmem:[%s16013_s9 + $0xfa0] sm:$0xff] }
 0x5b8   : > { %5931 = vmatprep.subr.bf16.mxu0 %v10509_v4  ;;  %v2816_v3 = vld [vmem:[%s16013_s9 + $0xfe0] sm:$0xff]  ;;  %v2809_v4 = vld [vmem:[%s16013_s9 + $0xfa8] sm:$0xff] }
 0x5b9   : > { %v10619_v8 = vcombine.high %v2808_v2, %v2816_v3  ;;  %v10618_v17 = vcombine.low %v2808_v2, %v2816_v3  ;;  %v10620_v19 = vcombine.low %v2809_v4, %v2817_v5 }
 0x5ba   : > { %5850 = vmatpush1.bf16.msra.mxu1 %v10506_v11  ;;  %v10621_v11 = vcombine.high %v2809_v4, %v2817_v5  ;;  %v2410_v5 = vld [vmem:[%s16013_s9 + $0x330] sm:$0xff] }
 0x5bb   : > { %5932 = vmatpush1.bf16.msra.mxu0 %v10508_v12  ;;  %5851 = vmatprep.subr.bf16.mxu1 %v10523_v13  ;;  %v2314_v12 = vld [vmem:[%s16013_s9 + $0x30] sm:$0xff] }
 0x5bc   : > { %5933 = vmatprep.subr.bf16.mxu0 %v10525_v14  ;;  %v2322_v13 = vld [vmem:[%s16013_s9 + $0x70] sm:$0xff]  ;;  %v2315_v14 = vld [vmem:[%s16013_s9 + $0x38] sm:$0xff] }
 0x5bd   : > { %v10127_v20 = vcombine.high %v2314_v12, %v2322_v13  ;;  %v10128_v27 = vcombine.low %v2315_v14, %v2323_v16 }
 0x5be   : > { %5852 = vmatpush1.bf16.msra.mxu1 %v10522_v21  ;;  %v10129_v21 = vcombine.high %v2315_v14, %v2323_v16  ;;  %v2426_v16 = vld [vmem:[%s16013_s9 + $0x3b0] sm:$0xff] }
 0x5bf   : > { %5934 = vmatpush1.bf16.msra.mxu0 %v10524_v22  ;;  %5853 = vmatprep.subr.bf16.mxu1 %v10539_v23  ;;  %v2330_v22 = vld [vmem:[%s16013_s9 + $0xb0] sm:$0xff] }
 0x5c0   : > { %5935 = vmatprep.subr.bf16.mxu0 %v10541_v24  ;;  %v2338_v23 = vld [vmem:[%s16013_s9 + $0xf0] sm:$0xff]  ;;  %v10126_v24 = vcombine.low %v2314_v12, %v2322_v13 }
 0x5c1   : > { %v10143_v28 = vcombine.high %v2330_v22, %v2338_v23  ;;  %v10142_v35 = vcombine.low %v2330_v22, %v2338_v23 }
 0x5c2   : > { %5854 = vmatpush1.bf16.msra.mxu1 %v10538_v29  ;;  %v2346_v29 = vld [vmem:[%s16013_s9 + $0x130] sm:$0xff] }
 0x5c3   : > { %5936 = vmatpush1.bf16.msra.mxu0 %v10540_v30  ;;  %5855 = vmatprep.subr.bf16.mxu1 %v10555_v31  ;;  %v2354_v30 = vld [vmem:[%s16013_s9 + $0x170] sm:$0xff]  ;;  %v2347_v31 = vld [vmem:[%s16013_s9 + $0x138] sm:$0xff] }
 0x5c4   : > { %5937 = vmatprep.subr.bf16.mxu0 %v10557_v34  ;;  %v10145_v34 = vcombine.high %v2331_v25, %v2339_v26  ;;  %v10159_v37 = vcombine.high %v2346_v29, %v2354_v30  ;;  %v10158_v47 = vcombine.low %v2346_v29, %v2354_v30  ;;  %v2442_v25 = vld [vmem:[%s16013_s9 + $0x430] sm:$0xff]  ;;  %v2451_v29 = vld [vmem:[%s16013_s9 + $0x478] sm:$0xff] }
 0x5c5   : > { %v2450_v26 = vld [vmem:[%s16013_s9 + $0x470] sm:$0xff] }
 0x5c6   : > { %5856 = vmatpush1.bf16.msra.mxu1 %v10554_v38  ;;  %v2362_v38 = vld [vmem:[%s16013_s9 + $0x1b0] sm:$0xff] }
 0x5c7   : > { %5938 = vmatpush1.bf16.msra.mxu0 %v10556_v39  ;;  %5857 = vmatprep.subr.bf16.mxu1 %v10571_v43  ;;  %v10161_v39 = vcombine.high %v2347_v31, %v2355_v9  ;;  %v2370_v43 = vld [vmem:[%s16013_s9 + $0x1f0] sm:$0xff] }
 0x5c8   : > { %5939 = vmatprep.subr.bf16.mxu0 %v10573_v15  ;;  %v2363_v15 = vld [vmem:[%s16013_s9 + $0x1b8] sm:$0xff]  ;;  %v10175_v48 = vcombine.high %v2362_v38, %v2370_v43  ;;  %v10174_v58 = vcombine.low %v2362_v38, %v2370_v43 }
 0x5c9   : > { %v10176_v59 = vcombine.low %v2363_v15, %v2371_v44  ;;  %v2467_v38 = vld [vmem:[%s16013_s9 + $0x4f8] sm:$0xff] }
 0x5ca   : > { %5858 = vmatpush1.bf16.msra.mxu1 %v10570_v50  ;;  %v2386_v50 = vld [vmem:[%s16013_s9 + $0x270] sm:$0xff] }
 0x5cb   : > { %5940 = vmatpush1.bf16.msra.mxu0 %v10572_v53  ;;  %5859 = vmatprep.subr.bf16.mxu1 %v10587_v55  ;;  %v10177_v53 = vcombine.high %v2363_v15, %v2371_v44  ;;  %v2379_v55 = vld [vmem:[%s16013_s9 + $0x238] sm:$0xff]  ;;  %v10191_v60 = vcombine.high %v2378_v49, %v2386_v50  ;;  %v10190_v2 = vcombine.low %v2378_v49, %v2386_v50  ;;  %v2474_v44 = vld [vmem:[%s16013_s9 + $0x530] sm:$0xff] }
 0x5cc   : > { %5941 = vmatprep.subr.bf16.mxu0 %v10589_v56  ;;  %v2387_v56 = vld [vmem:[%s16013_s9 + $0x278] sm:$0xff] }
 0x5cd   : > { %v10192_v3 = vcombine.low %v2379_v55, %v2387_v56  ;;  %v2483_v49 = vld [vmem:[%s16013_s9 + $0x578] sm:$0xff] }
 0x5ce   : > { %5860 = vmatpush1.bf16.msra.mxu1 %v10586_v62  ;;  %v2402_v62 = vld [vmem:[%s16013_s9 + $0x2f0] sm:$0xff] }
 0x5cf   : > { %5942 = vmatpush1.bf16.msra.mxu0 %v10588_v63  ;;  %5861 = vmatprep.subr.bf16.mxu1 %v10603_v0  ;;  %v2395_v63 = vld [vmem:[%s16013_s9 + $0x2b8] sm:$0xff]  ;;  %v10193_v0 = vcombine.high %v2379_v55, %v2387_v56  ;;  %v10207_v4 = vcombine.high %v2394_v61, %v2402_v62  ;;  %v10206_v12 = vcombine.low %v2394_v61, %v2402_v62  ;;  %v2490_v56 = vld [vmem:[%s16013_s9 + $0x5b0] sm:$0xff] }
 0x5d0   : > { %5943 = vmatprep.subr.bf16.mxu0 %v10605_v1  ;;  %v2403_v1 = vld [vmem:[%s16013_s9 + $0x2f8] sm:$0xff] }
 0x5d1   : > { %v10208_v13 = vcombine.low %v2395_v63, %v2403_v1  ;;  %v2499_v61 = vld [vmem:[%s16013_s9 + $0x5f8] sm:$0xff] }
 0x5d2   : > { %5862 = vmatpush1.bf16.msra.mxu1 %v10602_v6  ;;  %v2418_v6 = vld [vmem:[%s16013_s9 + $0x370] sm:$0xff] }
 0x5d3   : > { %5944 = vmatpush1.bf16.msra.mxu0 %v10604_v7  ;;  %5863 = vmatprep.subr.bf16.mxu1 %v10619_v8  ;;  %v2411_v7 = vld [vmem:[%s16013_s9 + $0x338] sm:$0xff]  ;;  %v10209_v8 = vcombine.high %v2395_v63, %v2403_v1  ;;  %v10223_v14 = vcombine.high %v2410_v5, %v2418_v6  ;;  %v10222_v22 = vcombine.low %v2410_v5, %v2418_v6  ;;  %v2506_v1 = vld [vmem:[%s16013_s9 + $0x630] sm:$0xff] }
 0x5d4   : > { %5945 = vmatprep.subr.bf16.mxu0 %v10621_v11  ;;  %v2419_v11 = vld [vmem:[%s16013_s9 + $0x378] sm:$0xff] }
 0x5d5   : > { %v10224_v23 = vcombine.low %v2411_v7, %v2419_v11  ;;  %v2515_v5 = vld [vmem:[%s16013_s9 + $0x678] sm:$0xff] }
 0x5d6   : > { %5864 = vmatpush1.bf16.msra.mxu1 %v10618_v17  ;;  %v2434_v17 = vld [vmem:[%s16013_s9 + $0x3f0] sm:$0xff] }
 0x5d7   : > { %5946 = vmatpush1.bf16.msra.mxu0 %v10620_v19  ;;  %5956 = vmatprep.subr.bf16.mxu1 %v10127_v20  ;;  %v2427_v19 = vld [vmem:[%s16013_s9 + $0x3b8] sm:$0xff]  ;;  %v10225_v20 = vcombine.high %v2411_v7, %v2419_v11  ;;  %v10238_v30 = vcombine.low %v2426_v16, %v2434_v17  ;;  %v2522_v11 = vld [vmem:[%s16013_s9 + $0x6b0] sm:$0xff] }
 0x5d8   : > { %6038 = vmatprep.subr.bf16.mxu0 %v10129_v21  ;;  %v2435_v21 = vld [vmem:[%s16013_s9 + $0x3f8] sm:$0xff] }
 0x5d9   : > { %5866 = vmatmul.mubr.bf16.vlgmr.msra.gmra.mrb[20].mxu1 %v14164_v57 }
 0x5da   : > { %5948 = vmatmul.mubr.bf16.vlgmr.msra.gmra.mrb[16].mxu0 %v14164_v57  ;;  %5957 = vmatpush1.bf16.msra.mxu1 %v10126_v24  ;;  %v10239_v24 = vcombine.high %v2426_v16, %v2434_v17  ;;  %v2531_v16 = vld [vmem:[%s16013_s9 + $0x6f8] sm:$0xff] }
 0x5db   : > { %5988 = vmatprep.mubr.bf16.mxu1 %v13954_v32  ;;  %6039 = vmatpush1.bf16.msra.mxu0 %v10128_v27  ;;  %v2443_v27 = vld [vmem:[%s16013_s9 + $0x438] sm:$0xff] }
 0x5dc   : > { %6070 = vmatprep.mubr.bf16.mxu0 %v13954_v32  ;;  %5958 = vmatprep.subr.bf16.mxu1 %v10143_v28  ;;  %v10160_v32 = vcombine.low %v2347_v31, %v2355_v9  ;;  %v10241_v28 = vcombine.high %v2427_v19, %v2435_v21  ;;  %v10240_v31 = vcombine.low %v2427_v19, %v2435_v21  ;;  %v2458_v9 = vld [vmem:[%s16013_s9 + $0x4b0] sm:$0xff] }
 0x5dd   : > { %6040 = vmatprep.subr.bf16.mxu0 %v10145_v34  ;;  %v10255_v34 = vcombine.high %v2442_v25, %v2450_v26  ;;  %v10256_v43 = vcombine.low %v2443_v27, %v2451_v29  ;;  %v2538_v21 = vld [vmem:[%s16013_s9 + $0x730] sm:$0xff] }
 0x5de   : > { %5959 = vmatpush1.bf16.msra.mxu1 %v10142_v35  ;;  %v2466_v35 = vld [vmem:[%s16013_s9 + $0x4f0] sm:$0xff] }
 0x5df   : > { %6041 = vmatpush1.bf16.msra.mxu0 %v10144_v36  ;;  %5960 = vmatprep.subr.bf16.mxu1 %v10159_v37  ;;  %v2459_v36 = vld [vmem:[%s16013_s9 + $0x4b8] sm:$0xff]  ;;  %v10257_v37 = vcombine.high %v2443_v27, %v2451_v29  ;;  %v10271_v15 = vcombine.high %v2458_v9, %v2466_v35  ;;  %v10270_v50 = vcombine.low %v2458_v9, %v2466_v35  ;;  %v2554_v29 = vld [vmem:[%s16013_s9 + $0x7b0] sm:$0xff] }
 0x5e0   : > { %6042 = vmatprep.subr.bf16.mxu0 %v10161_v39  ;;  %v10254_v39 = vcombine.low %v2442_v25, %v2450_v26  ;;  %v2547_v25 = vld [vmem:[%s16013_s9 + $0x778] sm:$0xff] }
 0x5e1   : > { %v2563_v9 = vld [vmem:[%s16013_s9 + $0x7f8] sm:$0xff] }
 0x5e2   : > { %5961 = vmatpush1.bf16.msra.mxu1 %v10158_v47  ;;  %v2482_v47 = vld [vmem:[%s16013_s9 + $0x570] sm:$0xff] }
 0x5e3   : > { %6043 = vmatpush1.bf16.msra.mxu0 %v10160_v32  ;;  %5962 = vmatprep.subr.bf16.mxu1 %v10175_v48  ;;  %v2475_v32 = vld [vmem:[%s16013_s9 + $0x538] sm:$0xff]  ;;  %v10273_v48 = vcombine.high %v2459_v36, %v2467_v38  ;;  %v10287_v55 = vcombine.high %v2474_v44, %v2482_v47  ;;  %v10286_v62 = vcombine.low %v2474_v44, %v2482_v47 }
 0x5e4   : > { %6044 = vmatprep.subr.bf16.mxu0 %v10177_v53  ;;  %v10272_v53 = vcombine.low %v2459_v36, %v2467_v38  ;;  %v10288_v63 = vcombine.low %v2475_v32, %v2483_v49  ;;  %v2570_v38 = vld [vmem:[%s16013_s9 + $0x830] sm:$0xff]  ;;  %v2579_v44 = vld [vmem:[%s16013_s9 + $0x878] sm:$0xff] }
 0x5e6   : > { %5963 = vmatpush1.bf16.msra.mxu1 %v10174_v58  ;;  %v2498_v58 = vld [vmem:[%s16013_s9 + $0x5f0] sm:$0xff] }
 0x5e7   : > { %6045 = vmatpush1.bf16.msra.mxu0 %v10176_v59  ;;  %5964 = vmatprep.subr.bf16.mxu1 %v10191_v60  ;;  %v2491_v59 = vld [vmem:[%s16013_s9 + $0x5b8] sm:$0xff]  ;;  %v10289_v60 = vcombine.high %v2475_v32, %v2483_v49  ;;  %v10302_v6 = vcombine.low %v2490_v56, %v2498_v58  ;;  %v2586_v49 = vld [vmem:[%s16013_s9 + $0x8b0] sm:$0xff] }
 0x5e8   : > { %6046 = vmatprep.subr.bf16.mxu0 %v10193_v0  ;;  %v10303_v0 = vcombine.high %v2490_v56, %v2498_v58  ;;  %v10304_v7 = vcombine.low %v2491_v59, %v2499_v61  ;;  %v2595_v56 = vld [vmem:[%s16013_s9 + $0x8f8] sm:$0xff] }
 0x5ea   : > { %5965 = vmatpush1.bf16.msra.mxu1 %v10190_v2  ;;  %v2514_v2 = vld [vmem:[%s16013_s9 + $0x670] sm:$0xff] }
 0x5eb   : > { %6047 = vmatpush1.bf16.msra.mxu0 %v10192_v3  ;;  %5966 = vmatprep.subr.bf16.mxu1 %v10207_v4  ;;  %v2507_v3 = vld [vmem:[%s16013_s9 + $0x638] sm:$0xff]  ;;  %v10305_v4 = vcombine.high %v2491_v59, %v2499_v61  ;;  %v10318_v17 = vcombine.low %v2506_v1, %v2514_v2  ;;  %v2602_v59 = vld [vmem:[%s16013_s9 + $0x930] sm:$0xff] }
 0x5ec   : > { %6048 = vmatprep.subr.bf16.mxu0 %v10209_v8  ;;  %v10319_v8 = vcombine.high %v2506_v1, %v2514_v2  ;;  %v10320_v19 = vcombine.low %v2507_v3, %v2515_v5  ;;  %v2611_v1 = vld [vmem:[%s16013_s9 + $0x978] sm:$0xff] }
 0x5ee   : > { %5967 = vmatpush1.bf16.msra.mxu1 %v10206_v12  ;;  %v2530_v12 = vld [vmem:[%s16013_s9 + $0x6f0] sm:$0xff] }
 0x5ef   : > { %6049 = vmatpush1.bf16.msra.mxu0 %v10208_v13  ;;  %5968 = vmatprep.subr.bf16.mxu1 %v10223_v14  ;;  %v2523_v13 = vld [vmem:[%s16013_s9 + $0x6b8] sm:$0xff]  ;;  %v10321_v14 = vcombine.high %v2507_v3, %v2515_v5  ;;  %v10334_v26 = vcombine.low %v2522_v11, %v2530_v12 }
 0x5f0   : > { %6050 = vmatprep.subr.bf16.mxu0 %v10225_v20  ;;  %v10335_v20 = vcombine.high %v2522_v11, %v2530_v12  ;;  %v10336_v27 = vcombine.low %v2523_v13, %v2531_v16 }
 0x5f2   : > { %5969 = vmatpush1.bf16.msra.mxu1 %v10222_v22  ;;  %v2546_v22 = vld [vmem:[%s16013_s9 + $0x770] sm:$0xff] }
 0x5f3   : > { %6051 = vmatpush1.bf16.msra.mxu0 %v10224_v23  ;;  %5970 = vmatprep.subr.bf16.mxu1 %v10239_v24  ;;  %v2539_v23 = vld [vmem:[%s16013_s9 + $0x738] sm:$0xff]  ;;  %v10337_v24 = vcombine.high %v2523_v13, %v2531_v16  ;;  %v10350_v35 = vcombine.low %v2538_v21, %v2546_v22  ;;  %v2634_v13 = vld [vmem:[%s16013_s9 + $0xa30] sm:$0xff] }
 0x5f4   : > { %6052 = vmatprep.subr.bf16.mxu0 %v10241_v28  ;;  %v10351_v28 = vcombine.high %v2538_v21, %v2546_v22  ;;  %v10352_v36 = vcombine.low %v2539_v23, %v2547_v25  ;;  %v2635_v16 = vld [vmem:[%s16013_s9 + $0xa38] sm:$0xff] }
 0x5f6   : > { %5971 = vmatpush1.bf16.msra.mxu1 %v10238_v30  ;;  %v2562_v30 = vld [vmem:[%s16013_s9 + $0x7f0] sm:$0xff] }
 0x5f7   : > { %6053 = vmatpush1.bf16.msra.mxu0 %v10240_v31  ;;  %5972 = vmatprep.subr.bf16.mxu1 %v10255_v34  ;;  %v2555_v31 = vld [vmem:[%s16013_s9 + $0x7b8] sm:$0xff]  ;;  %v10353_v34 = vcombine.high %v2539_v23, %v2547_v25  ;;  %v10366_v47 = vcombine.low %v2554_v29, %v2562_v30  ;;  %v2650_v23 = vld [vmem:[%s16013_s9 + $0xab0] sm:$0xff] }
 0x5f8   : > { %6054 = vmatprep.subr.bf16.mxu0 %v10257_v37  ;;  %v10367_v37 = vcombine.high %v2554_v29, %v2562_v30  ;;  %v10368_v32 = vcombine.low %v2555_v31, %v2563_v9  ;;  %v2651_v25 = vld [vmem:[%s16013_s9 + $0xab8] sm:$0xff] }
 0x5fa   : > { %5973 = vmatpush1.bf16.msra.mxu1 %v10254_v39  ;;  %v2578_v39 = vld [vmem:[%s16013_s9 + $0x870] sm:$0xff] }
 0x5fb   : > { %6055 = vmatpush1.bf16.msra.mxu0 %v10256_v43  ;;  %5974 = vmatprep.subr.bf16.mxu1 %v10271_v15  ;;  %v2571_v43 = vld [vmem:[%s16013_s9 + $0x838] sm:$0xff]  ;;  %v10369_v15 = vcombine.high %v2555_v31, %v2563_v9  ;;  %v10382_v58 = vcombine.low %v2570_v38, %v2578_v39  ;;  %v2666_v31 = vld [vmem:[%s16013_s9 + $0xb30] sm:$0xff] }
 0x5fc   : > { %6056 = vmatprep.subr.bf16.mxu0 %v10273_v48  ;;  %v10383_v48 = vcombine.high %v2570_v38, %v2578_v39  ;;  %v10384_v61 = vcombine.low %v2571_v43, %v2579_v44  ;;  %v2667_v9 = vld [vmem:[%s16013_s9 + $0xb38] sm:$0xff]  ;;  %v2682_v38 = vld [vmem:[%s16013_s9 + $0xbb0] sm:$0xff] }
 0x5fe   : > { %5975 = vmatpush1.bf16.msra.mxu1 %v10270_v50  ;;  %v2594_v50 = vld [vmem:[%s16013_s9 + $0x8f0] sm:$0xff] }
 0x5ff   : > { %6057 = vmatpush1.bf16.msra.mxu0 %v10272_v53  ;;  %5976 = vmatprep.subr.bf16.mxu1 %v10287_v55  ;;  %v10385_v53 = vcombine.high %v2571_v43, %v2579_v44  ;;  %v2587_v55 = vld [vmem:[%s16013_s9 + $0x8b8] sm:$0xff]  ;;  %v10398_v2 = vcombine.low %v2586_v49, %v2594_v50 }
 0x600   : > { %6058 = vmatprep.subr.bf16.mxu0 %v10289_v60  ;;  %v2610_v60 = vld [vmem:[%s16013_s9 + $0x970] sm:$0xff]  ;;  %v10400_v3 = vcombine.low %v2587_v55, %v2595_v56 }
 0x602   : > { %5977 = vmatpush1.bf16.msra.mxu1 %v10286_v62  ;;  %v10399_v62 = vcombine.high %v2586_v49, %v2594_v50  ;;  %v2683_v49 = vld [vmem:[%s16013_s9 + $0xbb8] sm:$0xff] }
 0x603   : > { %6059 = vmatpush1.bf16.msra.mxu0 %v10288_v63  ;;  %5978 = vmatprep.subr.bf16.mxu1 %v10303_v0  ;;  %v10401_v63 = vcombine.high %v2587_v55, %v2595_v56  ;;  %v2603_v0 = vld [vmem:[%s16013_s9 + $0x938] sm:$0xff] }
 0x604   : > { %6060 = vmatprep.subr.bf16.mxu0 %v10305_v4  ;;  %v10415_v4 = vcombine.high %v2602_v59, %v2610_v60  ;;  %v10417_v5 = vcombine.high %v2603_v0, %v2611_v1  ;;  %v10416_v11 = vcombine.low %v2603_v0, %v2611_v1  ;;  %v2691_v50 = vld [vmem:[%s16013_s9 + $0xbf8] sm:$0xff] }
 0x605   : > { %v10497_v1 = vcombine.high %v2683_v49, %v2691_v50 }
 0x606   : > { %5979 = vmatpush1.bf16.msra.mxu1 %v10302_v6  ;;  %v2618_v6 = vld [vmem:[%s16013_s9 + $0x9b0] sm:$0xff] }
 0x607   : > { %6061 = vmatpush1.bf16.msra.mxu0 %v10304_v7  ;;  %5980 = vmatprep.subr.bf16.mxu1 %v10319_v8  ;;  %v2626_v7 = vld [vmem:[%s16013_s9 + $0x9f0] sm:$0xff]  ;;  %v2627_v8 = vld [vmem:[%s16013_s9 + $0x9f8] sm:$0xff] }
 0x608   : > { %6062 = vmatprep.subr.bf16.mxu0 %v10321_v14  ;;  %v10431_v12 = vcombine.high %v2618_v6, %v2626_v7  ;;  %v2642_v14 = vld [vmem:[%s16013_s9 + $0xa70] sm:$0xff] }
 0x609   : > { %v10447_v22 = vcombine.high %v2634_v13, %v2642_v14 }
 0x60a   : > { %5981 = vmatpush1.bf16.msra.mxu1 %v10318_v17 }
 0x60b   : > { %6063 = vmatpush1.bf16.msra.mxu0 %v10320_v19  ;;  %5982 = vmatprep.subr.bf16.mxu1 %v10335_v20  ;;  %v2643_v19 = vld [vmem:[%s16013_s9 + $0xa78] sm:$0xff]  ;;  %v10430_v20 = vcombine.low %v2618_v6, %v2626_v7  ;;  %v2714_v7 = vld [vmem:[%s16013_s9 + $0xcb0] sm:$0xff] }
 0x60c   : > { %6064 = vmatprep.subr.bf16.mxu0 %v10337_v24  ;;  %v2658_v24 = vld [vmem:[%s16013_s9 + $0xaf0] sm:$0xff]  ;;  %v10448_v29 = vcombine.low %v2635_v16, %v2643_v19 }
 0x60d   : > { %v10463_v30 = vcombine.high %v2650_v23, %v2658_v24 }
 0x60e   : > { %5983 = vmatpush1.bf16.msra.mxu1 %v10334_v26  ;;  %v10449_v26 = vcombine.high %v2635_v16, %v2643_v19  ;;  %v2730_v16 = vld [vmem:[%s16013_s9 + $0xd30] sm:$0xff]  ;;  %v2731_v19 = vld [vmem:[%s16013_s9 + $0xd38] sm:$0xff] }
 0x60f   : > { %6065 = vmatpush1.bf16.msra.mxu0 %v10336_v27  ;;  %5984 = vmatprep.subr.bf16.mxu1 %v10351_v28  ;;  %v2659_v27 = vld [vmem:[%s16013_s9 + $0xaf8] sm:$0xff]  ;;  %v10446_v28 = vcombine.low %v2634_v13, %v2642_v14 }
 0x610   : > { %6066 = vmatprep.subr.bf16.mxu0 %v10353_v34  ;;  %v2674_v34 = vld [vmem:[%s16013_s9 + $0xb70] sm:$0xff]  ;;  %v10464_v39 = vcombine.low %v2651_v25, %v2659_v27 }
 0x611   : > { %v10479_v43 = vcombine.high %v2666_v31, %v2674_v34  ;;  %v10478_v56 = vcombine.low %v2666_v31, %v2674_v34 }
 0x612   : > { %5985 = vmatpush1.bf16.msra.mxu1 %v10350_v35  ;;  %v10465_v35 = vcombine.high %v2651_v25, %v2659_v27  ;;  %v2746_v25 = vld [vmem:[%s16013_s9 + $0xdb0] sm:$0xff]  ;;  %v2747_v27 = vld [vmem:[%s16013_s9 + $0xdb8] sm:$0xff] }
 0x613   : > { %6067 = vmatpush1.bf16.msra.mxu0 %v10352_v36  ;;  %5986 = vmatprep.subr.bf16.mxu1 %v10367_v37  ;;  %v2675_v36 = vld [vmem:[%s16013_s9 + $0xb78] sm:$0xff]  ;;  %v10462_v37 = vcombine.low %v2650_v23, %v2658_v24 }
 0x614   : > { %6068 = vmatprep.subr.bf16.mxu0 %v10369_v15  ;;  %v2690_v15 = vld [vmem:[%s16013_s9 + $0xbf0] sm:$0xff] }
 0x616   : > { %5987 = vmatpush1.bf16.msra.mxu1 %v10366_v47  ;;  %v10481_v47 = vcombine.high %v2667_v9, %v2675_v36 }
 0x617   : > { %6069 = vmatpush1.bf16.msra.mxu0 %v10368_v32  ;;  %5997 = vmatprep.subr.bf16.mxu1 %v10383_v48 }
 0x618   : > { %6079 = vmatprep.subr.bf16.mxu0 %v10385_v53 }
 0x619   : > { %5989 = vmatmul.mubr.bf16.vlgmr.msra.gmra.mrb[24].mxu1 %v13956_v33 }
 0x61a   : > { %6071 = vmatmul.mubr.bf16.vlgmr.msra.gmra.mrb[20].mxu0 %v13956_v33  ;;  %5998 = vmatpush1.bf16.msra.mxu1 %v10382_v58  ;;  %v2619_v33 = vld [vmem:[%s16013_s9 + $0x9b8] sm:$0xff]  ;;  %v2698_v58 = vld [vmem:[%s16013_s9 + $0xc30] sm:$0xff] }
 0x61b   : > { %6029 = vmatprep.mubr.bf16.mxu1 %v13972_v40  ;;  %6080 = vmatpush1.bf16.msra.mxu0 %v10384_v61  ;;  %v10433_v17 = vcombine.high %v2619_v33, %v2627_v8  ;;  %v10432_v21 = vcombine.low %v2619_v33, %v2627_v8  ;;  %v2722_v33 = vld [vmem:[%s16013_s9 + $0xcf0] sm:$0xff]  ;;  %v2715_v8 = vld [vmem:[%s16013_s9 + $0xcb8] sm:$0xff] }
 0x61c   : > { %6111 = vmatprep.mubr.bf16.mxu0 %v13972_v40  ;;  %5999 = vmatprep.subr.bf16.mxu1 %v10399_v62  ;;  %v10414_v40 = vcombine.low %v2602_v59, %v2610_v60  ;;  %v2706_v59 = vld [vmem:[%s16013_s9 + $0xc70] sm:$0xff]  ;;  %v10480_v62 = vcombine.low %v2667_v9, %v2675_v36  ;;  %v10527_v14 = vcombine.high %v2714_v7, %v2722_v33  ;;  %v2763_v36 = vld [vmem:[%s16013_s9 + $0xe38] sm:$0xff] }
 0x61d   : > { %6081 = vmatprep.subr.bf16.mxu0 %v10401_v63  ;;  %v10495_v63 = vcombine.high %v2682_v38, %v2690_v15  ;;  %v10511_v6 = vcombine.high %v2698_v58, %v2706_v59  ;;  %v2762_v9 = vld [vmem:[%s16013_s9 + $0xe30] sm:$0xff] }
 0x61e   : > { %6000 = vmatpush1.bf16.msra.mxu1 %v10398_v2  ;;  %v2699_v2 = vld [vmem:[%s16013_s9 + $0xc38] sm:$0xff] }
 0x61f   : > { %6082 = vmatpush1.bf16.msra.mxu0 %v10400_v3  ;;  %6001 = vmatprep.subr.bf16.mxu1 %v10415_v4  ;;  %v2707_v3 = vld [vmem:[%s16013_s9 + $0xc78] sm:$0xff]  ;;  %v10494_v4 = vcombine.low %v2682_v38, %v2690_v15 }
 0x620   : > { %6083 = vmatprep.subr.bf16.mxu0 %v10417_v5  ;;  %v10496_v5 = vcombine.low %v2683_v49, %v2691_v50  ;;  %v10512_v13 = vcombine.low %v2699_v2, %v2707_v3  ;;  %v2771_v38 = vld [vmem:[%s16013_s9 + $0xe78] sm:$0xff]  ;;  %v2786_v49 = vld [vmem:[%s16013_s9 + $0xef0] sm:$0xff] }
 0x621   : > { %v2779_v50 = vld [vmem:[%s16013_s9 + $0xeb8] sm:$0xff] }
 0x622   : > { %6002 = vmatpush1.bf16.msra.mxu1 %v10414_v40  ;;  %v10513_v40 = vcombine.high %v2699_v2, %v2707_v3  ;;  %v2803_v2 = vld [vmem:[%s16013_s9 + $0xf78] sm:$0xff] }
 0x623   : > { %6084 = vmatpush1.bf16.msra.mxu0 %v10416_v11  ;;  %6003 = vmatprep.subr.bf16.mxu1 %v10431_v12  ;;  %v2723_v11 = vld [vmem:[%s16013_s9 + $0xcf8] sm:$0xff]  ;;  %v10510_v12 = vcombine.low %v2698_v58, %v2706_v59  ;;  %v10576_v59 = vcombine.low %v2763_v36, %v2771_v38 }
 0x624   : > { %6085 = vmatprep.subr.bf16.mxu0 %v10433_v17  ;;  %v2738_v17 = vld [vmem:[%s16013_s9 + $0xd70] sm:$0xff]  ;;  %v10528_v23 = vcombine.low %v2715_v8, %v2723_v11 }
 0x625   : > { %v10543_v24 = vcombine.high %v2730_v16, %v2738_v17 }
 0x626   : > { %6004 = vmatpush1.bf16.msra.mxu1 %v10430_v20  ;;  %v10529_v20 = vcombine.high %v2715_v8, %v2723_v11 }
 0x627   : > { %6086 = vmatpush1.bf16.msra.mxu0 %v10432_v21  ;;  %6005 = vmatprep.subr.bf16.mxu1 %v10447_v22  ;;  %v2739_v21 = vld [vmem:[%s16013_s9 + $0xd78] sm:$0xff]  ;;  %v10526_v22 = vcombine.low %v2714_v7, %v2722_v33  ;;  %v2818_v7 = vld [vmem:[%s16013_s9 + $0xff0] sm:$0xff] }
 0x628   : > { %6087 = vmatprep.subr.bf16.mxu0 %v10449_v26  ;;  %v2754_v26 = vld [vmem:[%s16013_s9 + $0xdf0] sm:$0xff]  ;;  %v10544_v31 = vcombine.low %v2731_v19, %v2739_v21  ;;  %v2811_v33 = vld [vmem:[%s16013_s9 + $0xfb8] sm:$0xff] }
 0x629   : > { %v10559_v34 = vcombine.high %v2746_v25, %v2754_v26 }
 0x62a   : > { %6006 = vmatpush1.bf16.msra.mxu1 %v10446_v28  ;;  %v10545_v28 = vcombine.high %v2731_v19, %v2739_v21  ;;  %v11452_v21 = vld [vmem:[%s14975_s2 + $0x4] ss:$16 sps:$4 sm:$0xff]  }
 0x62b   : > { %6088 = vmatpush1.bf16.msra.mxu0 %v10448_v29  ;;  %6007 = vmatprep.subr.bf16.mxu1 %v10463_v30  ;;  %v2755_v29 = vld [vmem:[%s16013_s9 + $0xdf8] sm:$0xff]  ;;  %v10542_v30 = vcombine.low %v2730_v16, %v2738_v17 }
 0x62c   : > { %v15230_v44 = vpop.f32.mrb[16].mxu1  ;;  %6089 = vmatprep.subr.bf16.mxu0 %v10465_v35  ;;  %v2770_v35 = vld [vmem:[%s16013_s9 + $0xe70] sm:$0xff] }
 0x62d   : > { %v15232_v32 = vpop.f32.mrb[12].mxu0  ;;  %v15234_v48 = vpop.f32.mrb[17].mxu1  ;;  %v10575_v15 = vcombine.high %v2762_v9, %v2770_v35  ;;  %v10574_v58 = vcombine.low %v2762_v9, %v2770_v35  ;;  %v11465_v9 = vld [vmem:[%s14975_s2 + $0x48] ss:$16 sps:$4 sm:$0xff]   ;;  %v11468_v35 = vld [vmem:[%s14975_s2 + $0x60] ss:$16 sps:$4 sm:$0xff]  }
 0x62e   : > { %v15242_v53 = vpop.f32.mrb[13].mxu0  ;;  %v5707_v55 = vpop.f32.mrb[18].mxu1  ;;  %6008 = vmatpush1.bf16.msra.mxu1 %v10462_v37  ;;  %v10561_v37 = vcombine.high %v2747_v27, %v2755_v29 }
 0x62f   : > { %v5789_v60 = vpop.f32.mrb[14].mxu0  ;;  %6090 = vmatpush1.bf16.msra.mxu0 %v10464_v39  ;;  %v5708_v61 = vpop.f32.mrb[19].mxu1  ;;  %6009 = vmatprep.subr.bf16.mxu1 %v10479_v43  ;;  %v10558_v39 = vcombine.low %v2746_v25, %v2754_v26  ;;  %v10560_v43 = vcombine.low %v2747_v27, %v2755_v29  ;;  %v10577_v55 = vcombine.high %v2763_v36, %v2771_v38  ;;  %v11453_v25 = vld [vmem:[%s14975_s2 + $0x8] ss:$16 sps:$4 sm:$0xff]   ;;  %v11458_v26 = vld [vmem:[%s14975_s2 + $0x24] ss:$16 sps:$4 sm:$0xff]  }
 0x630   : > { %v5790_v0 = vpop.f32.mrb[15].mxu0  ;;  %6091 = vmatprep.subr.bf16.mxu0 %v10481_v47  ;;  %v2778_v47 = vld [vmem:[%s16013_s9 + $0xeb0] sm:$0xff]  ;;  %v11461_v29 = vld [vmem:[%s14975_s2 + $0x2c] ss:$16 sps:$4 sm:$0xff]  }
 0x631   : > { %v10591_v60 = vcombine.high %v2778_v47, %v2786_v49  ;;  %v2794_v61 = vld [vmem:[%s16013_s9 + $0xf30] sm:$0xff]  ;;  %v15328_v0 = vld [vmem:[%s16014_s10] sm:$0xff]  ;;  %v10590_v3 = vcombine.low %v2778_v47, %v2786_v49  ;;  %v11473_v36 = vld [vmem:[%s14975_s2 + $0x6c] ss:$16 sps:$4 sm:$0xff]  }
 0x632   : > { %6010 = vmatpush1.bf16.msra.mxu1 %v10478_v56  ;;  %v2787_v56 = vld [vmem:[%s16013_s9 + $0xef8] sm:$0xff]  ;;  %v2831_v11 = vrot.slane %v15328_v0, %v13730_v54  ;;  %v11456_v27 = vld [vmem:[%s14975_s2 + $0x20] ss:$16 sps:$4 sm:$0xff]   ;;  %v11476_v38 = vld [vmem:[%s14975_s2 + $0x84] ss:$16 sps:$4 sm:$0xff]  }
 0x633   : > { %6092 = vmatpush1.bf16.msra.mxu0 %v10480_v62  ;;  %6011 = vmatprep.subr.bf16.mxu1 %v10495_v63  ;;  %v2802_v62 = vld [vmem:[%s16013_s9 + $0xf70] sm:$0xff]  ;;  %v2795_v63 = vld [vmem:[%s16013_s9 + $0xf38] sm:$0xff] }
 0x634   : > { %6093 = vmatprep.subr.bf16.mxu0 %v10497_v1  ;;  %v10593_v1 = vcombine.high %v2779_v50, %v2787_v56  ;;  %v10609_v8 = vcombine.high %v2795_v63, %v2803_v2  ;;  %v11174_v17 = vadd.f32 %v14828_v45, %v2831_v11  ;;  %v11482_v47 = vld [vmem:[%s14975_s2 + $0xa4] ss:$16 sps:$4 sm:$0xff]   ;;  %v11480_v49 = vld [vmem:[%s14975_s2 + $0xa0] ss:$16 sps:$4 sm:$0xff]  }
 0x635   : > { %v11510_v11 = vld [vmem:[%s14975_s2 + $0x140] ss:$16 sps:$4 sm:$0xff]  }
 0x636   : > { %6012 = vmatpush1.bf16.msra.mxu1 %v10494_v4  ;;  %v10592_v4 = vcombine.low %v2779_v50, %v2787_v56  ;;  %v11485_v50 = vld [vmem:[%s14975_s2 + $0xac] ss:$16 sps:$4 sm:$0xff]   ;;  %v11488_v56 = vld [vmem:[%s14975_s2 + $0xc4] ss:$16 sps:$4 sm:$0xff]  }
 0x637   : > { %6094 = vmatpush1.bf16.msra.mxu0 %v10496_v5  ;;  %6013 = vmatprep.subr.bf16.mxu1 %v10511_v6  ;;  %v10607_v5 = vcombine.high %v2794_v61, %v2802_v62  ;;  %v2810_v6 = vld [vmem:[%s16013_s9 + $0xfb0] sm:$0xff] }
 0x638   : > { %6095 = vmatprep.subr.bf16.mxu0 %v10513_v40  ;;  %v2819_v40 = vld [vmem:[%s16013_s9 + $0xff8] sm:$0xff]  ;;  %v10622_v19 = vcombine.low %v2810_v6, %v2818_v7 }
 0x639   : > { %v10625_v16 = vcombine.high %v2811_v33, %v2819_v40 }
 0x63a   : > { %6014 = vmatpush1.bf16.msra.mxu1 %v10510_v12  ;;  %v10606_v12 = vcombine.low %v2794_v61, %v2802_v62  ;;  %v11494_v61 = vld [vmem:[%s14975_s2 + $0xe4] ss:$16 sps:$4 sm:$0xff]   ;;  %v11492_v62 = vld [vmem:[%s14975_s2 + $0xe0] ss:$16 sps:$4 sm:$0xff]  }
 0x63b   : > { %6096 = vmatpush1.bf16.msra.mxu0 %v10512_v13  ;;  %6015 = vmatprep.subr.bf16.mxu1 %v10527_v14  ;;  %v10608_v13 = vcombine.low %v2795_v63, %v2803_v2  ;;  %v10623_v14 = vcombine.high %v2810_v6, %v2818_v7  ;;  %v11497_v63 = vld [vmem:[%s14975_s2 + $0xec] ss:$16 sps:$4 sm:$0xff]   ;;  %v11500_v2 = vld [vmem:[%s14975_s2 + $0x104] ss:$16 sps:$4 sm:$0xff]   ;;  %v11504_v7 = vld [vmem:[%s14975_s2 + $0x120] ss:$16 sps:$4 sm:$0xff]  }
 0x63c   : > { %6097 = vmatprep.subr.bf16.mxu0 %v10529_v20  ;;  %v10624_v20 = vcombine.low %v2811_v33, %v2819_v40  ;;  %v11506_v6 = vld [vmem:[%s14975_s2 + $0x124] ss:$16 sps:$4 sm:$0xff]   ;;  %v11509_v33 = vld [vmem:[%s14975_s2 + $0x12c] ss:$16 sps:$4 sm:$0xff]  }
 0x63d   : > { %v11512_v40 = vld [vmem:[%s14975_s2 + $0x144] ss:$16 sps:$4 sm:$0xff]  }
 0x63e   : > { %6016 = vmatpush1.bf16.msra.mxu1 %v10526_v22  ;;  %v11450_v22 = vld [vmem:[%s14975_s2] ss:$16 sps:$4 sm:$0xff]  }
 0x63f   : > { %6098 = vmatpush1.bf16.msra.mxu0 %v10528_v23  ;;  %6017 = vmatprep.subr.bf16.mxu1 %v10543_v24  ;;  %v11455_v23 = vld [vmem:[%s14975_s2 + $0xc] ss:$16 sps:$4 sm:$0xff]   ;;  %v6121_v24 = vmax.f32 %v11174_v17, 0.0 }
 0x640   : > { %6099 = vmatprep.subr.bf16.mxu0 %v10545_v28  ;;  %v11459_v28 = vld [vmem:[%s14975_s2 + $0x28] ss:$16 sps:$4 sm:$0xff]   ;;  %v11521_v17 = vld [vmem:[%s14975_s2 + $0x16c] ss:$16 sps:$4 sm:$0xff]  }
 0x641   : > { %v6137_v45 = vpack.c.bf16 %v6121_v24, %v6121_v24  ;;  %v11530_v24 = vld [vmem:[%s14975_s2 + $0x1a4] ss:$16 sps:$4 sm:$0xff]  }
 0x642   : > { %6018 = vmatpush1.bf16.msra.mxu1 %v10542_v30  ;;  %v11464_v30 = vld [vmem:[%s14975_s2 + $0x44] ss:$16 sps:$4 sm:$0xff]  }
 0x643   : > { %6100 = vmatpush1.bf16.msra.mxu0 %v10544_v31  ;;  %6019 = vmatprep.subr.bf16.mxu1 %v10559_v34  ;;  %v11467_v31 = vld [vmem:[%s14975_s2 + $0x4c] ss:$16 sps:$4 sm:$0xff]   ;;  %v11462_v34 = vld [vmem:[%s14975_s2 + $0x40] ss:$16 sps:$4 sm:$0xff]  }
 0x644   : > { %6101 = vmatprep.subr.bf16.mxu0 %v10561_v37  ;;  %v11471_v37 = vld [vmem:[%s14975_s2 + $0x68] ss:$16 sps:$4 sm:$0xff]  }
 0x646   : > { %6020 = vmatpush1.bf16.msra.mxu1 %v10558_v39  ;;  %v11474_v39 = vld [vmem:[%s14975_s2 + $0x80] ss:$16 sps:$4 sm:$0xff]  }
 0x647   : > { %6102 = vmatpush1.bf16.msra.mxu0 %v10560_v43  ;;  %6021 = vmatprep.subr.bf16.mxu1 %v10575_v15  ;;  %v11479_v43 = vld [vmem:[%s14975_s2 + $0x8c] ss:$16 sps:$4 sm:$0xff]   ;;  %v11477_v15 = vld [vmem:[%s14975_s2 + $0x88] ss:$16 sps:$4 sm:$0xff]  }
 0x648   : > { %6103 = vmatprep.subr.bf16.mxu0 %v10577_v55  ;;  %v11483_v55 = vld [vmem:[%s14975_s2 + $0xa8] ss:$16 sps:$4 sm:$0xff]  }
 0x64a   : > { %6022 = vmatpush1.bf16.msra.mxu1 %v10574_v58  ;;  %v11486_v58 = vld [vmem:[%s14975_s2 + $0xc0] ss:$16 sps:$4 sm:$0xff]  }
 0x64b   : > { %6104 = vmatpush1.bf16.msra.mxu0 %v10576_v59  ;;  %6023 = vmatprep.subr.bf16.mxu1 %v10591_v60  ;;  %v11491_v59 = vld [vmem:[%s14975_s2 + $0xcc] ss:$16 sps:$4 sm:$0xff]   ;;  %v11489_v60 = vld [vmem:[%s14975_s2 + $0xc8] ss:$16 sps:$4 sm:$0xff]  }
 0x64c   : > { %6105 = vmatprep.subr.bf16.mxu0 %v10593_v1  ;;  %v11495_v1 = vld [vmem:[%s14975_s2 + $0xe8] ss:$16 sps:$4 sm:$0xff]  }
 0x64e   : > { %6024 = vmatpush1.bf16.msra.mxu1 %v10590_v3  ;;  %v11498_v3 = vld [vmem:[%s14975_s2 + $0x100] ss:$16 sps:$4 sm:$0xff]  }
 0x64f   : > { %6106 = vmatpush1.bf16.msra.mxu0 %v10592_v4  ;;  %6025 = vmatprep.subr.bf16.mxu1 %v10607_v5  ;;  %v11503_v4 = vld [vmem:[%s14975_s2 + $0x10c] ss:$16 sps:$4 sm:$0xff]   ;;  %v11501_v5 = vld [vmem:[%s14975_s2 + $0x108] ss:$16 sps:$4 sm:$0xff]  }
 0x650   : > { %6107 = vmatprep.subr.bf16.mxu0 %v10609_v8  ;;  %v11507_v8 = vld [vmem:[%s14975_s2 + $0x128] ss:$16 sps:$4 sm:$0xff]  }
 0x652   : > { %6026 = vmatpush1.bf16.msra.mxu1 %v10606_v12  ;;  %v11515_v12 = vld [vmem:[%s14975_s2 + $0x14c] ss:$16 sps:$4 sm:$0xff]  }
 0x653   : > { %6108 = vmatpush1.bf16.msra.mxu0 %v10608_v13  ;;  %6027 = vmatprep.subr.bf16.mxu1 %v10623_v14  ;;  %v11513_v13 = vld [vmem:[%s14975_s2 + $0x148] ss:$16 sps:$4 sm:$0xff]   ;;  %v11518_v14 = vld [vmem:[%s14975_s2 + $0x164] ss:$16 sps:$4 sm:$0xff]  }
 0x654   : > { %6109 = vmatprep.subr.bf16.mxu0 %v10625_v16  ;;  %v11516_v16 = vld [vmem:[%s14975_s2 + $0x160] ss:$16 sps:$4 sm:$0xff]  }
 0x656   : > { %6028 = vmatpush1.bf16.msra.mxu1 %v10622_v19  ;;  %v11519_v19 = vld [vmem:[%s14975_s2 + $0x168] ss:$16 sps:$4 sm:$0xff]  }
 0x657   : > { %6110 = vmatpush1.bf16.msra.mxu0 %v10624_v20  ;;  %9246 = vmatprep.subr.bf16.mxu1 %v11452_v21  ;;  %v11524_v20 = vld [vmem:[%s14975_s2 + $0x184] ss:$16 sps:$4 sm:$0xff]   ;;  %v11522_v21 = vld [vmem:[%s14975_s2 + $0x180] ss:$16 sps:$4 sm:$0xff]  }
 0x658   : > { %9574 = vmatprep.subr.bf16.mxu0 %v11455_v23  ;;  %v11525_v23 = vld [vmem:[%s14975_s2 + $0x188] ss:$16 sps:$4 sm:$0xff]  }
 0x659   : > { %6030 = vmatmul.mubr.bf16.vlgmr.msra.gmra.mrb[24].mxu1 %v14164_v57 }
 0x65a   : > { %6112 = vmatmul.mubr.bf16.vlgmr.msra.gmra.mrb[20].mxu0 %v14164_v57  ;;  %9247 = vmatpush1.bf16.msra.mxu1 %v11450_v22  ;;  %v11470_v57 = vld [vmem:[%s14975_s2 + $0x64] ss:$16 sps:$4 sm:$0xff]   ;;  %v11527_v22 = vld [vmem:[%s14975_s2 + $0x18c] ss:$16 sps:$4 sm:$0xff]  }
 0x65b   : > { %9278 = vmatprep.mubr.bf16.mxu1 %v6137_v45  ;;  %9575 = vmatpush1.bf16.msra.mxu0 %v11453_v25  ;;  %v11528_v25 = vld [vmem:[%s14975_s2 + $0x1a0] ss:$16 sps:$4 sm:$0xff]  }
 0x65c   : > { %9606 = vmatprep.mubr.bf16.mxu0 %v6137_v45  ;;  %9248 = vmatprep.subr.bf16.mxu1 %v11458_v26  ;;  %v11533_v26 = vld [vmem:[%s14975_s2 + $0x1ac] ss:$16 sps:$4 sm:$0xff]   ;;  %v2827_v45 = vrot.slane %v15328_v0, %v13724_v52 }
 0x65d   : > { %9576 = vmatprep.subr.bf16.mxu0 %v11461_v29  ;;  %v11534_v29 = vld [vmem:[%s14975_s2 + $0x1c0] ss:$16 sps:$4 sm:$0xff]  }
 0x65e   : > { %9249 = vmatpush1.bf16.msra.mxu1 %v11456_v27  ;;  %v11531_v27 = vld [vmem:[%s14975_s2 + $0x1a8] ss:$16 sps:$4 sm:$0xff]  }
 0x65f   : > { %9577 = vmatpush1.bf16.msra.mxu0 %v11459_v28  ;;  %9250 = vmatprep.subr.bf16.mxu1 %v11464_v30  ;;  %v11536_v28 = vld [vmem:[%s14975_s2 + $0x1c4] ss:$16 sps:$4 sm:$0xff]   ;;  %v11539_v30 = vld [vmem:[%s14975_s2 + $0x1cc] ss:$16 sps:$4 sm:$0xff]  }
 0x660   : > { %9578 = vmatprep.subr.bf16.mxu0 %v11467_v31  ;;  %v2839_v31 = vrot.slane %v15328_v0, %v13932_v10  ;;  %v11543_v0 = vld [vmem:[%s14975_s2 + $0x1e8] ss:$16 sps:$4 sm:$0xff]  }
 0x662   : > { %9251 = vmatpush1.bf16.msra.mxu1 %v11462_v34  ;;  %v11173_v34 = vadd.f32 %v14818_v41, %v2827_v45  ;;  %v11548_v41 = vld [vmem:[%s14975_s2 + $0x204] ss:$16 sps:$4 sm:$0xff]  }
 0x663   : > { %9579 = vmatpush1.bf16.msra.mxu0 %v11465_v9  ;;  %9252 = vmatprep.subr.bf16.mxu1 %v11470_v57  ;;  %v11537_v9 = vld [vmem:[%s14975_s2 + $0x1c8] ss:$16 sps:$4 sm:$0xff]   ;;  %v11542_v57 = vld [vmem:[%s14975_s2 + $0x1e4] ss:$16 sps:$4 sm:$0xff]  }
 0x664   : > { %9580 = vmatprep.subr.bf16.mxu0 %v11473_v36  ;;  %v11545_v36 = vld [vmem:[%s14975_s2 + $0x1ec] ss:$16 sps:$4 sm:$0xff]  }
 0x666   : > { %9253 = vmatpush1.bf16.msra.mxu1 %v11468_v35  ;;  %v11540_v35 = vld [vmem:[%s14975_s2 + $0x1e0] ss:$16 sps:$4 sm:$0xff]  }
 0x667   : > { %9581 = vmatpush1.bf16.msra.mxu0 %v11471_v37  ;;  %9254 = vmatprep.subr.bf16.mxu1 %v11476_v38  ;;  %v11176_v37 = vadd.f32 %v14830_v46, %v2839_v31  ;;  %v6120_v38 = vmax.f32 %v11173_v34, 0.0  ;;  %v11599_v31 = vld [vmem:[%s14975_s2 + $0x30c] ss:$16 sps:$4 sm:$0xff]   ;;  %v11597_v34 = vld [vmem:[%s14975_s2 + $0x308] ss:$16 sps:$4 sm:$0xff]  }
 0x668   : > { %9582 = vmatprep.subr.bf16.mxu0 %v11479_v43  ;;  %v11551_v43 = vld [vmem:[%s14975_s2 + $0x20c] ss:$16 sps:$4 sm:$0xff]  }
 0x66a   : > { %9255 = vmatpush1.bf16.msra.mxu1 %v11474_v39  ;;  %v11546_v39 = vld [vmem:[%s14975_s2 + $0x200] ss:$16 sps:$4 sm:$0xff]  }
 0x66b   : > { %9583 = vmatpush1.bf16.msra.mxu0 %v11477_v15  ;;  %9256 = vmatprep.subr.bf16.mxu1 %v11482_v47  ;;  %v6123_v15 = vmax.f32 %v11176_v37, 0.0  ;;  %v11549_v47 = vld [vmem:[%s14975_s2 + $0x208] ss:$16 sps:$4 sm:$0xff]   ;;  %v11608_v37 = vld [vmem:[%s14975_s2 + $0x344] ss:$16 sps:$4 sm:$0xff]  }
 0x66c   : > { %9584 = vmatprep.subr.bf16.mxu0 %v11485_v50  ;;  %v6136_v50 = vpack.c.bf16 %v6120_v38, %v6120_v38  ;;  %v11606_v38 = vld [vmem:[%s14975_s2 + $0x340] ss:$16 sps:$4 sm:$0xff]  }
 0x66d   : > { %v6139_v46 = vpack.c.bf16 %v6123_v15, %v6123_v15  ;;  %v11617_v15 = vld [vmem:[%s14975_s2 + $0x36c] ss:$16 sps:$4 sm:$0xff]  }
 0x66e   : > { %9257 = vmatpush1.bf16.msra.mxu1 %v11480_v49  ;;  %v11554_v49 = vld [vmem:[%s14975_s2 + $0x224] ss:$16 sps:$4 sm:$0xff]  }
 0x66f   : > { %9585 = vmatpush1.bf16.msra.mxu0 %v11483_v55  ;;  %9258 = vmatprep.subr.bf16.mxu1 %v11488_v56  ;;  %v11552_v55 = vld [vmem:[%s14975_s2 + $0x220] ss:$16 sps:$4 sm:$0xff]   ;;  %v11555_v56 = vld [vmem:[%s14975_s2 + $0x228] ss:$16 sps:$4 sm:$0xff]  }
 0x670   : > { %9586 = vmatprep.subr.bf16.mxu0 %v11491_v59  ;;  %v11560_v59 = vld [vmem:[%s14975_s2 + $0x244] ss:$16 sps:$4 sm:$0xff]  }
 0x672   : > { %9259 = vmatpush1.bf16.msra.mxu1 %v11486_v58  ;;  %v11557_v58 = vld [vmem:[%s14975_s2 + $0x22c] ss:$16 sps:$4 sm:$0xff]  }
 0x673   : > { %9587 = vmatpush1.bf16.msra.mxu0 %v11489_v60  ;;  %9260 = vmatprep.subr.bf16.mxu1 %v11494_v61  ;;  %v11563_v60 = vld [vmem:[%s14975_s2 + $0x24c] ss:$16 sps:$4 sm:$0xff]   ;;  %v11558_v61 = vld [vmem:[%s14975_s2 + $0x240] ss:$16 sps:$4 sm:$0xff]  }
 0x674   : > { %9588 = vmatprep.subr.bf16.mxu0 %v11497_v63  ;;  %v11566_v63 = vld [vmem:[%s14975_s2 + $0x264] ss:$16 sps:$4 sm:$0xff]  }
 0x676   : > { %9261 = vmatpush1.bf16.msra.mxu1 %v11492_v62  ;;  %v11561_v62 = vld [vmem:[%s14975_s2 + $0x248] ss:$16 sps:$4 sm:$0xff]  }
 0x677   : > { %9589 = vmatpush1.bf16.msra.mxu0 %v11495_v1  ;;  %9262 = vmatprep.subr.bf16.mxu1 %v11500_v2  ;;  %v11564_v1 = vld [vmem:[%s14975_s2 + $0x260] ss:$16 sps:$4 sm:$0xff]   ;;  %v11569_v2 = vld [vmem:[%s14975_s2 + $0x26c] ss:$16 sps:$4 sm:$0xff]  }
 0x678   : > { %9590 = vmatprep.subr.bf16.mxu0 %v11503_v4  ;;  %v11572_v4 = vld [vmem:[%s14975_s2 + $0x284] ss:$16 sps:$4 sm:$0xff]  }
 0x67a   : > { %9263 = vmatpush1.bf16.msra.mxu1 %v11498_v3  ;;  %v11567_v3 = vld [vmem:[%s14975_s2 + $0x268] ss:$16 sps:$4 sm:$0xff]  }
 0x67b   : > { %9591 = vmatpush1.bf16.msra.mxu0 %v11501_v5  ;;  %9264 = vmatprep.subr.bf16.mxu1 %v11506_v6  ;;  %v11570_v5 = vld [vmem:[%s14975_s2 + $0x280] ss:$16 sps:$4 sm:$0xff]   ;;  %v11575_v6 = vld [vmem:[%s14975_s2 + $0x28c] ss:$16 sps:$4 sm:$0xff]  }
 0x67c   : > { %9592 = vmatprep.subr.bf16.mxu0 %v11509_v33  ;;  %v11578_v33 = vld [vmem:[%s14975_s2 + $0x2a4] ss:$16 sps:$4 sm:$0xff]  }
 0x67e   : > { %9265 = vmatpush1.bf16.msra.mxu1 %v11504_v7  ;;  %v11573_v7 = vld [vmem:[%s14975_s2 + $0x288] ss:$16 sps:$4 sm:$0xff]  }
 0x67f   : > { %9593 = vmatpush1.bf16.msra.mxu0 %v11507_v8  ;;  %9266 = vmatprep.subr.bf16.mxu1 %v11512_v40  ;;  %v11581_v8 = vld [vmem:[%s14975_s2 + $0x2ac] ss:$16 sps:$4 sm:$0xff]   ;;  %v11576_v40 = vld [vmem:[%s14975_s2 + $0x2a0] ss:$16 sps:$4 sm:$0xff]  }
 0x680   : > { %9594 = vmatprep.subr.bf16.mxu0 %v11515_v12  ;;  %v11584_v12 = vld [vmem:[%s14975_s2 + $0x2c4] ss:$16 sps:$4 sm:$0xff]  }
 0x682   : > { %9267 = vmatpush1.bf16.msra.mxu1 %v11510_v11  ;;  %v11579_v11 = vld [vmem:[%s14975_s2 + $0x2a8] ss:$16 sps:$4 sm:$0xff]  }
 0x683   : > { %9595 = vmatpush1.bf16.msra.mxu0 %v11513_v13  ;;  %9268 = vmatprep.subr.bf16.mxu1 %v11518_v14  ;;  %v11587_v13 = vld [vmem:[%s14975_s2 + $0x2cc] ss:$16 sps:$4 sm:$0xff]  }
 0x684   : > { %9596 = vmatprep.subr.bf16.mxu0 %v11521_v17 }
 0x686   : > { %9269 = vmatpush1.bf16.msra.mxu1 %v11516_v16 }
 0x687   : > { %9597 = vmatpush1.bf16.msra.mxu0 %v11519_v19  ;;  %9270 = vmatprep.subr.bf16.mxu1 %v11524_v20  ;;  %v11582_v19 = vld [vmem:[%s14975_s2 + $0x2c0] ss:$16 sps:$4 sm:$0xff]   ;;  %v11585_v20 = vld [vmem:[%s14975_s2 + $0x2c8] ss:$16 sps:$4 sm:$0xff]  }
 0x688   : > { %9598 = vmatprep.subr.bf16.mxu0 %v11527_v22 }
 0x68a   : > { %9271 = vmatpush1.bf16.msra.mxu1 %v11522_v21 }
 0x68b   : > { %9599 = vmatpush1.bf16.msra.mxu0 %v11525_v23  ;;  %9272 = vmatprep.subr.bf16.mxu1 %v11530_v24  ;;  %v11590_v23 = vld [vmem:[%s14975_s2 + $0x2e4] ss:$16 sps:$4 sm:$0xff]   ;;  %v11593_v24 = vld [vmem:[%s14975_s2 + $0x2ec] ss:$16 sps:$4 sm:$0xff]  }
 0x68c   : > { %9600 = vmatprep.subr.bf16.mxu0 %v11533_v26 }
 0x68e   : > { %9273 = vmatpush1.bf16.msra.mxu1 %v11528_v25 }
 0x68f   : > { %9601 = vmatpush1.bf16.msra.mxu0 %v11531_v27  ;;  %9274 = vmatprep.subr.bf16.mxu1 %v11536_v28  ;;  %v11588_v27 = vld [vmem:[%s14975_s2 + $0x2e0] ss:$16 sps:$4 sm:$0xff]   ;;  %v11591_v28 = vld [vmem:[%s14975_s2 + $0x2e8] ss:$16 sps:$4 sm:$0xff]  }
 0x690   : > { %9602 = vmatprep.subr.bf16.mxu0 %v11539_v30  ;;  %v11594_v30 = vld [vmem:[%s14975_s2 + $0x300] ss:$16 sps:$4 sm:$0xff]  }
 0x692   : > { %9275 = vmatpush1.bf16.msra.mxu1 %v11534_v29  ;;  %v11596_v29 = vld [vmem:[%s14975_s2 + $0x304] ss:$16 sps:$4 sm:$0xff]  }
 0x693   : > { %9603 = vmatpush1.bf16.msra.mxu0 %v11537_v9  ;;  %9276 = vmatprep.subr.bf16.mxu1 %v11542_v57  ;;  %v11602_v9 = vld [vmem:[%s14975_s2 + $0x324] ss:$16 sps:$4 sm:$0xff]   ;;  %v11600_v57 = vld [vmem:[%s14975_s2 + $0x320] ss:$16 sps:$4 sm:$0xff]  }
 0x694   : > { %9604 = vmatprep.subr.bf16.mxu0 %v11545_v36  ;;  %v11603_v36 = vld [vmem:[%s14975_s2 + $0x328] ss:$16 sps:$4 sm:$0xff]  }
 0x696   : > { %9277 = vmatpush1.bf16.msra.mxu1 %v11540_v35  ;;  %v11605_v35 = vld [vmem:[%s14975_s2 + $0x32c] ss:$16 sps:$4 sm:$0xff]  }
 0x697   : > { %9605 = vmatpush1.bf16.msra.mxu0 %v11543_v0  ;;  %9287 = vmatprep.subr.bf16.mxu1 %v11548_v41  ;;  %v11611_v0 = vld [vmem:[%s14975_s2 + $0x34c] ss:$16 sps:$4 sm:$0xff]   ;;  %v11609_v41 = vld [vmem:[%s14975_s2 + $0x348] ss:$16 sps:$4 sm:$0xff]  }
 0x698   : > { %9615 = vmatprep.subr.bf16.mxu0 %v11551_v43  ;;  %v11612_v43 = vld [vmem:[%s14975_s2 + $0x360] ss:$16 sps:$4 sm:$0xff]  }
 0x699   : > { %9279 = vmatmul.mubr.bf16.vlgmr.msra.gmra.mrb[28].mxu1 %v6136_v50 }
 0x69a   : > { %9607 = vmatmul.mubr.bf16.vlgmr.msra.gmra.mrb[24].mxu0 %v6136_v50  ;;  %9288 = vmatpush1.bf16.msra.mxu1 %v11546_v39  ;;  %v11614_v39 = vld [vmem:[%s14975_s2 + $0x364] ss:$16 sps:$4 sm:$0xff]   ;;  %v11618_v50 = vld [vmem:[%s14975_s2 + $0x380] ss:$16 sps:$4 sm:$0xff]  }
 0x69b   : > { %9319 = vmatprep.mubr.bf16.mxu1 %v6139_v46  ;;  %9616 = vmatpush1.bf16.msra.mxu0 %v11549_v47  ;;  %v11615_v47 = vld [vmem:[%s14975_s2 + $0x368] ss:$16 sps:$4 sm:$0xff]  }
 0x69c   : > { %9647 = vmatprep.mubr.bf16.mxu0 %v6139_v46  ;;  %9289 = vmatprep.subr.bf16.mxu1 %v11554_v49  ;;  %v11620_v49 = vld [vmem:[%s14975_s2 + $0x384] ss:$16 sps:$4 sm:$0xff]   ;;  %v11623_v46 = vld [vmem:[%s14975_s2 + $0x38c] ss:$16 sps:$4 sm:$0xff]  }
 0x69d   : > { %9617 = vmatprep.subr.bf16.mxu0 %v11557_v58  ;;  %v11624_v58 = vld [vmem:[%s14975_s2 + $0x3a0] ss:$16 sps:$4 sm:$0xff]  }
 0x69e   : > { %9290 = vmatpush1.bf16.msra.mxu1 %v11552_v55  ;;  %v11621_v55 = vld [vmem:[%s14975_s2 + $0x388] ss:$16 sps:$4 sm:$0xff]  }
 0x69f   : > { %9618 = vmatpush1.bf16.msra.mxu0 %v11555_v56  ;;  %9291 = vmatprep.subr.bf16.mxu1 %v11560_v59  ;;  %v11626_v56 = vld [vmem:[%s14975_s2 + $0x3a4] ss:$16 sps:$4 sm:$0xff]   ;;  %v11629_v59 = vld [vmem:[%s14975_s2 + $0x3ac] ss:$16 sps:$4 sm:$0xff]  }
 0x6a0   : > { %9619 = vmatprep.subr.bf16.mxu0 %v11563_v60  ;;  %v2846_v60 = vsub.s32 5, %v13721_v51 }
 0x6a2   : > { %9292 = vmatpush1.bf16.msra.mxu1 %v11558_v61  ;;  %v15487_v61 = vld [vmem:[%s16014_s10] sm:$0xff] }
 0x6a3   : > { %9620 = vmatpush1.bf16.msra.mxu0 %v11561_v62  ;;  %9293 = vmatprep.subr.bf16.mxu1 %v11566_v63  ;;  %v2835_v62 = vrot.slane %v15487_v61, %v14111_v18  ;;  %v11627_v63 = vld [vmem:[%s14975_s2 + $0x3a8] ss:$16 sps:$4 sm:$0xff]  }
 0x6a4   : > { %9621 = vmatprep.subr.bf16.mxu0 %v11569_v2  ;;  %v11630_v2 = vld [vmem:[%s14975_s2 + $0x3c0] ss:$16 sps:$4 sm:$0xff]  }
 0x6a6   : > { %9294 = vmatpush1.bf16.msra.mxu1 %v11564_v1  ;;  %v11632_v1 = vld [vmem:[%s14975_s2 + $0x3c4] ss:$16 sps:$4 sm:$0xff]  }
 0x6a7   : > { %9622 = vmatpush1.bf16.msra.mxu0 %v11567_v3  ;;  %9295 = vmatprep.subr.bf16.mxu1 %v11572_v4  ;;  %v11635_v3 = vld [vmem:[%s14975_s2 + $0x3cc] ss:$16 sps:$4 sm:$0xff]   ;;  %v2847_v4 = vrot.slane %v15487_v61, %v2846_v60 }
 0x6a8   : > { %9623 = vmatprep.subr.bf16.mxu0 %v11575_v6  ;;  %v11633_v6 = vld [vmem:[%s14975_s2 + $0x3c8] ss:$16 sps:$4 sm:$0xff]  }
 0x6aa   : > { %9296 = vmatpush1.bf16.msra.mxu1 %v11570_v5  ;;  %v11175_v5 = vadd.f32 %v14820_v42, %v2835_v62  ;;  %v11644_v42 = vld [vmem:[%s14975_s2 + $0x404] ss:$16 sps:$4 sm:$0xff]   ;;  %v11695_v62 = vld [vmem:[%s14975_s2 + $0x50c] ss:$16 sps:$4 sm:$0xff]  }
 0x6ab   : > { %9624 = vmatpush1.bf16.msra.mxu0 %v11573_v7  ;;  %9297 = vmatprep.subr.bf16.mxu1 %v11578_v33  ;;  %v11638_v7 = vld [vmem:[%s14975_s2 + $0x3e4] ss:$16 sps:$4 sm:$0xff]   ;;  %v11636_v33 = vld [vmem:[%s14975_s2 + $0x3e0] ss:$16 sps:$4 sm:$0xff]  }
 0x6ac   : > { %v15446_v14 = vpop.f32.mrb[20].mxu1  ;;  %9625 = vmatprep.subr.bf16.mxu0 %v11581_v8  ;;  %v11641_v8 = vld [vmem:[%s14975_s2 + $0x3ec] ss:$16 sps:$4 sm:$0xff]  }
 0x6ad   : > { %v15448_v16 = vpop.f32.mrb[16].mxu0  ;;  %v15450_v17 = vpop.f32.mrb[21].mxu1 }
 0x6ae   : > { %v15454_v21 = vpop.f32.mrb[17].mxu0  ;;  %v5871_v22 = vpop.f32.mrb[22].mxu1  ;;  %9298 = vmatpush1.bf16.msra.mxu1 %v11576_v40  ;;  %v11178_v40 = vadd.f32 %v15234_v48, %v2847_v4  ;;  %v11696_v4 = vld [vmem:[%s14975_s2 + $0x520] ss:$16 sps:$4 sm:$0xff]  }
 0x6af   : > { %v5953_v25 = vpop.f32.mrb[18].mxu0  ;;  %9626 = vmatpush1.bf16.msra.mxu0 %v11579_v11  ;;  %v5872_v26 = vpop.f32.mrb[23].mxu1  ;;  %9299 = vmatprep.subr.bf16.mxu1 %v11584_v12  ;;  %v6122_v11 = vmax.f32 %v11175_v5, 0.0  ;;  %v11639_v12 = vld [vmem:[%s14975_s2 + $0x3e8] ss:$16 sps:$4 sm:$0xff]  }
 0x6b0   : > { %v5954_v45 = vpop.f32.mrb[19].mxu0  ;;  %9627 = vmatprep.subr.bf16.mxu0 %v11587_v13  ;;  %v11642_v13 = vld [vmem:[%s14975_s2 + $0x400] ss:$16 sps:$4 sm:$0xff]   ;;  %v11645_v22 = vld [vmem:[%s14975_s2 + $0x408] ss:$16 sps:$4 sm:$0xff]  }
 0x6b1   : > { %v11648_v25 = vld [vmem:[%s14975_s2 + $0x420] ss:$16 sps:$4 sm:$0xff]   ;;  %v11651_v26 = vld [vmem:[%s14975_s2 + $0x428] ss:$16 sps:$4 sm:$0xff]   ;;  %v11653_v45 = vld [vmem:[%s14975_s2 + $0x42c] ss:$16 sps:$4 sm:$0xff]  }
 0x6b2   : > { %9300 = vmatpush1.bf16.msra.mxu1 %v11582_v19  ;;  %v11647_v19 = vld [vmem:[%s14975_s2 + $0x40c] ss:$16 sps:$4 sm:$0xff]   ;;  %v11699_v5 = vld [vmem:[%s14975_s2 + $0x528] ss:$16 sps:$4 sm:$0xff]  }
 0x6b3   : > { %9628 = vmatpush1.bf16.msra.mxu0 %v11585_v20  ;;  %9301 = vmatprep.subr.bf16.mxu1 %v11590_v23  ;;  %v6125_v20 = vmax.f32 %v11178_v40, 0.0  ;;  %v11650_v23 = vld [vmem:[%s14975_s2 + $0x424] ss:$16 sps:$4 sm:$0xff]  }
 0x6b4   : > { %9629 = vmatprep.subr.bf16.mxu0 %v11593_v24  ;;  %v6138_v24 = vpack.c.bf16 %v6122_v11, %v6122_v11  ;;  %v11710_v40 = vld [vmem:[%s14975_s2 + $0x564] ss:$16 sps:$4 sm:$0xff]   ;;  %v11713_v11 = vld [vmem:[%s14975_s2 + $0x56c] ss:$16 sps:$4 sm:$0xff]  }
 0x6b5   : > { %v6141_v48 = vpack.c.bf16 %v6125_v20, %v6125_v20  ;;  %v11714_v20 = vld [vmem:[%s14975_s2 + $0x580] ss:$16 sps:$4 sm:$0xff]  }
 0x6b6   : > { %9302 = vmatpush1.bf16.msra.mxu1 %v11588_v27  ;;  %v11656_v27 = vld [vmem:[%s14975_s2 + $0x444] ss:$16 sps:$4 sm:$0xff]  }
 0x6b7   : > { %9630 = vmatpush1.bf16.msra.mxu0 %v11591_v28  ;;  %9303 = vmatprep.subr.bf16.mxu1 %v11596_v29  ;;  %v11659_v28 = vld [vmem:[%s14975_s2 + $0x44c] ss:$16 sps:$4 sm:$0xff]   ;;  %v11654_v29 = vld [vmem:[%s14975_s2 + $0x440] ss:$16 sps:$4 sm:$0xff]  }
 0x6b8   : > { %9631 = vmatprep.subr.bf16.mxu0 %v11599_v31  ;;  %v11662_v31 = vld [vmem:[%s14975_s2 + $0x464] ss:$16 sps:$4 sm:$0xff]  }
 0x6ba   : > { %9304 = vmatpush1.bf16.msra.mxu1 %v11594_v30  ;;  %v11657_v30 = vld [vmem:[%s14975_s2 + $0x448] ss:$16 sps:$4 sm:$0xff]  }
 0x6bb   : > { %9632 = vmatpush1.bf16.msra.mxu0 %v11597_v34  ;;  %9305 = vmatprep.subr.bf16.mxu1 %v11602_v9  ;;  %v11665_v34 = vld [vmem:[%s14975_s2 + $0x46c] ss:$16 sps:$4 sm:$0xff]   ;;  %v11660_v9 = vld [vmem:[%s14975_s2 + $0x460] ss:$16 sps:$4 sm:$0xff]  }
 0x6bc   : > { %9633 = vmatprep.subr.bf16.mxu0 %v11605_v35  ;;  %v11668_v35 = vld [vmem:[%s14975_s2 + $0x484] ss:$16 sps:$4 sm:$0xff]  }
 0x6be   : > { %9306 = vmatpush1.bf16.msra.mxu1 %v11600_v57  ;;  %v11663_v57 = vld [vmem:[%s14975_s2 + $0x468] ss:$16 sps:$4 sm:$0xff]  }
 0x6bf   : > { %9634 = vmatpush1.bf16.msra.mxu0 %v11603_v36  ;;  %9307 = vmatprep.subr.bf16.mxu1 %v11608_v37  ;;  %v11671_v36 = vld [vmem:[%s14975_s2 + $0x48c] ss:$16 sps:$4 sm:$0xff]   ;;  %v11666_v37 = vld [vmem:[%s14975_s2 + $0x480] ss:$16 sps:$4 sm:$0xff]  }
 0x6c0   : > { %9635 = vmatprep.subr.bf16.mxu0 %v11611_v0  ;;  %v11674_v0 = vld [vmem:[%s14975_s2 + $0x4a4] ss:$16 sps:$4 sm:$0xff]  }
 0x6c2   : > { %9308 = vmatpush1.bf16.msra.mxu1 %v11606_v38  ;;  %v11669_v38 = vld [vmem:[%s14975_s2 + $0x488] ss:$16 sps:$4 sm:$0xff]  }
 0x6c3   : > { %9636 = vmatpush1.bf16.msra.mxu0 %v11609_v41  ;;  %9309 = vmatprep.subr.bf16.mxu1 %v11614_v39  ;;  %v11677_v41 = vld [vmem:[%s14975_s2 + $0x4ac] ss:$16 sps:$4 sm:$0xff]   ;;  %v11672_v39 = vld [vmem:[%s14975_s2 + $0x4a0] ss:$16 sps:$4 sm:$0xff]  }
 0x6c4   : > { %9637 = vmatprep.subr.bf16.mxu0 %v11617_v15  ;;  %v11680_v15 = vld [vmem:[%s14975_s2 + $0x4c4] ss:$16 sps:$4 sm:$0xff]  }
 0x6c6   : > { %9310 = vmatpush1.bf16.msra.mxu1 %v11612_v43  ;;  %v11675_v43 = vld [vmem:[%s14975_s2 + $0x4a8] ss:$16 sps:$4 sm:$0xff]  }
 0x6c7   : > { %9638 = vmatpush1.bf16.msra.mxu0 %v11615_v47  ;;  %9311 = vmatprep.subr.bf16.mxu1 %v11620_v49  ;;  %v11683_v47 = vld [vmem:[%s14975_s2 + $0x4cc] ss:$16 sps:$4 sm:$0xff]   ;;  %v11678_v49 = vld [vmem:[%s14975_s2 + $0x4c0] ss:$16 sps:$4 sm:$0xff]  }
 0x6c8   : > { %9639 = vmatprep.subr.bf16.mxu0 %v11623_v46  ;;  %v11686_v46 = vld [vmem:[%s14975_s2 + $0x4e4] ss:$16 sps:$4 sm:$0xff]  }
 0x6ca   : > { %9312 = vmatpush1.bf16.msra.mxu1 %v11618_v50  ;;  %v11681_v50 = vld [vmem:[%s14975_s2 + $0x4c8] ss:$16 sps:$4 sm:$0xff]  }
 0x6cb   : > { %9640 = vmatpush1.bf16.msra.mxu0 %v11621_v55  ;;  %9313 = vmatprep.subr.bf16.mxu1 %v11626_v56  ;;  %v11689_v55 = vld [vmem:[%s14975_s2 + $0x4ec] ss:$16 sps:$4 sm:$0xff]   ;;  %v11684_v56 = vld [vmem:[%s14975_s2 + $0x4e0] ss:$16 sps:$4 sm:$0xff]  }
 0x6cc   : > { %9641 = vmatprep.subr.bf16.mxu0 %v11629_v59  ;;  %v11692_v59 = vld [vmem:[%s14975_s2 + $0x504] ss:$16 sps:$4 sm:$0xff]  }
 0x6ce   : > { %9314 = vmatpush1.bf16.msra.mxu1 %v11624_v58  ;;  %v11687_v58 = vld [vmem:[%s14975_s2 + $0x4e8] ss:$16 sps:$4 sm:$0xff]  }
 0x6cf   : > { %9642 = vmatpush1.bf16.msra.mxu0 %v11627_v63  ;;  %9315 = vmatprep.subr.bf16.mxu1 %v11632_v1  ;;  %v11690_v63 = vld [vmem:[%s14975_s2 + $0x500] ss:$16 sps:$4 sm:$0xff]   ;;  %v11693_v1 = vld [vmem:[%s14975_s2 + $0x508] ss:$16 sps:$4 sm:$0xff]  }
 0x6d0   : > { %9643 = vmatprep.subr.bf16.mxu0 %v11635_v3  ;;  %v11701_v3 = vld [vmem:[%s14975_s2 + $0x52c] ss:$16 sps:$4 sm:$0xff]  }
 0x6d2   : > { %9316 = vmatpush1.bf16.msra.mxu1 %v11630_v2  ;;  %v11698_v2 = vld [vmem:[%s14975_s2 + $0x524] ss:$16 sps:$4 sm:$0xff]  }
 0x6d3   : > { %9644 = vmatpush1.bf16.msra.mxu0 %v11633_v6  ;;  %9317 = vmatprep.subr.bf16.mxu1 %v11638_v7  ;;  %v11704_v6 = vld [vmem:[%s14975_s2 + $0x544] ss:$16 sps:$4 sm:$0xff]   ;;  %v11707_v7 = vld [vmem:[%s14975_s2 + $0x54c] ss:$16 sps:$4 sm:$0xff]  }
 0x6d4   : > { %9645 = vmatprep.subr.bf16.mxu0 %v11641_v8  ;;  %v11705_v8 = vld [vmem:[%s14975_s2 + $0x548] ss:$16 sps:$4 sm:$0xff]  }
 0x6d6   : > { %9318 = vmatpush1.bf16.msra.mxu1 %v11636_v33  ;;  %v11702_v33 = vld [vmem:[%s14975_s2 + $0x540] ss:$16 sps:$4 sm:$0xff]  }
 0x6d7   : > { %9646 = vmatpush1.bf16.msra.mxu0 %v11639_v12  ;;  %9328 = vmatprep.subr.bf16.mxu1 %v11644_v42  ;;  %v11708_v12 = vld [vmem:[%s14975_s2 + $0x560] ss:$16 sps:$4 sm:$0xff]   ;;  %v11711_v42 = vld [vmem:[%s14975_s2 + $0x568] ss:$16 sps:$4 sm:$0xff]  }
 0x6d8   : > { %9656 = vmatprep.subr.bf16.mxu0 %v11647_v19  ;;  %v11719_v19 = vld [vmem:[%s14975_s2 + $0x58c] ss:$16 sps:$4 sm:$0xff]  }
 0x6d9   : > { %9320 = vmatmul.mubr.bf16.vlgmr.msra.gmra.mrb[28].mxu1 %v6138_v24 }
 0x6da   : > { %9648 = vmatmul.mubr.bf16.vlgmr.msra.gmra.mrb[24].mxu0 %v6138_v24  ;;  %9329 = vmatpush1.bf16.msra.mxu1 %v11642_v13  ;;  %v11716_v13 = vld [vmem:[%s14975_s2 + $0x584] ss:$16 sps:$4 sm:$0xff]  }
 0x6db   : > { %9360 = vmatprep.mubr.bf16.mxu1 %v6141_v48  ;;  %9657 = vmatpush1.bf16.msra.mxu0 %v11645_v22  ;;  %v2842_v22 = vsub.s32 4, %v13721_v51  ;;  %v11722_v24 = vld [vmem:[%s14975_s2 + $0x5a4] ss:$16 sps:$4 sm:$0xff]  }
 0x6dc   : > { %9688 = vmatprep.mubr.bf16.mxu0 %v6141_v48  ;;  %9330 = vmatprep.subr.bf16.mxu1 %v11650_v23  ;;  %v11717_v23 = vld [vmem:[%s14975_s2 + $0x588] ss:$16 sps:$4 sm:$0xff]   ;;  %v11725_v48 = vld [vmem:[%s14975_s2 + $0x5ac] ss:$16 sps:$4 sm:$0xff]  }
 0x6dd   : > { %9658 = vmatprep.subr.bf16.mxu0 %v11653_v45  ;;  %v2843_v45 = vrot.slane %v15487_v61, %v2842_v22 }
 0x6de   : > { %9331 = vmatpush1.bf16.msra.mxu1 %v11648_v25  ;;  %v2854_v25 = vsub.s32 7, %v13721_v51 }
 0x6df   : > { %9659 = vmatpush1.bf16.msra.mxu0 %v11651_v26  ;;  %9332 = vmatprep.subr.bf16.mxu1 %v11656_v27  ;;  %v11720_v26 = vld [vmem:[%s14975_s2 + $0x5a0] ss:$16 sps:$4 sm:$0xff]   ;;  %v11723_v27 = vld [vmem:[%s14975_s2 + $0x5a8] ss:$16 sps:$4 sm:$0xff]  }
 0x6e0   : > { %9660 = vmatprep.subr.bf16.mxu0 %v11659_v28  ;;  %v11728_v28 = vld [vmem:[%s14975_s2 + $0x5c4] ss:$16 sps:$4 sm:$0xff]  }
 0x6e2   : > { %9333 = vmatpush1.bf16.msra.mxu1 %v11654_v29  ;;  %v11731_v29 = vld [vmem:[%s14975_s2 + $0x5cc] ss:$16 sps:$4 sm:$0xff]  }
 0x6e3   : > { %9661 = vmatpush1.bf16.msra.mxu0 %v11657_v30  ;;  %9334 = vmatprep.subr.bf16.mxu1 %v11662_v31  ;;  %v2855_v30 = vrot.slane %v15487_v61, %v2854_v25  ;;  %v11726_v31 = vld [vmem:[%s14975_s2 + $0x5c0] ss:$16 sps:$4 sm:$0xff]  }
 0x6e4   : > { %9662 = vmatprep.subr.bf16.mxu0 %v11665_v34  ;;  %v11177_v34 = vadd.f32 %v15230_v44, %v2843_v45  ;;  %v11740_v44 = vld [vmem:[%s14975_s2 + $0x604] ss:$16 sps:$4 sm:$0xff]  }
 0x6e6   : > { %9335 = vmatpush1.bf16.msra.mxu1 %v11660_v9  ;;  %v11729_v9 = vld [vmem:[%s14975_s2 + $0x5c8] ss:$16 sps:$4 sm:$0xff]  }
 0x6e7   : > { %9663 = vmatpush1.bf16.msra.mxu0 %v11663_v57  ;;  %9336 = vmatprep.subr.bf16.mxu1 %v11668_v35  ;;  %v11734_v57 = vld [vmem:[%s14975_s2 + $0x5e4] ss:$16 sps:$4 sm:$0xff]   ;;  %v11737_v35 = vld [vmem:[%s14975_s2 + $0x5ec] ss:$16 sps:$4 sm:$0xff]  }
 0x6e8   : > { %9664 = vmatprep.subr.bf16.mxu0 %v11671_v36  ;;  %v11180_v36 = vadd.f32 %v15242_v53, %v2855_v30  ;;  %v11741_v53 = vld [vmem:[%s14975_s2 + $0x608] ss:$16 sps:$4 sm:$0xff]   ;;  %v11785_v30 = vld [vmem:[%s14975_s2 + $0x6ec] ss:$16 sps:$4 sm:$0xff]  }
 0x6ea   : > { %9337 = vmatpush1.bf16.msra.mxu1 %v11666_v37  ;;  %v11732_v37 = vld [vmem:[%s14975_s2 + $0x5e0] ss:$16 sps:$4 sm:$0xff]  }
 0x6eb   : > { %9665 = vmatpush1.bf16.msra.mxu0 %v11669_v38  ;;  %9338 = vmatprep.subr.bf16.mxu1 %v11674_v0  ;;  %v6124_v38 = vmax.f32 %v11177_v34, 0.0  ;;  %v11735_v0 = vld [vmem:[%s14975_s2 + $0x5e8] ss:$16 sps:$4 sm:$0xff]  }
 0x6ec   : > { %9666 = vmatprep.subr.bf16.mxu0 %v11677_v41  ;;  %v11743_v41 = vld [vmem:[%s14975_s2 + $0x60c] ss:$16 sps:$4 sm:$0xff]   ;;  %v11783_v34 = vld [vmem:[%s14975_s2 + $0x6e8] ss:$16 sps:$4 sm:$0xff]  }
 0x6ee   : > { %9339 = vmatpush1.bf16.msra.mxu1 %v11672_v39  ;;  %v6127_v39 = vmax.f32 %v11180_v36, 0.0  ;;  %v11789_v36 = vld [vmem:[%s14975_s2 + $0x708] ss:$16 sps:$4 sm:$0xff]  }
 0x6ef   : > { %9667 = vmatpush1.bf16.msra.mxu0 %v11675_v43  ;;  %9340 = vmatprep.subr.bf16.mxu1 %v11680_v15  ;;  %v11738_v43 = vld [vmem:[%s14975_s2 + $0x600] ss:$16 sps:$4 sm:$0xff]   ;;  %v6140_v15 = vpack.c.bf16 %v6124_v38, %v6124_v38  ;;  %v11797_v38 = vld [vmem:[%s14975_s2 + $0x72c] ss:$16 sps:$4 sm:$0xff]  }
 0x6f0   : > { %9668 = vmatprep.subr.bf16.mxu0 %v11683_v47  ;;  %v11746_v47 = vld [vmem:[%s14975_s2 + $0x624] ss:$16 sps:$4 sm:$0xff]  }
 0x6f2   : > { %9341 = vmatpush1.bf16.msra.mxu1 %v11678_v49  ;;  %v6143_v49 = vpack.c.bf16 %v6127_v39, %v6127_v39  ;;  %v11803_v39 = vld [vmem:[%s14975_s2 + $0x74c] ss:$16 sps:$4 sm:$0xff]  }
 0x6f3   : > { %9669 = vmatpush1.bf16.msra.mxu0 %v11681_v50  ;;  %9342 = vmatprep.subr.bf16.mxu1 %v11686_v46  ;;  %v11749_v50 = vld [vmem:[%s14975_s2 + $0x62c] ss:$16 sps:$4 sm:$0xff]   ;;  %v11744_v46 = vld [vmem:[%s14975_s2 + $0x620] ss:$16 sps:$4 sm:$0xff]  }
 0x6f4   : > { %9670 = vmatprep.subr.bf16.mxu0 %v11689_v55  ;;  %v11747_v55 = vld [vmem:[%s14975_s2 + $0x628] ss:$16 sps:$4 sm:$0xff]  }
 0x6f6   : > { %9343 = vmatpush1.bf16.msra.mxu1 %v11684_v56  ;;  %v11752_v56 = vld [vmem:[%s14975_s2 + $0x644] ss:$16 sps:$4 sm:$0xff]  }
 0x6f7   : > { %9671 = vmatpush1.bf16.msra.mxu0 %v11687_v58  ;;  %9344 = vmatprep.subr.bf16.mxu1 %v11692_v59  ;;  %v11755_v58 = vld [vmem:[%s14975_s2 + $0x64c] ss:$16 sps:$4 sm:$0xff]   ;;  %v11750_v59 = vld [vmem:[%s14975_s2 + $0x640] ss:$16 sps:$4 sm:$0xff]  }
 0x6f8   : > { %9672 = vmatprep.subr.bf16.mxu0 %v11695_v62  ;;  %v11753_v62 = vld [vmem:[%s14975_s2 + $0x648] ss:$16 sps:$4 sm:$0xff]  }
 0x6fa   : > { %9345 = vmatpush1.bf16.msra.mxu1 %v11690_v63  ;;  %v11758_v63 = vld [vmem:[%s14975_s2 + $0x664] ss:$16 sps:$4 sm:$0xff]  }
 0x6fb   : > { %9673 = vmatpush1.bf16.msra.mxu0 %v11693_v1  ;;  %9346 = vmatprep.subr.bf16.mxu1 %v11698_v2  ;;  %v11761_v1 = vld [vmem:[%s14975_s2 + $0x66c] ss:$16 sps:$4 sm:$0xff]   ;;  %v11756_v2 = vld [vmem:[%s14975_s2 + $0x660] ss:$16 sps:$4 sm:$0xff]  }
 0x6fc   : > { %9674 = vmatprep.subr.bf16.mxu0 %v11701_v3  ;;  %v11759_v3 = vld [vmem:[%s14975_s2 + $0x668] ss:$16 sps:$4 sm:$0xff]  }
 0x6fe   : > { %9347 = vmatpush1.bf16.msra.mxu1 %v11696_v4  ;;  %v11764_v4 = vld [vmem:[%s14975_s2 + $0x684] ss:$16 sps:$4 sm:$0xff]  }
 0x6ff   : > { %9675 = vmatpush1.bf16.msra.mxu0 %v11699_v5  ;;  %9348 = vmatprep.subr.bf16.mxu1 %v11704_v6  ;;  %v11767_v5 = vld [vmem:[%s14975_s2 + $0x68c] ss:$16 sps:$4 sm:$0xff]   ;;  %v11762_v6 = vld [vmem:[%s14975_s2 + $0x680] ss:$16 sps:$4 sm:$0xff]  }
 0x700   : > { %9676 = vmatprep.subr.bf16.mxu0 %v11707_v7  ;;  %v11765_v7 = vld [vmem:[%s14975_s2 + $0x688] ss:$16 sps:$4 sm:$0xff]  }
 0x702   : > { %9349 = vmatpush1.bf16.msra.mxu1 %v11702_v33  ;;  %v11770_v33 = vld [vmem:[%s14975_s2 + $0x6a4] ss:$16 sps:$4 sm:$0xff]  }
 0x703   : > { %9677 = vmatpush1.bf16.msra.mxu0 %v11705_v8  ;;  %9350 = vmatprep.subr.bf16.mxu1 %v11710_v40  ;;  %v11773_v8 = vld [vmem:[%s14975_s2 + $0x6ac] ss:$16 sps:$4 sm:$0xff]   ;;  %v11768_v40 = vld [vmem:[%s14975_s2 + $0x6a0] ss:$16 sps:$4 sm:$0xff]  }
 0x704   : > { %9678 = vmatprep.subr.bf16.mxu0 %v11713_v11  ;;  %v11771_v11 = vld [vmem:[%s14975_s2 + $0x6a8] ss:$16 sps:$4 sm:$0xff]  }
 0x706   : > { %9351 = vmatpush1.bf16.msra.mxu1 %v11708_v12  ;;  %v11776_v12 = vld [vmem:[%s14975_s2 + $0x6c4] ss:$16 sps:$4 sm:$0xff]  }
 0x707   : > { %9679 = vmatpush1.bf16.msra.mxu0 %v11711_v42  ;;  %9352 = vmatprep.subr.bf16.mxu1 %v11716_v13  ;;  %v11779_v13 = vld [vmem:[%s14975_s2 + $0x6cc] ss:$16 sps:$4 sm:$0xff]  }
 0x708   : > { %9680 = vmatprep.subr.bf16.mxu0 %v11719_v19 }
 0x70a   : > { %9353 = vmatpush1.bf16.msra.mxu1 %v11714_v20 }
 0x70b   : > { %9681 = vmatpush1.bf16.msra.mxu0 %v11717_v23  ;;  %9354 = vmatprep.subr.bf16.mxu1 %v11722_v24 }
 0x70c   : > { %9682 = vmatprep.subr.bf16.mxu0 %v11725_v48  ;;  %v11774_v48 = vld [vmem:[%s14975_s2 + $0x6c0] ss:$16 sps:$4 sm:$0xff]  }
 0x70e   : > { %9355 = vmatpush1.bf16.msra.mxu1 %v11720_v26 }
 0x70f   : > { %9683 = vmatpush1.bf16.msra.mxu0 %v11723_v27  ;;  %9356 = vmatprep.subr.bf16.mxu1 %v11728_v28  ;;  %v11777_v27 = vld [vmem:[%s14975_s2 + $0x6c8] ss:$16 sps:$4 sm:$0xff]   ;;  %v11782_v28 = vld [vmem:[%s14975_s2 + $0x6e4] ss:$16 sps:$4 sm:$0xff]  }
 0x710   : > { %9684 = vmatprep.subr.bf16.mxu0 %v11731_v29 }
 0x712   : > { %9357 = vmatpush1.bf16.msra.mxu1 %v11726_v31  ;;  %v11780_v31 = vld [vmem:[%s14975_s2 + $0x6e0] ss:$16 sps:$4 sm:$0xff]  }
 0x713   : > { %9685 = vmatpush1.bf16.msra.mxu0 %v11729_v9  ;;  %9358 = vmatprep.subr.bf16.mxu1 %v11734_v57  ;;  %v11788_v9 = vld [vmem:[%s14975_s2 + $0x704] ss:$16 sps:$4 sm:$0xff]   ;;  %v11791_v57 = vld [vmem:[%s14975_s2 + $0x70c] ss:$16 sps:$4 sm:$0xff]  }
 0x714   : > { %9686 = vmatprep.subr.bf16.mxu0 %v11737_v35  ;;  %v11786_v35 = vld [vmem:[%s14975_s2 + $0x700] ss:$16 sps:$4 sm:$0xff]  }
 0x716   : > { %9359 = vmatpush1.bf16.msra.mxu1 %v11732_v37  ;;  %v11794_v37 = vld [vmem:[%s14975_s2 + $0x724] ss:$16 sps:$4 sm:$0xff]  }
 0x717   : > { %9687 = vmatpush1.bf16.msra.mxu0 %v11735_v0  ;;  %9369 = vmatprep.subr.bf16.mxu1 %v11740_v44  ;;  %v11792_v0 = vld [vmem:[%s14975_s2 + $0x720] ss:$16 sps:$4 sm:$0xff]   ;;  %v11795_v44 = vld [vmem:[%s14975_s2 + $0x728] ss:$16 sps:$4 sm:$0xff]  }
 0x718   : > { %9697 = vmatprep.subr.bf16.mxu0 %v11743_v41  ;;  %v11800_v41 = vld [vmem:[%s14975_s2 + $0x744] ss:$16 sps:$4 sm:$0xff]  }
 0x719   : > { %9361 = vmatmul.mubr.bf16.vlgmr.msra.gmra.mrb[28].mxu1 %v6140_v15 }
 0x71a   : > { %9689 = vmatmul.mubr.bf16.vlgmr.msra.gmra.mrb[24].mxu0 %v6140_v15  ;;  %9370 = vmatpush1.bf16.msra.mxu1 %v11738_v43  ;;  %v11798_v43 = vld [vmem:[%s14975_s2 + $0x740] ss:$16 sps:$4 sm:$0xff]   ;;  %v11801_v15 = vld [vmem:[%s14975_s2 + $0x748] ss:$16 sps:$4 sm:$0xff]  }
 0x71b   : > { %9401 = vmatprep.mubr.bf16.mxu1 %v6143_v49  ;;  %9698 = vmatpush1.bf16.msra.mxu0 %v11741_v53  ;;  %v11806_v53 = vld [vmem:[%s14975_s2 + $0x764] ss:$16 sps:$4 sm:$0xff]  }
 0x71c   : > { %9729 = vmatprep.mubr.bf16.mxu0 %v6143_v49  ;;  %9371 = vmatprep.subr.bf16.mxu1 %v11746_v47  ;;  %v11809_v47 = vld [vmem:[%s14975_s2 + $0x76c] ss:$16 sps:$4 sm:$0xff]   ;;  %v11804_v49 = vld [vmem:[%s14975_s2 + $0x760] ss:$16 sps:$4 sm:$0xff]  }
 0x71d   : > { %9699 = vmatprep.subr.bf16.mxu0 %v11749_v50  ;;  %v11807_v50 = vld [vmem:[%s14975_s2 + $0x768] ss:$16 sps:$4 sm:$0xff]  }
 0x71e   : > { %9372 = vmatpush1.bf16.msra.mxu1 %v11744_v46  ;;  %v11812_v46 = vld [vmem:[%s14975_s2 + $0x784] ss:$16 sps:$4 sm:$0xff]  }
 0x71f   : > { %9700 = vmatpush1.bf16.msra.mxu0 %v11747_v55  ;;  %9373 = vmatprep.subr.bf16.mxu1 %v11752_v56  ;;  %v11815_v55 = vld [vmem:[%s14975_s2 + $0x78c] ss:$16 sps:$4 sm:$0xff]   ;;  %v11810_v56 = vld [vmem:[%s14975_s2 + $0x780] ss:$16 sps:$4 sm:$0xff]  }
 0x720   : > { %9701 = vmatprep.subr.bf16.mxu0 %v11755_v58  ;;  %v2850_v58 = vsub.s32 6, %v13721_v51 }
 0x722   : > { %9374 = vmatpush1.bf16.msra.mxu1 %v11750_v59  ;;  %v11813_v59 = vld [vmem:[%s14975_s2 + $0x788] ss:$16 sps:$4 sm:$0xff]  }
 0x723   : > { %9702 = vmatpush1.bf16.msra.mxu0 %v11753_v62  ;;  %9375 = vmatprep.subr.bf16.mxu1 %v11758_v63  ;;  %v11818_v62 = vld [vmem:[%s14975_s2 + $0x7a4] ss:$16 sps:$4 sm:$0xff]   ;;  %v11821_v63 = vld [vmem:[%s14975_s2 + $0x7ac] ss:$16 sps:$4 sm:$0xff]  }
 0x724   : > { %9703 = vmatprep.subr.bf16.mxu0 %v11761_v1  ;;  %v15645_v1 = vld [vmem:[%s16014_s10 + $0x8] sm:$0xff] }
 0x726   : > { %9376 = vmatpush1.bf16.msra.mxu1 %v11756_v2  ;;  %v11816_v2 = vld [vmem:[%s14975_s2 + $0x7a0] ss:$16 sps:$4 sm:$0xff]  }
 0x727   : > { %9704 = vmatpush1.bf16.msra.mxu0 %v11759_v3  ;;  %9377 = vmatprep.subr.bf16.mxu1 %v11764_v4  ;;  %v2851_v3 = vrot.slane %v15487_v61, %v2850_v58  ;;  %v11819_v4 = vld [vmem:[%s14975_s2 + $0x7a8] ss:$16 sps:$4 sm:$0xff]  }
 0x728   : > { %9705 = vmatprep.subr.bf16.mxu0 %v11767_v5  ;;  %v11824_v5 = vld [vmem:[%s14975_s2 + $0x7c4] ss:$16 sps:$4 sm:$0xff]   ;;  %v11825_v61 = vld [vmem:[%s14975_s2 + $0x7c8] ss:$16 sps:$4 sm:$0xff]  }
 0x72a   : > { %9378 = vmatpush1.bf16.msra.mxu1 %v11762_v6  ;;  %v11827_v6 = vld [vmem:[%s14975_s2 + $0x7cc] ss:$16 sps:$4 sm:$0xff]  }
 0x72b   : > { %9706 = vmatpush1.bf16.msra.mxu0 %v11765_v7  ;;  %9379 = vmatprep.subr.bf16.mxu1 %v11770_v33  ;;  %v2863_v7 = vrot.slane %v15645_v1, %v13730_v54  ;;  %v11822_v33 = vld [vmem:[%s14975_s2 + $0x7c0] ss:$16 sps:$4 sm:$0xff]  }
 0x72c   : > { %v15604_v42 = vpop.f32.mrb[24].mxu1  ;;  %9707 = vmatprep.subr.bf16.mxu0 %v11773_v8  ;;  %v11179_v8 = vadd.f32 %v15232_v32, %v2851_v3  ;;  %v11836_v32 = vld [vmem:[%s14975_s2 + $0x804] ss:$16 sps:$4 sm:$0xff]   ;;  %v11876_v3 = vld [vmem:[%s14975_s2 + $0x8e0] ss:$16 sps:$4 sm:$0xff]  }
 0x72d   : > { %v15607_v19 = vpop.f32.mrb[20].mxu0  ;;  %v15609_v20 = vpop.f32.mrb[25].mxu1 }
 0x72e   : > { %v15611_v23 = vpop.f32.mrb[21].mxu0  ;;  %v6035_v24 = vpop.f32.mrb[26].mxu1  ;;  %9380 = vmatpush1.bf16.msra.mxu1 %v11768_v40  ;;  %v11830_v40 = vld [vmem:[%s14975_s2 + $0x7e4] ss:$16 sps:$4 sm:$0xff]  }
 0x72f   : > { %v6117_v26 = vpop.f32.mrb[22].mxu0  ;;  %9708 = vmatpush1.bf16.msra.mxu0 %v11771_v11  ;;  %v6036_v45 = vpop.f32.mrb[27].mxu1  ;;  %9381 = vmatprep.subr.bf16.mxu1 %v11776_v12  ;;  %v11833_v11 = vld [vmem:[%s14975_s2 + $0x7ec] ss:$16 sps:$4 sm:$0xff]   ;;  %v11182_v12 = vadd.f32 %v15450_v17, %v2863_v7  ;;  %v6126_v24 = vmax.f32 %v11179_v8, 0.0 }
 0x730   : > { %v6118_v29 = vpop.f32.mrb[23].mxu0  ;;  %9709 = vmatprep.subr.bf16.mxu0 %v11779_v13  ;;  %v11828_v13 = vld [vmem:[%s14975_s2 + $0x7e0] ss:$16 sps:$4 sm:$0xff]   ;;  %v11839_v26 = vld [vmem:[%s14975_s2 + $0x80c] ss:$16 sps:$4 sm:$0xff]  }
 0x731   : > { %v6129_v45 = vmax.f32 %v11182_v12, 0.0  ;;  %v11837_v17 = vld [vmem:[%s14975_s2 + $0x808] ss:$16 sps:$4 sm:$0xff]   ;;  %v11842_v29 = vld [vmem:[%s14975_s2 + $0x824] ss:$16 sps:$4 sm:$0xff]  }
 0x732   : > { %9382 = vmatpush1.bf16.msra.mxu1 %v11774_v48  ;;  %v11831_v48 = vld [vmem:[%s14975_s2 + $0x7e8] ss:$16 sps:$4 sm:$0xff]   ;;  %v11882_v7 = vld [vmem:[%s14975_s2 + $0x900] ss:$16 sps:$4 sm:$0xff]   ;;  %v11890_v8 = vld [vmem:[%s14975_s2 + $0x924] ss:$16 sps:$4 sm:$0xff]  }
 0x733   : > { %9710 = vmatpush1.bf16.msra.mxu0 %v11777_v27  ;;  %9383 = vmatprep.subr.bf16.mxu1 %v11782_v28  ;;  %v11834_v27 = vld [vmem:[%s14975_s2 + $0x800] ss:$16 sps:$4 sm:$0xff]   ;;  %v6142_v28 = vpack.c.bf16 %v6126_v24, %v6126_v24  ;;  %v11896_v12 = vld [vmem:[%s14975_s2 + $0x944] ss:$16 sps:$4 sm:$0xff]  }
 0x734   : > { %9711 = vmatprep.subr.bf16.mxu0 %v11785_v30  ;;  %v6145_v30 = vpack.c.bf16 %v6129_v45, %v6129_v45  ;;  %v11894_v24 = vld [vmem:[%s14975_s2 + $0x940] ss:$16 sps:$4 sm:$0xff]  }
 0x735   : > { %v11900_v45 = vld [vmem:[%s14975_s2 + $0x960] ss:$16 sps:$4 sm:$0xff]  }
 0x736   : > { %9384 = vmatpush1.bf16.msra.mxu1 %v11780_v31  ;;  %v11845_v31 = vld [vmem:[%s14975_s2 + $0x82c] ss:$16 sps:$4 sm:$0xff]  }
 0x737   : > { %9712 = vmatpush1.bf16.msra.mxu0 %v11783_v34  ;;  %9385 = vmatprep.subr.bf16.mxu1 %v11788_v9  ;;  %v11840_v34 = vld [vmem:[%s14975_s2 + $0x820] ss:$16 sps:$4 sm:$0xff]   ;;  %v11843_v9 = vld [vmem:[%s14975_s2 + $0x828] ss:$16 sps:$4 sm:$0xff]  }
 0x738   : > { %9713 = vmatprep.subr.bf16.mxu0 %v11791_v57  ;;  %v11848_v57 = vld [vmem:[%s14975_s2 + $0x844] ss:$16 sps:$4 sm:$0xff]  }
 0x73a   : > { %9386 = vmatpush1.bf16.msra.mxu1 %v11786_v35  ;;  %v11851_v35 = vld [vmem:[%s14975_s2 + $0x84c] ss:$16 sps:$4 sm:$0xff]  }
 0x73b   : > { %9714 = vmatpush1.bf16.msra.mxu0 %v11789_v36  ;;  %9387 = vmatprep.subr.bf16.mxu1 %v11794_v37  ;;  %v11846_v36 = vld [vmem:[%s14975_s2 + $0x840] ss:$16 sps:$4 sm:$0xff]   ;;  %v11849_v37 = vld [vmem:[%s14975_s2 + $0x848] ss:$16 sps:$4 sm:$0xff]  }
 0x73c   : > { %9715 = vmatprep.subr.bf16.mxu0 %v11797_v38  ;;  %v11854_v38 = vld [vmem:[%s14975_s2 + $0x864] ss:$16 sps:$4 sm:$0xff]  }
 0x73e   : > { %9388 = vmatpush1.bf16.msra.mxu1 %v11792_v0  ;;  %v11857_v0 = vld [vmem:[%s14975_s2 + $0x86c] ss:$16 sps:$4 sm:$0xff]  }
 0x73f   : > { %9716 = vmatpush1.bf16.msra.mxu0 %v11795_v44  ;;  %9389 = vmatprep.subr.bf16.mxu1 %v11800_v41  ;;  %v11852_v44 = vld [vmem:[%s14975_s2 + $0x860] ss:$16 sps:$4 sm:$0xff]   ;;  %v11855_v41 = vld [vmem:[%s14975_s2 + $0x868] ss:$16 sps:$4 sm:$0xff]  }
 0x740   : > { %9717 = vmatprep.subr.bf16.mxu0 %v11803_v39  ;;  %v11860_v39 = vld [vmem:[%s14975_s2 + $0x884] ss:$16 sps:$4 sm:$0xff]  }
 0x742   : > { %9390 = vmatpush1.bf16.msra.mxu1 %v11798_v43  ;;  %v11863_v43 = vld [vmem:[%s14975_s2 + $0x88c] ss:$16 sps:$4 sm:$0xff]  }
 0x743   : > { %9718 = vmatpush1.bf16.msra.mxu0 %v11801_v15  ;;  %9391 = vmatprep.subr.bf16.mxu1 %v11806_v53  ;;  %v11858_v15 = vld [vmem:[%s14975_s2 + $0x880] ss:$16 sps:$4 sm:$0xff]   ;;  %v11861_v53 = vld [vmem:[%s14975_s2 + $0x888] ss:$16 sps:$4 sm:$0xff]  }
 0x744   : > { %9719 = vmatprep.subr.bf16.mxu0 %v11809_v47  ;;  %v11866_v47 = vld [vmem:[%s14975_s2 + $0x8a4] ss:$16 sps:$4 sm:$0xff]  }
 0x746   : > { %9392 = vmatpush1.bf16.msra.mxu1 %v11804_v49  ;;  %v11869_v49 = vld [vmem:[%s14975_s2 + $0x8ac] ss:$16 sps:$4 sm:$0xff]  }
 0x747   : > { %9720 = vmatpush1.bf16.msra.mxu0 %v11807_v50  ;;  %9393 = vmatprep.subr.bf16.mxu1 %v11812_v46  ;;  %v11864_v50 = vld [vmem:[%s14975_s2 + $0x8a0] ss:$16 sps:$4 sm:$0xff]   ;;  %v11867_v46 = vld [vmem:[%s14975_s2 + $0x8a8] ss:$16 sps:$4 sm:$0xff]  }
 0x748   : > { %9721 = vmatprep.subr.bf16.mxu0 %v11815_v55  ;;  %v11872_v55 = vld [vmem:[%s14975_s2 + $0x8c4] ss:$16 sps:$4 sm:$0xff]  }
 0x74a   : > { %9394 = vmatpush1.bf16.msra.mxu1 %v11810_v56  ;;  %v11875_v56 = vld [vmem:[%s14975_s2 + $0x8cc] ss:$16 sps:$4 sm:$0xff]  }
 0x74b   : > { %9722 = vmatpush1.bf16.msra.mxu0 %v11813_v59  ;;  %9395 = vmatprep.subr.bf16.mxu1 %v11818_v62  ;;  %v11870_v59 = vld [vmem:[%s14975_s2 + $0x8c0] ss:$16 sps:$4 sm:$0xff]   ;;  %v11873_v62 = vld [vmem:[%s14975_s2 + $0x8c8] ss:$16 sps:$4 sm:$0xff]  }
 0x74c   : > { %9723 = vmatprep.subr.bf16.mxu0 %v11821_v63  ;;  %v11878_v63 = vld [vmem:[%s14975_s2 + $0x8e4] ss:$16 sps:$4 sm:$0xff]  }
 0x74e   : > { %9396 = vmatpush1.bf16.msra.mxu1 %v11816_v2  ;;  %v11881_v2 = vld [vmem:[%s14975_s2 + $0x8ec] ss:$16 sps:$4 sm:$0xff]  }
 0x74f   : > { %9724 = vmatpush1.bf16.msra.mxu0 %v11819_v4  ;;  %9397 = vmatprep.subr.bf16.mxu1 %v11824_v5  ;;  %v11879_v4 = vld [vmem:[%s14975_s2 + $0x8e8] ss:$16 sps:$4 sm:$0xff]   ;;  %v11884_v5 = vld [vmem:[%s14975_s2 + $0x904] ss:$16 sps:$4 sm:$0xff]  }
 0x750   : > { %9725 = vmatprep.subr.bf16.mxu0 %v11827_v6  ;;  %v11887_v6 = vld [vmem:[%s14975_s2 + $0x90c] ss:$16 sps:$4 sm:$0xff]  }
 0x752   : > { %9398 = vmatpush1.bf16.msra.mxu1 %v11822_v33  ;;  %v11885_v33 = vld [vmem:[%s14975_s2 + $0x908] ss:$16 sps:$4 sm:$0xff]  }
 0x753   : > { %9726 = vmatpush1.bf16.msra.mxu0 %v11825_v61  ;;  %9399 = vmatprep.subr.bf16.mxu1 %v11830_v40  ;;  %v11893_v61 = vld [vmem:[%s14975_s2 + $0x92c] ss:$16 sps:$4 sm:$0xff]   ;;  %v11888_v40 = vld [vmem:[%s14975_s2 + $0x920] ss:$16 sps:$4 sm:$0xff]  }
 0x754   : > { %9727 = vmatprep.subr.bf16.mxu0 %v11833_v11  ;;  %v11891_v11 = vld [vmem:[%s14975_s2 + $0x928] ss:$16 sps:$4 sm:$0xff]  }
 0x756   : > { %9400 = vmatpush1.bf16.msra.mxu1 %v11828_v13  ;;  %v11899_v13 = vld [vmem:[%s14975_s2 + $0x94c] ss:$16 sps:$4 sm:$0xff]  }
 0x757   : > { %9728 = vmatpush1.bf16.msra.mxu0 %v11831_v48  ;;  %9410 = vmatprep.subr.bf16.mxu1 %v11836_v32  ;;  %v11897_v48 = vld [vmem:[%s14975_s2 + $0x948] ss:$16 sps:$4 sm:$0xff]   ;;  %v11902_v32 = vld [vmem:[%s14975_s2 + $0x964] ss:$16 sps:$4 sm:$0xff]  }
 0x758   : > { %9738 = vmatprep.subr.bf16.mxu0 %v11839_v26  ;;  %v11905_v26 = vld [vmem:[%s14975_s2 + $0x96c] ss:$16 sps:$4 sm:$0xff]  }
 0x759   : > { %9402 = vmatmul.mubr.bf16.vlgmr.msra.gmra.mrb[28].mxu1 %v6142_v28 }
 0x75a   : > { %9730 = vmatmul.mubr.bf16.vlgmr.msra.gmra.mrb[24].mxu0 %v6142_v28  ;;  %9411 = vmatpush1.bf16.msra.mxu1 %v11834_v27  ;;  %v11903_v27 = vld [vmem:[%s14975_s2 + $0x968] ss:$16 sps:$4 sm:$0xff]   ;;  %v11908_v28 = vld [vmem:[%s14975_s2 + $0x984] ss:$16 sps:$4 sm:$0xff]  }
 0x75b   : > { %9442 = vmatprep.mubr.bf16.mxu1 %v6145_v30  ;;  %9739 = vmatpush1.bf16.msra.mxu0 %v11837_v17  ;;  %v11911_v17 = vld [vmem:[%s14975_s2 + $0x98c] ss:$16 sps:$4 sm:$0xff]  }
 0x75c   : > { %9770 = vmatprep.mubr.bf16.mxu0 %v6145_v30  ;;  %9412 = vmatprep.subr.bf16.mxu1 %v11842_v29  ;;  %v11906_v29 = vld [vmem:[%s14975_s2 + $0x980] ss:$16 sps:$4 sm:$0xff]   ;;  %v11909_v30 = vld [vmem:[%s14975_s2 + $0x988] ss:$16 sps:$4 sm:$0xff]  }
 0x75d   : > { %9740 = vmatprep.subr.bf16.mxu0 %v11845_v31  ;;  %v11914_v31 = vld [vmem:[%s14975_s2 + $0x9a4] ss:$16 sps:$4 sm:$0xff]  }
 0x75e   : > { %9413 = vmatpush1.bf16.msra.mxu1 %v11840_v34  ;;  %v11917_v34 = vld [vmem:[%s14975_s2 + $0x9ac] ss:$16 sps:$4 sm:$0xff]  }
 0x75f   : > { %9741 = vmatpush1.bf16.msra.mxu0 %v11843_v9  ;;  %9414 = vmatprep.subr.bf16.mxu1 %v11848_v57  ;;  %v11912_v9 = vld [vmem:[%s14975_s2 + $0x9a0] ss:$16 sps:$4 sm:$0xff]   ;;  %v2859_v57 = vrot.slane %v15645_v1, %v13724_v52 }
 0x760   : > { %9742 = vmatprep.subr.bf16.mxu0 %v11851_v35  ;;  %v11915_v35 = vld [vmem:[%s14975_s2 + $0x9a8] ss:$16 sps:$4 sm:$0xff]  }
 0x762   : > { %9415 = vmatpush1.bf16.msra.mxu1 %v11846_v36  ;;  %v11920_v36 = vld [vmem:[%s14975_s2 + $0x9c4] ss:$16 sps:$4 sm:$0xff]  }
 0x763   : > { %9743 = vmatpush1.bf16.msra.mxu0 %v11849_v37  ;;  %9416 = vmatprep.subr.bf16.mxu1 %v11854_v38  ;;  %v11923_v37 = vld [vmem:[%s14975_s2 + $0x9cc] ss:$16 sps:$4 sm:$0xff]   ;;  %v2871_v38 = vrot.slane %v15645_v1, %v13932_v10 }
 0x764   : > { %9744 = vmatprep.subr.bf16.mxu0 %v11857_v0  ;;  %v11918_v0 = vld [vmem:[%s14975_s2 + $0x9c0] ss:$16 sps:$4 sm:$0xff]  }
 0x766   : > { %9417 = vmatpush1.bf16.msra.mxu1 %v11852_v44  ;;  %v11181_v44 = vadd.f32 %v15446_v14, %v2859_v57  ;;  %v11932_v14 = vld [vmem:[%s14975_s2 + $0xa04] ss:$16 sps:$4 sm:$0xff]  }
 0x767   : > { %9745 = vmatpush1.bf16.msra.mxu0 %v11855_v41  ;;  %9418 = vmatprep.subr.bf16.mxu1 %v11860_v39  ;;  %v11921_v41 = vld [vmem:[%s14975_s2 + $0x9c8] ss:$16 sps:$4 sm:$0xff]   ;;  %v11926_v39 = vld [vmem:[%s14975_s2 + $0x9e4] ss:$16 sps:$4 sm:$0xff]  }
 0x768   : > { %9746 = vmatprep.subr.bf16.mxu0 %v11863_v43  ;;  %v11929_v43 = vld [vmem:[%s14975_s2 + $0x9ec] ss:$16 sps:$4 sm:$0xff]   ;;  %v11980_v57 = vld [vmem:[%s14975_s2 + $0xb04] ss:$16 sps:$4 sm:$0xff]  }
 0x76a   : > { %9419 = vmatpush1.bf16.msra.mxu1 %v11858_v15  ;;  %v11184_v15 = vadd.f32 %v15454_v21, %v2871_v38  ;;  %v11933_v21 = vld [vmem:[%s14975_s2 + $0xa08] ss:$16 sps:$4 sm:$0xff]   ;;  %v11986_v38 = vld [vmem:[%s14975_s2 + $0xb24] ss:$16 sps:$4 sm:$0xff]  }
 0x76b   : > { %9747 = vmatpush1.bf16.msra.mxu0 %v11861_v53  ;;  %9420 = vmatprep.subr.bf16.mxu1 %v11866_v47  ;;  %v11924_v53 = vld [vmem:[%s14975_s2 + $0x9e0] ss:$16 sps:$4 sm:$0xff]   ;;  %v6128_v47 = vmax.f32 %v11181_v44, 0.0 }
 0x76c   : > { %9748 = vmatprep.subr.bf16.mxu0 %v11869_v49  ;;  %v11927_v49 = vld [vmem:[%s14975_s2 + $0x9e8] ss:$16 sps:$4 sm:$0xff]   ;;  %v11984_v44 = vld [vmem:[%s14975_s2 + $0xb20] ss:$16 sps:$4 sm:$0xff]  }
 0x76e   : > { %9421 = vmatpush1.bf16.msra.mxu1 %v11864_v50  ;;  %v11935_v50 = vld [vmem:[%s14975_s2 + $0xa0c] ss:$16 sps:$4 sm:$0xff]  }
 0x76f   : > { %9749 = vmatpush1.bf16.msra.mxu0 %v11867_v46  ;;  %9422 = vmatprep.subr.bf16.mxu1 %v11872_v55  ;;  %v6131_v46 = vmax.f32 %v11184_v15, 0.0  ;;  %v11930_v55 = vld [vmem:[%s14975_s2 + $0xa00] ss:$16 sps:$4 sm:$0xff]  }
 0x770   : > { %9750 = vmatprep.subr.bf16.mxu0 %v11875_v56  ;;  %v6144_v56 = vpack.c.bf16 %v6128_v47, %v6128_v47  ;;  %v11990_v15 = vld [vmem:[%s14975_s2 + $0xb40] ss:$16 sps:$4 sm:$0xff]   ;;  %v11998_v47 = vld [vmem:[%s14975_s2 + $0xb64] ss:$16 sps:$4 sm:$0xff]  }
 0x772   : > { %9423 = vmatpush1.bf16.msra.mxu1 %v11870_v59  ;;  %v11938_v59 = vld [vmem:[%s14975_s2 + $0xa24] ss:$16 sps:$4 sm:$0xff]  }
 0x773   : > { %9751 = vmatpush1.bf16.msra.mxu0 %v11873_v62  ;;  %9424 = vmatprep.subr.bf16.mxu1 %v11878_v63  ;;  %v6147_v62 = vpack.c.bf16 %v6131_v46, %v6131_v46  ;;  %v11941_v63 = vld [vmem:[%s14975_s2 + $0xa2c] ss:$16 sps:$4 sm:$0xff]   ;;  %v12004_v46 = vld [vmem:[%s14975_s2 + $0xb84] ss:$16 sps:$4 sm:$0xff]  }
 0x774   : > { %9752 = vmatprep.subr.bf16.mxu0 %v11881_v2  ;;  %v11936_v2 = vld [vmem:[%s14975_s2 + $0xa20] ss:$16 sps:$4 sm:$0xff]  }
 0x776   : > { %9425 = vmatpush1.bf16.msra.mxu1 %v11876_v3  ;;  %v11939_v3 = vld [vmem:[%s14975_s2 + $0xa28] ss:$16 sps:$4 sm:$0xff]  }
 0x777   : > { %9753 = vmatpush1.bf16.msra.mxu0 %v11879_v4  ;;  %9426 = vmatprep.subr.bf16.mxu1 %v11884_v5  ;;  %v11944_v4 = vld [vmem:[%s14975_s2 + $0xa44] ss:$16 sps:$4 sm:$0xff]   ;;  %v11947_v5 = vld [vmem:[%s14975_s2 + $0xa4c] ss:$16 sps:$4 sm:$0xff]  }
 0x778   : > { %9754 = vmatprep.subr.bf16.mxu0 %v11887_v6  ;;  %v11942_v6 = vld [vmem:[%s14975_s2 + $0xa40] ss:$16 sps:$4 sm:$0xff]  }
 0x77a   : > { %9427 = vmatpush1.bf16.msra.mxu1 %v11882_v7  ;;  %v11945_v7 = vld [vmem:[%s14975_s2 + $0xa48] ss:$16 sps:$4 sm:$0xff]  }
 0x77b   : > { %9755 = vmatpush1.bf16.msra.mxu0 %v11885_v33  ;;  %9428 = vmatprep.subr.bf16.mxu1 %v11890_v8  ;;  %v11950_v33 = vld [vmem:[%s14975_s2 + $0xa64] ss:$16 sps:$4 sm:$0xff]   ;;  %v11953_v8 = vld [vmem:[%s14975_s2 + $0xa6c] ss:$16 sps:$4 sm:$0xff]  }
 0x77c   : > { %9756 = vmatprep.subr.bf16.mxu0 %v11893_v61  ;;  %v11948_v61 = vld [vmem:[%s14975_s2 + $0xa60] ss:$16 sps:$4 sm:$0xff]  }
 0x77e   : > { %9429 = vmatpush1.bf16.msra.mxu1 %v11888_v40  ;;  %v11951_v40 = vld [vmem:[%s14975_s2 + $0xa68] ss:$16 sps:$4 sm:$0xff]  }
 0x77f   : > { %9757 = vmatpush1.bf16.msra.mxu0 %v11891_v11  ;;  %9430 = vmatprep.subr.bf16.mxu1 %v11896_v12  ;;  %v11956_v11 = vld [vmem:[%s14975_s2 + $0xa84] ss:$16 sps:$4 sm:$0xff]   ;;  %v11959_v12 = vld [vmem:[%s14975_s2 + $0xa8c] ss:$16 sps:$4 sm:$0xff]  }
 0x780   : > { %9758 = vmatprep.subr.bf16.mxu0 %v11899_v13  ;;  %v11954_v13 = vld [vmem:[%s14975_s2 + $0xa80] ss:$16 sps:$4 sm:$0xff]  }
 0x782   : > { %9431 = vmatpush1.bf16.msra.mxu1 %v11894_v24  ;;  %v11957_v24 = vld [vmem:[%s14975_s2 + $0xa88] ss:$16 sps:$4 sm:$0xff]  }
 0x783   : > { %9759 = vmatpush1.bf16.msra.mxu0 %v11897_v48  ;;  %9432 = vmatprep.subr.bf16.mxu1 %v11902_v32  ;;  %v11962_v48 = vld [vmem:[%s14975_s2 + $0xaa4] ss:$16 sps:$4 sm:$0xff]   ;;  %v11965_v32 = vld [vmem:[%s14975_s2 + $0xaac] ss:$16 sps:$4 sm:$0xff]  }
 0x784   : > { %9760 = vmatprep.subr.bf16.mxu0 %v11905_v26  ;;  %v11960_v26 = vld [vmem:[%s14975_s2 + $0xaa0] ss:$16 sps:$4 sm:$0xff]  }
 0x786   : > { %9433 = vmatpush1.bf16.msra.mxu1 %v11900_v45  ;;  %v11963_v45 = vld [vmem:[%s14975_s2 + $0xaa8] ss:$16 sps:$4 sm:$0xff]  }
 0x787   : > { %9761 = vmatpush1.bf16.msra.mxu0 %v11903_v27  ;;  %9434 = vmatprep.subr.bf16.mxu1 %v11908_v28  ;;  %v11968_v27 = vld [vmem:[%s14975_s2 + $0xac4] ss:$16 sps:$4 sm:$0xff]   ;;  %v11971_v28 = vld [vmem:[%s14975_s2 + $0xacc] ss:$16 sps:$4 sm:$0xff]  }
 0x788   : > { %9762 = vmatprep.subr.bf16.mxu0 %v11911_v17  ;;  %v11966_v17 = vld [vmem:[%s14975_s2 + $0xac0] ss:$16 sps:$4 sm:$0xff]  }
 0x78a   : > { %9435 = vmatpush1.bf16.msra.mxu1 %v11906_v29  ;;  %v11969_v29 = vld [vmem:[%s14975_s2 + $0xac8] ss:$16 sps:$4 sm:$0xff]  }
 0x78b   : > { %9763 = vmatpush1.bf16.msra.mxu0 %v11909_v30  ;;  %9436 = vmatprep.subr.bf16.mxu1 %v11914_v31  ;;  %v11974_v30 = vld [vmem:[%s14975_s2 + $0xae4] ss:$16 sps:$4 sm:$0xff]   ;;  %v11977_v31 = vld [vmem:[%s14975_s2 + $0xaec] ss:$16 sps:$4 sm:$0xff]  }
 0x78c   : > { %9764 = vmatprep.subr.bf16.mxu0 %v11917_v34  ;;  %v11972_v34 = vld [vmem:[%s14975_s2 + $0xae0] ss:$16 sps:$4 sm:$0xff]  }
 0x78e   : > { %9437 = vmatpush1.bf16.msra.mxu1 %v11912_v9  ;;  %v11975_v9 = vld [vmem:[%s14975_s2 + $0xae8] ss:$16 sps:$4 sm:$0xff]  }
 0x78f   : > { %9765 = vmatpush1.bf16.msra.mxu0 %v11915_v35  ;;  %9438 = vmatprep.subr.bf16.mxu1 %v11920_v36  ;;  %v11983_v35 = vld [vmem:[%s14975_s2 + $0xb0c] ss:$16 sps:$4 sm:$0xff]   ;;  %v11978_v36 = vld [vmem:[%s14975_s2 + $0xb00] ss:$16 sps:$4 sm:$0xff]  }
 0x790   : > { %9766 = vmatprep.subr.bf16.mxu0 %v11923_v37  ;;  %v11981_v37 = vld [vmem:[%s14975_s2 + $0xb08] ss:$16 sps:$4 sm:$0xff]  }
 0x792   : > { %9439 = vmatpush1.bf16.msra.mxu1 %v11918_v0  ;;  %v11989_v0 = vld [vmem:[%s14975_s2 + $0xb2c] ss:$16 sps:$4 sm:$0xff]  }
 0x793   : > { %9767 = vmatpush1.bf16.msra.mxu0 %v11921_v41  ;;  %9440 = vmatprep.subr.bf16.mxu1 %v11926_v39  ;;  %v11987_v41 = vld [vmem:[%s14975_s2 + $0xb28] ss:$16 sps:$4 sm:$0xff]   ;;  %v11992_v39 = vld [vmem:[%s14975_s2 + $0xb44] ss:$16 sps:$4 sm:$0xff]  }
 0x794   : > { %9768 = vmatprep.subr.bf16.mxu0 %v11929_v43  ;;  %v11995_v43 = vld [vmem:[%s14975_s2 + $0xb4c] ss:$16 sps:$4 sm:$0xff]  }
 0x796   : > { %9441 = vmatpush1.bf16.msra.mxu1 %v11924_v53  ;;  %v11993_v53 = vld [vmem:[%s14975_s2 + $0xb48] ss:$16 sps:$4 sm:$0xff]  }
 0x797   : > { %9769 = vmatpush1.bf16.msra.mxu0 %v11927_v49  ;;  %9451 = vmatprep.subr.bf16.mxu1 %v11932_v14  ;;  %v12001_v49 = vld [vmem:[%s14975_s2 + $0xb6c] ss:$16 sps:$4 sm:$0xff]   ;;  %v11996_v14 = vld [vmem:[%s14975_s2 + $0xb60] ss:$16 sps:$4 sm:$0xff]  }
 0x798   : > { %9779 = vmatprep.subr.bf16.mxu0 %v11935_v50  ;;  %v11999_v50 = vld [vmem:[%s14975_s2 + $0xb68] ss:$16 sps:$4 sm:$0xff]  }
 0x799   : > { %9443 = vmatmul.mubr.bf16.vlgmr.msra.gmra.mrb[28].mxu1 %v6144_v56 }
 0x79a   : > { %9771 = vmatmul.mubr.bf16.vlgmr.msra.gmra.mrb[24].mxu0 %v6144_v56  ;;  %9452 = vmatpush1.bf16.msra.mxu1 %v11930_v55  ;;  %v12007_v55 = vld [vmem:[%s14975_s2 + $0xb8c] ss:$16 sps:$4 sm:$0xff]   ;;  %v12002_v56 = vld [vmem:[%s14975_s2 + $0xb80] ss:$16 sps:$4 sm:$0xff]  }
 0x79b   : > { %9483 = vmatprep.mubr.bf16.mxu1 %v6147_v62  ;;  %9780 = vmatpush1.bf16.msra.mxu0 %v11933_v21  ;;  %v12005_v21 = vld [vmem:[%s14975_s2 + $0xb88] ss:$16 sps:$4 sm:$0xff]  }
 0x79c   : > { %9811 = vmatprep.mubr.bf16.mxu0 %v6147_v62  ;;  %9453 = vmatprep.subr.bf16.mxu1 %v11938_v59  ;;  %v12010_v59 = vld [vmem:[%s14975_s2 + $0xba4] ss:$16 sps:$4 sm:$0xff]   ;;  %v12013_v62 = vld [vmem:[%s14975_s2 + $0xbac] ss:$16 sps:$4 sm:$0xff]  }
 0x79d   : > { %9781 = vmatprep.subr.bf16.mxu0 %v11941_v63  ;;  %v12008_v63 = vld [vmem:[%s14975_s2 + $0xba0] ss:$16 sps:$4 sm:$0xff]  }
 0x79e   : > { %9454 = vmatpush1.bf16.msra.mxu1 %v11936_v2  ;;  %v2867_v2 = vrot.slane %v15645_v1, %v14111_v18 }
 0x79f   : > { %9782 = vmatpush1.bf16.msra.mxu0 %v11939_v3  ;;  %9455 = vmatprep.subr.bf16.mxu1 %v11944_v4  ;;  %v12011_v3 = vld [vmem:[%s14975_s2 + $0xba8] ss:$16 sps:$4 sm:$0xff]   ;;  %v12016_v4 = vld [vmem:[%s14975_s2 + $0xbc4] ss:$16 sps:$4 sm:$0xff]  }
 0x7a0   : > { %9783 = vmatprep.subr.bf16.mxu0 %v11947_v5  ;;  %v12019_v5 = vld [vmem:[%s14975_s2 + $0xbcc] ss:$16 sps:$4 sm:$0xff]  }
 0x7a2   : > { %9456 = vmatpush1.bf16.msra.mxu1 %v11942_v6  ;;  %v2879_v6 = vrot.slane %v15645_v1, %v2846_v60 }
 0x7a3   : > { %9784 = vmatpush1.bf16.msra.mxu0 %v11945_v7  ;;  %9457 = vmatprep.subr.bf16.mxu1 %v11950_v33  ;;  %v12014_v7 = vld [vmem:[%s14975_s2 + $0xbc0] ss:$16 sps:$4 sm:$0xff]   ;;  %v11183_v33 = vadd.f32 %v15448_v16, %v2867_v2  ;;  %v12028_v16 = vld [vmem:[%s14975_s2 + $0xc04] ss:$16 sps:$4 sm:$0xff]   ;;  %v12077_v2 = vld [vmem:[%s14975_s2 + $0xd08] ss:$16 sps:$4 sm:$0xff]  }
 0x7a4   : > { %9785 = vmatprep.subr.bf16.mxu0 %v11953_v8  ;;  %v12017_v8 = vld [vmem:[%s14975_s2 + $0xbc8] ss:$16 sps:$4 sm:$0xff]  }
 0x7a5   : > { %v6130_v60 = vmax.f32 %v11183_v33, 0.0  ;;  %v12091_v33 = vld [vmem:[%s14975_s2 + $0xd4c] ss:$16 sps:$4 sm:$0xff]  }
 0x7a6   : > { %9458 = vmatpush1.bf16.msra.mxu1 %v11948_v61  ;;  %v12022_v61 = vld [vmem:[%s14975_s2 + $0xbe4] ss:$16 sps:$4 sm:$0xff]  }
 0x7a7   : > { %9786 = vmatpush1.bf16.msra.mxu0 %v11951_v40  ;;  %9459 = vmatprep.subr.bf16.mxu1 %v11956_v11  ;;  %v12025_v40 = vld [vmem:[%s14975_s2 + $0xbec] ss:$16 sps:$4 sm:$0xff]   ;;  %v11186_v11 = vadd.f32 %v15609_v20, %v2879_v6  ;;  %v12029_v20 = vld [vmem:[%s14975_s2 + $0xc08] ss:$16 sps:$4 sm:$0xff]  }
 0x7a8   : > { %9787 = vmatprep.subr.bf16.mxu0 %v11959_v12  ;;  %v12020_v12 = vld [vmem:[%s14975_s2 + $0xbe0] ss:$16 sps:$4 sm:$0xff]   ;;  %v12083_v6 = vld [vmem:[%s14975_s2 + $0xd28] ss:$16 sps:$4 sm:$0xff]  }
 0x7aa   : > { %9460 = vmatpush1.bf16.msra.mxu1 %v11954_v13  ;;  %v12023_v13 = vld [vmem:[%s14975_s2 + $0xbe8] ss:$16 sps:$4 sm:$0xff]  }
 0x7ab   : > { %9788 = vmatpush1.bf16.msra.mxu0 %v11957_v24  ;;  %9461 = vmatprep.subr.bf16.mxu1 %v11962_v48  ;;  %v12031_v24 = vld [vmem:[%s14975_s2 + $0xc0c] ss:$16 sps:$4 sm:$0xff]   ;;  %v6133_v48 = vmax.f32 %v11186_v11, 0.0 }
 0x7ac   : > { %9789 = vmatprep.subr.bf16.mxu0 %v11965_v32  ;;  %v12026_v32 = vld [vmem:[%s14975_s2 + $0xc00] ss:$16 sps:$4 sm:$0xff]   ;;  %v12097_v11 = vld [vmem:[%s14975_s2 + $0xd6c] ss:$16 sps:$4 sm:$0xff]  }
 0x7ae   : > { %9462 = vmatpush1.bf16.msra.mxu1 %v11960_v26  ;;  %v6146_v26 = vpack.c.bf16 %v6130_v60, %v6130_v60  ;;  %v12095_v60 = vld [vmem:[%s14975_s2 + $0xd68] ss:$16 sps:$4 sm:$0xff]  }
 0x7af   : > { %9790 = vmatpush1.bf16.msra.mxu0 %v11963_v45  ;;  %9463 = vmatprep.subr.bf16.mxu1 %v11968_v27  ;;  %v12034_v45 = vld [vmem:[%s14975_s2 + $0xc24] ss:$16 sps:$4 sm:$0xff]   ;;  %v6149_v27 = vpack.c.bf16 %v6133_v48, %v6133_v48  ;;  %v12101_v48 = vld [vmem:[%s14975_s2 + $0xd88] ss:$16 sps:$4 sm:$0xff]  }
 0x7b0   : > { %9791 = vmatprep.subr.bf16.mxu0 %v11971_v28  ;;  %v12037_v28 = vld [vmem:[%s14975_s2 + $0xc2c] ss:$16 sps:$4 sm:$0xff]  }
 0x7b2   : > { %9464 = vmatpush1.bf16.msra.mxu1 %v11966_v17  ;;  %v12032_v17 = vld [vmem:[%s14975_s2 + $0xc20] ss:$16 sps:$4 sm:$0xff]  }
 0x7b3   : > { %9792 = vmatpush1.bf16.msra.mxu0 %v11969_v29  ;;  %9465 = vmatprep.subr.bf16.mxu1 %v11974_v30  ;;  %v12035_v29 = vld [vmem:[%s14975_s2 + $0xc28] ss:$16 sps:$4 sm:$0xff]   ;;  %v12040_v30 = vld [vmem:[%s14975_s2 + $0xc44] ss:$16 sps:$4 sm:$0xff]  }
 0x7b4   : > { %9793 = vmatprep.subr.bf16.mxu0 %v11977_v31  ;;  %v12043_v31 = vld [vmem:[%s14975_s2 + $0xc4c] ss:$16 sps:$4 sm:$0xff]  }
 0x7b6   : > { %9466 = vmatpush1.bf16.msra.mxu1 %v11972_v34  ;;  %v12038_v34 = vld [vmem:[%s14975_s2 + $0xc40] ss:$16 sps:$4 sm:$0xff]  }
 0x7b7   : > { %9794 = vmatpush1.bf16.msra.mxu0 %v11975_v9  ;;  %9467 = vmatprep.subr.bf16.mxu1 %v11980_v57  ;;  %v12041_v9 = vld [vmem:[%s14975_s2 + $0xc48] ss:$16 sps:$4 sm:$0xff]   ;;  %v12046_v57 = vld [vmem:[%s14975_s2 + $0xc64] ss:$16 sps:$4 sm:$0xff]  }
 0x7b8   : > { %9795 = vmatprep.subr.bf16.mxu0 %v11983_v35  ;;  %v12049_v35 = vld [vmem:[%s14975_s2 + $0xc6c] ss:$16 sps:$4 sm:$0xff]  }
 0x7ba   : > { %9468 = vmatpush1.bf16.msra.mxu1 %v11978_v36  ;;  %v12044_v36 = vld [vmem:[%s14975_s2 + $0xc60] ss:$16 sps:$4 sm:$0xff]  }
 0x7bb   : > { %9796 = vmatpush1.bf16.msra.mxu0 %v11981_v37  ;;  %9469 = vmatprep.subr.bf16.mxu1 %v11986_v38  ;;  %v12047_v37 = vld [vmem:[%s14975_s2 + $0xc68] ss:$16 sps:$4 sm:$0xff]   ;;  %v12052_v38 = vld [vmem:[%s14975_s2 + $0xc84] ss:$16 sps:$4 sm:$0xff]  }
 0x7bc   : > { %9797 = vmatprep.subr.bf16.mxu0 %v11989_v0  ;;  %v12055_v0 = vld [vmem:[%s14975_s2 + $0xc8c] ss:$16 sps:$4 sm:$0xff]  }
 0x7be   : > { %9470 = vmatpush1.bf16.msra.mxu1 %v11984_v44  ;;  %v12050_v44 = vld [vmem:[%s14975_s2 + $0xc80] ss:$16 sps:$4 sm:$0xff]  }
 0x7bf   : > { %9798 = vmatpush1.bf16.msra.mxu0 %v11987_v41  ;;  %9471 = vmatprep.subr.bf16.mxu1 %v11992_v39  ;;  %v12053_v41 = vld [vmem:[%s14975_s2 + $0xc88] ss:$16 sps:$4 sm:$0xff]   ;;  %v12058_v39 = vld [vmem:[%s14975_s2 + $0xca4] ss:$16 sps:$4 sm:$0xff]  }
 0x7c0   : > { %9799 = vmatprep.subr.bf16.mxu0 %v11995_v43  ;;  %v12061_v43 = vld [vmem:[%s14975_s2 + $0xcac] ss:$16 sps:$4 sm:$0xff]  }
 0x7c2   : > { %9472 = vmatpush1.bf16.msra.mxu1 %v11990_v15  ;;  %v12056_v15 = vld [vmem:[%s14975_s2 + $0xca0] ss:$16 sps:$4 sm:$0xff]  }
 0x7c3   : > { %9800 = vmatpush1.bf16.msra.mxu0 %v11993_v53  ;;  %9473 = vmatprep.subr.bf16.mxu1 %v11998_v47  ;;  %v12059_v53 = vld [vmem:[%s14975_s2 + $0xca8] ss:$16 sps:$4 sm:$0xff]   ;;  %v12064_v47 = vld [vmem:[%s14975_s2 + $0xcc4] ss:$16 sps:$4 sm:$0xff]  }
 0x7c4   : > { %9801 = vmatprep.subr.bf16.mxu0 %v12001_v49  ;;  %v12067_v49 = vld [vmem:[%s14975_s2 + $0xccc] ss:$16 sps:$4 sm:$0xff]  }
 0x7c6   : > { %9474 = vmatpush1.bf16.msra.mxu1 %v11996_v14  ;;  %v12062_v14 = vld [vmem:[%s14975_s2 + $0xcc0] ss:$16 sps:$4 sm:$0xff]  }
 0x7c7   : > { %9802 = vmatpush1.bf16.msra.mxu0 %v11999_v50  ;;  %9475 = vmatprep.subr.bf16.mxu1 %v12004_v46  ;;  %v12065_v50 = vld [vmem:[%s14975_s2 + $0xcc8] ss:$16 sps:$4 sm:$0xff]   ;;  %v12070_v46 = vld [vmem:[%s14975_s2 + $0xce4] ss:$16 sps:$4 sm:$0xff]  }
 0x7c8   : > { %9803 = vmatprep.subr.bf16.mxu0 %v12007_v55  ;;  %v12073_v55 = vld [vmem:[%s14975_s2 + $0xcec] ss:$16 sps:$4 sm:$0xff]  }
 0x7ca   : > { %9476 = vmatpush1.bf16.msra.mxu1 %v12002_v56  ;;  %v12068_v56 = vld [vmem:[%s14975_s2 + $0xce0] ss:$16 sps:$4 sm:$0xff]  }
 0x7cb   : > { %9804 = vmatpush1.bf16.msra.mxu0 %v12005_v21  ;;  %9477 = vmatprep.subr.bf16.mxu1 %v12010_v59  ;;  %v12071_v21 = vld [vmem:[%s14975_s2 + $0xce8] ss:$16 sps:$4 sm:$0xff]   ;;  %v12076_v59 = vld [vmem:[%s14975_s2 + $0xd04] ss:$16 sps:$4 sm:$0xff]  }
 0x7cc   : > { %9805 = vmatprep.subr.bf16.mxu0 %v12013_v62  ;;  %v12079_v62 = vld [vmem:[%s14975_s2 + $0xd0c] ss:$16 sps:$4 sm:$0xff]  }
 0x7ce   : > { %9478 = vmatpush1.bf16.msra.mxu1 %v12008_v63  ;;  %v12074_v63 = vld [vmem:[%s14975_s2 + $0xd00] ss:$16 sps:$4 sm:$0xff]  }
 0x7cf   : > { %9806 = vmatpush1.bf16.msra.mxu0 %v12011_v3  ;;  %9479 = vmatprep.subr.bf16.mxu1 %v12016_v4  ;;  %v12082_v3 = vld [vmem:[%s14975_s2 + $0xd24] ss:$16 sps:$4 sm:$0xff]   ;;  %v12085_v4 = vld [vmem:[%s14975_s2 + $0xd2c] ss:$16 sps:$4 sm:$0xff]  }
 0x7d0   : > { %9807 = vmatprep.subr.bf16.mxu0 %v12019_v5  ;;  %v12080_v5 = vld [vmem:[%s14975_s2 + $0xd20] ss:$16 sps:$4 sm:$0xff]  }
 0x7d2   : > { %9480 = vmatpush1.bf16.msra.mxu1 %v12014_v7  ;;  %v12088_v7 = vld [vmem:[%s14975_s2 + $0xd44] ss:$16 sps:$4 sm:$0xff]  }
 0x7d3   : > { %9808 = vmatpush1.bf16.msra.mxu0 %v12017_v8  ;;  %9481 = vmatprep.subr.bf16.mxu1 %v12022_v61  ;;  %v12086_v8 = vld [vmem:[%s14975_s2 + $0xd40] ss:$16 sps:$4 sm:$0xff]   ;;  %v12089_v61 = vld [vmem:[%s14975_s2 + $0xd48] ss:$16 sps:$4 sm:$0xff]  }
 0x7d4   : > { %9809 = vmatprep.subr.bf16.mxu0 %v12025_v40  ;;  %v12094_v40 = vld [vmem:[%s14975_s2 + $0xd64] ss:$16 sps:$4 sm:$0xff]  }
 0x7d6   : > { %9482 = vmatpush1.bf16.msra.mxu1 %v12020_v12  ;;  %v12092_v12 = vld [vmem:[%s14975_s2 + $0xd60] ss:$16 sps:$4 sm:$0xff]  }
 0x7d7   : > { %9810 = vmatpush1.bf16.msra.mxu0 %v12023_v13  ;;  %9492 = vmatprep.subr.bf16.mxu1 %v12028_v16  ;;  %v12100_v13 = vld [vmem:[%s14975_s2 + $0xd84] ss:$16 sps:$4 sm:$0xff]   ;;  %v12103_v16 = vld [vmem:[%s14975_s2 + $0xd8c] ss:$16 sps:$4 sm:$0xff]  }
 0x7d8   : > { %9820 = vmatprep.subr.bf16.mxu0 %v12031_v24  ;;  %v12098_v24 = vld [vmem:[%s14975_s2 + $0xd80] ss:$16 sps:$4 sm:$0xff]  }
 0x7d9   : > { %9484 = vmatmul.mubr.bf16.vlgmr.msra.gmra.mrb[28].mxu1 %v6146_v26 }
 0x7da   : > { %9812 = vmatmul.mubr.bf16.vlgmr.msra.gmra.mrb[24].mxu0 %v6146_v26  ;;  %9493 = vmatpush1.bf16.msra.mxu1 %v12026_v32  ;;  %v12106_v32 = vld [vmem:[%s14975_s2 + $0xda4] ss:$16 sps:$4 sm:$0xff]   ;;  %v12109_v26 = vld [vmem:[%s14975_s2 + $0xdac] ss:$16 sps:$4 sm:$0xff]  }
 0x7db   : > { %9524 = vmatprep.mubr.bf16.mxu1 %v6149_v27  ;;  %9821 = vmatpush1.bf16.msra.mxu0 %v12029_v20  ;;  %v12104_v20 = vld [vmem:[%s14975_s2 + $0xda0] ss:$16 sps:$4 sm:$0xff]  }
 0x7dc   : > { %9852 = vmatprep.mubr.bf16.mxu0 %v6149_v27  ;;  %9494 = vmatprep.subr.bf16.mxu1 %v12034_v45  ;;  %v2875_v45 = vrot.slane %v15645_v1, %v2842_v22  ;;  %v12107_v27 = vld [vmem:[%s14975_s2 + $0xda8] ss:$16 sps:$4 sm:$0xff]  }
 0x7dd   : > { %9822 = vmatprep.subr.bf16.mxu0 %v12037_v28  ;;  %v12112_v28 = vld [vmem:[%s14975_s2 + $0xdc4] ss:$16 sps:$4 sm:$0xff]   ;;  %v12113_v22 = vld [vmem:[%s14975_s2 + $0xdc8] ss:$16 sps:$4 sm:$0xff]  }
 0x7de   : > { %9495 = vmatpush1.bf16.msra.mxu1 %v12032_v17  ;;  %v12115_v17 = vld [vmem:[%s14975_s2 + $0xdcc] ss:$16 sps:$4 sm:$0xff]  }
 0x7df   : > { %9823 = vmatpush1.bf16.msra.mxu0 %v12035_v29  ;;  %9496 = vmatprep.subr.bf16.mxu1 %v12040_v30  ;;  %v2887_v29 = vrot.slane %v15645_v1, %v2854_v25  ;;  %v12110_v30 = vld [vmem:[%s14975_s2 + $0xdc0] ss:$16 sps:$4 sm:$0xff]   ;;  %v12119_v1 = vld [vmem:[%s14975_s2 + $0xde8] ss:$16 sps:$4 sm:$0xff]  }
 0x7e0   : > { %9824 = vmatprep.subr.bf16.mxu0 %v12043_v31  ;;  %v11185_v31 = vadd.f32 %v15604_v42, %v2875_v45  ;;  %v12124_v42 = vld [vmem:[%s14975_s2 + $0xe04] ss:$16 sps:$4 sm:$0xff]  }
 0x7e1   : > { %v12184_v45 = vld [vmem:[%s14975_s2 + $0xf44] ss:$16 sps:$4 sm:$0xff]  }
 0x7e2   : > { %9497 = vmatpush1.bf16.msra.mxu1 %v12038_v34  ;;  %v12118_v34 = vld [vmem:[%s14975_s2 + $0xde4] ss:$16 sps:$4 sm:$0xff]   ;;  %v6132_v25 = vmax.f32 %v11185_v31, 0.0  ;;  %v12188_v31 = vld [vmem:[%s14975_s2 + $0xf60] ss:$16 sps:$4 sm:$0xff]  }
 0x7e3   : > { %9825 = vmatpush1.bf16.msra.mxu0 %v12041_v9  ;;  %9498 = vmatprep.subr.bf16.mxu1 %v12046_v57  ;;  %v12121_v9 = vld [vmem:[%s14975_s2 + $0xdec] ss:$16 sps:$4 sm:$0xff]   ;;  %v11188_v57 = vadd.f32 %v15611_v23, %v2887_v29  ;;  %v12125_v23 = vld [vmem:[%s14975_s2 + $0xe08] ss:$16 sps:$4 sm:$0xff]   ;;  %v12190_v29 = vld [vmem:[%s14975_s2 + $0xf64] ss:$16 sps:$4 sm:$0xff]  }
 0x7e4   : > { %9826 = vmatprep.subr.bf16.mxu0 %v12049_v35  ;;  %v12116_v35 = vld [vmem:[%s14975_s2 + $0xde0] ss:$16 sps:$4 sm:$0xff]  }
 0x7e6   : > { %9499 = vmatpush1.bf16.msra.mxu1 %v12044_v36  ;;  %v12127_v36 = vld [vmem:[%s14975_s2 + $0xe0c] ss:$16 sps:$4 sm:$0xff]  }
 0x7e7   : > { %9827 = vmatpush1.bf16.msra.mxu0 %v12047_v37  ;;  %9500 = vmatprep.subr.bf16.mxu1 %v12052_v38  ;;  %v6135_v37 = vmax.f32 %v11188_v57, 0.0  ;;  %v12122_v38 = vld [vmem:[%s14975_s2 + $0xe00] ss:$16 sps:$4 sm:$0xff]  }
 0x7e8   : > { %9828 = vmatprep.subr.bf16.mxu0 %v12055_v0  ;;  %v6148_v0 = vpack.c.bf16 %v6132_v25, %v6132_v25  ;;  %v12194_v57 = vld [vmem:[%s14975_s2 + $0xf80] ss:$16 sps:$4 sm:$0xff]   ;;  %v12202_v25 = vld [vmem:[%s14975_s2 + $0xfa4] ss:$16 sps:$4 sm:$0xff]  }
 0x7ea   : > { %9501 = vmatpush1.bf16.msra.mxu1 %v12050_v44  ;;  %v12130_v44 = vld [vmem:[%s14975_s2 + $0xe24] ss:$16 sps:$4 sm:$0xff]  }
 0x7eb   : > { %9829 = vmatpush1.bf16.msra.mxu0 %v12053_v41  ;;  %9502 = vmatprep.subr.bf16.mxu1 %v12058_v39  ;;  %v6151_v41 = vpack.c.bf16 %v6135_v37, %v6135_v37  ;;  %v12133_v39 = vld [vmem:[%s14975_s2 + $0xe2c] ss:$16 sps:$4 sm:$0xff]  }
 0x7ec   : > { %9830 = vmatprep.subr.bf16.mxu0 %v12061_v43  ;;  %v12128_v43 = vld [vmem:[%s14975_s2 + $0xe20] ss:$16 sps:$4 sm:$0xff]  }
 0x7ee   : > { %9503 = vmatpush1.bf16.msra.mxu1 %v12056_v15  ;;  %v12131_v15 = vld [vmem:[%s14975_s2 + $0xe28] ss:$16 sps:$4 sm:$0xff]  }
 0x7ef   : > { %9831 = vmatpush1.bf16.msra.mxu0 %v12059_v53  ;;  %9504 = vmatprep.subr.bf16.mxu1 %v12064_v47  ;;  %v12136_v53 = vld [vmem:[%s14975_s2 + $0xe44] ss:$16 sps:$4 sm:$0xff]   ;;  %v12139_v47 = vld [vmem:[%s14975_s2 + $0xe4c] ss:$16 sps:$4 sm:$0xff]  }
 0x7f0   : > { %9832 = vmatprep.subr.bf16.mxu0 %v12067_v49  ;;  %v12134_v49 = vld [vmem:[%s14975_s2 + $0xe40] ss:$16 sps:$4 sm:$0xff]  }
 0x7f2   : > { %9505 = vmatpush1.bf16.msra.mxu1 %v12062_v14  ;;  %v12137_v14 = vld [vmem:[%s14975_s2 + $0xe48] ss:$16 sps:$4 sm:$0xff]  }
 0x7f3   : > { %9833 = vmatpush1.bf16.msra.mxu0 %v12065_v50  ;;  %9506 = vmatprep.subr.bf16.mxu1 %v12070_v46  ;;  %v12142_v50 = vld [vmem:[%s14975_s2 + $0xe64] ss:$16 sps:$4 sm:$0xff]   ;;  %v12145_v46 = vld [vmem:[%s14975_s2 + $0xe6c] ss:$16 sps:$4 sm:$0xff]  }
 0x7f4   : > { %9834 = vmatprep.subr.bf16.mxu0 %v12073_v55  ;;  %v12140_v55 = vld [vmem:[%s14975_s2 + $0xe60] ss:$16 sps:$4 sm:$0xff]  }
 0x7f6   : > { %9507 = vmatpush1.bf16.msra.mxu1 %v12068_v56  ;;  %v12143_v56 = vld [vmem:[%s14975_s2 + $0xe68] ss:$16 sps:$4 sm:$0xff]  }
 0x7f7   : > { %9835 = vmatpush1.bf16.msra.mxu0 %v12071_v21  ;;  %9508 = vmatprep.subr.bf16.mxu1 %v12076_v59  ;;  %v12148_v21 = vld [vmem:[%s14975_s2 + $0xe84] ss:$16 sps:$4 sm:$0xff]   ;;  %v12151_v59 = vld [vmem:[%s14975_s2 + $0xe8c] ss:$16 sps:$4 sm:$0xff]  }
 0x7f8   : > { %9836 = vmatprep.subr.bf16.mxu0 %v12079_v62  ;;  %v12146_v62 = vld [vmem:[%s14975_s2 + $0xe80] ss:$16 sps:$4 sm:$0xff]  }
 0x7fa   : > { %9509 = vmatpush1.bf16.msra.mxu1 %v12074_v63  ;;  %v12149_v63 = vld [vmem:[%s14975_s2 + $0xe88] ss:$16 sps:$4 sm:$0xff]  }
 0x7fb   : > { %9837 = vmatpush1.bf16.msra.mxu0 %v12077_v2  ;;  %9510 = vmatprep.subr.bf16.mxu1 %v12082_v3  ;;  %v12154_v2 = vld [vmem:[%s14975_s2 + $0xea4] ss:$16 sps:$4 sm:$0xff]   ;;  %v12157_v3 = vld [vmem:[%s14975_s2 + $0xeac] ss:$16 sps:$4 sm:$0xff]  }
 0x7fc   : > { %9838 = vmatprep.subr.bf16.mxu0 %v12085_v4  ;;  %v12152_v4 = vld [vmem:[%s14975_s2 + $0xea0] ss:$16 sps:$4 sm:$0xff]  }
 0x7fe   : > { %9511 = vmatpush1.bf16.msra.mxu1 %v12080_v5  ;;  %v12155_v5 = vld [vmem:[%s14975_s2 + $0xea8] ss:$16 sps:$4 sm:$0xff]  }
 0x7ff   : > { %9839 = vmatpush1.bf16.msra.mxu0 %v12083_v6  ;;  %9512 = vmatprep.subr.bf16.mxu1 %v12088_v7  ;;  %v12160_v6 = vld [vmem:[%s14975_s2 + $0xec4] ss:$16 sps:$4 sm:$0xff]   ;;  %v12163_v7 = vld [vmem:[%s14975_s2 + $0xecc] ss:$16 sps:$4 sm:$0xff]  }
 0x800   : > { %9840 = vmatprep.subr.bf16.mxu0 %v12091_v33  ;;  %v12158_v33 = vld [vmem:[%s14975_s2 + $0xec0] ss:$16 sps:$4 sm:$0xff]  }
 0x802   : > { %9513 = vmatpush1.bf16.msra.mxu1 %v12086_v8  ;;  %v12161_v8 = vld [vmem:[%s14975_s2 + $0xec8] ss:$16 sps:$4 sm:$0xff]  }
 0x803   : > { %9841 = vmatpush1.bf16.msra.mxu0 %v12089_v61  ;;  %9514 = vmatprep.subr.bf16.mxu1 %v12094_v40  ;;  %v12166_v61 = vld [vmem:[%s14975_s2 + $0xee4] ss:$16 sps:$4 sm:$0xff]   ;;  %v12169_v40 = vld [vmem:[%s14975_s2 + $0xeec] ss:$16 sps:$4 sm:$0xff]  }
 0x804   : > { %9842 = vmatprep.subr.bf16.mxu0 %v12097_v11  ;;  %v12164_v11 = vld [vmem:[%s14975_s2 + $0xee0] ss:$16 sps:$4 sm:$0xff]  }
 0x806   : > { %9515 = vmatpush1.bf16.msra.mxu1 %v12092_v12  ;;  %v12167_v12 = vld [vmem:[%s14975_s2 + $0xee8] ss:$16 sps:$4 sm:$0xff]  }
 0x807   : > { %9843 = vmatpush1.bf16.msra.mxu0 %v12095_v60  ;;  %9516 = vmatprep.subr.bf16.mxu1 %v12100_v13  ;;  %v12172_v60 = vld [vmem:[%s14975_s2 + $0xf04] ss:$16 sps:$4 sm:$0xff]   ;;  %v12175_v13 = vld [vmem:[%s14975_s2 + $0xf0c] ss:$16 sps:$4 sm:$0xff]  }
 0x808   : > { %9844 = vmatprep.subr.bf16.mxu0 %v12103_v16  ;;  %v12170_v16 = vld [vmem:[%s14975_s2 + $0xf00] ss:$16 sps:$4 sm:$0xff]  }
 0x80a   : > { %9517 = vmatpush1.bf16.msra.mxu1 %v12098_v24  ;;  %v12173_v24 = vld [vmem:[%s14975_s2 + $0xf08] ss:$16 sps:$4 sm:$0xff]  }
 0x80b   : > { %9845 = vmatpush1.bf16.msra.mxu0 %v12101_v48  ;;  %9518 = vmatprep.subr.bf16.mxu1 %v12106_v32  ;;  %v12178_v48 = vld [vmem:[%s14975_s2 + $0xf24] ss:$16 sps:$4 sm:$0xff]   ;;  %v12181_v32 = vld [vmem:[%s14975_s2 + $0xf2c] ss:$16 sps:$4 sm:$0xff]  }
 0x80c   : > { %9846 = vmatprep.subr.bf16.mxu0 %v12109_v26  ;;  %v12176_v26 = vld [vmem:[%s14975_s2 + $0xf20] ss:$16 sps:$4 sm:$0xff]  }
 0x80e   : > { %9519 = vmatpush1.bf16.msra.mxu1 %v12104_v20  ;;  %v12179_v20 = vld [vmem:[%s14975_s2 + $0xf28] ss:$16 sps:$4 sm:$0xff]  }
 0x80f   : > { %9847 = vmatpush1.bf16.msra.mxu0 %v12107_v27  ;;  %9520 = vmatprep.subr.bf16.mxu1 %v12112_v28  ;;  %v12187_v27 = vld [vmem:[%s14975_s2 + $0xf4c] ss:$16 sps:$4 sm:$0xff]   ;;  %v12182_v28 = vld [vmem:[%s14975_s2 + $0xf40] ss:$16 sps:$4 sm:$0xff]  }
 0x810   : > { %9848 = vmatprep.subr.bf16.mxu0 %v12115_v17  ;;  %v12185_v17 = vld [vmem:[%s14975_s2 + $0xf48] ss:$16 sps:$4 sm:$0xff]  }
 0x812   : > { %9521 = vmatpush1.bf16.msra.mxu1 %v12110_v30  ;;  %v12193_v30 = vld [vmem:[%s14975_s2 + $0xf6c] ss:$16 sps:$4 sm:$0xff]  }
 0x813   : > { %9849 = vmatpush1.bf16.msra.mxu0 %v12113_v22  ;;  %9522 = vmatprep.subr.bf16.mxu1 %v12118_v34  ;;  %v12191_v22 = vld [vmem:[%s14975_s2 + $0xf68] ss:$16 sps:$4 sm:$0xff]   ;;  %v12196_v34 = vld [vmem:[%s14975_s2 + $0xf84] ss:$16 sps:$4 sm:$0xff]  }
 0x814   : > { %9850 = vmatprep.subr.bf16.mxu0 %v12121_v9  ;;  %v12199_v9 = vld [vmem:[%s14975_s2 + $0xf8c] ss:$16 sps:$4 sm:$0xff]  }
 0x816   : > { %9523 = vmatpush1.bf16.msra.mxu1 %v12116_v35  ;;  %v12197_v35 = vld [vmem:[%s14975_s2 + $0xf88] ss:$16 sps:$4 sm:$0xff]  }
 0x817   : > { %9851 = vmatpush1.bf16.msra.mxu0 %v12119_v1  ;;  %9533 = vmatprep.subr.bf16.mxu1 %v12124_v42  ;;  %v12205_v1 = vld [vmem:[%s14975_s2 + $0xfac] ss:$16 sps:$4 sm:$0xff]   ;;  %v12200_v42 = vld [vmem:[%s14975_s2 + $0xfa0] ss:$16 sps:$4 sm:$0xff]  }
 0x818   : > { %9861 = vmatprep.subr.bf16.mxu0 %v12127_v36  ;;  %v12219_v36 = vld [vmem:[%s16014_s10 + $0x8] sm:$0xff] }
 0x819   : > { %9525 = vmatmul.mubr.bf16.vlgmr.msra.gmra.mrb[28].mxu1 %v6148_v0  ;;  %v2883_v37 = vrot.slane %v12219_v36, %v2850_v58  ;;  %v12212_v58 = vld [vmem:[%s14975_s2 + $0xfe0] ss:$16 sps:$4 sm:$0xff]  }
 0x81a   : > { %9853 = vmatmul.mubr.bf16.vlgmr.msra.gmra.mrb[24].mxu0 %v6148_v0  ;;  %9534 = vmatpush1.bf16.msra.mxu1 %v12122_v38  ;;  %v12203_v38 = vld [vmem:[%s14975_s2 + $0xfa8] ss:$16 sps:$4 sm:$0xff]   ;;  %v12208_v0 = vld [vmem:[%s14975_s2 + $0xfc4] ss:$16 sps:$4 sm:$0xff]  }
 0x81b   : > { %9565 = vmatprep.mubr.bf16.mxu1 %v6151_v41  ;;  %9862 = vmatpush1.bf16.msra.mxu0 %v12125_v23  ;;  %v12211_v23 = vld [vmem:[%s14975_s2 + $0xfcc] ss:$16 sps:$4 sm:$0xff]  }
 0x81c   : > { %9893 = vmatprep.mubr.bf16.mxu0 %v6151_v41  ;;  %9535 = vmatprep.subr.bf16.mxu1 %v12130_v44  ;;  %v12206_v44 = vld [vmem:[%s14975_s2 + $0xfc0] ss:$16 sps:$4 sm:$0xff]   ;;  %v11187_v41 = vadd.f32 %v15607_v19, %v2883_v37 }
 0x81d   : > { %9863 = vmatprep.subr.bf16.mxu0 %v12133_v39  ;;  %v12209_v39 = vld [vmem:[%s14975_s2 + $0xfc8] ss:$16 sps:$4 sm:$0xff]   ;;  %v6664_v19 = vld [vmem:[%s1499_s23] sm:$0xf]  ;;  %s12226_s23 = scalar_lea.vmem %s12225_s22, 256 }
 0x81e   : > { %9536 = vmatpush1.bf16.msra.mxu1 %v12128_v43  ;;  %v12214_v43 = vld [vmem:[%s14975_s2 + $0xfe4] ss:$16 sps:$4 sm:$0xff]  }
 0x81f   : > { %9864 = vmatpush1.bf16.msra.mxu0 %v12131_v15  ;;  %9537 = vmatprep.subr.bf16.mxu1 %v12136_v53  ;;  %v12217_v15 = vld [vmem:[%s14975_s2 + $0xfec] ss:$16 sps:$4 sm:$0xff]   ;;  %v6134_v53 = vmax.f32 %v11187_v41, 0.0 }
 0x820   : > { %9865 = vmatprep.subr.bf16.mxu0 %v12139_v47  ;;  %v12215_v47 = vld [vmem:[%s14975_s2 + $0xfe8] ss:$16 sps:$4 sm:$0xff]   ;;  %s10022_s2 = sshll.u32 %s14959_s16, 3 }
 0x821   : > { %s1494_s15 = scalar_lea.vmem [#allocation3], %s10022_s2 }
 0x822   : > { %9538 = vmatpush1.bf16.msra.mxu1 %v12134_v49  ;;  %v6150_v49 = vpack.c.bf16 %v6134_v53, %v6134_v53  ;;  %s9940_s30 = sshll.u32 %s1494_s15, 4  ;;  %s15963_s30 = int_to_ptr.vmem [resolvable:$true] %s9940_s30 }
 0x823   : > { %9866 = vmatpush1.bf16.msra.mxu0 %v12137_v14  ;;  %9539 = vmatprep.subr.bf16.mxu1 %v12142_v50  ;;  %v12287_v14 = vmov 1983009808   ;;  %s12220_s0 = scalar_lea.vmem %s15963_s30, 128  ;;  %p12227_p3 = scmp.lt.s32.totalorder %s15963_s30, %s12225_s22 }
 0x824   : > { %9867 = vmatprep.subr.bf16.mxu0 %v12145_v46  ;;  %v9909_v50 = vunpack.c.l.s4 %v12287_v14  ;;  %v6669_v46 = vrot.slane %v6664_v19, %v13724_v52  ;;  %p12221_p0 = scmp.ne.s32.totalorder %s15963_s30, %s12220_s0  ;;  %p12228_p4 = scmp.lt.s32.totalorder %s12226_s23, %s12220_s0 }
 0x826   : > { %9540 = vmatpush1.bf16.msra.mxu1 %v12140_v55  ;;  %v6677_v55 = vrot.slane %v6664_v19, %v14111_v18  ;;  %p12222_p1 = pnand %p12221_p0, %p12398_p6  ;;  %p12229_p5 = por %p12228_p4, %p12227_p3 }
 0x827   : > { %9868 = vmatpush1.bf16.msra.mxu0 %v12143_v56  ;;  %9541 = vmatprep.subr.bf16.mxu1 %v12148_v21  ;;  %v6673_v56 = vrot.slane %v6664_v19, %v13730_v54  ;;  %v9910_v21 = vunpack.c.0.s8 %v9909_v50 }
 0x828   : > { %9869 = vmatprep.subr.bf16.mxu0 %v12151_v59  ;;  %v6681_v59 = vrot.slane %v6664_v19, %v13932_v10  ;;  %p12223_p2 = pneg %p12222_p1 }
 0x82a   : > { %9542 = vmatpush1.bf16.msra.mxu1 %v12146_v62  ;;  %p12230_p7 = pnand %p12229_p5, %p12223_p2 }
 0x82b   : > { %9870 = vmatpush1.bf16.msra.mxu0 %v12149_v63  ;;  %9543 = vmatprep.subr.bf16.mxu1 %v12154_v2 }
 0x82c   : > { %9871 = vmatprep.subr.bf16.mxu0 %v12157_v3 }
 0x82e   : > { %9544 = vmatpush1.bf16.msra.mxu1 %v12152_v4 }
 0x82f   : > { %9872 = vmatpush1.bf16.msra.mxu0 %v12155_v5  ;;  %9545 = vmatprep.subr.bf16.mxu1 %v12160_v6  ;;  %v9913_v6 = vsub.s32 %v9910_v21, %v13721_v51 }
 0x830   : > { %9873 = vmatprep.subr.bf16.mxu0 %v12163_v7 }
 0x832   : > { %9546 = vmatpush1.bf16.msra.mxu1 %v12158_v33 }
 0x833   : > { %9874 = vmatpush1.bf16.msra.mxu0 %v12161_v8  ;;  %9547 = vmatprep.subr.bf16.mxu1 %v12166_v61 }
 0x834   : > { %9875 = vmatprep.subr.bf16.mxu0 %v12169_v40 }
 0x836   : > { %9548 = vmatpush1.bf16.msra.mxu1 %v12164_v11 }
 0x837   : > { %9876 = vmatpush1.bf16.msra.mxu0 %v12167_v12  ;;  %9549 = vmatprep.subr.bf16.mxu1 %v12172_v60 }
 0x838   : > { %9877 = vmatprep.subr.bf16.mxu0 %v12175_v13 }
 0x83a   : > { %9550 = vmatpush1.bf16.msra.mxu1 %v12170_v16 }
 0x83b   : > { %9878 = vmatpush1.bf16.msra.mxu0 %v12173_v24  ;;  %9551 = vmatprep.subr.bf16.mxu1 %v12178_v48 }
 0x83c   : > { %9879 = vmatprep.subr.bf16.mxu0 %v12181_v32 }
 0x83e   : > { %9552 = vmatpush1.bf16.msra.mxu1 %v12176_v26 }
 0x83f   : > { %9880 = vmatpush1.bf16.msra.mxu0 %v12179_v20  ;;  %9553 = vmatprep.subr.bf16.mxu1 %v12184_v45 }
 0x840   : > { %9881 = vmatprep.subr.bf16.mxu0 %v12187_v27 }
 0x842   : > { %9554 = vmatpush1.bf16.msra.mxu1 %v12182_v28 }
 0x843   : > { %9882 = vmatpush1.bf16.msra.mxu0 %v12185_v17  ;;  %9555 = vmatprep.subr.bf16.mxu1 %v12190_v29 }
 0x844   : > { %9883 = vmatprep.subr.bf16.mxu0 %v12193_v30 }
 0x846   : > { %9556 = vmatpush1.bf16.msra.mxu1 %v12188_v31 }
 0x847   : > { %9884 = vmatpush1.bf16.msra.mxu0 %v12191_v22  ;;  %9557 = vmatprep.subr.bf16.mxu1 %v12196_v34 }
 0x848   : > { %9885 = vmatprep.subr.bf16.mxu0 %v12199_v9 }
 0x84a   : > { %9558 = vmatpush1.bf16.msra.mxu1 %v12194_v57 }
 0x84b   : > { %9886 = vmatpush1.bf16.msra.mxu0 %v12197_v35  ;;  %9559 = vmatprep.subr.bf16.mxu1 %v12202_v25 }
 0x84c   : > { %9887 = vmatprep.subr.bf16.mxu0 %v12205_v1 }
 0x84e   : > { %9560 = vmatpush1.bf16.msra.mxu1 %v12200_v42 }
 0x84f   : > { %9888 = vmatpush1.bf16.msra.mxu0 %v12203_v38  ;;  %9561 = vmatprep.subr.bf16.mxu1 %v12208_v0 }
 0x850   : > { %9889 = vmatprep.subr.bf16.mxu0 %v12211_v23 }
 0x852   : > { %9562 = vmatpush1.bf16.msra.mxu1 %v12206_v44 }
 0x853   : > { %9890 = vmatpush1.bf16.msra.mxu0 %v12209_v39  ;;  %9563 = vmatprep.subr.bf16.mxu1 %v12214_v43 }
 0x854   : > { %9891 = vmatprep.subr.bf16.mxu0 %v12217_v15 }
 0x856   : > { %9564 = vmatpush1.bf16.msra.mxu1 %v12212_v58 }
 0x857   : > { %9892 = vmatpush1.bf16.msra.mxu0 %v12215_v47 }
 0x859   : > { %9566 = vmatmul.mubr.bf16.vlgmr.msra.gmra.mrb[28].mxu1 %v6150_v49 }
 0x85a   : > { %9894 = vmatmul.mubr.bf16.vlgmr.msra.gmra.mrb[24].mxu0 %v6150_v49 }
 0x92c   : > { %v9567_v62 = vpop.f32.mrb[28].mxu1 }
 0x92d   : > { %v11189_v63 = vadd.f32 %v9567_v62, %v6669_v46  ;;  %v9895_v2 = vpop.f32.mrb[24].mxu0  ;;  %v9569_v3 = vpop.f32.mrb[29].mxu1 }
 0x92e   : > { %v11191_v4 = vadd.f32 %v9895_v2, %v6677_v55  ;;  %v11190_v5 = vadd.f32 %v9569_v3, %v6673_v56  ;;  %v9897_v7 = vpop.f32.mrb[25].mxu0  ;;  %v9571_v33 = vpop.f32.mrb[30].mxu1 }
 0x92f   : > { %v11192_v52 = vadd.f32 %v9897_v7, %v6681_v59  ;;  %v9899_v18 = vpop.f32.mrb[26].mxu0  ;;  %v9572_v8 = vpop.f32.mrb[31].mxu1 }
 0x930   : > { %v9906_v54 = vcombine.low %v11189_v63, %v11190_v5  ;;  %v9900_v61 = vpop.f32.mrb[27].mxu0 }
 0x931   : > { %v9907_v10 = vcombine.low %v11191_v4, %v11192_v52 }
 0x932   : > { %v9914_v40 = vrot.slane %v9906_v54, %v9913_v6 }
 0x933   : > { %v9921_v11 = vrot.slane %v9907_v10, %v9913_v6 }
 0x935   : > { %v9922_v12 = vcombine.low %v9914_v40, %v9921_v11 }
 0x937   : > { %9924 = vst [vmem:[%s1494_s15] sm:$0xff] %v9922_v12 }
 0x938   : > { %12233 = shalt.err (!%p12230_p7)
}
 0x939   : > { %s12234_s16 = scalar_lea.hbm %s15961_s20, 128  ;;  %s12238_s15 = scalar_lea.hbm %s16017_s13, 1536 }
 0x93a   : > { %p12235_p9 = scmp.ne.s32.totalorder %s15961_s20, %s12234_s16  ;;  %p12239_p12 = scmp.lt.u32.totalorder %s15961_s20, %s16017_s13 }
 0x93b   : > { %p12240_p13 = scmp.lt.u32.totalorder %s12238_s15, %s12234_s16  ;;  %p12242_p1 = scmp.lt.u32.totalorder %s12234_s16, %s15961_s20 }
 0x93c   : > { %p12236_p10 = pnand %p12235_p9, %p12398_p6 }
 0x93d   : > { %p12241_p0 = por %p12240_p13, %p12239_p12 }
 0x93e   : > { %p12237_p11 = pneg %p12236_p10 }
 0x93f   : > { %p12243_p2 = por %p12242_p1, %p12241_p0 }
 0x941   : > { %p12244_p3 = pnand %p12243_p2, %p12237_p11 }
 0x943   : > { %12247 = shalt.err (!%p12244_p3)
}
 0x944   : > { %11281 = dma.vmem_to_hbm [thread:$0]  (%p12398_p6), %s15963_s30, 128, %s15961_s20, %s9926_s21  }
 0x945 PF: > { %p11287_p4 = scmp.ge.s32.totalorder %s12282_s28, 2  ;;  %s9952_s0 = sand.u32 1, %s12270_s25  }
 0x946   : > { %s9953_s29 = scalar_lea.sflag [#allocation4], %s9952_s0 }
 0x947   : > { %p11284_p5 = pnand %p11287_p4, %p12402_p8 }
 0x949   : > { %12265 = dma.done.wait (!%p11284_p5), %s9953_s29, 128  }
 0x94a   : > { %12267 = vsyncadd (!%p11284_p5), %s9953_s29, 4294967168  ;;  %p23_p7 = scmp.ge.s32.totalorder %s12384_s14, 14   ;;  %s16028_s25 = smov %s12274_s26 }
 0x94b   : > { %s16029_s26 = smov %s12278_s27  ;;  %s16030_s27 = smov %s12396_s17 }
 0x94c   : > { %s16031_s28 = smov %s12384_s14  ;;  %25 = sbr.rel (!%p23_p7) target bundleno = 8 (0x8), region = 138 }
 0x953   :  { %9958 = vsyncpa [#allocation4], 1 }
 0x954   :  { %9960 = vsyncpa [#allocation4 + $0x1], 1 }

</bundles_post_ra>
